<compile_context>
chip_gen: v7x
topology: tpu7x:2x2x1
jax: 0.10.0
libtpu: 0.0.40
codegen_flags: <defaults>
</compile_context>

<pallas_src>
import jax
import jax.numpy as jnp
from jax import lax
from jax.experimental import pallas as pl
from jax.experimental.pallas import tpu as pltpu


# ----------------------------------------------------------------------------
# VGG19Limited structure (faithful to the PyTorch module, including the slice
# bug that puts features[12:16] into relu3_2 and leaves relu3_3 as identity).
# ----------------------------------------------------------------------------

LAYER_PLAN = (
    ("relu1_1", ("conv:0",)),
    ("relu1_2", ("conv:1",)),
    ("relu2_1", ("pool", "conv:2")),
    ("relu2_2", ("conv:3",)),
    ("relu3_1", ("pool", "conv:4")),
    ("relu3_2", ("conv:5", "conv:6")),   # two conv+relu (module adds 12..15 here)
    ("relu3_3", ()),                      # empty nn.Sequential -> identity
    ("relu3_4", ("conv:7",)),
    ("relu4_1", ("pool", "conv:8")),
    ("relu4_2", ("conv:9",)),
    ("relu4_3", ("conv:10",)),
    ("relu4_4", ("conv:11",)),
    ("relu5_1", ("pool", "conv:12")),
    ("relu5_2", ("conv:13",)),
)

OUT_NAMES = tuple(n for n, _ in LAYER_PLAN if n != "relu3_3")

_MEAN = jnp.array([0.485, 0.456, 0.406], jnp.float32)
_STD = jnp.array([0.229, 0.224, 0.225], jnp.float32)


def make_params(base=8, seed=0):
    """Deterministic synthetic VGG19 conv weights (scaled-down channel widths)."""
    c1, c2, c3, c4, c5 = base, 2 * base, 4 * base, 8 * base, 8 * base
    conv_io = [(3, c1), (c1, c1),
               (c1, c2), (c2, c2),
               (c2, c3), (c3, c3), (c3, c3), (c3, c3),
               (c3, c4), (c4, c4), (c4, c4), (c4, c4),
               (c4, c5), (c5, c5)]
    key = jax.random.PRNGKey(seed)
    params = []
    for cin, cout in conv_io:
        key, kw, kb = jax.random.split(key, 3)
        # PyTorch Conv2d weight layout is (Cout, Cin, 3, 3); convert to HWIO.
        w_oihw = jax.random.normal(kw, (cout, cin, 3, 3), jnp.float32) \
            * jnp.sqrt(2.0 / (9.0 * cin))
        b = 0.01 * jax.random.normal(kb, (cout,), jnp.float32)
        params.append((jnp.transpose(w_oihw, (2, 3, 1, 0)), b))
    return params


# ----------------------------------------------------------------------------
# In-kernel building blocks (operate on VMEM-resident values)
# ----------------------------------------------------------------------------

def _conv3x3_relu(act, w_ref, b_ref):
    """3x3 conv (pad=1, stride=1) + bias + ReLU on a VMEM-resident activation.

    act:   (H, W, Cin) float32 value
    w_ref: (9*Cin, Cout) bfloat16 ref; row index = dx*3*Cin + dy*Cin + c
    b_ref: (1, Cout) float32 ref
    """
    H, W, Cin = act.shape
    Cout = b_ref.shape[1]

    # In-kernel zero padding (no HBM pad): pad W (sublane axis) then H.
    zcol = jnp.zeros((H, 1, Cin), act.dtype)
    xp = jnp.concatenate([zcol, act, zcol], axis=1)           # (H, W+2, Cin)
    zrow = jnp.zeros((1, W + 2, Cin), act.dtype)
    xp = jnp.concatenate([zrow, xp, zrow], axis=0)            # (H+2, W+2, Cin)

    # All 9 taps folded into K: single MXU matmul of K = 9*Cin per conv,
    # bf16 operands, f32 accumulation.
    patch = jnp.concatenate(
        [xp[dy:dy + H, dx:dx + W, :] for dx in range(3) for dy in range(3)],
        axis=-1)
    patch = patch.reshape(H * W, 9 * Cin).astype(jnp.bfloat16)

    y = jnp.dot(patch, w_ref[...], preferred_element_type=jnp.float32)
    y = y + b_ref[...]                                        # (H*W, Cout)
    return jnp.maximum(y, 0.0).reshape(H, W, Cout)


def _maxpool2x2(act):
    """2x2 max pool, stride 2, on a VMEM-resident (H, W, C) value."""
    H, W, C = act.shape
    Ho, Wo = H // 2, W // 2
    act = jnp.max(act.reshape(Ho, 2, W, C), axis=1)
    return jnp.max(act.reshape(Ho, Wo, 2, C), axis=2)


def _make_fused_kernel(n_conv):
    def kernel(*refs):
        x_ref, prep_ref = refs[0], refs[1]
        w_refs = refs[2:2 + n_conv]
        b_refs = refs[2 + n_conv:2 + 2 * n_conv]
        out_refs = refs[2 + 2 * n_conv:]

        # preprocess: ((x + 1) / 2 - mean) / std  ==  x * scale + shift
        x = x_ref[0]                                     # (H, W, 3) f32
        act = x * prep_ref[0:1, :] + prep_ref[1:2, :]

        conv_i = 0
        out_i = 0
        for name, ops in LAYER_PLAN:
            for op in ops:
                if op == "pool":
                    act = _maxpool2x2(act)
                else:
                    act = _conv3x3_relu(act, w_refs[conv_i], b_refs[conv_i])
                    conv_i += 1
            if name == "relu3_3":
                # empty nn.Sequential -> identity of relu3_2 (duplicated in the
                # wrapper; no extra HBM write).
                continue
            H, W, C = act.shape
            o_ref = out_refs[out_i]
            # Keep the output as a 2-D (H*W, C) slab; (H, W, C) reshape and
            # NHWC->NCHW transpose happen in the JAX wrapper.
            o_ref[0] = act.reshape(H * W, C).astype(o_ref.dtype)
            out_i += 1

    return kernel


# ----------------------------------------------------------------------------
# Public wrapper (NCHW in, dict of NCHW features out, like the PyTorch module)
# ----------------------------------------------------------------------------

def vgg19limited_forward(params, x_nchw, max_layer="relu5_2"):
    N, C0, H, W = x_nchw.shape
    assert C0 == 3 and H % 16 == 0 and W % 16 == 0, "need RGB, H/W divisible by 16"

    x_nhwc = jnp.transpose(x_nchw, (0, 2, 3, 1)).astype(jnp.float32)

    # Preprocess constants: 1/std precomputed here, no divide in the kernel.
    scale = 0.5 / _STD
    shift = (0.5 - _MEAN) / _STD
    prep = jnp.stack([scale, shift], axis=0)              # (2, 3) f32

    # Kernel-layout weights: (9*Cin, Cout) bf16 with all taps folded into K
    # (row index = dx*3*Cin + dy*Cin + c); biases as (1, Cout) f32.
    w_list, b_list = [], []
    for w_hwio, b in params:
        kh, kw, cin, cout = w_hwio.shape
        wk = jnp.transpose(w_hwio, (1, 0, 2, 3)).reshape(kw * kh * cin, cout)
        w_list.append(wk.astype(jnp.bfloat16))
        b_list.append(b.reshape(1, cout).astype(jnp.float32))

    # Static per-named-layer output shapes.
    shapes = {}
    h, w, c = H, W, 3
    for name, ops in LAYER_PLAN:
        for op in ops:
            if op == "pool":
                h, w = h // 2, w // 2
            else:
                c = params[int(op.split(":")[1])][1].shape[0]
        shapes[name] = (h, w, c)

    out_shapes, out_specs = [], []
    for name in OUT_NAMES:
        hh, ww, cc = shapes[name]
        out_shapes.append(jax.ShapeDtypeStruct((N, hh * ww, cc), jnp.float32))
        out_specs.append(pl.BlockSpec((1, hh * ww, cc), lambda n: (n, 0, 0)))

    in_specs = [pl.BlockSpec((1, H, W, 3), lambda n: (n, 0, 0, 0)),
                pl.BlockSpec((2, 3), lambda n: (0, 0))]
    in_specs += [pl.BlockSpec(wk.shape, lambda n: (0, 0)) for wk in w_list]
    in_specs += [pl.BlockSpec(bk.shape, lambda n: (0, 0)) for bk in b_list]

    outs = pl.pallas_call(
        _make_fused_kernel(len(w_list)),
        out_shape=tuple(out_shapes),
        grid=(N,),
        in_specs=in_specs,
        out_specs=tuple(out_specs),
        compiler_params=pltpu.CompilerParams(
            dimension_semantics=("parallel",),
            vmem_limit_bytes=32 * 1024 * 1024),
    )(x_nhwc, prep, *w_list, *b_list)

    feat = {}
    for name, arr in zip(OUT_NAMES, outs):
        hh, ww, cc = shapes[name]
        feat[name] = jnp.transpose(arr.reshape(N, hh, ww, cc), (0, 3, 1, 2))
    feat["relu3_3"] = feat["relu3_2"]   # identity layer

    # Honor max_layer the way the module does: later layers come back as None.
    result = {}
    done = False
    for name, _ in LAYER_PLAN:
        result[name] = None if done else feat[name]
        if name == max_layer:
            done = True
    return result


# ----------------------------------------------------------------------------
# Pure-JAX reference (same bf16 matmul-operand quantization, for the check)
# ----------------------------------------------------------------------------

def _ref_forward(params, x_nchw, max_layer="relu5_2"):
    scale = (0.5 / _STD).reshape(1, 1, 1, 3)
    shift = ((0.5 - _MEAN) / _STD).reshape(1, 1, 1, 3)
    cur = jnp.transpose(x_nchw, (0, 2, 3, 1)).astype(jnp.float32)
    cur = cur * scale + shift

    def conv(x, w, b):
        y = lax.conv_general_dilated(
            x.astype(jnp.bfloat16), w.astype(jnp.bfloat16),
            window_strides=(1, 1), padding="SAME",
            dimension_numbers=("NHWC", "HWIO", "NHWC"),
            preferred_element_type=jnp.float32)
        return jnp.maximum(y + b.reshape(1, 1, 1, -1), 0.0)

    def pool(x):
        return lax.reduce_window(x, -jnp.inf, lax.max,
                                 (1, 2, 2, 1), (1, 2, 2, 1), "VALID")

    result = {}
    for name, ops in LAYER_PLAN:
        for op in ops:
            if op == "pool":
                cur = pool(cur)
            else:
                w, b = params[int(op.split(":")[1])]
                cur = conv(cur, w, b)
        result[name] = cur
        if name == max_layer:
            break
    return {name: (None if result.get(name) is None
                   else jnp.transpose(result[name], (0, 3, 1, 2)))
            for name, _ in LAYER_PLAN}


# ----------------------------------------------------------------------------
# Main
# ----------------------------------------------------------------------------

if __name__ == "__main__":
    key = jax.random.PRNGKey(0)
    kx, _ = jax.random.split(key)
    # Small but structurally consistent shapes: batch=2, RGB input, 16x16.
    x = jax.random.uniform(kx, (2, 3, 16, 16), jnp.float32,
                           minval=-1.0, maxval=1.0)
    params = make_params(base=8, seed=0)

    fwd = jax.jit(vgg19limited_forward, static_argnames=("max_layer",))
    out = fwd(params, x, max_layer="relu5_2")
    out = jax.block_until_ready(out)
    ref = _ref_forward(params, x, max_layer="relu5_2")

    for name, _ in LAYER_PLAN:
        v, r = out[name], ref[name]
        if v is None:
            assert r is None
            continue
        assert v.shape == r.shape, (name, v.shape, r.shape)
        err = float(jnp.max(jnp.abs(v - r)))
        tol = 3e-2 * max(1.0, float(jnp.max(jnp.abs(r))))
        assert err <= tol, f"{name} mismatch: max abs err {err} (tol {tol})"

    print("KERNEL_OK")
</pallas_src>

<mosaic_0001>
module attributes {stable_mosaic.version = 11 : i64} {
  func.func @kernel(%arg0: i32, %arg1: memref<1x16x16x3xf32, #tpu.memory_space<vmem>>, %arg2: memref<2x3xf32, #tpu.memory_space<vmem>>, %arg3: memref<27x8xbf16, #tpu.memory_space<vmem>>, %arg4: memref<72x8xbf16, #tpu.memory_space<vmem>>, %arg5: memref<72x16xbf16, #tpu.memory_space<vmem>>, %arg6: memref<144x16xbf16, #tpu.memory_space<vmem>>, %arg7: memref<144x32xbf16, #tpu.memory_space<vmem>>, %arg8: memref<288x32xbf16, #tpu.memory_space<vmem>>, %arg9: memref<288x32xbf16, #tpu.memory_space<vmem>>, %arg10: memref<288x32xbf16, #tpu.memory_space<vmem>>, %arg11: memref<288x64xbf16, #tpu.memory_space<vmem>>, %arg12: memref<576x64xbf16, #tpu.memory_space<vmem>>, %arg13: memref<576x64xbf16, #tpu.memory_space<vmem>>, %arg14: memref<576x64xbf16, #tpu.memory_space<vmem>>, %arg15: memref<576x64xbf16, #tpu.memory_space<vmem>>, %arg16: memref<576x64xbf16, #tpu.memory_space<vmem>>, %arg17: memref<1x8xf32, #tpu.memory_space<vmem>>, %arg18: memref<1x8xf32, #tpu.memory_space<vmem>>, %arg19: memref<1x16xf32, #tpu.memory_space<vmem>>, %arg20: memref<1x16xf32, #tpu.memory_space<vmem>>, %arg21: memref<1x32xf32, #tpu.memory_space<vmem>>, %arg22: memref<1x32xf32, #tpu.memory_space<vmem>>, %arg23: memref<1x32xf32, #tpu.memory_space<vmem>>, %arg24: memref<1x32xf32, #tpu.memory_space<vmem>>, %arg25: memref<1x64xf32, #tpu.memory_space<vmem>>, %arg26: memref<1x64xf32, #tpu.memory_space<vmem>>, %arg27: memref<1x64xf32, #tpu.memory_space<vmem>>, %arg28: memref<1x64xf32, #tpu.memory_space<vmem>>, %arg29: memref<1x64xf32, #tpu.memory_space<vmem>>, %arg30: memref<1x64xf32, #tpu.memory_space<vmem>>, %arg31: memref<1x256x8xf32, #tpu.memory_space<vmem>>, %arg32: memref<1x256x8xf32, #tpu.memory_space<vmem>>, %arg33: memref<1x64x16xf32, #tpu.memory_space<vmem>>, %arg34: memref<1x64x16xf32, #tpu.memory_space<vmem>>, %arg35: memref<1x16x32xf32, #tpu.memory_space<vmem>>, %arg36: memref<1x16x32xf32, #tpu.memory_space<vmem>>, %arg37: memref<1x16x32xf32, #tpu.memory_space<vmem>>, %arg38: memref<1x4x64xf32, #tpu.memory_space<vmem>>, %arg39: memref<1x4x64xf32, #tpu.memory_space<vmem>>, %arg40: memref<1x4x64xf32, #tpu.memory_space<vmem>>, %arg41: memref<1x4x64xf32, #tpu.memory_space<vmem>>, %arg42: memref<1x1x64xf32, #tpu.memory_space<vmem>>, %arg43: memref<1x1x64xf32, #tpu.memory_space<vmem>>) attributes {dimension_semantics = [#tpu.dimension_semantics<parallel>], iteration_bounds = array<i64: 2>, scalar_prefetch = 0 : i64, scratch_operands = 0 : i64, tpu.core_type = #tpu.core_type<tc>, window_params = [{transform_indices = @transform_0, window_bounds = array<i64: 1, 16, 16, 3>}, {pipeline_mode = #tpu.pipeline_mode<synchronous>, transform_indices = @transform_1, window_bounds = array<i64: 2, 3>}, {pipeline_mode = #tpu.pipeline_mode<synchronous>, transform_indices = @transform_2, window_bounds = array<i64: 27, 8>}, {pipeline_mode = #tpu.pipeline_mode<synchronous>, transform_indices = @transform_3, window_bounds = array<i64: 72, 8>}, {pipeline_mode = #tpu.pipeline_mode<synchronous>, transform_indices = @transform_4, window_bounds = array<i64: 72, 16>}, {pipeline_mode = #tpu.pipeline_mode<synchronous>, transform_indices = @transform_5, window_bounds = array<i64: 144, 16>}, {pipeline_mode = #tpu.pipeline_mode<synchronous>, transform_indices = @transform_6, window_bounds = array<i64: 144, 32>}, {pipeline_mode = #tpu.pipeline_mode<synchronous>, transform_indices = @transform_7, window_bounds = array<i64: 288, 32>}, {pipeline_mode = #tpu.pipeline_mode<synchronous>, transform_indices = @transform_8, window_bounds = array<i64: 288, 32>}, {pipeline_mode = #tpu.pipeline_mode<synchronous>, transform_indices = @transform_9, window_bounds = array<i64: 288, 32>}, {pipeline_mode = #tpu.pipeline_mode<synchronous>, transform_indices = @transform_10, window_bounds = array<i64: 288, 64>}, {pipeline_mode = #tpu.pipeline_mode<synchronous>, transform_indices = @transform_11, window_bounds = array<i64: 576, 64>}, {pipeline_mode = #tpu.pipeline_mode<synchronous>, transform_indices = @transform_12, window_bounds = array<i64: 576, 64>}, {pipeline_mode = #tpu.pipeline_mode<synchronous>, transform_indices = @transform_13, window_bounds = array<i64: 576, 64>}, {pipeline_mode = #tpu.pipeline_mode<synchronous>, transform_indices = @transform_14, window_bounds = array<i64: 576, 64>}, {pipeline_mode = #tpu.pipeline_mode<synchronous>, transform_indices = @transform_15, window_bounds = array<i64: 576, 64>}, {pipeline_mode = #tpu.pipeline_mode<synchronous>, transform_indices = @transform_16, window_bounds = array<i64: 1, 8>}, {pipeline_mode = #tpu.pipeline_mode<synchronous>, transform_indices = @transform_17, window_bounds = array<i64: 1, 8>}, {pipeline_mode = #tpu.pipeline_mode<synchronous>, transform_indices = @transform_18, window_bounds = array<i64: 1, 16>}, {pipeline_mode = #tpu.pipeline_mode<synchronous>, transform_indices = @transform_19, window_bounds = array<i64: 1, 16>}, {pipeline_mode = #tpu.pipeline_mode<synchronous>, transform_indices = @transform_20, window_bounds = array<i64: 1, 32>}, {pipeline_mode = #tpu.pipeline_mode<synchronous>, transform_indices = @transform_21, window_bounds = array<i64: 1, 32>}, {pipeline_mode = #tpu.pipeline_mode<synchronous>, transform_indices = @transform_22, window_bounds = array<i64: 1, 32>}, {pipeline_mode = #tpu.pipeline_mode<synchronous>, transform_indices = @transform_23, window_bounds = array<i64: 1, 32>}, {pipeline_mode = #tpu.pipeline_mode<synchronous>, transform_indices = @transform_24, window_bounds = array<i64: 1, 64>}, {pipeline_mode = #tpu.pipeline_mode<synchronous>, transform_indices = @transform_25, window_bounds = array<i64: 1, 64>}, {pipeline_mode = #tpu.pipeline_mode<synchronous>, transform_indices = @transform_26, window_bounds = array<i64: 1, 64>}, {pipeline_mode = #tpu.pipeline_mode<synchronous>, transform_indices = @transform_27, window_bounds = array<i64: 1, 64>}, {pipeline_mode = #tpu.pipeline_mode<synchronous>, transform_indices = @transform_28, window_bounds = array<i64: 1, 64>}, {pipeline_mode = #tpu.pipeline_mode<synchronous>, transform_indices = @transform_29, window_bounds = array<i64: 1, 64>}, {transform_indices = @transform_30, window_bounds = array<i64: 1, 256, 8>}, {transform_indices = @transform_31, window_bounds = array<i64: 1, 256, 8>}, {transform_indices = @transform_32, window_bounds = array<i64: 1, 64, 16>}, {transform_indices = @transform_33, window_bounds = array<i64: 1, 64, 16>}, {transform_indices = @transform_34, window_bounds = array<i64: 1, 16, 32>}, {transform_indices = @transform_35, window_bounds = array<i64: 1, 16, 32>}, {transform_indices = @transform_36, window_bounds = array<i64: 1, 16, 32>}, {transform_indices = @transform_37, window_bounds = array<i64: 1, 4, 64>}, {transform_indices = @transform_38, window_bounds = array<i64: 1, 4, 64>}, {transform_indices = @transform_39, window_bounds = array<i64: 1, 4, 64>}, {transform_indices = @transform_40, window_bounds = array<i64: 1, 4, 64>}, {transform_indices = @transform_41, window_bounds = array<i64: 1, 1, 64>}, {transform_indices = @transform_42, window_bounds = array<i64: 1, 1, 64>}]} {
    %c0 = arith.constant 0 : index
    %c0_0 = arith.constant 0 : index
    %c0_1 = arith.constant 0 : index
    %c0_2 = arith.constant 0 : index
    %0 = vector.load %arg1[%c0, %c0_0, %c0_1, %c0_2] : memref<1x16x16x3xf32, #tpu.memory_space<vmem>>, vector<1x16x16x3xf32>
    %1 = vector.shape_cast %0 : vector<1x16x16x3xf32> to vector<16x16x3xf32>
    %c0_3 = arith.constant 0 : index
    %c0_4 = arith.constant 0 : index
    %2 = vector.load %arg2[%c0_3, %c0_4] : memref<2x3xf32, #tpu.memory_space<vmem>>, vector<1x3xf32>
    %3 = vector.shape_cast %2 : vector<1x3xf32> to vector<1x1x3xf32>
    %4 = vector.broadcast %3 : vector<1x1x3xf32> to vector<16x16x3xf32>
    %5 = arith.mulf %1, %4 : vector<16x16x3xf32>
    %c1 = arith.constant 1 : index
    %c0_5 = arith.constant 0 : index
    %6 = vector.load %arg2[%c1, %c0_5] : memref<2x3xf32, #tpu.memory_space<vmem>>, vector<1x3xf32>
    %7 = vector.shape_cast %6 : vector<1x3xf32> to vector<1x1x3xf32>
    %8 = vector.broadcast %7 : vector<1x1x3xf32> to vector<16x16x3xf32>
    %9 = arith.addf %5, %8 : vector<16x16x3xf32>
    %cst = arith.constant 0.000000e+00 : f32
    %10 = vector.broadcast %cst : f32 to vector<16x1x3xf32>
    %11 = tpu.concatenate %10, %9, %10 in 1 : vector<16x1x3xf32>, vector<16x16x3xf32>, vector<16x1x3xf32> -> vector<16x18x3xf32>
    %cst_6 = arith.constant 0.000000e+00 : f32
    %12 = vector.broadcast %cst_6 : f32 to vector<1x18x3xf32>
    %13 = tpu.concatenate %12, %11, %12 in 0 : vector<1x18x3xf32>, vector<16x18x3xf32>, vector<1x18x3xf32> -> vector<18x18x3xf32>
    %14 = vector.extract_strided_slice %13 {offsets = [0, 0, 0], sizes = [16, 16, 3], strides = [1, 1, 1]} : vector<18x18x3xf32> to vector<16x16x3xf32>
    %15 = vector.extract_strided_slice %13 {offsets = [1, 0, 0], sizes = [16, 16, 3], strides = [1, 1, 1]} : vector<18x18x3xf32> to vector<16x16x3xf32>
    %16 = vector.extract_strided_slice %13 {offsets = [2, 0, 0], sizes = [16, 16, 3], strides = [1, 1, 1]} : vector<18x18x3xf32> to vector<16x16x3xf32>
    %17 = vector.extract_strided_slice %13 {offsets = [0, 1, 0], sizes = [16, 16, 3], strides = [1, 1, 1]} : vector<18x18x3xf32> to vector<16x16x3xf32>
    %18 = vector.extract_strided_slice %13 {offsets = [1, 1, 0], sizes = [16, 16, 3], strides = [1, 1, 1]} : vector<18x18x3xf32> to vector<16x16x3xf32>
    %19 = vector.extract_strided_slice %13 {offsets = [2, 1, 0], sizes = [16, 16, 3], strides = [1, 1, 1]} : vector<18x18x3xf32> to vector<16x16x3xf32>
    %20 = vector.extract_strided_slice %13 {offsets = [0, 2, 0], sizes = [16, 16, 3], strides = [1, 1, 1]} : vector<18x18x3xf32> to vector<16x16x3xf32>
    %21 = vector.extract_strided_slice %13 {offsets = [1, 2, 0], sizes = [16, 16, 3], strides = [1, 1, 1]} : vector<18x18x3xf32> to vector<16x16x3xf32>
    %22 = vector.extract_strided_slice %13 {offsets = [2, 2, 0], sizes = [16, 16, 3], strides = [1, 1, 1]} : vector<18x18x3xf32> to vector<16x16x3xf32>
    %23 = tpu.concatenate %14, %15, %16, %17, %18, %19, %20, %21, %22 in 2 : vector<16x16x3xf32>, vector<16x16x3xf32>, vector<16x16x3xf32>, vector<16x16x3xf32>, vector<16x16x3xf32>, vector<16x16x3xf32>, vector<16x16x3xf32>, vector<16x16x3xf32>, vector<16x16x3xf32> -> vector<16x16x27xf32>
    %24 = vector.shape_cast %23 : vector<16x16x27xf32> to vector<256x27xf32>
    %25 = arith.truncf %24 : vector<256x27xf32> to vector<256x27xbf16>
    %c0_7 = arith.constant 0 : index
    %c0_8 = arith.constant 0 : index
    %26 = vector.load %arg3[%c0_7, %c0_8] : memref<27x8xbf16, #tpu.memory_space<vmem>>, vector<27x8xbf16>
    %cst_9 = arith.constant dense<0.000000e+00> : vector<256x8xf32>
    %27 = tpu.matmul %25, %26, %cst_9 {dimension_numbers = #tpu.dot_dimension_numbers<[1], [0], [0], [1], [0, 0, 1, 1], [], []>} : vector<256x27xbf16>, vector<27x8xbf16>, vector<256x8xf32> -> vector<256x8xf32>
    %c0_10 = arith.constant 0 : index
    %c0_11 = arith.constant 0 : index
    %28 = vector.load %arg17[%c0_10, %c0_11] : memref<1x8xf32, #tpu.memory_space<vmem>>, vector<1x8xf32>
    %29 = vector.broadcast %28 : vector<1x8xf32> to vector<256x8xf32>
    %30 = arith.addf %27, %29 : vector<256x8xf32>
    %cst_12 = arith.constant 0.000000e+00 : f32
    %31 = vector.broadcast %cst_12 : f32 to vector<256x8xf32>
    %32 = arith.maximumf %30, %31 : vector<256x8xf32>
    %33 = vector.shape_cast %32 : vector<256x8xf32> to vector<16x16x8xf32>
    %34 = vector.shape_cast %33 : vector<16x16x8xf32> to vector<256x8xf32>
    %c0_13 = arith.constant 0 : index
    %c0_14 = arith.constant 0 : index
    %c0_15 = arith.constant 0 : index
    %35 = vector.load %arg31[%c0_13, %c0_14, %c0_15] : memref<1x256x8xf32, #tpu.memory_space<vmem>>, vector<1x256x8xf32>
    %36 = vector.shape_cast %35 : vector<1x256x8xf32> to vector<256x8xf32>
    %37 = vector.shape_cast %34 : vector<256x8xf32> to vector<1x256x8xf32>
    tpu.vector_store %arg31[%c0_13, %c0_14, %c0_15], %37 {strides = array<i32>} : memref<1x256x8xf32, #tpu.memory_space<vmem>>, vector<1x256x8xf32>,
    %cst_16 = arith.constant 0.000000e+00 : f32
    %38 = vector.broadcast %cst_16 : f32 to vector<16x1x8xf32>
    %39 = tpu.concatenate %38, %33, %38 in 1 : vector<16x1x8xf32>, vector<16x16x8xf32>, vector<16x1x8xf32> -> vector<16x18x8xf32>
    %cst_17 = arith.constant 0.000000e+00 : f32
    %40 = vector.broadcast %cst_17 : f32 to vector<1x18x8xf32>
    %41 = tpu.concatenate %40, %39, %40 in 0 : vector<1x18x8xf32>, vector<16x18x8xf32>, vector<1x18x8xf32> -> vector<18x18x8xf32>
    %42 = vector.extract_strided_slice %41 {offsets = [0, 0, 0], sizes = [16, 16, 8], strides = [1, 1, 1]} : vector<18x18x8xf32> to vector<16x16x8xf32>
    %43 = vector.extract_strided_slice %41 {offsets = [1, 0, 0], sizes = [16, 16, 8], strides = [1, 1, 1]} : vector<18x18x8xf32> to vector<16x16x8xf32>
    %44 = vector.extract_strided_slice %41 {offsets = [2, 0, 0], sizes = [16, 16, 8], strides = [1, 1, 1]} : vector<18x18x8xf32> to vector<16x16x8xf32>
    %45 = vector.extract_strided_slice %41 {offsets = [0, 1, 0], sizes = [16, 16, 8], strides = [1, 1, 1]} : vector<18x18x8xf32> to vector<16x16x8xf32>
    %46 = vector.extract_strided_slice %41 {offsets = [1, 1, 0], sizes = [16, 16, 8], strides = [1, 1, 1]} : vector<18x18x8xf32> to vector<16x16x8xf32>
    %47 = vector.extract_strided_slice %41 {offsets = [2, 1, 0], sizes = [16, 16, 8], strides = [1, 1, 1]} : vector<18x18x8xf32> to vector<16x16x8xf32>
    %48 = vector.extract_strided_slice %41 {offsets = [0, 2, 0], sizes = [16, 16, 8], strides = [1, 1, 1]} : vector<18x18x8xf32> to vector<16x16x8xf32>
    %49 = vector.extract_strided_slice %41 {offsets = [1, 2, 0], sizes = [16, 16, 8], strides = [1, 1, 1]} : vector<18x18x8xf32> to vector<16x16x8xf32>
    %50 = vector.extract_strided_slice %41 {offsets = [2, 2, 0], sizes = [16, 16, 8], strides = [1, 1, 1]} : vector<18x18x8xf32> to vector<16x16x8xf32>
    %51 = tpu.concatenate %42, %43, %44, %45, %46, %47, %48, %49, %50 in 2 : vector<16x16x8xf32>, vector<16x16x8xf32>, vector<16x16x8xf32>, vector<16x16x8xf32>, vector<16x16x8xf32>, vector<16x16x8xf32>, vector<16x16x8xf32>, vector<16x16x8xf32>, vector<16x16x8xf32> -> vector<16x16x72xf32>
    %52 = vector.shape_cast %51 : vector<16x16x72xf32> to vector<256x72xf32>
    %53 = arith.truncf %52 : vector<256x72xf32> to vector<256x72xbf16>
    %c0_18 = arith.constant 0 : index
    %c0_19 = arith.constant 0 : index
    %54 = vector.load %arg4[%c0_18, %c0_19] : memref<72x8xbf16, #tpu.memory_space<vmem>>, vector<72x8xbf16>
    %cst_20 = arith.constant dense<0.000000e+00> : vector<256x8xf32>
    %55 = tpu.matmul %53, %54, %cst_20 {dimension_numbers = #tpu.dot_dimension_numbers<[1], [0], [0], [1], [0, 0, 1, 1], [], []>} : vector<256x72xbf16>, vector<72x8xbf16>, vector<256x8xf32> -> vector<256x8xf32>
    %c0_21 = arith.constant 0 : index
    %c0_22 = arith.constant 0 : index
    %56 = vector.load %arg18[%c0_21, %c0_22] : memref<1x8xf32, #tpu.memory_space<vmem>>, vector<1x8xf32>
    %57 = vector.broadcast %56 : vector<1x8xf32> to vector<256x8xf32>
    %58 = arith.addf %55, %57 : vector<256x8xf32>
    %cst_23 = arith.constant 0.000000e+00 : f32
    %59 = vector.broadcast %cst_23 : f32 to vector<256x8xf32>
    %60 = arith.maximumf %58, %59 : vector<256x8xf32>
    %61 = vector.shape_cast %60 : vector<256x8xf32> to vector<16x16x8xf32>
    %62 = vector.shape_cast %61 : vector<16x16x8xf32> to vector<256x8xf32>
    %c0_24 = arith.constant 0 : index
    %c0_25 = arith.constant 0 : index
    %c0_26 = arith.constant 0 : index
    %63 = vector.load %arg32[%c0_24, %c0_25, %c0_26] : memref<1x256x8xf32, #tpu.memory_space<vmem>>, vector<1x256x8xf32>
    %64 = vector.shape_cast %63 : vector<1x256x8xf32> to vector<256x8xf32>
    %65 = vector.shape_cast %62 : vector<256x8xf32> to vector<1x256x8xf32>
    tpu.vector_store %arg32[%c0_24, %c0_25, %c0_26], %65 {strides = array<i32>} : memref<1x256x8xf32, #tpu.memory_space<vmem>>, vector<1x256x8xf32>,
    %66 = vector.shape_cast %61 : vector<16x16x8xf32> to vector<8x2x16x8xf32>
    %cst_27 = arith.constant dense<0xFF800000> : vector<8x16x8xf32>
    %67 = vector.multi_reduction <maximumf>, %66, %cst_27 [1] : vector<8x2x16x8xf32> to vector<8x16x8xf32>
    %68 = vector.shape_cast %67 : vector<8x16x8xf32> to vector<8x8x2x8xf32>
    %cst_28 = arith.constant dense<0xFF800000> : vector<8x8x8xf32>
    %69 = vector.multi_reduction <maximumf>, %68, %cst_28 [2] : vector<8x8x2x8xf32> to vector<8x8x8xf32>
    %cst_29 = arith.constant 0.000000e+00 : f32
    %70 = vector.broadcast %cst_29 : f32 to vector<8x1x8xf32>
    %71 = tpu.concatenate %70, %69, %70 in 1 : vector<8x1x8xf32>, vector<8x8x8xf32>, vector<8x1x8xf32> -> vector<8x10x8xf32>
    %cst_30 = arith.constant 0.000000e+00 : f32
    %72 = vector.broadcast %cst_30 : f32 to vector<1x10x8xf32>
    %73 = tpu.concatenate %72, %71, %72 in 0 : vector<1x10x8xf32>, vector<8x10x8xf32>, vector<1x10x8xf32> -> vector<10x10x8xf32>
    %74 = vector.extract_strided_slice %73 {offsets = [0, 0, 0], sizes = [8, 8, 8], strides = [1, 1, 1]} : vector<10x10x8xf32> to vector<8x8x8xf32>
    %75 = vector.extract_strided_slice %73 {offsets = [1, 0, 0], sizes = [8, 8, 8], strides = [1, 1, 1]} : vector<10x10x8xf32> to vector<8x8x8xf32>
    %76 = vector.extract_strided_slice %73 {offsets = [2, 0, 0], sizes = [8, 8, 8], strides = [1, 1, 1]} : vector<10x10x8xf32> to vector<8x8x8xf32>
    %77 = vector.extract_strided_slice %73 {offsets = [0, 1, 0], sizes = [8, 8, 8], strides = [1, 1, 1]} : vector<10x10x8xf32> to vector<8x8x8xf32>
    %78 = vector.extract_strided_slice %73 {offsets = [1, 1, 0], sizes = [8, 8, 8], strides = [1, 1, 1]} : vector<10x10x8xf32> to vector<8x8x8xf32>
    %79 = vector.extract_strided_slice %73 {offsets = [2, 1, 0], sizes = [8, 8, 8], strides = [1, 1, 1]} : vector<10x10x8xf32> to vector<8x8x8xf32>
    %80 = vector.extract_strided_slice %73 {offsets = [0, 2, 0], sizes = [8, 8, 8], strides = [1, 1, 1]} : vector<10x10x8xf32> to vector<8x8x8xf32>
    %81 = vector.extract_strided_slice %73 {offsets = [1, 2, 0], sizes = [8, 8, 8], strides = [1, 1, 1]} : vector<10x10x8xf32> to vector<8x8x8xf32>
    %82 = vector.extract_strided_slice %73 {offsets = [2, 2, 0], sizes = [8, 8, 8], strides = [1, 1, 1]} : vector<10x10x8xf32> to vector<8x8x8xf32>
    %83 = tpu.concatenate %74, %75, %76, %77, %78, %79, %80, %81, %82 in 2 : vector<8x8x8xf32>, vector<8x8x8xf32>, vector<8x8x8xf32>, vector<8x8x8xf32>, vector<8x8x8xf32>, vector<8x8x8xf32>, vector<8x8x8xf32>, vector<8x8x8xf32>, vector<8x8x8xf32> -> vector<8x8x72xf32>
    %84 = vector.shape_cast %83 : vector<8x8x72xf32> to vector<64x72xf32>
    %85 = arith.truncf %84 : vector<64x72xf32> to vector<64x72xbf16>
    %c0_31 = arith.constant 0 : index
    %c0_32 = arith.constant 0 : index
    %86 = vector.load %arg5[%c0_31, %c0_32] : memref<72x16xbf16, #tpu.memory_space<vmem>>, vector<72x16xbf16>
    %cst_33 = arith.constant dense<0.000000e+00> : vector<64x16xf32>
    %87 = tpu.matmul %85, %86, %cst_33 {dimension_numbers = #tpu.dot_dimension_numbers<[1], [0], [0], [1], [0, 0, 1, 1], [], []>} : vector<64x72xbf16>, vector<72x16xbf16>, vector<64x16xf32> -> vector<64x16xf32>
    %c0_34 = arith.constant 0 : index
    %c0_35 = arith.constant 0 : index
    %88 = vector.load %arg19[%c0_34, %c0_35] : memref<1x16xf32, #tpu.memory_space<vmem>>, vector<1x16xf32>
    %89 = vector.broadcast %88 : vector<1x16xf32> to vector<64x16xf32>
    %90 = arith.addf %87, %89 : vector<64x16xf32>
    %cst_36 = arith.constant 0.000000e+00 : f32
    %91 = vector.broadcast %cst_36 : f32 to vector<64x16xf32>
    %92 = arith.maximumf %90, %91 : vector<64x16xf32>
    %93 = vector.shape_cast %92 : vector<64x16xf32> to vector<8x8x16xf32>
    %94 = vector.shape_cast %93 : vector<8x8x16xf32> to vector<64x16xf32>
    %c0_37 = arith.constant 0 : index
    %c0_38 = arith.constant 0 : index
    %c0_39 = arith.constant 0 : index
    %95 = vector.load %arg33[%c0_37, %c0_38, %c0_39] : memref<1x64x16xf32, #tpu.memory_space<vmem>>, vector<1x64x16xf32>
    %96 = vector.shape_cast %95 : vector<1x64x16xf32> to vector<64x16xf32>
    %97 = vector.shape_cast %94 : vector<64x16xf32> to vector<1x64x16xf32>
    tpu.vector_store %arg33[%c0_37, %c0_38, %c0_39], %97 {strides = array<i32>} : memref<1x64x16xf32, #tpu.memory_space<vmem>>, vector<1x64x16xf32>,
    %cst_40 = arith.constant 0.000000e+00 : f32
    %98 = vector.broadcast %cst_40 : f32 to vector<8x1x16xf32>
    %99 = tpu.concatenate %98, %93, %98 in 1 : vector<8x1x16xf32>, vector<8x8x16xf32>, vector<8x1x16xf32> -> vector<8x10x16xf32>
    %cst_41 = arith.constant 0.000000e+00 : f32
    %100 = vector.broadcast %cst_41 : f32 to vector<1x10x16xf32>
    %101 = tpu.concatenate %100, %99, %100 in 0 : vector<1x10x16xf32>, vector<8x10x16xf32>, vector<1x10x16xf32> -> vector<10x10x16xf32>
    %102 = vector.extract_strided_slice %101 {offsets = [0, 0, 0], sizes = [8, 8, 16], strides = [1, 1, 1]} : vector<10x10x16xf32> to vector<8x8x16xf32>
    %103 = vector.extract_strided_slice %101 {offsets = [1, 0, 0], sizes = [8, 8, 16], strides = [1, 1, 1]} : vector<10x10x16xf32> to vector<8x8x16xf32>
    %104 = vector.extract_strided_slice %101 {offsets = [2, 0, 0], sizes = [8, 8, 16], strides = [1, 1, 1]} : vector<10x10x16xf32> to vector<8x8x16xf32>
    %105 = vector.extract_strided_slice %101 {offsets = [0, 1, 0], sizes = [8, 8, 16], strides = [1, 1, 1]} : vector<10x10x16xf32> to vector<8x8x16xf32>
    %106 = vector.extract_strided_slice %101 {offsets = [1, 1, 0], sizes = [8, 8, 16], strides = [1, 1, 1]} : vector<10x10x16xf32> to vector<8x8x16xf32>
    %107 = vector.extract_strided_slice %101 {offsets = [2, 1, 0], sizes = [8, 8, 16], strides = [1, 1, 1]} : vector<10x10x16xf32> to vector<8x8x16xf32>
    %108 = vector.extract_strided_slice %101 {offsets = [0, 2, 0], sizes = [8, 8, 16], strides = [1, 1, 1]} : vector<10x10x16xf32> to vector<8x8x16xf32>
    %109 = vector.extract_strided_slice %101 {offsets = [1, 2, 0], sizes = [8, 8, 16], strides = [1, 1, 1]} : vector<10x10x16xf32> to vector<8x8x16xf32>
    %110 = vector.extract_strided_slice %101 {offsets = [2, 2, 0], sizes = [8, 8, 16], strides = [1, 1, 1]} : vector<10x10x16xf32> to vector<8x8x16xf32>
    %111 = tpu.concatenate %102, %103, %104, %105, %106, %107, %108, %109, %110 in 2 : vector<8x8x16xf32>, vector<8x8x16xf32>, vector<8x8x16xf32>, vector<8x8x16xf32>, vector<8x8x16xf32>, vector<8x8x16xf32>, vector<8x8x16xf32>, vector<8x8x16xf32>, vector<8x8x16xf32> -> vector<8x8x144xf32>
    %112 = vector.shape_cast %111 : vector<8x8x144xf32> to vector<64x144xf32>
    %113 = arith.truncf %112 : vector<64x144xf32> to vector<64x144xbf16>
    %c0_42 = arith.constant 0 : index
    %c0_43 = arith.constant 0 : index
    %114 = vector.load %arg6[%c0_42, %c0_43] : memref<144x16xbf16, #tpu.memory_space<vmem>>, vector<144x16xbf16>
    %cst_44 = arith.constant dense<0.000000e+00> : vector<64x16xf32>
    %115 = tpu.matmul %113, %114, %cst_44 {dimension_numbers = #tpu.dot_dimension_numbers<[1], [0], [0], [1], [0, 0, 1, 1], [], []>} : vector<64x144xbf16>, vector<144x16xbf16>, vector<64x16xf32> -> vector<64x16xf32>
    %c0_45 = arith.constant 0 : index
    %c0_46 = arith.constant 0 : index
    %116 = vector.load %arg20[%c0_45, %c0_46] : memref<1x16xf32, #tpu.memory_space<vmem>>, vector<1x16xf32>
    %117 = vector.broadcast %116 : vector<1x16xf32> to vector<64x16xf32>
    %118 = arith.addf %115, %117 : vector<64x16xf32>
    %cst_47 = arith.constant 0.000000e+00 : f32
    %119 = vector.broadcast %cst_47 : f32 to vector<64x16xf32>
    %120 = arith.maximumf %118, %119 : vector<64x16xf32>
    %121 = vector.shape_cast %120 : vector<64x16xf32> to vector<8x8x16xf32>
    %122 = vector.shape_cast %121 : vector<8x8x16xf32> to vector<64x16xf32>
    %c0_48 = arith.constant 0 : index
    %c0_49 = arith.constant 0 : index
    %c0_50 = arith.constant 0 : index
    %123 = vector.load %arg34[%c0_48, %c0_49, %c0_50] : memref<1x64x16xf32, #tpu.memory_space<vmem>>, vector<1x64x16xf32>
    %124 = vector.shape_cast %123 : vector<1x64x16xf32> to vector<64x16xf32>
    %125 = vector.shape_cast %122 : vector<64x16xf32> to vector<1x64x16xf32>
    tpu.vector_store %arg34[%c0_48, %c0_49, %c0_50], %125 {strides = array<i32>} : memref<1x64x16xf32, #tpu.memory_space<vmem>>, vector<1x64x16xf32>,
    %126 = vector.shape_cast %121 : vector<8x8x16xf32> to vector<4x2x8x16xf32>
    %cst_51 = arith.constant dense<0xFF800000> : vector<4x8x16xf32>
    %127 = vector.multi_reduction <maximumf>, %126, %cst_51 [1] : vector<4x2x8x16xf32> to vector<4x8x16xf32>
    %128 = vector.shape_cast %127 : vector<4x8x16xf32> to vector<4x4x2x16xf32>
    %cst_52 = arith.constant dense<0xFF800000> : vector<4x4x16xf32>
    %129 = vector.multi_reduction <maximumf>, %128, %cst_52 [2] : vector<4x4x2x16xf32> to vector<4x4x16xf32>
    %cst_53 = arith.constant 0.000000e+00 : f32
    %130 = vector.broadcast %cst_53 : f32 to vector<4x1x16xf32>
    %131 = tpu.concatenate %130, %129, %130 in 1 : vector<4x1x16xf32>, vector<4x4x16xf32>, vector<4x1x16xf32> -> vector<4x6x16xf32>
    %cst_54 = arith.constant 0.000000e+00 : f32
    %132 = vector.broadcast %cst_54 : f32 to vector<1x6x16xf32>
    %133 = tpu.concatenate %132, %131, %132 in 0 : vector<1x6x16xf32>, vector<4x6x16xf32>, vector<1x6x16xf32> -> vector<6x6x16xf32>
    %134 = vector.extract_strided_slice %133 {offsets = [0, 0, 0], sizes = [4, 4, 16], strides = [1, 1, 1]} : vector<6x6x16xf32> to vector<4x4x16xf32>
    %135 = vector.extract_strided_slice %133 {offsets = [1, 0, 0], sizes = [4, 4, 16], strides = [1, 1, 1]} : vector<6x6x16xf32> to vector<4x4x16xf32>
    %136 = vector.extract_strided_slice %133 {offsets = [2, 0, 0], sizes = [4, 4, 16], strides = [1, 1, 1]} : vector<6x6x16xf32> to vector<4x4x16xf32>
    %137 = vector.extract_strided_slice %133 {offsets = [0, 1, 0], sizes = [4, 4, 16], strides = [1, 1, 1]} : vector<6x6x16xf32> to vector<4x4x16xf32>
    %138 = vector.extract_strided_slice %133 {offsets = [1, 1, 0], sizes = [4, 4, 16], strides = [1, 1, 1]} : vector<6x6x16xf32> to vector<4x4x16xf32>
    %139 = vector.extract_strided_slice %133 {offsets = [2, 1, 0], sizes = [4, 4, 16], strides = [1, 1, 1]} : vector<6x6x16xf32> to vector<4x4x16xf32>
    %140 = vector.extract_strided_slice %133 {offsets = [0, 2, 0], sizes = [4, 4, 16], strides = [1, 1, 1]} : vector<6x6x16xf32> to vector<4x4x16xf32>
    %141 = vector.extract_strided_slice %133 {offsets = [1, 2, 0], sizes = [4, 4, 16], strides = [1, 1, 1]} : vector<6x6x16xf32> to vector<4x4x16xf32>
    %142 = vector.extract_strided_slice %133 {offsets = [2, 2, 0], sizes = [4, 4, 16], strides = [1, 1, 1]} : vector<6x6x16xf32> to vector<4x4x16xf32>
    %143 = tpu.concatenate %134, %135, %136, %137, %138, %139, %140, %141, %142 in 2 : vector<4x4x16xf32>, vector<4x4x16xf32>, vector<4x4x16xf32>, vector<4x4x16xf32>, vector<4x4x16xf32>, vector<4x4x16xf32>, vector<4x4x16xf32>, vector<4x4x16xf32>, vector<4x4x16xf32> -> vector<4x4x144xf32>
    %144 = vector.shape_cast %143 : vector<4x4x144xf32> to vector<16x144xf32>
    %145 = arith.truncf %144 : vector<16x144xf32> to vector<16x144xbf16>
    %c0_55 = arith.constant 0 : index
    %c0_56 = arith.constant 0 : index
    %146 = vector.load %arg7[%c0_55, %c0_56] : memref<144x32xbf16, #tpu.memory_space<vmem>>, vector<144x32xbf16>
    %cst_57 = arith.constant dense<0.000000e+00> : vector<16x32xf32>
    %147 = tpu.matmul %145, %146, %cst_57 {dimension_numbers = #tpu.dot_dimension_numbers<[1], [0], [0], [1], [0, 0, 1, 1], [], []>} : vector<16x144xbf16>, vector<144x32xbf16>, vector<16x32xf32> -> vector<16x32xf32>
    %c0_58 = arith.constant 0 : index
    %c0_59 = arith.constant 0 : index
    %148 = vector.load %arg21[%c0_58, %c0_59] : memref<1x32xf32, #tpu.memory_space<vmem>>, vector<1x32xf32>
    %149 = vector.broadcast %148 : vector<1x32xf32> to vector<16x32xf32>
    %150 = arith.addf %147, %149 : vector<16x32xf32>
    %cst_60 = arith.constant 0.000000e+00 : f32
    %151 = vector.broadcast %cst_60 : f32 to vector<16x32xf32>
    %152 = arith.maximumf %150, %151 : vector<16x32xf32>
    %153 = vector.shape_cast %152 : vector<16x32xf32> to vector<4x4x32xf32>
    %154 = vector.shape_cast %153 : vector<4x4x32xf32> to vector<16x32xf32>
    %c0_61 = arith.constant 0 : index
    %c0_62 = arith.constant 0 : index
    %c0_63 = arith.constant 0 : index
    %155 = vector.load %arg35[%c0_61, %c0_62, %c0_63] : memref<1x16x32xf32, #tpu.memory_space<vmem>>, vector<1x16x32xf32>
    %156 = vector.shape_cast %155 : vector<1x16x32xf32> to vector<16x32xf32>
    %157 = vector.shape_cast %154 : vector<16x32xf32> to vector<1x16x32xf32>
    tpu.vector_store %arg35[%c0_61, %c0_62, %c0_63], %157 {strides = array<i32>} : memref<1x16x32xf32, #tpu.memory_space<vmem>>, vector<1x16x32xf32>,
    %cst_64 = arith.constant 0.000000e+00 : f32
    %158 = vector.broadcast %cst_64 : f32 to vector<4x1x32xf32>
    %159 = tpu.concatenate %158, %153, %158 in 1 : vector<4x1x32xf32>, vector<4x4x32xf32>, vector<4x1x32xf32> -> vector<4x6x32xf32>
    %cst_65 = arith.constant 0.000000e+00 : f32
    %160 = vector.broadcast %cst_65 : f32 to vector<1x6x32xf32>
    %161 = tpu.concatenate %160, %159, %160 in 0 : vector<1x6x32xf32>, vector<4x6x32xf32>, vector<1x6x32xf32> -> vector<6x6x32xf32>
    %162 = vector.extract_strided_slice %161 {offsets = [0, 0, 0], sizes = [4, 4, 32], strides = [1, 1, 1]} : vector<6x6x32xf32> to vector<4x4x32xf32>
    %163 = vector.extract_strided_slice %161 {offsets = [1, 0, 0], sizes = [4, 4, 32], strides = [1, 1, 1]} : vector<6x6x32xf32> to vector<4x4x32xf32>
    %164 = vector.extract_strided_slice %161 {offsets = [2, 0, 0], sizes = [4, 4, 32], strides = [1, 1, 1]} : vector<6x6x32xf32> to vector<4x4x32xf32>
    %165 = vector.extract_strided_slice %161 {offsets = [0, 1, 0], sizes = [4, 4, 32], strides = [1, 1, 1]} : vector<6x6x32xf32> to vector<4x4x32xf32>
    %166 = vector.extract_strided_slice %161 {offsets = [1, 1, 0], sizes = [4, 4, 32], strides = [1, 1, 1]} : vector<6x6x32xf32> to vector<4x4x32xf32>
    %167 = vector.extract_strided_slice %161 {offsets = [2, 1, 0], sizes = [4, 4, 32], strides = [1, 1, 1]} : vector<6x6x32xf32> to vector<4x4x32xf32>
    %168 = vector.extract_strided_slice %161 {offsets = [0, 2, 0], sizes = [4, 4, 32], strides = [1, 1, 1]} : vector<6x6x32xf32> to vector<4x4x32xf32>
    %169 = vector.extract_strided_slice %161 {offsets = [1, 2, 0], sizes = [4, 4, 32], strides = [1, 1, 1]} : vector<6x6x32xf32> to vector<4x4x32xf32>
    %170 = vector.extract_strided_slice %161 {offsets = [2, 2, 0], sizes = [4, 4, 32], strides = [1, 1, 1]} : vector<6x6x32xf32> to vector<4x4x32xf32>
    %171 = tpu.concatenate %162, %163, %164, %165, %166, %167, %168, %169, %170 in 2 : vector<4x4x32xf32>, vector<4x4x32xf32>, vector<4x4x32xf32>, vector<4x4x32xf32>, vector<4x4x32xf32>, vector<4x4x32xf32>, vector<4x4x32xf32>, vector<4x4x32xf32>, vector<4x4x32xf32> -> vector<4x4x288xf32>
    %172 = vector.shape_cast %171 : vector<4x4x288xf32> to vector<16x288xf32>
    %173 = arith.truncf %172 : vector<16x288xf32> to vector<16x288xbf16>
    %c0_66 = arith.constant 0 : index
    %c0_67 = arith.constant 0 : index
    %174 = vector.load %arg8[%c0_66, %c0_67] : memref<288x32xbf16, #tpu.memory_space<vmem>>, vector<288x32xbf16>
    %cst_68 = arith.constant dense<0.000000e+00> : vector<16x32xf32>
    %175 = tpu.matmul %173, %174, %cst_68 {dimension_numbers = #tpu.dot_dimension_numbers<[1], [0], [0], [1], [0, 0, 1, 1], [], []>} : vector<16x288xbf16>, vector<288x32xbf16>, vector<16x32xf32> -> vector<16x32xf32>
    %c0_69 = arith.constant 0 : index
    %c0_70 = arith.constant 0 : index
    %176 = vector.load %arg22[%c0_69, %c0_70] : memref<1x32xf32, #tpu.memory_space<vmem>>, vector<1x32xf32>
    %177 = vector.broadcast %176 : vector<1x32xf32> to vector<16x32xf32>
    %178 = arith.addf %175, %177 : vector<16x32xf32>
    %cst_71 = arith.constant 0.000000e+00 : f32
    %179 = vector.broadcast %cst_71 : f32 to vector<16x32xf32>
    %180 = arith.maximumf %178, %179 : vector<16x32xf32>
    %181 = vector.shape_cast %180 : vector<16x32xf32> to vector<4x4x32xf32>
    %cst_72 = arith.constant 0.000000e+00 : f32
    %182 = vector.broadcast %cst_72 : f32 to vector<4x1x32xf32>
    %183 = tpu.concatenate %182, %181, %182 in 1 : vector<4x1x32xf32>, vector<4x4x32xf32>, vector<4x1x32xf32> -> vector<4x6x32xf32>
    %cst_73 = arith.constant 0.000000e+00 : f32
    %184 = vector.broadcast %cst_73 : f32 to vector<1x6x32xf32>
    %185 = tpu.concatenate %184, %183, %184 in 0 : vector<1x6x32xf32>, vector<4x6x32xf32>, vector<1x6x32xf32> -> vector<6x6x32xf32>
    %186 = vector.extract_strided_slice %185 {offsets = [0, 0, 0], sizes = [4, 4, 32], strides = [1, 1, 1]} : vector<6x6x32xf32> to vector<4x4x32xf32>
    %187 = vector.extract_strided_slice %185 {offsets = [1, 0, 0], sizes = [4, 4, 32], strides = [1, 1, 1]} : vector<6x6x32xf32> to vector<4x4x32xf32>
    %188 = vector.extract_strided_slice %185 {offsets = [2, 0, 0], sizes = [4, 4, 32], strides = [1, 1, 1]} : vector<6x6x32xf32> to vector<4x4x32xf32>
    %189 = vector.extract_strided_slice %185 {offsets = [0, 1, 0], sizes = [4, 4, 32], strides = [1, 1, 1]} : vector<6x6x32xf32> to vector<4x4x32xf32>
    %190 = vector.extract_strided_slice %185 {offsets = [1, 1, 0], sizes = [4, 4, 32], strides = [1, 1, 1]} : vector<6x6x32xf32> to vector<4x4x32xf32>
    %191 = vector.extract_strided_slice %185 {offsets = [2, 1, 0], sizes = [4, 4, 32], strides = [1, 1, 1]} : vector<6x6x32xf32> to vector<4x4x32xf32>
    %192 = vector.extract_strided_slice %185 {offsets = [0, 2, 0], sizes = [4, 4, 32], strides = [1, 1, 1]} : vector<6x6x32xf32> to vector<4x4x32xf32>
    %193 = vector.extract_strided_slice %185 {offsets = [1, 2, 0], sizes = [4, 4, 32], strides = [1, 1, 1]} : vector<6x6x32xf32> to vector<4x4x32xf32>
    %194 = vector.extract_strided_slice %185 {offsets = [2, 2, 0], sizes = [4, 4, 32], strides = [1, 1, 1]} : vector<6x6x32xf32> to vector<4x4x32xf32>
    %195 = tpu.concatenate %186, %187, %188, %189, %190, %191, %192, %193, %194 in 2 : vector<4x4x32xf32>, vector<4x4x32xf32>, vector<4x4x32xf32>, vector<4x4x32xf32>, vector<4x4x32xf32>, vector<4x4x32xf32>, vector<4x4x32xf32>, vector<4x4x32xf32>, vector<4x4x32xf32> -> vector<4x4x288xf32>
    %196 = vector.shape_cast %195 : vector<4x4x288xf32> to vector<16x288xf32>
    %197 = arith.truncf %196 : vector<16x288xf32> to vector<16x288xbf16>
    %c0_74 = arith.constant 0 : index
    %c0_75 = arith.constant 0 : index
    %198 = vector.load %arg9[%c0_74, %c0_75] : memref<288x32xbf16, #tpu.memory_space<vmem>>, vector<288x32xbf16>
    %cst_76 = arith.constant dense<0.000000e+00> : vector<16x32xf32>
    %199 = tpu.matmul %197, %198, %cst_76 {dimension_numbers = #tpu.dot_dimension_numbers<[1], [0], [0], [1], [0, 0, 1, 1], [], []>} : vector<16x288xbf16>, vector<288x32xbf16>, vector<16x32xf32> -> vector<16x32xf32>
    %c0_77 = arith.constant 0 : index
    %c0_78 = arith.constant 0 : index
    %200 = vector.load %arg23[%c0_77, %c0_78] : memref<1x32xf32, #tpu.memory_space<vmem>>, vector<1x32xf32>
    %201 = vector.broadcast %200 : vector<1x32xf32> to vector<16x32xf32>
    %202 = arith.addf %199, %201 : vector<16x32xf32>
    %cst_79 = arith.constant 0.000000e+00 : f32
    %203 = vector.broadcast %cst_79 : f32 to vector<16x32xf32>
    %204 = arith.maximumf %202, %203 : vector<16x32xf32>
    %205 = vector.shape_cast %204 : vector<16x32xf32> to vector<4x4x32xf32>
    %206 = vector.shape_cast %205 : vector<4x4x32xf32> to vector<16x32xf32>
    %c0_80 = arith.constant 0 : index
    %c0_81 = arith.constant 0 : index
    %c0_82 = arith.constant 0 : index
    %207 = vector.load %arg36[%c0_80, %c0_81, %c0_82] : memref<1x16x32xf32, #tpu.memory_space<vmem>>, vector<1x16x32xf32>
    %208 = vector.shape_cast %207 : vector<1x16x32xf32> to vector<16x32xf32>
    %209 = vector.shape_cast %206 : vector<16x32xf32> to vector<1x16x32xf32>
    tpu.vector_store %arg36[%c0_80, %c0_81, %c0_82], %209 {strides = array<i32>} : memref<1x16x32xf32, #tpu.memory_space<vmem>>, vector<1x16x32xf32>,
    %cst_83 = arith.constant 0.000000e+00 : f32
    %210 = vector.broadcast %cst_83 : f32 to vector<4x1x32xf32>
    %211 = tpu.concatenate %210, %205, %210 in 1 : vector<4x1x32xf32>, vector<4x4x32xf32>, vector<4x1x32xf32> -> vector<4x6x32xf32>
    %cst_84 = arith.constant 0.000000e+00 : f32
    %212 = vector.broadcast %cst_84 : f32 to vector<1x6x32xf32>
    %213 = tpu.concatenate %212, %211, %212 in 0 : vector<1x6x32xf32>, vector<4x6x32xf32>, vector<1x6x32xf32> -> vector<6x6x32xf32>
    %214 = vector.extract_strided_slice %213 {offsets = [0, 0, 0], sizes = [4, 4, 32], strides = [1, 1, 1]} : vector<6x6x32xf32> to vector<4x4x32xf32>
    %215 = vector.extract_strided_slice %213 {offsets = [1, 0, 0], sizes = [4, 4, 32], strides = [1, 1, 1]} : vector<6x6x32xf32> to vector<4x4x32xf32>
    %216 = vector.extract_strided_slice %213 {offsets = [2, 0, 0], sizes = [4, 4, 32], strides = [1, 1, 1]} : vector<6x6x32xf32> to vector<4x4x32xf32>
    %217 = vector.extract_strided_slice %213 {offsets = [0, 1, 0], sizes = [4, 4, 32], strides = [1, 1, 1]} : vector<6x6x32xf32> to vector<4x4x32xf32>
    %218 = vector.extract_strided_slice %213 {offsets = [1, 1, 0], sizes = [4, 4, 32], strides = [1, 1, 1]} : vector<6x6x32xf32> to vector<4x4x32xf32>
    %219 = vector.extract_strided_slice %213 {offsets = [2, 1, 0], sizes = [4, 4, 32], strides = [1, 1, 1]} : vector<6x6x32xf32> to vector<4x4x32xf32>
    %220 = vector.extract_strided_slice %213 {offsets = [0, 2, 0], sizes = [4, 4, 32], strides = [1, 1, 1]} : vector<6x6x32xf32> to vector<4x4x32xf32>
    %221 = vector.extract_strided_slice %213 {offsets = [1, 2, 0], sizes = [4, 4, 32], strides = [1, 1, 1]} : vector<6x6x32xf32> to vector<4x4x32xf32>
    %222 = vector.extract_strided_slice %213 {offsets = [2, 2, 0], sizes = [4, 4, 32], strides = [1, 1, 1]} : vector<6x6x32xf32> to vector<4x4x32xf32>
    %223 = tpu.concatenate %214, %215, %216, %217, %218, %219, %220, %221, %222 in 2 : vector<4x4x32xf32>, vector<4x4x32xf32>, vector<4x4x32xf32>, vector<4x4x32xf32>, vector<4x4x32xf32>, vector<4x4x32xf32>, vector<4x4x32xf32>, vector<4x4x32xf32>, vector<4x4x32xf32> -> vector<4x4x288xf32>
    %224 = vector.shape_cast %223 : vector<4x4x288xf32> to vector<16x288xf32>
    %225 = arith.truncf %224 : vector<16x288xf32> to vector<16x288xbf16>
    %c0_85 = arith.constant 0 : index
    %c0_86 = arith.constant 0 : index
    %226 = vector.load %arg10[%c0_85, %c0_86] : memref<288x32xbf16, #tpu.memory_space<vmem>>, vector<288x32xbf16>
    %cst_87 = arith.constant dense<0.000000e+00> : vector<16x32xf32>
    %227 = tpu.matmul %225, %226, %cst_87 {dimension_numbers = #tpu.dot_dimension_numbers<[1], [0], [0], [1], [0, 0, 1, 1], [], []>} : vector<16x288xbf16>, vector<288x32xbf16>, vector<16x32xf32> -> vector<16x32xf32>
    %c0_88 = arith.constant 0 : index
    %c0_89 = arith.constant 0 : index
    %228 = vector.load %arg24[%c0_88, %c0_89] : memref<1x32xf32, #tpu.memory_space<vmem>>, vector<1x32xf32>
    %229 = vector.broadcast %228 : vector<1x32xf32> to vector<16x32xf32>
    %230 = arith.addf %227, %229 : vector<16x32xf32>
    %cst_90 = arith.constant 0.000000e+00 : f32
    %231 = vector.broadcast %cst_90 : f32 to vector<16x32xf32>
    %232 = arith.maximumf %230, %231 : vector<16x32xf32>
    %233 = vector.shape_cast %232 : vector<16x32xf32> to vector<4x4x32xf32>
    %234 = vector.shape_cast %233 : vector<4x4x32xf32> to vector<16x32xf32>
    %c0_91 = arith.constant 0 : index
    %c0_92 = arith.constant 0 : index
    %c0_93 = arith.constant 0 : index
    %235 = vector.load %arg37[%c0_91, %c0_92, %c0_93] : memref<1x16x32xf32, #tpu.memory_space<vmem>>, vector<1x16x32xf32>
    %236 = vector.shape_cast %235 : vector<1x16x32xf32> to vector<16x32xf32>
    %237 = vector.shape_cast %234 : vector<16x32xf32> to vector<1x16x32xf32>
    tpu.vector_store %arg37[%c0_91, %c0_92, %c0_93], %237 {strides = array<i32>} : memref<1x16x32xf32, #tpu.memory_space<vmem>>, vector<1x16x32xf32>,
    %238 = vector.shape_cast %233 : vector<4x4x32xf32> to vector<2x2x4x32xf32>
    %cst_94 = arith.constant dense<0xFF800000> : vector<2x4x32xf32>
    %239 = vector.multi_reduction <maximumf>, %238, %cst_94 [1] : vector<2x2x4x32xf32> to vector<2x4x32xf32>
    %240 = vector.shape_cast %239 : vector<2x4x32xf32> to vector<2x2x2x32xf32>
    %cst_95 = arith.constant dense<0xFF800000> : vector<2x2x32xf32>
    %241 = vector.multi_reduction <maximumf>, %240, %cst_95 [2] : vector<2x2x2x32xf32> to vector<2x2x32xf32>
    %cst_96 = arith.constant 0.000000e+00 : f32
    %242 = vector.broadcast %cst_96 : f32 to vector<2x1x32xf32>
    %243 = tpu.concatenate %242, %241, %242 in 1 : vector<2x1x32xf32>, vector<2x2x32xf32>, vector<2x1x32xf32> -> vector<2x4x32xf32>
    %cst_97 = arith.constant 0.000000e+00 : f32
    %244 = vector.broadcast %cst_97 : f32 to vector<1x4x32xf32>
    %245 = tpu.concatenate %244, %243, %244 in 0 : vector<1x4x32xf32>, vector<2x4x32xf32>, vector<1x4x32xf32> -> vector<4x4x32xf32>
    %246 = vector.extract_strided_slice %245 {offsets = [0, 0, 0], sizes = [2, 2, 32], strides = [1, 1, 1]} : vector<4x4x32xf32> to vector<2x2x32xf32>
    %247 = vector.extract_strided_slice %245 {offsets = [1, 0, 0], sizes = [2, 2, 32], strides = [1, 1, 1]} : vector<4x4x32xf32> to vector<2x2x32xf32>
    %248 = vector.extract_strided_slice %245 {offsets = [2, 0, 0], sizes = [2, 2, 32], strides = [1, 1, 1]} : vector<4x4x32xf32> to vector<2x2x32xf32>
    %249 = vector.extract_strided_slice %245 {offsets = [0, 1, 0], sizes = [2, 2, 32], strides = [1, 1, 1]} : vector<4x4x32xf32> to vector<2x2x32xf32>
    %250 = vector.extract_strided_slice %245 {offsets = [1, 1, 0], sizes = [2, 2, 32], strides = [1, 1, 1]} : vector<4x4x32xf32> to vector<2x2x32xf32>
    %251 = vector.extract_strided_slice %245 {offsets = [2, 1, 0], sizes = [2, 2, 32], strides = [1, 1, 1]} : vector<4x4x32xf32> to vector<2x2x32xf32>
    %252 = vector.extract_strided_slice %245 {offsets = [0, 2, 0], sizes = [2, 2, 32], strides = [1, 1, 1]} : vector<4x4x32xf32> to vector<2x2x32xf32>
    %253 = vector.extract_strided_slice %245 {offsets = [1, 2, 0], sizes = [2, 2, 32], strides = [1, 1, 1]} : vector<4x4x32xf32> to vector<2x2x32xf32>
    %254 = vector.extract_strided_slice %245 {offsets = [2, 2, 0], sizes = [2, 2, 32], strides = [1, 1, 1]} : vector<4x4x32xf32> to vector<2x2x32xf32>
    %255 = tpu.concatenate %246, %247, %248, %249, %250, %251, %252, %253, %254 in 2 : vector<2x2x32xf32>, vector<2x2x32xf32>, vector<2x2x32xf32>, vector<2x2x32xf32>, vector<2x2x32xf32>, vector<2x2x32xf32>, vector<2x2x32xf32>, vector<2x2x32xf32>, vector<2x2x32xf32> -> vector<2x2x288xf32>
    %256 = vector.shape_cast %255 : vector<2x2x288xf32> to vector<4x288xf32>
    %257 = arith.truncf %256 : vector<4x288xf32> to vector<4x288xbf16>
    %c0_98 = arith.constant 0 : index
    %c0_99 = arith.constant 0 : index
    %258 = vector.load %arg11[%c0_98, %c0_99] : memref<288x64xbf16, #tpu.memory_space<vmem>>, vector<288x64xbf16>
    %cst_100 = arith.constant dense<0.000000e+00> : vector<4x64xf32>
    %259 = tpu.matmul %257, %258, %cst_100 {dimension_numbers = #tpu.dot_dimension_numbers<[1], [0], [0], [1], [0, 0, 1, 1], [], []>} : vector<4x288xbf16>, vector<288x64xbf16>, vector<4x64xf32> -> vector<4x64xf32>
    %c0_101 = arith.constant 0 : index
    %c0_102 = arith.constant 0 : index
    %260 = vector.load %arg25[%c0_101, %c0_102] : memref<1x64xf32, #tpu.memory_space<vmem>>, vector<1x64xf32>
    %261 = vector.broadcast %260 : vector<1x64xf32> to vector<4x64xf32>
    %262 = arith.addf %259, %261 : vector<4x64xf32>
    %cst_103 = arith.constant 0.000000e+00 : f32
    %263 = vector.broadcast %cst_103 : f32 to vector<4x64xf32>
    %264 = arith.maximumf %262, %263 : vector<4x64xf32>
    %265 = vector.shape_cast %264 : vector<4x64xf32> to vector<2x2x64xf32>
    %266 = vector.shape_cast %265 : vector<2x2x64xf32> to vector<4x64xf32>
    %c0_104 = arith.constant 0 : index
    %c0_105 = arith.constant 0 : index
    %c0_106 = arith.constant 0 : index
    %267 = vector.load %arg38[%c0_104, %c0_105, %c0_106] : memref<1x4x64xf32, #tpu.memory_space<vmem>>, vector<1x4x64xf32>
    %268 = vector.shape_cast %267 : vector<1x4x64xf32> to vector<4x64xf32>
    %269 = vector.shape_cast %266 : vector<4x64xf32> to vector<1x4x64xf32>
    tpu.vector_store %arg38[%c0_104, %c0_105, %c0_106], %269 {strides = array<i32>} : memref<1x4x64xf32, #tpu.memory_space<vmem>>, vector<1x4x64xf32>,
    %cst_107 = arith.constant 0.000000e+00 : f32
    %270 = vector.broadcast %cst_107 : f32 to vector<2x1x64xf32>
    %271 = tpu.concatenate %270, %265, %270 in 1 : vector<2x1x64xf32>, vector<2x2x64xf32>, vector<2x1x64xf32> -> vector<2x4x64xf32>
    %cst_108 = arith.constant 0.000000e+00 : f32
    %272 = vector.broadcast %cst_108 : f32 to vector<1x4x64xf32>
    %273 = tpu.concatenate %272, %271, %272 in 0 : vector<1x4x64xf32>, vector<2x4x64xf32>, vector<1x4x64xf32> -> vector<4x4x64xf32>
    %274 = vector.extract_strided_slice %273 {offsets = [0, 0, 0], sizes = [2, 2, 64], strides = [1, 1, 1]} : vector<4x4x64xf32> to vector<2x2x64xf32>
    %275 = vector.extract_strided_slice %273 {offsets = [1, 0, 0], sizes = [2, 2, 64], strides = [1, 1, 1]} : vector<4x4x64xf32> to vector<2x2x64xf32>
    %276 = vector.extract_strided_slice %273 {offsets = [2, 0, 0], sizes = [2, 2, 64], strides = [1, 1, 1]} : vector<4x4x64xf32> to vector<2x2x64xf32>
    %277 = vector.extract_strided_slice %273 {offsets = [0, 1, 0], sizes = [2, 2, 64], strides = [1, 1, 1]} : vector<4x4x64xf32> to vector<2x2x64xf32>
    %278 = vector.extract_strided_slice %273 {offsets = [1, 1, 0], sizes = [2, 2, 64], strides = [1, 1, 1]} : vector<4x4x64xf32> to vector<2x2x64xf32>
    %279 = vector.extract_strided_slice %273 {offsets = [2, 1, 0], sizes = [2, 2, 64], strides = [1, 1, 1]} : vector<4x4x64xf32> to vector<2x2x64xf32>
    %280 = vector.extract_strided_slice %273 {offsets = [0, 2, 0], sizes = [2, 2, 64], strides = [1, 1, 1]} : vector<4x4x64xf32> to vector<2x2x64xf32>
    %281 = vector.extract_strided_slice %273 {offsets = [1, 2, 0], sizes = [2, 2, 64], strides = [1, 1, 1]} : vector<4x4x64xf32> to vector<2x2x64xf32>
    %282 = vector.extract_strided_slice %273 {offsets = [2, 2, 0], sizes = [2, 2, 64], strides = [1, 1, 1]} : vector<4x4x64xf32> to vector<2x2x64xf32>
    %283 = tpu.concatenate %274, %275, %276, %277, %278, %279, %280, %281, %282 in 2 : vector<2x2x64xf32>, vector<2x2x64xf32>, vector<2x2x64xf32>, vector<2x2x64xf32>, vector<2x2x64xf32>, vector<2x2x64xf32>, vector<2x2x64xf32>, vector<2x2x64xf32>, vector<2x2x64xf32> -> vector<2x2x576xf32>
    %284 = vector.shape_cast %283 : vector<2x2x576xf32> to vector<4x576xf32>
    %285 = arith.truncf %284 : vector<4x576xf32> to vector<4x576xbf16>
    %c0_109 = arith.constant 0 : index
    %c0_110 = arith.constant 0 : index
    %286 = vector.load %arg12[%c0_109, %c0_110] : memref<576x64xbf16, #tpu.memory_space<vmem>>, vector<576x64xbf16>
    %cst_111 = arith.constant dense<0.000000e+00> : vector<4x64xf32>
    %287 = tpu.matmul %285, %286, %cst_111 {dimension_numbers = #tpu.dot_dimension_numbers<[1], [0], [0], [1], [0, 0, 1, 1], [], []>} : vector<4x576xbf16>, vector<576x64xbf16>, vector<4x64xf32> -> vector<4x64xf32>
    %c0_112 = arith.constant 0 : index
    %c0_113 = arith.constant 0 : index
    %288 = vector.load %arg26[%c0_112, %c0_113] : memref<1x64xf32, #tpu.memory_space<vmem>>, vector<1x64xf32>
    %289 = vector.broadcast %288 : vector<1x64xf32> to vector<4x64xf32>
    %290 = arith.addf %287, %289 : vector<4x64xf32>
    %cst_114 = arith.constant 0.000000e+00 : f32
    %291 = vector.broadcast %cst_114 : f32 to vector<4x64xf32>
    %292 = arith.maximumf %290, %291 : vector<4x64xf32>
    %293 = vector.shape_cast %292 : vector<4x64xf32> to vector<2x2x64xf32>
    %294 = vector.shape_cast %293 : vector<2x2x64xf32> to vector<4x64xf32>
    %c0_115 = arith.constant 0 : index
    %c0_116 = arith.constant 0 : index
    %c0_117 = arith.constant 0 : index
    %295 = vector.load %arg39[%c0_115, %c0_116, %c0_117] : memref<1x4x64xf32, #tpu.memory_space<vmem>>, vector<1x4x64xf32>
    %296 = vector.shape_cast %295 : vector<1x4x64xf32> to vector<4x64xf32>
    %297 = vector.shape_cast %294 : vector<4x64xf32> to vector<1x4x64xf32>
    tpu.vector_store %arg39[%c0_115, %c0_116, %c0_117], %297 {strides = array<i32>} : memref<1x4x64xf32, #tpu.memory_space<vmem>>, vector<1x4x64xf32>,
    %cst_118 = arith.constant 0.000000e+00 : f32
    %298 = vector.broadcast %cst_118 : f32 to vector<2x1x64xf32>
    %299 = tpu.concatenate %298, %293, %298 in 1 : vector<2x1x64xf32>, vector<2x2x64xf32>, vector<2x1x64xf32> -> vector<2x4x64xf32>
    %cst_119 = arith.constant 0.000000e+00 : f32
    %300 = vector.broadcast %cst_119 : f32 to vector<1x4x64xf32>
    %301 = tpu.concatenate %300, %299, %300 in 0 : vector<1x4x64xf32>, vector<2x4x64xf32>, vector<1x4x64xf32> -> vector<4x4x64xf32>
    %302 = vector.extract_strided_slice %301 {offsets = [0, 0, 0], sizes = [2, 2, 64], strides = [1, 1, 1]} : vector<4x4x64xf32> to vector<2x2x64xf32>
    %303 = vector.extract_strided_slice %301 {offsets = [1, 0, 0], sizes = [2, 2, 64], strides = [1, 1, 1]} : vector<4x4x64xf32> to vector<2x2x64xf32>
    %304 = vector.extract_strided_slice %301 {offsets = [2, 0, 0], sizes = [2, 2, 64], strides = [1, 1, 1]} : vector<4x4x64xf32> to vector<2x2x64xf32>
    %305 = vector.extract_strided_slice %301 {offsets = [0, 1, 0], sizes = [2, 2, 64], strides = [1, 1, 1]} : vector<4x4x64xf32> to vector<2x2x64xf32>
    %306 = vector.extract_strided_slice %301 {offsets = [1, 1, 0], sizes = [2, 2, 64], strides = [1, 1, 1]} : vector<4x4x64xf32> to vector<2x2x64xf32>
    %307 = vector.extract_strided_slice %301 {offsets = [2, 1, 0], sizes = [2, 2, 64], strides = [1, 1, 1]} : vector<4x4x64xf32> to vector<2x2x64xf32>
    %308 = vector.extract_strided_slice %301 {offsets = [0, 2, 0], sizes = [2, 2, 64], strides = [1, 1, 1]} : vector<4x4x64xf32> to vector<2x2x64xf32>
    %309 = vector.extract_strided_slice %301 {offsets = [1, 2, 0], sizes = [2, 2, 64], strides = [1, 1, 1]} : vector<4x4x64xf32> to vector<2x2x64xf32>
    %310 = vector.extract_strided_slice %301 {offsets = [2, 2, 0], sizes = [2, 2, 64], strides = [1, 1, 1]} : vector<4x4x64xf32> to vector<2x2x64xf32>
    %311 = tpu.concatenate %302, %303, %304, %305, %306, %307, %308, %309, %310 in 2 : vector<2x2x64xf32>, vector<2x2x64xf32>, vector<2x2x64xf32>, vector<2x2x64xf32>, vector<2x2x64xf32>, vector<2x2x64xf32>, vector<2x2x64xf32>, vector<2x2x64xf32>, vector<2x2x64xf32> -> vector<2x2x576xf32>
    %312 = vector.shape_cast %311 : vector<2x2x576xf32> to vector<4x576xf32>
    %313 = arith.truncf %312 : vector<4x576xf32> to vector<4x576xbf16>
    %c0_120 = arith.constant 0 : index
    %c0_121 = arith.constant 0 : index
    %314 = vector.load %arg13[%c0_120, %c0_121] : memref<576x64xbf16, #tpu.memory_space<vmem>>, vector<576x64xbf16>
    %cst_122 = arith.constant dense<0.000000e+00> : vector<4x64xf32>
    %315 = tpu.matmul %313, %314, %cst_122 {dimension_numbers = #tpu.dot_dimension_numbers<[1], [0], [0], [1], [0, 0, 1, 1], [], []>} : vector<4x576xbf16>, vector<576x64xbf16>, vector<4x64xf32> -> vector<4x64xf32>
    %c0_123 = arith.constant 0 : index
    %c0_124 = arith.constant 0 : index
    %316 = vector.load %arg27[%c0_123, %c0_124] : memref<1x64xf32, #tpu.memory_space<vmem>>, vector<1x64xf32>
    %317 = vector.broadcast %316 : vector<1x64xf32> to vector<4x64xf32>
    %318 = arith.addf %315, %317 : vector<4x64xf32>
    %cst_125 = arith.constant 0.000000e+00 : f32
    %319 = vector.broadcast %cst_125 : f32 to vector<4x64xf32>
    %320 = arith.maximumf %318, %319 : vector<4x64xf32>
    %321 = vector.shape_cast %320 : vector<4x64xf32> to vector<2x2x64xf32>
    %322 = vector.shape_cast %321 : vector<2x2x64xf32> to vector<4x64xf32>
    %c0_126 = arith.constant 0 : index
    %c0_127 = arith.constant 0 : index
    %c0_128 = arith.constant 0 : index
    %323 = vector.load %arg40[%c0_126, %c0_127, %c0_128] : memref<1x4x64xf32, #tpu.memory_space<vmem>>, vector<1x4x64xf32>
    %324 = vector.shape_cast %323 : vector<1x4x64xf32> to vector<4x64xf32>
    %325 = vector.shape_cast %322 : vector<4x64xf32> to vector<1x4x64xf32>
    tpu.vector_store %arg40[%c0_126, %c0_127, %c0_128], %325 {strides = array<i32>} : memref<1x4x64xf32, #tpu.memory_space<vmem>>, vector<1x4x64xf32>,
    %cst_129 = arith.constant 0.000000e+00 : f32
    %326 = vector.broadcast %cst_129 : f32 to vector<2x1x64xf32>
    %327 = tpu.concatenate %326, %321, %326 in 1 : vector<2x1x64xf32>, vector<2x2x64xf32>, vector<2x1x64xf32> -> vector<2x4x64xf32>
    %cst_130 = arith.constant 0.000000e+00 : f32
    %328 = vector.broadcast %cst_130 : f32 to vector<1x4x64xf32>
    %329 = tpu.concatenate %328, %327, %328 in 0 : vector<1x4x64xf32>, vector<2x4x64xf32>, vector<1x4x64xf32> -> vector<4x4x64xf32>
    %330 = vector.extract_strided_slice %329 {offsets = [0, 0, 0], sizes = [2, 2, 64], strides = [1, 1, 1]} : vector<4x4x64xf32> to vector<2x2x64xf32>
    %331 = vector.extract_strided_slice %329 {offsets = [1, 0, 0], sizes = [2, 2, 64], strides = [1, 1, 1]} : vector<4x4x64xf32> to vector<2x2x64xf32>
    %332 = vector.extract_strided_slice %329 {offsets = [2, 0, 0], sizes = [2, 2, 64], strides = [1, 1, 1]} : vector<4x4x64xf32> to vector<2x2x64xf32>
    %333 = vector.extract_strided_slice %329 {offsets = [0, 1, 0], sizes = [2, 2, 64], strides = [1, 1, 1]} : vector<4x4x64xf32> to vector<2x2x64xf32>
    %334 = vector.extract_strided_slice %329 {offsets = [1, 1, 0], sizes = [2, 2, 64], strides = [1, 1, 1]} : vector<4x4x64xf32> to vector<2x2x64xf32>
    %335 = vector.extract_strided_slice %329 {offsets = [2, 1, 0], sizes = [2, 2, 64], strides = [1, 1, 1]} : vector<4x4x64xf32> to vector<2x2x64xf32>
    %336 = vector.extract_strided_slice %329 {offsets = [0, 2, 0], sizes = [2, 2, 64], strides = [1, 1, 1]} : vector<4x4x64xf32> to vector<2x2x64xf32>
    %337 = vector.extract_strided_slice %329 {offsets = [1, 2, 0], sizes = [2, 2, 64], strides = [1, 1, 1]} : vector<4x4x64xf32> to vector<2x2x64xf32>
    %338 = vector.extract_strided_slice %329 {offsets = [2, 2, 0], sizes = [2, 2, 64], strides = [1, 1, 1]} : vector<4x4x64xf32> to vector<2x2x64xf32>
    %339 = tpu.concatenate %330, %331, %332, %333, %334, %335, %336, %337, %338 in 2 : vector<2x2x64xf32>, vector<2x2x64xf32>, vector<2x2x64xf32>, vector<2x2x64xf32>, vector<2x2x64xf32>, vector<2x2x64xf32>, vector<2x2x64xf32>, vector<2x2x64xf32>, vector<2x2x64xf32> -> vector<2x2x576xf32>
    %340 = vector.shape_cast %339 : vector<2x2x576xf32> to vector<4x576xf32>
    %341 = arith.truncf %340 : vector<4x576xf32> to vector<4x576xbf16>
    %c0_131 = arith.constant 0 : index
    %c0_132 = arith.constant 0 : index
    %342 = vector.load %arg14[%c0_131, %c0_132] : memref<576x64xbf16, #tpu.memory_space<vmem>>, vector<576x64xbf16>
    %cst_133 = arith.constant dense<0.000000e+00> : vector<4x64xf32>
    %343 = tpu.matmul %341, %342, %cst_133 {dimension_numbers = #tpu.dot_dimension_numbers<[1], [0], [0], [1], [0, 0, 1, 1], [], []>} : vector<4x576xbf16>, vector<576x64xbf16>, vector<4x64xf32> -> vector<4x64xf32>
    %c0_134 = arith.constant 0 : index
    %c0_135 = arith.constant 0 : index
    %344 = vector.load %arg28[%c0_134, %c0_135] : memref<1x64xf32, #tpu.memory_space<vmem>>, vector<1x64xf32>
    %345 = vector.broadcast %344 : vector<1x64xf32> to vector<4x64xf32>
    %346 = arith.addf %343, %345 : vector<4x64xf32>
    %cst_136 = arith.constant 0.000000e+00 : f32
    %347 = vector.broadcast %cst_136 : f32 to vector<4x64xf32>
    %348 = arith.maximumf %346, %347 : vector<4x64xf32>
    %349 = vector.shape_cast %348 : vector<4x64xf32> to vector<2x2x64xf32>
    %350 = vector.shape_cast %349 : vector<2x2x64xf32> to vector<4x64xf32>
    %c0_137 = arith.constant 0 : index
    %c0_138 = arith.constant 0 : index
    %c0_139 = arith.constant 0 : index
    %351 = vector.load %arg41[%c0_137, %c0_138, %c0_139] : memref<1x4x64xf32, #tpu.memory_space<vmem>>, vector<1x4x64xf32>
    %352 = vector.shape_cast %351 : vector<1x4x64xf32> to vector<4x64xf32>
    %353 = vector.shape_cast %350 : vector<4x64xf32> to vector<1x4x64xf32>
    tpu.vector_store %arg41[%c0_137, %c0_138, %c0_139], %353 {strides = array<i32>} : memref<1x4x64xf32, #tpu.memory_space<vmem>>, vector<1x4x64xf32>,
    %354 = vector.shape_cast %349 : vector<2x2x64xf32> to vector<1x2x2x64xf32>
    %cst_140 = arith.constant dense<0xFF800000> : vector<1x2x64xf32>
    %355 = vector.multi_reduction <maximumf>, %354, %cst_140 [1] : vector<1x2x2x64xf32> to vector<1x2x64xf32>
    %356 = vector.shape_cast %355 : vector<1x2x64xf32> to vector<1x1x2x64xf32>
    %cst_141 = arith.constant dense<0xFF800000> : vector<1x1x64xf32>
    %357 = vector.multi_reduction <maximumf>, %356, %cst_141 [2] : vector<1x1x2x64xf32> to vector<1x1x64xf32>
    %cst_142 = arith.constant 0.000000e+00 : f32
    %358 = vector.broadcast %cst_142 : f32 to vector<1x1x64xf32>
    %359 = tpu.concatenate %358, %357, %358 in 1 : vector<1x1x64xf32>, vector<1x1x64xf32>, vector<1x1x64xf32> -> vector<1x3x64xf32>
    %cst_143 = arith.constant 0.000000e+00 : f32
    %360 = vector.broadcast %cst_143 : f32 to vector<1x3x64xf32>
    %361 = tpu.concatenate %360, %359, %360 in 0 : vector<1x3x64xf32>, vector<1x3x64xf32>, vector<1x3x64xf32> -> vector<3x3x64xf32>
    %362 = vector.extract_strided_slice %361 {offsets = [0, 0, 0], sizes = [1, 1, 64], strides = [1, 1, 1]} : vector<3x3x64xf32> to vector<1x1x64xf32>
    %363 = vector.extract_strided_slice %361 {offsets = [1, 0, 0], sizes = [1, 1, 64], strides = [1, 1, 1]} : vector<3x3x64xf32> to vector<1x1x64xf32>
    %364 = vector.extract_strided_slice %361 {offsets = [2, 0, 0], sizes = [1, 1, 64], strides = [1, 1, 1]} : vector<3x3x64xf32> to vector<1x1x64xf32>
    %365 = vector.extract_strided_slice %361 {offsets = [0, 1, 0], sizes = [1, 1, 64], strides = [1, 1, 1]} : vector<3x3x64xf32> to vector<1x1x64xf32>
    %366 = vector.extract_strided_slice %361 {offsets = [1, 1, 0], sizes = [1, 1, 64], strides = [1, 1, 1]} : vector<3x3x64xf32> to vector<1x1x64xf32>
    %367 = vector.extract_strided_slice %361 {offsets = [2, 1, 0], sizes = [1, 1, 64], strides = [1, 1, 1]} : vector<3x3x64xf32> to vector<1x1x64xf32>
    %368 = vector.extract_strided_slice %361 {offsets = [0, 2, 0], sizes = [1, 1, 64], strides = [1, 1, 1]} : vector<3x3x64xf32> to vector<1x1x64xf32>
    %369 = vector.extract_strided_slice %361 {offsets = [1, 2, 0], sizes = [1, 1, 64], strides = [1, 1, 1]} : vector<3x3x64xf32> to vector<1x1x64xf32>
    %370 = vector.extract_strided_slice %361 {offsets = [2, 2, 0], sizes = [1, 1, 64], strides = [1, 1, 1]} : vector<3x3x64xf32> to vector<1x1x64xf32>
    %371 = tpu.concatenate %362, %363, %364, %365, %366, %367, %368, %369, %370 in 2 : vector<1x1x64xf32>, vector<1x1x64xf32>, vector<1x1x64xf32>, vector<1x1x64xf32>, vector<1x1x64xf32>, vector<1x1x64xf32>, vector<1x1x64xf32>, vector<1x1x64xf32>, vector<1x1x64xf32> -> vector<1x1x576xf32>
    %372 = vector.shape_cast %371 : vector<1x1x576xf32> to vector<1x576xf32>
    %373 = arith.truncf %372 : vector<1x576xf32> to vector<1x576xbf16>
    %c0_144 = arith.constant 0 : index
    %c0_145 = arith.constant 0 : index
    %374 = vector.load %arg15[%c0_144, %c0_145] : memref<576x64xbf16, #tpu.memory_space<vmem>>, vector<576x64xbf16>
    %cst_146 = arith.constant dense<0.000000e+00> : vector<1x64xf32>
    %375 = tpu.matmul %373, %374, %cst_146 {dimension_numbers = #tpu.dot_dimension_numbers<[1], [0], [0], [1], [0, 0, 1, 1], [], []>} : vector<1x576xbf16>, vector<576x64xbf16>, vector<1x64xf32> -> vector<1x64xf32>
    %c0_147 = arith.constant 0 : index
    %c0_148 = arith.constant 0 : index
    %376 = vector.load %arg29[%c0_147, %c0_148] : memref<1x64xf32, #tpu.memory_space<vmem>>, vector<1x64xf32>
    %377 = arith.addf %375, %376 : vector<1x64xf32>
    %cst_149 = arith.constant 0.000000e+00 : f32
    %378 = vector.broadcast %cst_149 : f32 to vector<1x64xf32>
    %379 = arith.maximumf %377, %378 : vector<1x64xf32>
    %380 = vector.shape_cast %379 : vector<1x64xf32> to vector<1x1x64xf32>
    %381 = vector.shape_cast %380 : vector<1x1x64xf32> to vector<1x64xf32>
    %c0_150 = arith.constant 0 : index
    %c0_151 = arith.constant 0 : index
    %c0_152 = arith.constant 0 : index
    %382 = vector.load %arg42[%c0_150, %c0_151, %c0_152] : memref<1x1x64xf32, #tpu.memory_space<vmem>>, vector<1x1x64xf32>
    %383 = vector.shape_cast %382 : vector<1x1x64xf32> to vector<1x64xf32>
    %384 = vector.shape_cast %381 : vector<1x64xf32> to vector<1x1x64xf32>
    tpu.vector_store %arg42[%c0_150, %c0_151, %c0_152], %384 {strides = array<i32>} : memref<1x1x64xf32, #tpu.memory_space<vmem>>, vector<1x1x64xf32>,
    %cst_153 = arith.constant 0.000000e+00 : f32
    %385 = vector.broadcast %cst_153 : f32 to vector<1x1x64xf32>
    %386 = tpu.concatenate %385, %380, %385 in 1 : vector<1x1x64xf32>, vector<1x1x64xf32>, vector<1x1x64xf32> -> vector<1x3x64xf32>
    %cst_154 = arith.constant 0.000000e+00 : f32
    %387 = vector.broadcast %cst_154 : f32 to vector<1x3x64xf32>
    %388 = tpu.concatenate %387, %386, %387 in 0 : vector<1x3x64xf32>, vector<1x3x64xf32>, vector<1x3x64xf32> -> vector<3x3x64xf32>
    %389 = vector.extract_strided_slice %388 {offsets = [0, 0, 0], sizes = [1, 1, 64], strides = [1, 1, 1]} : vector<3x3x64xf32> to vector<1x1x64xf32>
    %390 = vector.extract_strided_slice %388 {offsets = [1, 0, 0], sizes = [1, 1, 64], strides = [1, 1, 1]} : vector<3x3x64xf32> to vector<1x1x64xf32>
    %391 = vector.extract_strided_slice %388 {offsets = [2, 0, 0], sizes = [1, 1, 64], strides = [1, 1, 1]} : vector<3x3x64xf32> to vector<1x1x64xf32>
    %392 = vector.extract_strided_slice %388 {offsets = [0, 1, 0], sizes = [1, 1, 64], strides = [1, 1, 1]} : vector<3x3x64xf32> to vector<1x1x64xf32>
    %393 = vector.extract_strided_slice %388 {offsets = [1, 1, 0], sizes = [1, 1, 64], strides = [1, 1, 1]} : vector<3x3x64xf32> to vector<1x1x64xf32>
    %394 = vector.extract_strided_slice %388 {offsets = [2, 1, 0], sizes = [1, 1, 64], strides = [1, 1, 1]} : vector<3x3x64xf32> to vector<1x1x64xf32>
    %395 = vector.extract_strided_slice %388 {offsets = [0, 2, 0], sizes = [1, 1, 64], strides = [1, 1, 1]} : vector<3x3x64xf32> to vector<1x1x64xf32>
    %396 = vector.extract_strided_slice %388 {offsets = [1, 2, 0], sizes = [1, 1, 64], strides = [1, 1, 1]} : vector<3x3x64xf32> to vector<1x1x64xf32>
    %397 = vector.extract_strided_slice %388 {offsets = [2, 2, 0], sizes = [1, 1, 64], strides = [1, 1, 1]} : vector<3x3x64xf32> to vector<1x1x64xf32>
    %398 = tpu.concatenate %389, %390, %391, %392, %393, %394, %395, %396, %397 in 2 : vector<1x1x64xf32>, vector<1x1x64xf32>, vector<1x1x64xf32>, vector<1x1x64xf32>, vector<1x1x64xf32>, vector<1x1x64xf32>, vector<1x1x64xf32>, vector<1x1x64xf32>, vector<1x1x64xf32> -> vector<1x1x576xf32>
    %399 = vector.shape_cast %398 : vector<1x1x576xf32> to vector<1x576xf32>
    %400 = arith.truncf %399 : vector<1x576xf32> to vector<1x576xbf16>
    %c0_155 = arith.constant 0 : index
    %c0_156 = arith.constant 0 : index
    %401 = vector.load %arg16[%c0_155, %c0_156] : memref<576x64xbf16, #tpu.memory_space<vmem>>, vector<576x64xbf16>
    %cst_157 = arith.constant dense<0.000000e+00> : vector<1x64xf32>
    %402 = tpu.matmul %400, %401, %cst_157 {dimension_numbers = #tpu.dot_dimension_numbers<[1], [0], [0], [1], [0, 0, 1, 1], [], []>} : vector<1x576xbf16>, vector<576x64xbf16>, vector<1x64xf32> -> vector<1x64xf32>
    %c0_158 = arith.constant 0 : index
    %c0_159 = arith.constant 0 : index
    %403 = vector.load %arg30[%c0_158, %c0_159] : memref<1x64xf32, #tpu.memory_space<vmem>>, vector<1x64xf32>
    %404 = arith.addf %402, %403 : vector<1x64xf32>
    %cst_160 = arith.constant 0.000000e+00 : f32
    %405 = vector.broadcast %cst_160 : f32 to vector<1x64xf32>
    %406 = arith.maximumf %404, %405 : vector<1x64xf32>
    %407 = vector.shape_cast %406 : vector<1x64xf32> to vector<1x1x64xf32>
    %408 = vector.shape_cast %407 : vector<1x1x64xf32> to vector<1x64xf32>
    %c0_161 = arith.constant 0 : index
    %c0_162 = arith.constant 0 : index
    %c0_163 = arith.constant 0 : index
    %409 = vector.load %arg43[%c0_161, %c0_162, %c0_163] : memref<1x1x64xf32, #tpu.memory_space<vmem>>, vector<1x1x64xf32>
    %410 = vector.shape_cast %409 : vector<1x1x64xf32> to vector<1x64xf32>
    %411 = vector.shape_cast %408 : vector<1x64xf32> to vector<1x1x64xf32>
    tpu.vector_store %arg43[%c0_161, %c0_162, %c0_163], %411 {strides = array<i32>} : memref<1x1x64xf32, #tpu.memory_space<vmem>>, vector<1x1x64xf32>,
    return
  }
  func.func @transform_0(%arg0: i32) -> (i32, i32, i32, i32) {
    %c0_i32 = arith.constant 0 : i32
    %c0_i32_0 = arith.constant 0 : i32
    %c0_i32_1 = arith.constant 0 : i32
    %c0_i32_2 = arith.constant 0 : i32
    return %arg0, %c0_i32, %c0_i32_0, %c0_i32_1 : i32, i32, i32, i32
  }
  func.func @transform_1(%arg0: i32) -> (i32, i32) {
    %c0_i32 = arith.constant 0 : i32
    %c0_i32_0 = arith.constant 0 : i32
    %c0_i32_1 = arith.constant 0 : i32
    return %c0_i32, %c0_i32_0 : i32, i32
  }
  func.func @transform_2(%arg0: i32) -> (i32, i32) {
    %c0_i32 = arith.constant 0 : i32
    %c0_i32_0 = arith.constant 0 : i32
    %c0_i32_1 = arith.constant 0 : i32
    return %c0_i32, %c0_i32_0 : i32, i32
  }
  func.func @transform_3(%arg0: i32) -> (i32, i32) {
    %c0_i32 = arith.constant 0 : i32
    %c0_i32_0 = arith.constant 0 : i32
    %c0_i32_1 = arith.constant 0 : i32
    return %c0_i32, %c0_i32_0 : i32, i32
  }
  func.func @transform_4(%arg0: i32) -> (i32, i32) {
    %c0_i32 = arith.constant 0 : i32
    %c0_i32_0 = arith.constant 0 : i32
    %c0_i32_1 = arith.constant 0 : i32
    return %c0_i32, %c0_i32_0 : i32, i32
  }
  func.func @transform_5(%arg0: i32) -> (i32, i32) {
    %c0_i32 = arith.constant 0 : i32
    %c0_i32_0 = arith.constant 0 : i32
    %c0_i32_1 = arith.constant 0 : i32
    return %c0_i32, %c0_i32_0 : i32, i32
  }
  func.func @transform_6(%arg0: i32) -> (i32, i32) {
    %c0_i32 = arith.constant 0 : i32
    %c0_i32_0 = arith.constant 0 : i32
    %c0_i32_1 = arith.constant 0 : i32
    return %c0_i32, %c0_i32_0 : i32, i32
  }
  func.func @transform_7(%arg0: i32) -> (i32, i32) {
    %c0_i32 = arith.constant 0 : i32
    %c0_i32_0 = arith.constant 0 : i32
    %c0_i32_1 = arith.constant 0 : i32
    return %c0_i32, %c0_i32_0 : i32, i32
  }
  func.func @transform_8(%arg0: i32) -> (i32, i32) {
    %c0_i32 = arith.constant 0 : i32
    %c0_i32_0 = arith.constant 0 : i32
    %c0_i32_1 = arith.constant 0 : i32
    return %c0_i32, %c0_i32_0 : i32, i32
  }
  func.func @transform_9(%arg0: i32) -> (i32, i32) {
    %c0_i32 = arith.constant 0 : i32
    %c0_i32_0 = arith.constant 0 : i32
    %c0_i32_1 = arith.constant 0 : i32
    return %c0_i32, %c0_i32_0 : i32, i32
  }
  func.func @transform_10(%arg0: i32) -> (i32, i32) {
    %c0_i32 = arith.constant 0 : i32
    %c0_i32_0 = arith.constant 0 : i32
    %c0_i32_1 = arith.constant 0 : i32
    return %c0_i32, %c0_i32_0 : i32, i32
  }
  func.func @transform_11(%arg0: i32) -> (i32, i32) {
    %c0_i32 = arith.constant 0 : i32
    %c0_i32_0 = arith.constant 0 : i32
    %c0_i32_1 = arith.constant 0 : i32
    return %c0_i32, %c0_i32_0 : i32, i32
  }
  func.func @transform_12(%arg0: i32) -> (i32, i32) {
    %c0_i32 = arith.constant 0 : i32
    %c0_i32_0 = arith.constant 0 : i32
    %c0_i32_1 = arith.constant 0 : i32
    return %c0_i32, %c0_i32_0 : i32, i32
  }
  func.func @transform_13(%arg0: i32) -> (i32, i32) {
    %c0_i32 = arith.constant 0 : i32
    %c0_i32_0 = arith.constant 0 : i32
    %c0_i32_1 = arith.constant 0 : i32
    return %c0_i32, %c0_i32_0 : i32, i32
  }
  func.func @transform_14(%arg0: i32) -> (i32, i32) {
    %c0_i32 = arith.constant 0 : i32
    %c0_i32_0 = arith.constant 0 : i32
    %c0_i32_1 = arith.constant 0 : i32
    return %c0_i32, %c0_i32_0 : i32, i32
  }
  func.func @transform_15(%arg0: i32) -> (i32, i32) {
    %c0_i32 = arith.constant 0 : i32
    %c0_i32_0 = arith.constant 0 : i32
    %c0_i32_1 = arith.constant 0 : i32
    return %c0_i32, %c0_i32_0 : i32, i32
  }
  func.func @transform_16(%arg0: i32) -> (i32, i32) {
    %c0_i32 = arith.constant 0 : i32
    %c0_i32_0 = arith.constant 0 : i32
    %c0_i32_1 = arith.constant 0 : i32
    return %c0_i32, %c0_i32_0 : i32, i32
  }
  func.func @transform_17(%arg0: i32) -> (i32, i32) {
    %c0_i32 = arith.constant 0 : i32
    %c0_i32_0 = arith.constant 0 : i32
    %c0_i32_1 = arith.constant 0 : i32
    return %c0_i32, %c0_i32_0 : i32, i32
  }
  func.func @transform_18(%arg0: i32) -> (i32, i32) {
    %c0_i32 = arith.constant 0 : i32
    %c0_i32_0 = arith.constant 0 : i32
    %c0_i32_1 = arith.constant 0 : i32
    return %c0_i32, %c0_i32_0 : i32, i32
  }
  func.func @transform_19(%arg0: i32) -> (i32, i32) {
    %c0_i32 = arith.constant 0 : i32
    %c0_i32_0 = arith.constant 0 : i32
    %c0_i32_1 = arith.constant 0 : i32
    return %c0_i32, %c0_i32_0 : i32, i32
  }
  func.func @transform_20(%arg0: i32) -> (i32, i32) {
    %c0_i32 = arith.constant 0 : i32
    %c0_i32_0 = arith.constant 0 : i32
    %c0_i32_1 = arith.constant 0 : i32
    return %c0_i32, %c0_i32_0 : i32, i32
  }
  func.func @transform_21(%arg0: i32) -> (i32, i32) {
    %c0_i32 = arith.constant 0 : i32
    %c0_i32_0 = arith.constant 0 : i32
    %c0_i32_1 = arith.constant 0 : i32
    return %c0_i32, %c0_i32_0 : i32, i32
  }
  func.func @transform_22(%arg0: i32) -> (i32, i32) {
    %c0_i32 = arith.constant 0 : i32
    %c0_i32_0 = arith.constant 0 : i32
    %c0_i32_1 = arith.constant 0 : i32
    return %c0_i32, %c0_i32_0 : i32, i32
  }
  func.func @transform_23(%arg0: i32) -> (i32, i32) {
    %c0_i32 = arith.constant 0 : i32
    %c0_i32_0 = arith.constant 0 : i32
    %c0_i32_1 = arith.constant 0 : i32
    return %c0_i32, %c0_i32_0 : i32, i32
  }
  func.func @transform_24(%arg0: i32) -> (i32, i32) {
    %c0_i32 = arith.constant 0 : i32
    %c0_i32_0 = arith.constant 0 : i32
    %c0_i32_1 = arith.constant 0 : i32
    return %c0_i32, %c0_i32_0 : i32, i32
  }
  func.func @transform_25(%arg0: i32) -> (i32, i32) {
    %c0_i32 = arith.constant 0 : i32
    %c0_i32_0 = arith.constant 0 : i32
    %c0_i32_1 = arith.constant 0 : i32
    return %c0_i32, %c0_i32_0 : i32, i32
  }
  func.func @transform_26(%arg0: i32) -> (i32, i32) {
    %c0_i32 = arith.constant 0 : i32
    %c0_i32_0 = arith.constant 0 : i32
    %c0_i32_1 = arith.constant 0 : i32
    return %c0_i32, %c0_i32_0 : i32, i32
  }
  func.func @transform_27(%arg0: i32) -> (i32, i32) {
    %c0_i32 = arith.constant 0 : i32
    %c0_i32_0 = arith.constant 0 : i32
    %c0_i32_1 = arith.constant 0 : i32
    return %c0_i32, %c0_i32_0 : i32, i32
  }
  func.func @transform_28(%arg0: i32) -> (i32, i32) {
    %c0_i32 = arith.constant 0 : i32
    %c0_i32_0 = arith.constant 0 : i32
    %c0_i32_1 = arith.constant 0 : i32
    return %c0_i32, %c0_i32_0 : i32, i32
  }
  func.func @transform_29(%arg0: i32) -> (i32, i32) {
    %c0_i32 = arith.constant 0 : i32
    %c0_i32_0 = arith.constant 0 : i32
    %c0_i32_1 = arith.constant 0 : i32
    return %c0_i32, %c0_i32_0 : i32, i32
  }
  func.func @transform_30(%arg0: i32) -> (i32, i32, i32) {
    %c0_i32 = arith.constant 0 : i32
    %c0_i32_0 = arith.constant 0 : i32
    %c0_i32_1 = arith.constant 0 : i32
    return %arg0, %c0_i32, %c0_i32_0 : i32, i32, i32
  }
  func.func @transform_31(%arg0: i32) -> (i32, i32, i32) {
    %c0_i32 = arith.constant 0 : i32
    %c0_i32_0 = arith.constant 0 : i32
    %c0_i32_1 = arith.constant 0 : i32
    return %arg0, %c0_i32, %c0_i32_0 : i32, i32, i32
  }
  func.func @transform_32(%arg0: i32) -> (i32, i32, i32) {
    %c0_i32 = arith.constant 0 : i32
    %c0_i32_0 = arith.constant 0 : i32
    %c0_i32_1 = arith.constant 0 : i32
    return %arg0, %c0_i32, %c0_i32_0 : i32, i32, i32
  }
  func.func @transform_33(%arg0: i32) -> (i32, i32, i32) {
    %c0_i32 = arith.constant 0 : i32
    %c0_i32_0 = arith.constant 0 : i32
    %c0_i32_1 = arith.constant 0 : i32
    return %arg0, %c0_i32, %c0_i32_0 : i32, i32, i32
  }
  func.func @transform_34(%arg0: i32) -> (i32, i32, i32) {
    %c0_i32 = arith.constant 0 : i32
    %c0_i32_0 = arith.constant 0 : i32
    %c0_i32_1 = arith.constant 0 : i32
    return %arg0, %c0_i32, %c0_i32_0 : i32, i32, i32
  }
  func.func @transform_35(%arg0: i32) -> (i32, i32, i32) {
    %c0_i32 = arith.constant 0 : i32
    %c0_i32_0 = arith.constant 0 : i32
    %c0_i32_1 = arith.constant 0 : i32
    return %arg0, %c0_i32, %c0_i32_0 : i32, i32, i32
  }
  func.func @transform_36(%arg0: i32) -> (i32, i32, i32) {
    %c0_i32 = arith.constant 0 : i32
    %c0_i32_0 = arith.constant 0 : i32
    %c0_i32_1 = arith.constant 0 : i32
    return %arg0, %c0_i32, %c0_i32_0 : i32, i32, i32
  }
  func.func @transform_37(%arg0: i32) -> (i32, i32, i32) {
    %c0_i32 = arith.constant 0 : i32
    %c0_i32_0 = arith.constant 0 : i32
    %c0_i32_1 = arith.constant 0 : i32
    return %arg0, %c0_i32, %c0_i32_0 : i32, i32, i32
  }
  func.func @transform_38(%arg0: i32) -> (i32, i32, i32) {
    %c0_i32 = arith.constant 0 : i32
    %c0_i32_0 = arith.constant 0 : i32
    %c0_i32_1 = arith.constant 0 : i32
    return %arg0, %c0_i32, %c0_i32_0 : i32, i32, i32
  }
  func.func @transform_39(%arg0: i32) -> (i32, i32, i32) {
    %c0_i32 = arith.constant 0 : i32
    %c0_i32_0 = arith.constant 0 : i32
    %c0_i32_1 = arith.constant 0 : i32
    return %arg0, %c0_i32, %c0_i32_0 : i32, i32, i32
  }
  func.func @transform_40(%arg0: i32) -> (i32, i32, i32) {
    %c0_i32 = arith.constant 0 : i32
    %c0_i32_0 = arith.constant 0 : i32
    %c0_i32_1 = arith.constant 0 : i32
    return %arg0, %c0_i32, %c0_i32_0 : i32, i32, i32
  }
  func.func @transform_41(%arg0: i32) -> (i32, i32, i32) {
    %c0_i32 = arith.constant 0 : i32
    %c0_i32_0 = arith.constant 0 : i32
    %c0_i32_1 = arith.constant 0 : i32
    return %arg0, %c0_i32, %c0_i32_0 : i32, i32, i32
  }
  func.func @transform_42(%arg0: i32) -> (i32, i32, i32) {
    %c0_i32 = arith.constant 0 : i32
    %c0_i32_0 = arith.constant 0 : i32
    %c0_i32_1 = arith.constant 0 : i32
    return %arg0, %c0_i32, %c0_i32_0 : i32, i32, i32
  }
}

</mosaic_0001>

<bundles_post_ra>
// kernel: vgg19limited_forward.1
= control target key start
LH: loop header
LB: loop body
LE: loop exit
PB: predicated region body
PF: predicated region fallthrough
CT: control target
= control target key end

     0   :  { %s15530_s6 = smov 1   ;;  %s15531_s10 = smov 2   ;;  %s20896_s0 = inlined_call_operand.smem [shape: u32[43], index: -1, kind: input, shape index: {}] }
   0x1   :  { %s15614_s5 = sld [smem:[%s20896_s0]]   ;;  %s15532_s14 = smov 3  }
   0x2   :  { %s15619_s9 = sld [smem:[%s20896_s0 + %s15530_s6]]   ;;  %s15533_s18 = smov 4  }
   0x3   :  { %s15624_s13 = sld [smem:[%s20896_s0 + %s15531_s10]]   ;;  %s15534_s22 = smov 5  }
   0x4   :  { %s15629_s17 = sld [smem:[%s20896_s0 + %s15532_s14]]   ;;  %s15535_s26 = smov 6  }
   0x5   :  { %s15634_s21 = sld [smem:[%s20896_s0 + %s15533_s18]]   ;;  %s15536_s30 = smov 7  }
   0x6   :  { %s15639_s25 = sld [smem:[%s20896_s0 + %s15534_s22]]   ;;  %s15537_s4 = smov 8  }
   0x7   :  { %21016 = sst [smem:[#allocation24_spill]] %s15614_s5  ;;  %s15538_s10 = smov 9  }
   0x8   :  { %21017 = sst [smem:[#allocation25_spill]] %s15619_s9  ;;  %s15539_s15 = smov 10  }
   0x9   :  { %21018 = sst [smem:[#allocation26_spill]] %s15624_s13  ;;  %s15540_s20 = smov 11  }
   0xa   :  { %21019 = sst [smem:[#allocation27_spill]] %s15629_s17  ;;  %s15542_s1 = smov 13  }
   0xb   :  { %21020 = sst [smem:[#allocation28_spill]] %s15634_s21  ;;  %s15543_s7 = smov 14  }
   0xc   :  { %21021 = sst [smem:[#allocation29_spill]] %s15639_s25  ;;  %s15545_s22 = smov 16  }
   0xd   :  { %s15644_s29 = sld [smem:[%s20896_s0 + %s15535_s26]]   ;;  %s15541_s26 = smov 12  }
   0xe   :  { %s15649_s3 = sld [smem:[%s20896_s0 + %s15536_s30]]   ;;  %s15546_s28 = smov 17  }
   0xf   :  { %s15654_s8 = sld [smem:[%s20896_s0 + %s15537_s4]]  }
  0x10   :  { %s15659_s14 = sld [smem:[%s20896_s0 + %s15538_s10]]  }
  0x11   :  { %s15664_s19 = sld [smem:[%s20896_s0 + %s15539_s15]]   ;;  %s15544_s15 = smov 15  }
  0x12   :  { %s15669_s24 = sld [smem:[%s20896_s0 + %s15540_s20]]  }
  0x13   :  { %s15674_s30 = sld [smem:[%s20896_s0 + %s15541_s26]]  }
  0x14   :  { %21022 = sst [smem:[#allocation30_spill]] %s15649_s3 }
  0x15   :  { %21023 = sst [smem:[#allocation31_spill]] %s15654_s8 }
  0x16   :  { %21024 = sst [smem:[#allocation32_spill]] %s15659_s14 }
  0x17   :  { %21025 = sst [smem:[#allocation33_spill]] %s15664_s19 }
  0x18   :  { %21026 = sst [smem:[#allocation34_spill]] %s15669_s24 }
  0x19   :  { %21027 = sst [smem:[#allocation35_spill]] %s15674_s30 }
  0x1a   :  { %s15679_s6 = sld [smem:[%s20896_s0 + %s15542_s1]]  }
  0x1b   :  { %s15684_s12 = sld [smem:[%s20896_s0 + %s15543_s7]]   ;;  %s15547_s7 = smov 18  }
  0x1c   :  { %s15689_s20 = sld [smem:[%s20896_s0 + %s15544_s15]]   ;;  %s15548_s15 = smov 19  }
  0x1d   :  { %s15694_s27 = sld [smem:[%s20896_s0 + %s15545_s22]]   ;;  %s15549_s22 = smov 20  }
  0x1e   :  { %s15699_s4 = sld [smem:[%s20896_s0 + %s15546_s28]]   ;;  %s15550_s28 = smov 21  }
  0x1f   :  { %s15719_s30 = sld [smem:[%s20896_s0 + %s15550_s28]]   ;;  %s15554_s28 = smov 25  }
  0x20   :  { %21028 = sst [smem:[#allocation36_spill]] %s15679_s6 }
  0x21   :  { %21029 = sst [smem:[#allocation37_spill]] %s15684_s12 }
  0x22   :  { %21030 = sst [smem:[#allocation38_spill]] %s15689_s20 }
  0x23   :  { %21031 = sst [smem:[#allocation39_spill]] %s15694_s27 }
  0x24   :  { %21032 = sst [smem:[#allocation40_spill]] %s15699_s4 }
  0x25   :  { %s15704_s12 = sld [smem:[%s20896_s0 + %s15547_s7]]   ;;  %s15551_s7 = smov 22  }
  0x26   :  { %s15709_s20 = sld [smem:[%s20896_s0 + %s15548_s15]]   ;;  %s15552_s15 = smov 23  }
  0x27   :  { %s15714_s6 = sld [smem:[%s20896_s0 + %s15549_s22]]   ;;  %s15553_s22 = smov 24  }
  0x28   :  { %21036 = sst [smem:[#allocation44_spill]] %s15719_s30 }
  0x29   :  { %s15724_s24 = sld [smem:[%s20896_s0 + %s15551_s7]]   ;;  %s15555_s7 = smov 26  }
  0x2a   :  { %s15729_s19 = sld [smem:[%s20896_s0 + %s15552_s15]]   ;;  %s15556_s15 = smov 27  }
  0x2b   :  { %21033 = sst [smem:[#allocation41_spill]] %s15704_s12 }
  0x2c   :  { %21034 = sst [smem:[#allocation42_spill]] %s15709_s20 }
  0x2d   :  { %21035 = sst [smem:[#allocation43_spill]] %s15714_s6 }
  0x2e   :  { %s15734_s14 = sld [smem:[%s20896_s0 + %s15553_s22]]   ;;  %s15557_s22 = smov 28  }
  0x2f   :  { %21037 = sst [smem:[#allocation45_spill]] %s15724_s24 }
  0x30   :  { %21038 = sst [smem:[#allocation46_spill]] %s15729_s19 }
  0x31   :  { %s15739_s30 = sld [smem:[%s20896_s0 + %s15554_s28]]   ;;  %s15558_s28 = smov 29  }
  0x32   :  { %s15744_s24 = sld [smem:[%s20896_s0 + %s15555_s7]]   ;;  %s15559_s7 = smov 30  }
  0x33   :  { %s15749_s19 = sld [smem:[%s20896_s0 + %s15556_s15]]   ;;  %s15560_s15 = smov 31  }
  0x34   :  { %21039 = sst [smem:[#allocation47_spill]] %s15734_s14 }
  0x35   :  { %s15754_s14 = sld [smem:[%s20896_s0 + %s15557_s22]]   ;;  %s15561_s22 = smov 32  }
  0x37   :  { %21040 = sst [smem:[#allocation48_spill]] %s15739_s30 }
  0x38   :  { %21041 = sst [smem:[#allocation49_spill]] %s15744_s24 }
  0x39   :  { %21042 = sst [smem:[#allocation50_spill]] %s15749_s19 }
  0x3a   :  { %s15759_s30 = sld [smem:[%s20896_s0 + %s15558_s28]]   ;;  %s15562_s28 = smov 33  }
  0x3b   :  { %21043 = sst [smem:[#allocation51_spill]] %s15754_s14 }
  0x3c   :  { %s15764_s24 = sld [smem:[%s20896_s0 + %s15559_s7]]   ;;  %s15563_s7 = smov 34  }
  0x3d   :  { %s15769_s19 = sld [smem:[%s20896_s0 + %s15560_s15]]   ;;  %s15564_s15 = smov 35  }
  0x3e   :  { %s15774_s14 = sld [smem:[%s20896_s0 + %s15561_s22]]   ;;  %s15565_s22 = smov 36  }
  0x3f   :  { %s15784_s8 = sld [smem:[%s20896_s0 + %s15563_s7]]   ;;  %s15567_s7 = smov 38  }
  0x40   :  { %21044 = sst [smem:[#allocation52_spill]] %s15759_s30 }
  0x41   :  { %s15779_s30 = sld [smem:[%s20896_s0 + %s15562_s28]]   ;;  %s15566_s28 = smov 37  }
  0x42   :  { %21045 = sst [smem:[#allocation53_spill]] %s15764_s24 }
  0x43   :  { %21046 = sst [smem:[#allocation54_spill]] %s15769_s19 }
  0x44   :  { %21047 = sst [smem:[#allocation55_spill]] %s15774_s14 }
  0x45   :  { %21049 = sst [smem:[#allocation57_spill]] %s15784_s8 }
  0x46   :  { %s15789_s6 = sld [smem:[%s20896_s0 + %s15564_s15]]   ;;  %s15568_s15 = smov 39  }
  0x47   :  { %21048 = sst [smem:[#allocation56_spill]] %s15779_s30 }
  0x48   :  { %s15794_s14 = sld [smem:[%s20896_s0 + %s15565_s22]]   ;;  %s15569_s22 = smov 40  }
  0x49   :  { %s15799_s30 = sld [smem:[%s20896_s0 + %s15566_s28]]   ;;  %s15570_s28 = smov 41  }
  0x4a   :  { %s15804_s8 = sld [smem:[%s20896_s0 + %s15567_s7]]   ;;  %s15571_s7 = smov 42  }
  0x4c   :  { %21050 = sst [smem:[#allocation58_spill]] %s15789_s6 }
  0x4d   :  { %s15809_s6 = sld [smem:[%s20896_s0 + %s15568_s15]]  }
  0x4e   :  { %21051 = sst [smem:[#allocation59_spill]] %s15794_s14 }
  0x4f   :  { %21052 = sst [smem:[#allocation60_spill]] %s15799_s30 }
  0x50   :  { %21053 = sst [smem:[#allocation61_spill]] %s15804_s8 }
  0x51   :  { %s15814_s14 = sld [smem:[%s20896_s0 + %s15569_s22]]  }
  0x52   :  { %s15819_s30 = sld [smem:[%s20896_s0 + %s15570_s28]]  }
  0x53   :  { %s15824_s8 = sld [smem:[%s20896_s0 + %s15571_s7]]  }
  0x57   :  { %21054 = sst [smem:[#allocation62_spill]] %s15814_s14 }
  0x58   :  { %91 = vsyncpa [#allocation3], 0 }
  0x59   :  { %93 = vsyncpa [#allocation3 + $0x1], 0 }
  0x5a   :  { %94 = vsyncpa [#allocation5], 0 }
  0x5b   :  { %96 = vsyncpa [#allocation5 + $0x1], 0 }
  0x5c   :  { %97 = vsyncpa [#allocation8], 0 }
  0x5d   :  { %99 = vsyncpa [#allocation8 + $0x1], 0 }
  0x5e   :  { %100 = vsyncpa [#allocation11], 0 }
  0x5f   :  { %102 = vsyncpa [#allocation11 + $0x1], 0 }
  0x60   :  { %103 = vsyncpa [#allocation14], 0 }
  0x61   :  { %105 = vsyncpa [#allocation14 + $0x1], 0 }
  0x62   :  { %106 = vsyncpa [#allocation17], 0 }
  0x63   :  { %108 = vsyncpa [#allocation17 + $0x1], 0  ;;  %s15826_s15 = smov 0   ;;  %s15828_s16 = smov 0  }
  0x64   :  { %s15830_s18 = smov 0   ;;  %s15832_s0 = smov 0  }
  0x65 LB: > { %s21055_s14 = sld [smem:[#allocation62_spill]]  ;;  %s21056_s27 = sld [smem:[#allocation39_spill]]  ;;  %s15516_s15 = sphi %s15826_s15, %s21437_s15   ;;  %s15528_s0 = sphi %s15832_s0, %s21434_s0   ;;  %s15524_s18 = sphi %s15830_s18, %s21436_s18   ;;  %s15520_s16 = sphi %s15828_s16, %s21438_s16  }
  0x66   : > { %s21057_s25 = sld [smem:[#allocation29_spill]]  ;;  %s21058_s21 = sld [smem:[#allocation28_spill]] }
  0x67   : > { %s21059_s17 = sld [smem:[#allocation27_spill]]  ;;  %s21060_s9 = sld [smem:[#allocation25_spill]] }
  0x68   : > { %s21061_s4 = sld [smem:[#allocation40_spill]]  ;;  %s21062_s3 = sld [smem:[#allocation30_spill]] }
  0x69   : > { %s21063_s13 = sld [smem:[#allocation26_spill]]  ;;  %21065 = sst [smem:[#allocation64_spill]] %s15524_s18 }
  0x6a   : > { %21064 = sst [smem:[#allocation63_spill]] %s15516_s15  ;;  %s15847_s22 = sadd.s32 4294967295, %s15528_s0  }
  0x6b   : > { %s20911_s23 = sadd.s32 4294967294, %s15528_s0   ;;  %s15851_s26 = sadd.s32 1, %s15528_s0  }
  0x6c   : > { %21066 = sst [smem:[#allocation65_spill]] %s15851_s26  ;;  %s808_s28 = sadd.s32 1, %s15524_s18 }
  0x6d   : > { %s805_s1 = ssub.s32 %s15528_s0, %s15851_s26  ;;  %p818_p0 = scmp.ne.s32.totalorder %s15524_s18, %s15520_s16 }
  0x6e   : > { %p806_p1 = scmp.eq.s32.totalorder %s805_s1, 0  ;;  %p819_p2 = scmp.eq.s32.totalorder %s15847_s22, 1 }
  0x6f   : > { %p824_p3 = scmp.ne.s32.totalorder %s15520_s16, %s15516_s15  ;;  %p825_p4 = scmp.eq.s32.totalorder %s20911_s23, 1 }
  0x70   : > { %s15864_s2 = scalar_select %p806_p1, %s15524_s18, %s808_s28  }
  0x71   : > { %p15866_p5 = por %p819_p2, %p818_p0  ;;  %p15870_p6 = por %p825_p4, %p824_p3 }
  0x72   : > { %21067 = sst [smem:[#allocation66_spill]] %s15864_s2  ;;  %p12221_p7 = scmp.ge.s32.totalorder %s15528_s0, 1 }
  0x73   : > { %s21069_s10 = scalar_select %p15870_p6, 1, 0 }
  0x74   : > { %p1198_p8 = scmp.lt.s32.totalorder %s15528_s0, 3 }
  0x75   : > { %21070 = sst [smem:[#allocation67_spill]] %s21069_s10 }
  0x76   : > { %p1199_p9 = pnand %p12221_p7, %p1198_p8 }
  0x78   : > { %1202 = sbr.rel (%p1199_p9) target bundleno = 5700 (0x1644), region = 140 }
  0x7f   : > { %s21071_s5 = sld [smem:[#allocation24_spill]]  ;;  %p1358_p10 = scmp.lt.s32.totalorder %s15847_s22, 1  ;;  %v15881_v0 = vld [vmem:[%s21060_s9] ss:$0 sm:$0xff]  ;;  %v15891_v1 = vld [vmem:[%s21060_s9 + $0x1] ss:$0 sm:$0xff] }
  0x80   : > { %vm1517_vm0 = vcmask 1040384   ;;  %vm1866_vm1 = vcmask 1046528   ;;  %s20914_s23 = smov 6   ;;  %v20934_v41 = vmov 0.0   ;;  %s20912_s2 = smov 9   ;;  %vm2232_vm2 = vcmask 1045504  }
  0x81   : > { %s15878_s11 = scalar_select %p1358_p10, %s15847_s22, 1  ;;  %v15947_v42 = vrot.slane %v20934_v41, 1  ;;  %vm20965_vm3 = vcmask 1044480   ;;  %vm2597_vm4 = vcmask 23552   ;;  %vm2630_vm5 = vcmask 48128  }
  0x82   : > { %s21078_s18 = smov 15   ;;  %s21080_s26 = smov 18   ;;  %vm2663_vm6 = vcmask 72704   ;;  %vm2696_vm7 = vcmask 97280   ;;  %vm2729_vm8 = vcmask 121856   ;;  %vm2762_vm9 = vcmask 146432  }
  0x83   : > { %s15884_s28 = sshll.u32 %s15878_s11, 8  ;;  %21072 = vst [vmem:[#allocation68_spill] sm:$0xff] %v15947_v42  ;;  %s21084_s10 = smov 21   ;;  %vm2795_vm10 = vcmask 171008   ;;  %vm20973_vm11 = vcmask 195584   ;;  %vm2899_vm12 = vcmask 220160  }
  0x84   : > { %s21088_s15 = smov 3   ;;  %vm3147_vm13 = vcmask 64512   ;;  %s21183_s24 = sld [smem:[#allocation53_spill]]  ;;  %vm4654_vm14 = vcmask 1043456   ;;  %vm20970_vm15 = vcmask 130048  }
  0x85   : > { %s15888_s1 = scalar_lea.vmem %s21071_s5, %s15884_s28  ;;  %s20926_s5 = smov 3  }
  0x86   : > { %v1381_v2 = vld [vmem:[%s15888_s1 + $0x10] sm:$0xff]  ;;  %v1382_v3 = vld [vmem:[%s15888_s1 + $0x18] sm:$0xff]  ;;  %v1379_v4 = vld [vmem:[%s15888_s1] sm:$0xff]  ;;  %s21211_s19 = sld [smem:[#allocation54_spill]]  ;;  %s21260_s12 = sld [smem:[#allocation41_spill]] }
  0x87   : > { %v1418_v5 = vmul.f32 %v15881_v0, %v1381_v2  ;;  %v1419_v6 = vmul.f32 %v15881_v0, %v1382_v3  ;;  %v1380_v7 = vld [vmem:[%s15888_s1 + $0x8] sm:$0xff]  ;;  %v1416_v8 = vmul.f32 %v15881_v0, %v1379_v4  ;;  %v1383_v9 = vld [vmem:[%s15888_s1 + $0x20] sm:$0xff]  ;;  %v1385_v55 = vld [vmem:[%s15888_s1 + $0x30] sm:$0xff]  ;;  %s21299_s20 = sld [smem:[#allocation42_spill]] }
  0x88   : > { %v1384_v10 = vld [vmem:[%s15888_s1 + $0x28] sm:$0xff]  ;;  %v1417_v11 = vmul.f32 %v15881_v0, %v1380_v7  ;;  %v1420_v12 = vmul.f32 %v15881_v0, %v1383_v9  ;;  %v1386_v56 = vld [vmem:[%s15888_s1 + $0x38] sm:$0xff]  ;;  %v1422_v4 = vmul.f32 %v15881_v0, %v1385_v55  ;;  %v1387_v9 = vld [vmem:[%s15888_s1 + $0x40] sm:$0xff] }
  0x89   : > { %v1421_v13 = vmul.f32 %v15881_v0, %v1384_v10  ;;  %v1455_v14 = vadd.f32 %v15891_v1, %v1418_v5  ;;  %v1456_v15 = vadd.f32 %v15891_v1, %v1419_v6  ;;  %v1453_v16 = vadd.f32 %v15891_v1, %v1416_v8 }
  0x8a   : > { %v1454_v17 = vadd.f32 %v15891_v1, %v1417_v11  ;;  %v1457_v18 = vadd.f32 %v15891_v1, %v1420_v12  ;;  %v15984_v5 = vrot.slane %v20934_v41, 2  ;;  %v1423_v6 = vmul.f32 %v15881_v0, %v1386_v56 }
  0x8b   : > { %v1458_v19 = vadd.f32 %v15891_v1, %v1421_v13  ;;  %v1521_v20 = vrot.slane %v1455_v14, 7  ;;  %v1522_v21 = vrot.slane %v1456_v15, 7  ;;  %v1518_v22 = vrot.slane %v1453_v16, 7  ;;  %v1388_v14 = vld [vmem:[%s15888_s1 + $0x48] sm:$0xff]  ;;  %v14908_v16 = vld [vmem:[%s21063_s13] sm:$0xff]  }
  0x8c   : > { %v1519_v23 = vrot.slane %v1454_v17, 7  ;;  %v1524_v24 = vrot.slane %v1457_v18, 7  ;;  %21073 = vst [vmem:[#allocation69_spill] sm:$0xff] %v15984_v5  ;;  %v1459_v13 = vadd.f32 %v15891_v1, %v1422_v4  ;;  %v1460_v15 = vadd.f32 %v15891_v1, %v1423_v6  ;;  %13053 = vmatprep.subr.bf16.mxu0 %v14908_v16 }
  0x8d   : > { %v1525_v25 = vrot.slane %v1458_v19, 7  ;;  %v15912_v26 = vsel %vm1517_vm0, %v1521_v20, %v1522_v21  ;;  %v15915_v27 = vsel %vm1517_vm0, 0.0, %v1521_v20  ;;  %v15918_v28 = vsel %vm1517_vm0, 0.0, %v1518_v22  ;;  %13054 = vmatpush3.bf16.msra.mxu0 %v14908_v16 }
  0x8e   : > { %v15921_v29 = vsel %vm1517_vm0, %v1522_v21, 0.0  ;;  %v13403_v30 = vpack.i.bf16 %v15912_v26, %v15915_v27  ;;  %v15926_v31 = vsel %vm1517_vm0, %v1518_v22, %v1519_v23  ;;  %v15932_v33 = vsel %vm1517_vm0, 0.0, %v1524_v24 }
  0x8f   : > { %v15929_v32 = vsel %vm1517_vm0, %v1524_v24, %v1525_v25  ;;  %v13393_v34 = vpack.i.bf16 %v15926_v31, %v15918_v28  ;;  %v1629_v36 = vsel %vm1517_vm0, %v1519_v23, 0.0  ;;  %v1870_v37 = vrot.slane %v15926_v31, 1 }
  0x90   : > { %v15938_v35 = vpack.i.bf16 %v15929_v32, %v15932_v33  ;;  %13404 = vrot.lane.b32.xlu1 %v13403_v30, %s20914_s23  ;;  %v1872_v38 = vrot.slane %v1629_v36, 1  ;;  %v1874_v39 = vrot.slane %v15915_v27, 1  ;;  %v1875_v40 = vrot.slane %v15912_v26, 1 }
  0x91   : > { %13394 = vrot.lane.b32.xlu0 %v13393_v34, %s20926_s5  ;;  %v1869_v43 = vrot.slane %v15918_v28, 1  ;;  %v1877_v44 = vrot.slane %v15921_v29, 1  ;;  %v15954_v47 = vsel %vm1517_vm0, %v1525_v25, 0.0  ;;  %v1879_v49 = vrot.slane %v15932_v33, 1 }
  0x92   : > { %v1873_v45 = vsel %vm1866_vm1, %v1870_v37, %v1872_v38  ;;  %v1876_v46 = vsel %vm1866_vm1, %v1874_v39, %v1875_v40  ;;  %v1880_v53 = vrot.slane %v15929_v32, 1  ;;  %v1882_v54 = vrot.slane %v15954_v47, 1 }
  0x93   : > { %v1871_v48 = vsel %vm1866_vm1, %v1869_v43, %v1870_v37  ;;  %v13418_v50 = vpack.i.bf16 %v1876_v46, %v1873_v45  ;;  %v15963_v52 = vsel %vm1866_vm1, %v1875_v40, %v1877_v44  ;;  %v2236_v57 = vrot.slane %v15926_v31, 2 }
  0x94   : > { %13409 = vrot.lane.b32.xlu1 %v15938_v35, %s20914_s23  ;;  %v13413_v51 = vpack.i.bf16 %v1871_v48, %v15947_v42  ;;  %v2238_v58 = vrot.slane %v1629_v36, 2  ;;  %v13428_v59 = vpack.i.bf16 %v15963_v52, %v1876_v46  ;;  %v2240_v60 = vrot.slane %v15915_v27, 2  ;;  %s20918_s23 = smov 15  }
  0x95   : > { %13399 = vrot.lane.b32.xlu0 %v13403_v30, %s20926_s5  ;;  %v2241_v61 = vrot.slane %v15912_v26, 2  ;;  %v13423_v62 = vpack.i.bf16 %v1873_v45, %v1871_v48  ;;  %v15976_v63 = vsel %vm1866_vm1, %v1879_v49, %v1880_v53  ;;  %v15979_v2 = vsel %vm1866_vm1, %v1880_v53, %v1882_v54 }
  0x96   : > { %v2235_v3 = vrot.slane %v15918_v28, 2  ;;  %v15990_v7 = vpack.i.bf16 %v15979_v2, %v15976_v63  ;;  %v2243_v8 = vrot.slane %v15921_v29, 2  ;;  %v2239_v10 = vsel %vm2232_vm2, %v2236_v57, %v2238_v58  ;;  %v1390_v58 = vld [vmem:[%s15888_s1 + $0x58] sm:$0xff] }
  0x97   : > { %v2242_v11 = vsel %vm2232_vm2, %v2240_v60, %v2241_v61  ;;  %v1424_v20 = vmul.f32 %v15881_v0, %v1387_v9  ;;  %v1425_v21 = vmul.f32 %v15881_v0, %v1388_v14  ;;  %v1527_v22 = vrot.slane %v1459_v13, 7 }
  0x98   : > { %13419 = vrot.lane.b32.xlu1 %v13418_v50, %s20912_s2  ;;  %v2237_v12 = vsel %vm2232_vm2, %v2235_v3, %v2236_v57  ;;  %v13448_v17 = vpack.i.bf16 %v2242_v11, %v2239_v10  ;;  %v16005_v18 = vsel %vm2232_vm2, %v2241_v61, %v2243_v8  ;;  %v1528_v23 = vrot.slane %v1460_v15, 7  ;;  %v1389_v57 = vld [vmem:[%s15888_s1 + $0x50] sm:$0xff]  ;;  %v1391_v3 = vld [vmem:[%s15888_s1 + $0x60] sm:$0xff]  ;;  %v1392_v8 = vld [vmem:[%s15888_s1 + $0x68] sm:$0xff] }
  0x99   : > { %13414 = vrot.lane.b32.xlu0 %v13413_v51, %s20912_s2  ;;  %s20916_s2 = smov 12   ;;  %v13443_v19 = vpack.i.bf16 %v2237_v12, %v15984_v5  ;;  %v2245_v24 = vrot.slane %v15932_v33, 2  ;;  %v13458_v25 = vpack.i.bf16 %v16005_v18, %v2242_v11  ;;  %v13453_v29 = vpack.i.bf16 %v2239_v10, %v2237_v12  ;;  %v1393_v15 = vld [vmem:[%s15888_s1 + $0x70] sm:$0xff] }
  0x9a   : > { %v1461_v30 = vadd.f32 %v15891_v1, %v1424_v20  ;;  %v1462_v34 = vadd.f32 %v15891_v1, %v1425_v21  ;;  %v2246_v36 = vrot.slane %v15929_v32, 2  ;;  %v2248_v37 = vrot.slane %v15954_v47, 2  ;;  %v1394_v20 = vld [vmem:[%s15888_s1 + $0x78] sm:$0xff] }
  0x9b   : > { %v16020_v38 = vsel %vm1517_vm0, 0.0, %v1527_v22  ;;  %v16025_v39 = vsel %vm1517_vm0, %v1527_v22, %v1528_v23  ;;  %v1632_v51 = vsel %vm1517_vm0, %v1528_v23, 0.0  ;;  %v13493_v4 = vpack.i.bf16 %v15976_v63, %v15963_v52  ;;  %v1395_v23 = vld [vmem:[%s15888_s1 + $0x80] sm:$0xff] }
  0x9c   : > { %13429 = vrot.lane.b32.xlu1 %v13428_v59, %s20916_s2  ;;  %21074 = vst [vmem:[#allocation70_spill] sm:$0xff] %v16025_v39  ;;  %v1530_v40 = vrot.slane %v1461_v30, 7  ;;  %v1531_v43 = vrot.slane %v1462_v34, 7  ;;  %v16028_v44 = vsel %vm2232_vm2, %v2245_v24, %v2246_v36  ;;  %v16031_v45 = vsel %vm2232_vm2, %v2246_v36, %v2248_v37  ;;  %v1396_v34 = vld [vmem:[%s15888_s1 + $0x88] sm:$0xff] }
  0x9d   : > { %13424 = vrot.lane.b32.xlu0 %v13423_v62, %s20916_s2  ;;  %s20922_s2 = smov 18   ;;  %v13478_v46 = vpack.i.bf16 %v16025_v39, %v16020_v38  ;;  %v1884_v47 = vrot.slane %v16020_v38, 1  ;;  %v1885_v48 = vrot.slane %v16025_v39, 1  ;;  %v16042_v49 = vpack.i.bf16 %v16031_v45, %v16028_v44 }
  0x9e   : > { %v16045_v50 = vsel %vm1517_vm0, %v1530_v40, %v1531_v43  ;;  %v1887_v54 = vrot.slane %v1632_v51, 1  ;;  %v1633_v55 = vsel %vm1517_vm0, %v1531_v43, 0.0  ;;  %v1426_v9 = vmul.f32 %v15881_v0, %v1389_v57 }
  0x9f   : > { %v1886_v56 = vsel %vm1866_vm1, %v1884_v47, %v1885_v48  ;;  %v1890_v61 = vrot.slane %v16045_v50, 1  ;;  %v1892_v62 = vrot.slane %v1633_v55, 1  ;;  %v2250_v11 = vrot.slane %v16020_v38, 2 }
  0xa0   : > { %13439 = vrot.lane.b32.xlu1 %v15990_v7, %s20918_s23  ;;  %v16072_v6 = vsel %vm1866_vm1, %v1885_v48, %v1887_v54  ;;  %v2251_v12 = vrot.slane %v16025_v39, 2  ;;  %v1428_v13 = vmul.f32 %v15881_v0, %v1391_v3  ;;  %v1429_v14 = vmul.f32 %v15881_v0, %v1392_v8 }
  0xa1   : > { %13434 = vrot.lane.b32.xlu0 %v13428_v59, %s20918_s23  ;;  %s20920_s23 = smov 21   ;;  %v13498_v59 = vpack.i.bf16 %v1886_v56, %v15979_v2  ;;  %v1427_v2 = vmul.f32 %v15881_v0, %v1390_v58  ;;  %v13508_v10 = vpack.i.bf16 %v16072_v6, %v1886_v56  ;;  %v16086_v63 = vsel %vm1866_vm1, %v1890_v61, %v1892_v62 }
  0xa2   : > { %v2253_v16 = vrot.slane %v1632_v51, 2  ;;  %v2252_v22 = vsel %vm2232_vm2, %v2250_v11, %v2251_v12  ;;  %v1430_v30 = vmul.f32 %v15881_v0, %v1393_v15  ;;  %v2256_v36 = vrot.slane %v16045_v50, 2 }
  0xa3   : > { %v2258_v37 = vrot.slane %v1633_v55, 2  ;;  %v13528_v48 = vpack.i.bf16 %v2252_v22, %v16031_v45  ;;  %v13523_v51 = vpack.i.bf16 %v16028_v44, %v16005_v18  ;;  %v1433_v57 = vmul.f32 %v15881_v0, %v1396_v34 }
  0xa4   : > { %13449 = vrot.lane.b32.xlu1 %v13448_v17, %s20922_s2  ;;  %v1463_v17 = vadd.f32 %v15891_v1, %v1426_v9  ;;  %v16111_v43 = vsel %vm2232_vm2, %v2251_v12, %v2253_v16  ;;  %v1467_v56 = vadd.f32 %v15891_v1, %v1430_v30  ;;  %v1400_v30 = vld [vmem:[%s15888_s1 + $0xa8] sm:$0xff] }
  0xa5   : > { %13444 = vrot.lane.b32.xlu0 %v13443_v19, %s20922_s2  ;;  %s21075_s2 = smov 6   ;;  %v1464_v19 = vadd.f32 %v15891_v1, %v1427_v2  ;;  %v13538_v58 = vpack.i.bf16 %v16111_v43, %v2252_v22  ;;  %v1470_v2 = vadd.f32 %v15891_v1, %v1433_v57 }
  0xa6   : > { %v1539_v9 = vrot.slane %v1467_v56, 7 }
  0xa7   : > { %v1534_v47 = vrot.slane %v1464_v19, 7 }
  0xa8   : > { %13459 = vrot.lane.b32.xlu1 %v13458_v25, %s20920_s23  ;;  %v16173_v34 = vsel %vm1517_vm0, 0.0, %v1539_v9 }
  0xa9   : > { %13454 = vrot.lane.b32.xlu0 %v13453_v29, %s20920_s23  ;;  %s20924_s23 = smov 24   ;;  %v1466_v29 = vadd.f32 %v15891_v1, %v1429_v14  ;;  %v16137_v62 = vsel %vm1517_vm0, %v1534_v47, 0.0  ;;  %21085 = vst [vmem:[#allocation75_spill] sm:$0xff] %v16173_v34 }
  0xaa   : > { %v1897_v16 = vrot.slane %v16137_v62, 1 }
  0xab   : > { %v1537_v55 = vrot.slane %v1466_v29, 7  ;;  %v1399_v29 = vld [vmem:[%s15888_s1 + $0xa0] sm:$0xff] }
  0xac   : > { %13469 = vrot.lane.b32.xlu1 %v15938_v35, %s20926_s5  ;;  %v16048_v35 = vsel %vm1517_vm0, 0.0, %v1530_v40  ;;  %v1431_v40 = vmul.f32 %v15881_v0, %v1394_v20  ;;  %v1398_v20 = vld [vmem:[%s15888_s1 + $0x98] sm:$0xff] }
  0xad   : > { %13464 = vrot.lane.b32.xlu0 %v13458_v25, %s20924_s23  ;;  %v16054_v53 = vpack.i.bf16 %v16045_v50, %v16048_v35  ;;  %v1889_v60 = vrot.slane %v16048_v35, 1  ;;  %v2255_v24 = vrot.slane %v16048_v35, 2  ;;  %v1465_v25 = vadd.f32 %v15891_v1, %v1428_v13 }
  0xae   : > { %v1468_v45 = vadd.f32 %v15891_v1, %v1431_v40  ;;  %v16146_v8 = vsel %vm1517_vm0, %v1537_v55, 0.0  ;;  %v1543_v40 = vrot.slane %v1470_v2, 7  ;;  %v1437_v2 = vmul.f32 %v15881_v0, %v1400_v30 }
  0xaf   : > { %v16083_v52 = vsel %vm1866_vm1, %v1889_v60, %v1890_v61  ;;  %v1536_v54 = vrot.slane %v1465_v25, 7  ;;  %v16127_v60 = vsel %vm2232_vm2, %v2256_v36, %v2258_v37  ;;  %v2263_v25 = vrot.slane %v16137_v62, 2 }
  0xb0   : > { %13479 = vrot.lane.b32.xlu1 %v13478_v46, %s20926_s5  ;;  %s21077_s5 = smov 12   ;;  %v16097_v21 = vpack.i.bf16 %v16086_v63, %v16083_v52  ;;  %v1540_v14 = vrot.slane %v1468_v45, 7  ;;  %v16196_v57 = vsel %vm1517_vm0, %v1543_v40, 0.0  ;;  %v1435_v45 = vmul.f32 %v15881_v0, %v1398_v20 }
  0xb1   : > { %13474 = vrot.lane.b32.xlu0 %v16042_v49, %s20924_s23  ;;  %s21076_s23 = smov 9   ;;  %v16154_v12 = vsel %vm1517_vm0, %v1536_v54, %v1537_v55  ;;  %v16157_v13 = vsel %vm1517_vm0, 0.0, %v1536_v54  ;;  %v1401_v55 = vld [vmem:[%s15888_s1 + $0xb0] sm:$0xff] }
  0xb2   : > { %21082 = vst [vmem:[#allocation73_spill] sm:$0xff] %v16154_v12  ;;  %21083 = vst [vmem:[#allocation74_spill] sm:$0xff] %v16157_v13  ;;  %v1900_v22 = vrot.slane %v16154_v12, 1  ;;  %v2266_v37 = vrot.slane %v16154_v12, 2 }
  0xb4   : > { %13489 = vrot.lane.b32.xlu1 %v16054_v53, %s21075_s2 }
  0xb5   : > { %13484 = vrot.lane.b32.xlu0 %v13478_v46, %s21075_s2  ;;  %v1533_v46 = vrot.slane %v1463_v17, 7  ;;  %v1899_v17 = vrot.slane %v16157_v13, 1 }
  0xb7   : > { %v16131_v18 = vsel %vm1517_vm0, 0.0, %v1533_v46  ;;  %v16151_v11 = vsel %vm1517_vm0, %v1533_v46, %v1534_v47  ;;  %v14909_v46 = vld [vmem:[%s21063_s13 + $0x8] sm:$0x3f]   ;;  %v16179_v47 = vsel %vm1517_vm0, %v1539_v9, %v1540_v14  ;;  %s21089_s13 = smov 24   ;;  %v1436_v9 = vmul.f32 %v15881_v0, %v1399_v29 }
  0xb8   : > { %13499 = vrot.lane.b32.xlu1 %v13498_v59, %s21076_s23  ;;  %v16124_v59 = vsel %vm2232_vm2, %v2255_v24, %v2256_v36  ;;  %21079 = vst [vmem:[#allocation71_spill] sm:$0xff] %v16131_v18  ;;  %v1894_v61 = vrot.slane %v16131_v18, 1  ;;  %v2260_v3 = vrot.slane %v16131_v18, 2  ;;  %21081 = vst [vmem:[#allocation72_spill] sm:$0xff] %v16151_v11  ;;  %v1895_v15 = vrot.slane %v16151_v11, 1 }
  0xb9   : > { %13494 = vrot.lane.b32.xlu0 %v13493_v4, %s21076_s23  ;;  %v16143_v4 = vpack.i.bf16 %v16127_v60, %v16124_v59  ;;  %v2261_v24 = vrot.slane %v16151_v11, 2  ;;  %v2265_v36 = vrot.slane %v16157_v13, 2  ;;  %21086 = vst [vmem:[#allocation76_spill] sm:$0xff] %v16179_v47  ;;  %v13558_v56 = vpack.i.bf16 %v16151_v11, %v16131_v18 }
  0xba   : > { %v1896_v30 = vsel %vm1866_vm1, %v1894_v61, %v1895_v15 }
  0xbc   : > { %13509 = vrot.lane.b32.xlu1 %v13508_v10, %s21077_s5 }
  0xbd   : > { %13504 = vrot.lane.b32.xlu0 %v15990_v7, %s21077_s5  ;;  %v1432_v7 = vmul.f32 %v15881_v0, %v1395_v23  ;;  %v1902_v23 = vrot.slane %v16146_v8, 1 }
  0xbf   : > { %v1469_v44 = vadd.f32 %v15891_v1, %v1432_v7  ;;  %v16182_v7 = vsel %vm1517_vm0, %v1540_v14, 0.0 }
  0xc0   : > { %13519 = vrot.lane.b32.xlu1 %v16097_v21, %s21078_s18 }
  0xc1   : > { %13514 = vrot.lane.b32.xlu0 %v13508_v10, %s21078_s18  ;;  %v1397_v10 = vld [vmem:[%s15888_s1 + $0x90] sm:$0xff]  ;;  %v1542_v19 = vrot.slane %v1469_v44, 7  ;;  %v16228_v44 = vsel %vm1866_vm1, %v1895_v15, %v1897_v16  ;;  %v1438_v15 = vmul.f32 %v15881_v0, %v1401_v55 }
  0xc2   : > { %v13588_v16 = vpack.i.bf16 %v16228_v44, %v1896_v30 }
  0xc3   : > { %v16205_v14 = vsel %vm1517_vm0, %v1542_v19, %v1543_v40  ;;  %v1472_v40 = vadd.f32 %v15891_v1, %v1435_v45  ;;  %v1402_v45 = vld [vmem:[%s15888_s1 + $0xb8] sm:$0xff] }
  0xc4   : > { %13529 = vrot.lane.b32.xlu1 %v13528_v48, %s21080_s26  ;;  %v1434_v48 = vmul.f32 %v15881_v0, %v1397_v10  ;;  %v15581_v10 = vmov 65535   ;;  %21090 = vst [vmem:[#allocation78_spill] sm:$0xff] %v16205_v14 }
  0xc5   : > { %13524 = vrot.lane.b32.xlu0 %v13523_v51, %s21080_s26  ;;  %v16187_v51 = vsel %vm1517_vm0, 0.0, %v1542_v19  ;;  %v16216_v19 = vpack.i.bf16 %v16154_v12, %v16157_v13 }
  0xc6   : > { %21087 = vst [vmem:[#allocation77_spill] sm:$0xff] %v16187_v51  ;;  %v1471_v54 = vadd.f32 %v15891_v1, %v1434_v48  ;;  %v1404_v48 = vld [vmem:[%s15888_s1 + $0xc8] sm:$0xff] }
  0xc8   : > { %13539 = vrot.lane.b32.xlu1 %v13538_v58, %s21084_s10  ;;  %v1545_v41 = vrot.slane %v1471_v54, 7 }
  0xc9   : > { %13534 = vrot.lane.b32.xlu0 %v16042_v49, %s21084_s10 }
  0xca   : > { %v16257_v55 = vsel %vm1517_vm0, 0.0, %v1545_v41 }
  0xcb   : > { %21091 = vst [vmem:[#allocation79_spill] sm:$0xff] %v16257_v55 }
  0xcc   : > { %13549 = vrot.lane.b32.xlu1 %v16054_v53, %s21088_s15  ;;  %v2949_v53 = vsel %vm20965_vm3, 4294967295, %v15581_v10  ;;  %v1473_v10 = vadd.f32 %v15891_v1, %v1436_v9  ;;  %v13578_v9 = vpack.i.bf16 %v1896_v30, %v16086_v63  ;;  %v16254_v63 = vsel %vm1866_vm1, %v1900_v22, %v1902_v23 }
  0xcd   : > { %13544 = vrot.lane.b32.xlu0 %v13538_v58, %s21089_s13  ;;  %v2950_v20 = vsel %vm2232_vm2, %v2949_v53, 0  ;;  %v1474_v53 = vadd.f32 %v15891_v1, %v1437_v2  ;;  %v13573_v58 = vpack.i.bf16 %v16083_v52, %v16072_v6  ;;  %v1546_v2 = vrot.slane %v1472_v40, 7 }
  0xce   : > { %v2952_v29 = vand.u32 %v14909_v46, %v2950_v20  ;;  %v1403_v20 = vld [vmem:[%s15888_s1 + $0xc0] sm:$0xff]  ;;  %v16247_v6 = vsel %vm1866_vm1, %v1899_v17, %v1900_v22  ;;  %v1548_v52 = vrot.slane %v1473_v10, 7  ;;  %v1439_v10 = vmul.f32 %v15881_v0, %v1402_v45  ;;  %v1405_v46 = vld [vmem:[%s15888_s1 + $0xd0] sm:$0xff] }
  0xcf   : > { %v1549_v54 = vrot.slane %v1474_v53, 7  ;;  %v16269_v22 = vsel %vm1517_vm0, %v1545_v41, %v1546_v2  ;;  %v1475_v53 = vadd.f32 %v15891_v1, %v1438_v15  ;;  %v16289_v40 = vpack.i.bf16 %v16254_v63, %v16247_v6 }
  0xd0   : > { %13559 = vrot.lane.b32.xlu1 %v13558_v56, %s21088_s15  ;;  %13055 = vmatprep.subr.bf16.mxu0 %v2952_v29  ;;  %21092 = vst [vmem:[#allocation80_spill] sm:$0xff] %v16269_v22  ;;  %v16282_v45 = vsel %vm1517_vm0, 0.0, %v1548_v52  ;;  %v1442_v17 = vmul.f32 %v15881_v0, %v1405_v46  ;;  %v16319_v46 = vsel %vm2232_vm2, %v2261_v24, %v2263_v25  ;;  %vm20971_vm3 = vcmask 1043459  }
  0xd1   : > { %13554 = vrot.lane.b32.xlu0 %v16143_v4, %s21089_s13  ;;  %13056 = vmatpush3.bf16.msra.mxu0 %v2952_v29  ;;  %v1440_v29 = vmul.f32 %v15881_v0, %v1403_v20  ;;  %v16272_v23 = vsel %vm1517_vm0, %v1549_v54, 0.0  ;;  %v1441_v20 = vmul.f32 %v15881_v0, %v1404_v48  ;;  %v16279_v30 = vsel %vm1517_vm0, %v1548_v52, %v1549_v54 }
  0xd2   : > { %v2262_v52 = vsel %vm2232_vm2, %v2260_v3, %v2261_v24  ;;  %v13603_v24 = vpack.i.bf16 %v16124_v59, %v16111_v43 }
  0xd3   : > { %v1477_v15 = vadd.f32 %v15891_v1, %v1440_v29  ;;  %v1478_v29 = vadd.f32 %v15891_v1, %v1441_v20  ;;  %v13608_v48 = vpack.i.bf16 %v2262_v52, %v16127_v60  ;;  %v1408_v20 = vld [vmem:[%s15888_s1 + $0xe8] sm:$0xff]  ;;  %v1479_v60 = vadd.f32 %v15891_v1, %v1442_v17 }
  0xd4   : > { %13569 = vrot.lane.b32.xlu1 %v16216_v19, %s21075_s2 }
  0xd5   : > { %13564 = vrot.lane.b32.xlu0 %v13558_v56, %s21075_s2  ;;  %v16260_v56 = vsel %vm1517_vm0, %v1546_v2, 0.0  ;;  %v1406_v2 = vld [vmem:[%s15888_s1 + $0xd8] sm:$0xff]  ;;  %v1554_v49 = vrot.slane %v1477_v15, 7  ;;  %v1557_v59 = vrot.slane %v1479_v60, 7 }
  0xd6   : > { %v1443_v41 = vmul.f32 %v15881_v0, %v1406_v2  ;;  %v1555_v2 = vrot.slane %v1478_v29, 7  ;;  %v15190_v29 = vld [vmem:[%s21060_s9] ss:$0 sm:$0xff] }
  0xd7   : > { %v16338_v15 = vsel %vm1517_vm0, 0.0, %v1554_v49  ;;  %v1445_v25 = vmul.f32 %v15190_v29, %v1408_v20  ;;  %v13638_v20 = vpack.i.bf16 %v16179_v47, %v16173_v34 }
  0xd8   : > { %13579 = vrot.lane.b32.xlu1 %v13578_v9, %s21076_s23  ;;  %v1476_v9 = vadd.f32 %v15891_v1, %v1439_v10  ;;  %v1407_v10 = vld [vmem:[%s15888_s1 + $0xe0] sm:$0xff]  ;;  %v1480_v62 = vadd.f32 %v15891_v1, %v1443_v41  ;;  %v13618_v1 = vpack.i.bf16 %v16319_v46, %v2262_v52  ;;  %v16350_v43 = vsel %vm1517_vm0, %v1554_v49, %v1555_v2 }
  0xd9   : > { %13574 = vrot.lane.b32.xlu0 %v13573_v58, %s21076_s23  ;;  %v1551_v58 = vrot.slane %v1475_v53, 7  ;;  %v16341_v53 = vsel %vm1517_vm0, %v1555_v2, 0.0  ;;  %v1444_v17 = vmul.f32 %v15190_v29, %v1407_v10  ;;  %v21093_v2 = vrot.slane %v16146_v8, 2  ;;  %v1410_v10 = vld [vmem:[%s15888_s1 + $0xf8] sm:$0xff] }
  0xda   : > { %v1558_v41 = vrot.slane %v1480_v62, 7  ;;  %v2267_v62 = vsel %vm2232_vm2, %v2265_v36, %v2266_v37  ;;  %v21095_v36 = vrot.slane %v16173_v34, 1 }
  0xdb   : > { %v16326_v0 = vsel %vm1517_vm0, 0.0, %v1551_v58 }
  0xdc   : > { %13589 = vrot.lane.b32.xlu1 %v13588_v16, %s21077_s5 }
  0xdd   : > { %13584 = vrot.lane.b32.xlu0 %v16097_v21, %s21077_s5  ;;  %v1552_v21 = vrot.slane %v1476_v9, 7 }
  0xdf   : > { %v16335_v9 = vsel %vm1517_vm0, %v1552_v21, 0.0 }
  0xe0   : > { %13599 = vrot.lane.b32.xlu1 %v16289_v40, %s21078_s18 }
  0xe1   : > { %13594 = vrot.lane.b32.xlu0 %v13588_v16, %s21078_s18  ;;  %v16346_v16 = vsel %vm1517_vm0, %v1551_v58, %v1552_v21  ;;  %v15191_v21 = vld [vmem:[%s21060_s9 + $0x1] ss:$0 sm:$0xff]  ;;  %v16369_v58 = vsel %vm1517_vm0, 0.0, %v1557_v59  ;;  %s21002_s9 = sshll.u32 %s15847_s22, 10 }
  0xe2   : > { %v1481_v49 = vadd.f32 %v15191_v21, %v1444_v17  ;;  %v16387_v17 = vsel %vm1517_vm0, %v1558_v41, 0.0 }
  0xe4   : > { %13609 = vrot.lane.b32.xlu1 %v13608_v48, %s21080_s26  ;;  %v1482_v48 = vadd.f32 %v15191_v21, %v1445_v25  ;;  %v1560_v25 = vrot.slane %v1481_v49, 7 }
  0xe5   : > { %13604 = vrot.lane.b32.xlu0 %v13603_v24, %s21080_s26  ;;  %v16366_v24 = vsel %vm1517_vm0, %v1557_v59, %v1558_v41  ;;  %v2269_v59 = vsel %vm2232_vm2, %v2266_v37, %v21093_v2 }
  0xe6   : > { %v1561_v60 = vrot.slane %v1482_v48, 7  ;;  %v13633_v8 = vpack.i.bf16 %v2269_v59, %v2267_v62  ;;  %v16399_v49 = vsel %vm1517_vm0, 0.0, %v1560_v25  ;;  %v1447_v48 = vmul.f32 %v15190_v29, %v1410_v10 }
  0xe8   : > { %13619 = vrot.lane.b32.xlu1 %v13618_v1, %s21084_s10  ;;  %v16412_v52 = vsel %vm1517_vm0, %v1561_v60, 0.0  ;;  %v16426_v3 = vadd.f32 %v15191_v21, %v1447_v48 }
  0xe9   : > { %13614 = vrot.lane.b32.xlu0 %v16143_v4, %s21084_s10  ;;  %v1409_v4 = vld [vmem:[%s15888_s1 + $0xf0] sm:$0xff]  ;;  %s15588_s1 = smov 48  }
  0xea   : > { %v1446_v2 = vmul.f32 %v15190_v29, %v1409_v4  ;;  %v21096_v4 = vrot.slane %v16182_v7, 1  ;;  %21099 = vst [vmem:[#allocation82_spill] sm:$0xff] %v16426_v3 }
  0xec   : > { %13629 = vrot.lane.b32.xlu1 %v16216_v19, %s21088_s15  ;;  %v13648_v19 = vpack.i.bf16 %v16205_v14, %v16187_v51  ;;  %v16424_v54 = vadd.f32 %v15191_v21, %v1446_v2 }
  0xed   : > { %13624 = vrot.lane.b32.xlu0 %v13618_v1, %s21089_s13  ;;  %v21094_v1 = vrot.slane %v16179_v47, 1 }
  0xee   : > { %21098 = vst [vmem:[#allocation81_spill] sm:$0xff] %v16424_v54  ;;  %v20938_v21 = vrot.slane %v16424_v54, 7 }
  0xef   : > { %v1906_v37 = vsel %vm1866_vm1, %v21095_v36, %v21094_v1  ;;  %v21097_v29 = vmov %v21094_v1  ;;  %v13653_v36 = vpack.i.bf16 %v16247_v6, %v16228_v44  ;;  %v16432_v1 = vsel %vm1517_vm0, %v1560_v25, %v1561_v60 }
  0xf0   : > { %13639 = vrot.lane.b32.xlu1 %v13638_v20, %s21088_s15  ;;  %v13658_v61 = vpack.i.bf16 %v1906_v37, %v16254_v63  ;;  %v16422_v10 = vsel %vm1866_vm1, %v21097_v29, %v21096_v4  ;;  %v21100_v44 = vrot.slane %v16205_v14, 1  ;;  %v21101_v6 = vrot.slane %v16187_v51, 1 }
  0xf1   : > { %13634 = vrot.lane.b32.xlu0 %v13633_v8, %s21089_s13  ;;  %v13668_v63 = vpack.i.bf16 %v16422_v10, %v1906_v37  ;;  %v21102_v25 = vrot.slane %v16196_v57, 1  ;;  %v21104_v29 = vrot.slane %v16179_v47, 2  ;;  %v21116_v47 = vrot.slane %v16260_v56, 1 }
  0xf2   : > { %v16448_v60 = vsel %vm1866_vm1, %v21101_v6, %v21100_v44 }
  0xf4   : > { %13649 = vrot.lane.b32.xlu1 %v13648_v19, %s21075_s2 }
  0xf5   : > { %13644 = vrot.lane.b32.xlu0 %v13638_v20, %s21075_s2  ;;  %v20939_v20 = vrot.slane %v16426_v3, 7 }
  0xf8   : > { %13659 = vrot.lane.b32.xlu1 %v13658_v61, %s21076_s23  ;;  %v21103_v61 = vmov %v21100_v44 }
  0xf9   : > { %13654 = vrot.lane.b32.xlu0 %v13653_v36, %s21076_s23  ;;  %v16455_v37 = vsel %vm1866_vm1, %v21103_v61, %v21102_v25  ;;  %v21105_v36 = vrot.slane %v16173_v34, 2  ;;  %v21106_v25 = vrot.slane %v16182_v7, 2  ;;  %v21107_v61 = vmov %v21104_v29 }
  0xfa   : > { %v16460_v4 = vpack.i.bf16 %v16455_v37, %v16448_v60 }
  0xfb   : > { %v2272_v44 = vsel %vm2232_vm2, %v21105_v36, %v21104_v29  ;;  %v16476_v48 = vsel %vm2232_vm2, %v21107_v61, %v21106_v25  ;;  %v21110_v61 = vrot.slane %v16205_v14, 2 }
  0xfc   : > { %13669 = vrot.lane.b32.xlu1 %v13668_v63, %s21077_s5  ;;  %v13688_v6 = vpack.i.bf16 %v2272_v44, %v2269_v59  ;;  %v13698_v29 = vpack.i.bf16 %v16476_v48, %v2272_v44 }
  0xfd   : > { %13664 = vrot.lane.b32.xlu0 %v16289_v40, %s21077_s5  ;;  %v13683_v40 = vpack.i.bf16 %v2267_v62, %v16319_v46  ;;  %v16495_v46 = vsel %vm1517_vm0, %v20939_v20, 0.0 }
  0xfe   : > { %21109 = vst [vmem:[#allocation84_spill] sm:$0xff] %v16495_v46 }
 0x100   : > { %13679 = vrot.lane.b32.xlu1 %v16460_v4, %s21078_s18 }
 0x101   : > { %13674 = vrot.lane.b32.xlu0 %v13668_v63, %s21078_s18  ;;  %v16490_v63 = vsel %vm1517_vm0, 0.0, %v20938_v21 }
 0x102   : > { %v16480_v2 = vpop.permute.xlu1 %13404  ;;  %21108 = vst [vmem:[#allocation83_spill] sm:$0xff] %v16490_v63  ;;  %v21123_v63 = vrot.slane %v16257_v55, 2 }
 0x103   : > { %v13395_v5 = vpop.permute.xlu0 %13394  ;;  %v13406_v18 = vunpack.i.l.bf16 %v16480_v2 }
 0x104   : > { %v13397_v36 = vunpack.i.h.bf16 %v13395_v5  ;;  %v13396_v41 = vunpack.i.l.bf16 %v13395_v5  ;;  %13689 = vrot.lane.b32.xlu1 %v13688_v6, %s21080_s26 }
 0x105   : > { %13684 = vrot.lane.b32.xlu0 %v13683_v40, %s21080_s26  ;;  %v21111_v40 = vrot.slane %v16187_v51, 2 }
 0x106   : > { %v2599_v5 = vsel %vm2597_vm4, 0.0, %v13397_v36  ;;  %v2598_v62 = vsel %vm2597_vm4, 0.0, %v13396_v41  ;;  %v16499_v44 = vpop.permute.xlu1 %13409  ;;  %v21112_v36 = vrot.slane %v16196_v57, 2  ;;  %v21113_v41 = vmov %v21110_v61 }
 0x107   : > { %v13400_v6 = vpop.permute.xlu0 %13399  ;;  %v16510_v59 = vsel %vm2232_vm2, %v21111_v40, %v21110_v61 }
 0x108   : > { %13699 = vrot.lane.b32.xlu1 %v13698_v29, %s21084_s10  ;;  %v16517_v7 = vsel %vm2232_vm2, %v21113_v41, %v21112_v36  ;;  %v21115_v36 = vrot.slane %v16257_v55, 1  ;;  %v13402_v34 = vunpack.i.h.bf16 %v13400_v6  ;;  %v13401_v11 = vunpack.i.l.bf16 %v13400_v6 }
 0x109   : > { %13694 = vrot.lane.b32.xlu0 %v13633_v8, %s21084_s10  ;;  %v13718_v8 = vpack.i.bf16 %v16269_v22, %v16257_v55  ;;  %v16527_v61 = vpack.i.bf16 %v16517_v7, %v16510_v59  ;;  %v21119_v6 = vrot.slane %v16282_v45, 1 }
 0x10a   : > { %v16503_v25 = vpop.permute.xlu1 %13419 }
 0x10b   : > { %v16519_v21 = vpop.permute.xlu0 %13414  ;;  %v13421_v54 = vunpack.i.l.bf16 %v16503_v25 }
 0x10c   : > { %13709 = vrot.lane.b32.xlu1 %v13648_v19, %s21088_s15  ;;  %v16536_v19 = vpack.i.bf16 %v16279_v30, %v16282_v45  ;;  %v13416_v55 = vunpack.i.l.bf16 %v16519_v21 }
 0x10d   : > { %13704 = vrot.lane.b32.xlu0 %v13698_v29, %s21089_s13  ;;  %v21114_v29 = vrot.slane %v16269_v22, 1 }
 0x10e   : > { %v16529_v57 = vpop.permute.xlu1 %13429 }
 0x10f   : > { %v16531_v40 = vpop.permute.xlu0 %13424  ;;  %v1916_v41 = vsel %vm1866_vm1, %v21115_v36, %v21114_v29  ;;  %v21117_v51 = vmov %v21114_v29  ;;  %v13733_v29 = vpack.i.bf16 %v16448_v60, %v16422_v10  ;;  %v13407_v36 = vunpack.i.h.bf16 %v16480_v2 }
 0x110   : > { %13719 = vrot.lane.b32.xlu1 %v13718_v8, %s21088_s15  ;;  %v16552_v14 = vsel %vm1866_vm1, %v21117_v51, %v21116_v47  ;;  %v13738_v13 = vpack.i.bf16 %v1916_v41, %v16455_v37  ;;  %v21118_v51 = vrot.slane %v16279_v30, 1  ;;  %v13412_v37 = vunpack.i.h.bf16 %v16499_v44 }
 0x111   : > { %13714 = vrot.lane.b32.xlu0 %v16527_v61, %s21089_s13  ;;  %v13748_v47 = vpack.i.bf16 %v16552_v14, %v1916_v41  ;;  %v21120_v10 = vrot.slane %v16272_v23, 1  ;;  %v21122_v41 = vrot.slane %v16269_v22, 2  ;;  %v13411_v2 = vunpack.i.l.bf16 %v16499_v44 }
 0x112   : > { %v16545_v20 = vpop.permute.xlu1 %13439  ;;  %v16567_v12 = vsel %vm1866_vm1, %v21119_v6, %v21118_v51  ;;  %v21121_v60 = vmov %v21118_v51  ;;  %v2601_v6 = vsel %vm2597_vm4, %v15926_v31, %v13402_v34  ;;  %v2632_v44 = vsel %vm2630_vm5, %v2599_v5, %v13407_v36 }
 0x113   : > { %v13435_v42 = vpop.permute.xlu0 %13434  ;;  %v16585_v51 = vsel %vm2232_vm2, %v21123_v63, %v21122_v41  ;;  %v21125_v34 = vmov %v21122_v41  ;;  %v2634_v5 = vsel %vm2630_vm5, %v2601_v6, %v13412_v37  ;;  %v13426_v36 = vunpack.i.l.bf16 %v16531_v40 }
 0x114   : > { %13729 = vrot.lane.b32.xlu1 %v16536_v19, %s21075_s2  ;;  %v2667_v63 = vsel %vm2663_vm6, %v2634_v5, %v13421_v54  ;;  %v13436_v39 = vunpack.i.l.bf16 %v13435_v42  ;;  %v13431_v37 = vunpack.i.l.bf16 %v16529_v57 }
 0x115   : > { %13724 = vrot.lane.b32.xlu0 %v13718_v8, %s21075_s2  ;;  %v16578_v8 = vsel %vm1866_vm1, %v21121_v60, %v21120_v10  ;;  %v2600_v10 = vsel %vm2597_vm4, %v15918_v28, %v13401_v11  ;;  %v13417_v60 = vunpack.i.h.bf16 %v16519_v21  ;;  %v13768_v28 = vpack.i.bf16 %v16585_v51, %v16517_v7 }
 0x116   : > { %v16571_v46 = vpop.permute.xlu1 %13449  ;;  %v16604_v31 = vpack.i.bf16 %v16578_v8, %v16567_v12  ;;  %v21124_v11 = vrot.slane %v16260_v56, 2  ;;  %v2631_v21 = vsel %vm2630_vm5, %v2598_v62, %v13406_v18  ;;  %v2633_v7 = vsel %vm2630_vm5, %v2600_v10, %v13411_v2 }
 0x117   : > { %v16591_v3 = vpop.permute.xlu0 %13444  ;;  %v13437_v56 = vunpack.i.h.bf16 %v13435_v42  ;;  %v2665_v18 = vsel %vm2663_vm6, %v2632_v44, %v13416_v55  ;;  %v13442_v10 = vunpack.i.h.bf16 %v16545_v20 }
 0x118   : > { %13739 = vrot.lane.b32.xlu1 %v13738_v13, %s21076_s23  ;;  %v16613_v13 = vsel %vm2232_vm2, %v21125_v34, %v21124_v11  ;;  %v2666_v11 = vsel %vm2663_vm6, %v2633_v7, %v13417_v60  ;;  %v2664_v34 = vsel %vm2663_vm6, %v2631_v21, %v13416_v55  ;;  %v13446_v62 = vunpack.i.l.bf16 %v16591_v3 }
 0x119   : > { %13734 = vrot.lane.b32.xlu0 %v13733_v29, %s21076_s23  ;;  %v13427_v29 = vunpack.i.h.bf16 %v16531_v40  ;;  %v13432_v40 = vunpack.i.h.bf16 %v16529_v57  ;;  %v2697_v42 = vsel %vm2696_vm7, %v2664_v34, %v13426_v36  ;;  %v13441_v55 = vunpack.i.l.bf16 %v16545_v20 }
 0x11a   : > { %v13460_v41 = vpop.permute.xlu1 %13459  ;;  %v2730_v44 = vsel %vm2729_vm8, %v2697_v42, %v13436_v39  ;;  %v13451_v57 = vunpack.i.l.bf16 %v16571_v46 }
 0x11b   : > { %v13455_v22 = vpop.permute.xlu0 %13454  ;;  %v2698_v2 = vsel %vm2696_vm7, %v2665_v18, %v13427_v29  ;;  %v2763_v29 = vsel %vm2762_vm9, %v2730_v44, %v13446_v62  ;;  %v13462_v36 = vunpack.i.h.bf16 %v13460_v41  ;;  %v13461_v34 = vunpack.i.l.bf16 %v13460_v41 }
 0x11c   : > { %13749 = vrot.lane.b32.xlu1 %v13748_v47, %s21077_s5  ;;  %v13457_v54 = vunpack.i.h.bf16 %v13455_v22  ;;  %v13456_v6 = vunpack.i.l.bf16 %v13455_v22  ;;  %v2731_v21 = vsel %vm2729_vm8, %v2698_v2, %v13437_v56  ;;  %v13447_v22 = vunpack.i.h.bf16 %v16591_v3 }
 0x11d   : > { %13744 = vrot.lane.b32.xlu0 %v16460_v4, %s21077_s5  ;;  %v2764_v20 = vsel %vm2762_vm9, %v2731_v21, %v13446_v62  ;;  %v2699_v3 = vsel %vm2696_vm7, %v2666_v11, %v13431_v37  ;;  %v2700_v18 = vsel %vm2696_vm7, %v2667_v63, %v13432_v40 }
 0x11e   : > { %v16634_v60 = vpop.permute.xlu1 %13469  ;;  %v2796_v39 = vsel %vm2795_vm10, %v2763_v29, %v13456_v6  ;;  %v2797_v56 = vsel %vm2795_vm10, %v2764_v20, %v13457_v54  ;;  %v2732_v62 = vsel %vm2729_vm8, %v2699_v3, %v13441_v55  ;;  %v2733_v41 = vsel %vm2729_vm8, %v2700_v18, %v13442_v10 }
 0x11f   : > { %v13465_v5 = vpop.permute.xlu0 %13464  ;;  %v13778_v6 = vpack.i.bf16 %v16613_v13, %v16585_v51  ;;  %v2766_v54 = vsel %vm2762_vm9, %v2733_v41, %v13451_v57  ;;  %v2765_v11 = vsel %vm2762_vm9, %v2732_v62, %v13447_v22  ;;  %v21126_v10 = vpack.i.bf16 %v16510_v59, %v16476_v48 }
 0x120   : > { %v13467_v4 = vunpack.i.h.bf16 %v13465_v5  ;;  %v13466_v7 = vunpack.i.l.bf16 %v13465_v5  ;;  %13759 = vrot.lane.b32.xlu1 %v16604_v31, %s21078_s18  ;;  %v2798_v37 = vsel %vm2795_vm10, %v2765_v11, %v13461_v34  ;;  %v2799_v5 = vsel %vm2795_vm10, %v2766_v54, %v13462_v36 }
 0x121   : > { %13754 = vrot.lane.b32.xlu0 %v13748_v47, %s21078_s18  ;;  %v21127_v59 = vrot.slane %v16279_v30, 2  ;;  %v21129_v29 = vrot.slane %v16272_v23, 2  ;;  %v16711_v3 = vpack.i.bf16 %v16350_v43, %v16338_v15  ;;  %v21132_v18 = vrot.slane %v16326_v0, 1 }
 0x122   : > { %v16649_v42 = vpop.permute.xlu1 %13479  ;;  %v2829_v2 = vsel %vm20973_vm11, %v2796_v39, %v13466_v7  ;;  %v2830_v44 = vsel %vm20973_vm11, %v2797_v56, %v13467_v4  ;;  %v21128_v4 = vrot.slane %v16282_v45, 2  ;;  %v21135_v54 = vrot.slane %v16350_v43, 1 }
 0x123   : > { %v13475_v21 = vpop.permute.xlu0 %13474  ;;  %v2861_v47 = vpack.c.bf16 %v2830_v44, %v2829_v2  ;;  %v21130_v20 = vmov %v21127_v59  ;;  %v21133_v44 = vrot.slane %v16335_v9, 1  ;;  %v21136_v11 = vrot.slane %v16338_v15, 1 }
 0x124   : > { %v13477_v63 = vunpack.i.h.bf16 %v13475_v21  ;;  %v13476_v40 = vunpack.i.l.bf16 %v13475_v21  ;;  %13769 = vrot.lane.b32.xlu1 %v13768_v28, %s21080_s26  ;;  %v16684_v7 = vsel %vm2232_vm2, %v21128_v4, %v21127_v59  ;;  %v16691_v36 = vsel %vm2232_vm2, %v21130_v20, %v21129_v29 }
 0x125   : > { %13764 = vrot.lane.b32.xlu0 %v21126_v10, %s21080_s26  ;;  %13057 = vmatprep.mubr.msk.bf16.mxu0 %vm2899_vm12, %v2861_v47  ;;  %v16702_v39 = vpack.i.bf16 %v16691_v36, %v16684_v7  ;;  %v13471_v21 = vunpack.i.l.bf16 %v16634_v60  ;;  %v13482_v47 = vunpack.i.h.bf16 %v16649_v42  ;;  %v13843_v4 = vpack.i.bf16 %v16684_v7, %v16613_v13 }
 0x126   : > { %v2832_v51 = vsel %vm20973_vm11, %v2799_v5, %v13477_v63  ;;  %v2831_v55 = vsel %vm20973_vm11, %v2798_v37, %v13476_v40  ;;  %v16669_v57 = vpop.permute.xlu1 %13489  ;;  %v16736_v63 = vsel %vm1866_vm1, %v21136_v11, %v21135_v54  ;;  %v21137_v40 = vrot.slane %v16341_v53, 1 }
 0x127   : > { %v16671_v22 = vpop.permute.xlu0 %13484  ;;  %v2862_v28 = vpack.c.bf16 %v2832_v51, %v2831_v55  ;;  %v21138_v37 = vmov %v21135_v54  ;;  %v13813_v55 = vpack.i.bf16 %v16567_v12, %v16552_v14  ;;  %v21139_v12 = vrot.slane %v16346_v16, 2 }
 0x128   : > { %13779 = vrot.lane.b32.xlu1 %v13778_v6, %s21084_s10  ;;  %v16743_v5 = vsel %vm1866_vm1, %v21138_v37, %v21137_v40  ;;  %v13486_v10 = vunpack.i.l.bf16 %v16671_v22  ;;  %v21140_v14 = vrot.slane %v16326_v0, 2  ;;  %v21141_v37 = vrot.slane %v16335_v9, 2 }
 0x129   : > { %13774 = vrot.lane.b32.xlu0 %v16527_v61, %s21084_s10  ;;  %13058 = vmatmul.mubr.msk.bf16.vlgmr.msra.gmra.mrb[0].mxu0 %vm2899_vm12, %v2862_v28  ;;  %v13798_v61 = vpack.i.bf16 %v16346_v16, %v16326_v0  ;;  %v13481_v28 = vunpack.i.l.bf16 %v16649_v42  ;;  %v16760_v20 = vpack.i.bf16 %v16743_v5, %v16736_v63  ;;  %v21143_v7 = vrot.slane %v16350_v43, 2 }
 0x12a   : > { %v16677_v48 = vpop.permute.xlu1 %13499  ;;  %v16767_v42 = vsel %vm2232_vm2, %v21140_v14, %v21139_v12 }
 0x12b   : > { %v16693_v34 = vpop.permute.xlu0 %13494 }
 0x12c   : > { %13789 = vrot.lane.b32.xlu1 %v16536_v19, %s21088_s15  ;;  %v21131_v19 = vrot.slane %v16346_v16, 1 }
 0x12d   : > { %13784 = vrot.lane.b32.xlu0 %v13778_v6, %s21089_s13 }
 0x12e   : > { %v16704_v23 = vpop.permute.xlu1 %13509  ;;  %v1926_v2 = vsel %vm1866_vm1, %v21132_v18, %v21131_v19  ;;  %v21134_v62 = vmov %v21131_v19  ;;  %v13472_v19 = vunpack.i.h.bf16 %v16634_v60  ;;  %v2605_v18 = vsel %vm2597_vm4, %v15929_v32, %v13482_v47 }
 0x12f   : > { %v16706_v56 = vpop.permute.xlu0 %13504  ;;  %v16725_v41 = vsel %vm1866_vm1, %v21134_v62, %v21133_v44  ;;  %v13818_v59 = vpack.i.bf16 %v1926_v2, %v16578_v8  ;;  %v13422_v8 = vunpack.i.h.bf16 %v16503_v25  ;;  %v13492_v44 = vunpack.i.h.bf16 %v16669_v57 }
 0x130   : > { %13799 = vrot.lane.b32.xlu1 %v13798_v61, %s21088_s15  ;;  %v16756_v29 = vpack.i.bf16 %v16725_v41, %v1926_v2  ;;  %v13491_v62 = vunpack.i.l.bf16 %v16669_v57  ;;  %v13506_v11 = vunpack.i.l.bf16 %v16706_v56  ;;  %v2604_v25 = vsel %vm2597_vm4, %v15932_v33, %v13481_v28 }
 0x131   : > { %13794 = vrot.lane.b32.xlu0 %v16702_v39, %s21089_s13  ;;  %v13501_v60 = vunpack.i.l.bf16 %v16677_v48  ;;  %v13496_v57 = vunpack.i.l.bf16 %v16693_v34  ;;  %v13848_v47 = vpack.i.bf16 %v16767_v42, %v16691_v36  ;;  %v21142_v33 = vmov %v21139_v12 }
 0x132   : > { %v16729_v6 = vpop.permute.xlu1 %13519  ;;  %v2603_v28 = vsel %vm2597_vm4, %v15912_v26, %v13472_v19  ;;  %v2637_v12 = vsel %vm2630_vm5, %v2604_v25, %v13491_v62  ;;  %v2638_v36 = vsel %vm2630_vm5, %v2605_v18, %v13492_v44  ;;  %v13511_v44 = vunpack.i.l.bf16 %v16704_v23 }
 0x133   : > { %v13515_v51 = vpop.permute.xlu0 %13514  ;;  %v13521_v25 = vunpack.i.l.bf16 %v16729_v6 }
 0x134   : > { %13809 = vrot.lane.b32.xlu1 %v16711_v3, %s21075_s2  ;;  %v13516_v32 = vunpack.i.l.bf16 %v13515_v51  ;;  %v13517_v14 = vunpack.i.h.bf16 %v13515_v51  ;;  %v13512_v51 = vunpack.i.h.bf16 %v16704_v23 }
 0x135   : > { %13804 = vrot.lane.b32.xlu0 %v13798_v61, %s21075_s2  ;;  %v2602_v61 = vsel %vm2597_vm4, %v15915_v27, %v13471_v21  ;;  %v13487_v27 = vunpack.i.h.bf16 %v16671_v22  ;;  %v13497_v21 = vunpack.i.h.bf16 %v16693_v34  ;;  %v16798_v22 = vsel %vm2232_vm2, %v21142_v33, %v21141_v37 }
 0x136   : > { %v16775_v2 = vpop.permute.xlu1 %13529  ;;  %v2635_v54 = vsel %vm2630_vm5, %v2602_v61, %v13486_v10  ;;  %v13452_v10 = vunpack.i.h.bf16 %v16571_v46  ;;  %v2671_v46 = vsel %vm2663_vm6, %v2638_v36, %v13501_v60 }
 0x137   : > { %v16781_v40 = vpop.permute.xlu0 %13524  ;;  %v2668_v34 = vsel %vm2663_vm6, %v2635_v54, %v13422_v8  ;;  %v2636_v37 = vsel %vm2630_vm5, %v2603_v28, %v13487_v27  ;;  %v13522_v54 = vunpack.i.h.bf16 %v16729_v6  ;;  %v13531_v60 = vunpack.i.l.bf16 %v16775_v2 }
 0x138   : > { %13819 = vrot.lane.b32.xlu1 %v13818_v59, %s21076_s23  ;;  %v13507_v59 = vunpack.i.h.bf16 %v16706_v56  ;;  %v2701_v9 = vsel %vm2696_vm7, %v2668_v34, %v13506_v11  ;;  %v13526_v26 = vunpack.i.l.bf16 %v16781_v40  ;;  %v2670_v56 = vsel %vm2663_vm6, %v2637_v12, %v13497_v21 }
 0x139   : > { %13814 = vrot.lane.b32.xlu0 %v13813_v55, %s21076_s23  ;;  %v2734_v33 = vsel %vm2729_vm8, %v2701_v9, %v13516_v32  ;;  %v2669_v8 = vsel %vm2663_vm6, %v2636_v37, %v13496_v57 }
 0x13a   : > { %v13540_v55 = vpop.permute.xlu1 %13539  ;;  %v2702_v62 = vsel %vm2696_vm7, %v2669_v8, %v13507_v59  ;;  %v2767_v32 = vsel %vm2762_vm9, %v2734_v33, %v13452_v10  ;;  %v2703_v10 = vsel %vm2696_vm7, %v2670_v56, %v13511_v44 }
 0x13b   : > { %v13535_v61 = vpop.permute.xlu0 %13534  ;;  %v2735_v27 = vsel %vm2729_vm8, %v2702_v62, %v13517_v14  ;;  %v13542_v59 = vunpack.i.h.bf16 %v13540_v55  ;;  %v13541_v34 = vunpack.i.l.bf16 %v13540_v55 }
 0x13c   : > { %13829 = vrot.lane.b32.xlu1 %v16756_v29, %s21077_s5  ;;  %v13537_v19 = vunpack.i.h.bf16 %v13535_v61  ;;  %v13536_v18 = vunpack.i.l.bf16 %v13535_v61  ;;  %v2768_v57 = vsel %vm2762_vm9, %v2735_v27, %v13526_v26  ;;  %v2736_v61 = vsel %vm2729_vm8, %v2703_v10, %v13521_v25 }
 0x13d   : > { %13824 = vrot.lane.b32.xlu0 %v16604_v31, %s21077_s5  ;;  %v13527_v31 = vunpack.i.h.bf16 %v16781_v40  ;;  %v2704_v40 = vsel %vm2696_vm7, %v2671_v46, %v13512_v51  ;;  %v13858_v26 = vpack.i.bf16 %v16798_v22, %v16767_v42  ;;  %v21145_v25 = vrot.slane %v16341_v53, 2 }
 0x13e   : > { %v16822_v11 = vpop.permute.xlu1 %13549  ;;  %v2800_v6 = vsel %vm2795_vm10, %v2767_v32, %v13536_v18  ;;  %v2801_v12 = vsel %vm2795_vm10, %v2768_v57, %v13537_v19  ;;  %v2737_v55 = vsel %vm2729_vm8, %v2704_v40, %v13522_v54  ;;  %v21146_v27 = vmov %v21143_v7 }
 0x13f   : > { %v13545_v21 = vpop.permute.xlu0 %13544  ;;  %v2769_v56 = vsel %vm2762_vm9, %v2736_v61, %v13527_v31  ;;  %v16900_v57 = vpack.i.bf16 %v16432_v1, %v16399_v49 }
 0x140   : > { %v13547_v23 = vunpack.i.h.bf16 %v13545_v21  ;;  %v13546_v28 = vunpack.i.l.bf16 %v13545_v21  ;;  %13839 = vrot.lane.b32.xlu1 %v16760_v20, %s21078_s18  ;;  %v2802_v19 = vsel %vm2795_vm10, %v2769_v56, %v13541_v34 }
 0x141   : > { %13834 = vrot.lane.b32.xlu0 %v16756_v29, %s21078_s18  ;;  %v2770_v29 = vsel %vm2762_vm9, %v2737_v55, %v13531_v60  ;;  %v16880_v60 = vsel %vm2232_vm2, %v21146_v27, %v21145_v25 }
 0x142   : > { %v2833_v36 = vsel %vm20973_vm11, %v2800_v6, %v13546_v28  ;;  %v2834_v9 = vsel %vm20973_vm11, %v2801_v12, %v13547_v23  ;;  %v16840_v14 = vpop.permute.xlu1 %13559  ;;  %v2803_v18 = vsel %vm2795_vm10, %v2770_v29, %v13542_v59  ;;  %v21148_v23 = vrot.slane %v16369_v58, 1 }
 0x143   : > { %v13555_v37 = vpop.permute.xlu0 %13554  ;;  %v2863_v33 = vpack.c.bf16 %v2834_v9, %v2833_v36  ;;  %v21149_v59 = vrot.slane %v16387_v17, 1  ;;  %v13551_v12 = vunpack.i.l.bf16 %v16822_v11  ;;  %v13562_v10 = vunpack.i.h.bf16 %v16840_v14 }
 0x144   : > { %v13557_v46 = vunpack.i.h.bf16 %v13555_v37  ;;  %v13556_v8 = vunpack.i.l.bf16 %v13555_v37  ;;  %13849 = vrot.lane.b32.xlu1 %v13848_v47, %s21080_s26  ;;  %v21151_v36 = vrot.slane %v16366_v24, 2  ;;  %v21152_v9 = vrot.slane %v16369_v58, 2 }
 0x145   : > { %13844 = vrot.lane.b32.xlu0 %v13843_v4, %s21080_s26  ;;  %13061 = vmatprep.mubr.msk.bf16.mxu0 %vm2899_vm12, %v2863_v33  ;;  %v21144_v4 = vrot.slane %v16338_v15, 2  ;;  %v13893_v33 = vpack.i.bf16 %v16736_v63, %v16725_v41  ;;  %v21155_v63 = vrot.slane %v16412_v52, 1 }
 0x146   : > { %v2836_v42 = vsel %vm20973_vm11, %v2803_v18, %v13557_v46  ;;  %v2835_v51 = vsel %vm20973_vm11, %v2802_v19, %v13556_v8  ;;  %v16858_v44 = vpop.permute.xlu1 %13569  ;;  %v16925_v61 = vsel %vm2232_vm2, %v21152_v9, %v21151_v36  ;;  %v21153_v8 = vrot.slane %v16432_v1, 1 }
 0x147   : > { %v16860_v62 = vpop.permute.xlu0 %13564  ;;  %v2864_v47 = vpack.c.bf16 %v2836_v42, %v2835_v51  ;;  %v16873_v54 = vsel %vm2232_vm2, %v21144_v4, %v21143_v7  ;;  %v21154_v19 = vrot.slane %v16399_v49, 1  ;;  %v13928_v18 = vpack.i.bf16 %v16925_v61, %v16880_v60 }
 0x148   : > { %13859 = vrot.lane.b32.xlu1 %v13858_v26, %s21084_s10  ;;  %v16891_v21 = vpack.i.bf16 %v16880_v60, %v16873_v54  ;;  %v13566_v55 = vunpack.i.l.bf16 %v16860_v62  ;;  %v13923_v46 = vpack.i.bf16 %v16873_v54, %v16798_v22  ;;  %v13502_v42 = vunpack.i.h.bf16 %v16677_v48  ;;  %v21160_v22 = vld [vmem:[#allocation82_spill] sm:$0xff] }
 0x149   : > { %13854 = vrot.lane.b32.xlu0 %v16702_v39, %s21084_s10  ;;  %13062 = vmatmul.mubr.msk.bf16.gmra.mrb[4].mxu0 %vm2899_vm12, %v2864_v47  ;;  %v13878_v39 = vpack.i.bf16 %v16366_v24, %v16369_v58  ;;  %v16945_v41 = vsel %vm1866_vm1, %v21154_v19, %v21153_v8  ;;  %v13552_v51 = vunpack.i.h.bf16 %v16822_v11  ;;  %v2606_v47 = vsel %vm2597_vm4, %v16020_v38, %v13551_v12 }
 0x14a   : > { %v16866_v13 = vpop.permute.xlu1 %13579  ;;  %v2609_v7 = vsel %vm2597_vm4, %v16045_v50, %v13562_v10  ;;  %v13572_v25 = vunpack.i.h.bf16 %v16858_v44  ;;  %v13571_v27 = vunpack.i.l.bf16 %v16858_v44  ;;  %v13567_v38 = vunpack.i.h.bf16 %v16860_v62  ;;  %v21159_v10 = vld [vmem:[#allocation70_spill] sm:$0xff] }
 0x14b   : > { %v16882_v32 = vpop.permute.xlu0 %13574  ;;  %v13581_v11 = vunpack.i.l.bf16 %v16866_v13  ;;  %v13532_v12 = vunpack.i.h.bf16 %v16775_v2  ;;  %v21161_v54 = vrot.slane %v21160_v22, 7 }
 0x14c   : > { %13869 = vrot.lane.b32.xlu1 %v16711_v3, %s21088_s15  ;;  %v21147_v3 = vrot.slane %v16366_v24, 1  ;;  %v13576_v44 = vunpack.i.l.bf16 %v16882_v32 }
 0x14d   : > { %13864 = vrot.lane.b32.xlu0 %v13858_v26, %s21089_s13  ;;  %v13561_v26 = vunpack.i.l.bf16 %v16840_v14  ;;  %v21156_v14 = vmov %v21153_v8 }
 0x14e   : > { %v16893_v53 = vpop.permute.xlu1 %13589  ;;  %v1936_v28 = vsel %vm1866_vm1, %v21148_v23, %v21147_v3  ;;  %v21150_v34 = vmov %v21147_v3 }
 0x14f   : > { %v16895_v31 = vpop.permute.xlu0 %13584  ;;  %v16914_v6 = vsel %vm1866_vm1, %v21150_v34, %v21149_v59  ;;  %v13898_v29 = vpack.i.bf16 %v1936_v28, %v16743_v5  ;;  %v16952_v5 = vsel %vm1866_vm1, %v21156_v14, %v21155_v63  ;;  %v2608_v48 = vsel %vm2597_vm4, %v16048_v35, %v13561_v26 }
 0x150   : > { %13879 = vrot.lane.b32.xlu1 %v13878_v39, %s21088_s15  ;;  %v16935_v56 = vpack.i.bf16 %v16914_v6, %v1936_v28  ;;  %v13586_v3 = vunpack.i.l.bf16 %v16895_v31  ;;  %v13577_v28 = vunpack.i.h.bf16 %v16882_v32  ;;  %v16980_v59 = vpack.i.bf16 %v16952_v5, %v16945_v41 }
 0x151   : > { %13874 = vrot.lane.b32.xlu0 %v16891_v21, %s21089_s13  ;;  %v21157_v34 = vrot.slane %v16387_v17, 2  ;;  %v21158_v35 = vmov %v21151_v36  ;;  %v2607_v36 = vsel %vm2597_vm4, %v21159_v10, %v13552_v51  ;;  %v13587_v32 = vunpack.i.h.bf16 %v16895_v31 }
 0x152   : > { %v16918_v40 = vpop.permute.xlu1 %13599  ;;  %v2642_v26 = vsel %vm2630_vm5, %v2609_v7, %v13572_v25  ;;  %v2640_v19 = vsel %vm2630_vm5, %v2607_v36, %v13567_v38  ;;  %v13591_v7 = vunpack.i.l.bf16 %v16893_v53 }
 0x153   : > { %v13595_v37 = vpop.permute.xlu0 %13594  ;;  %v16987_v62 = vsel %vm2232_vm2, %v21158_v35, %v21157_v34  ;;  %v2675_v2 = vsel %vm2663_vm6, %v2642_v26, %v13581_v11 }
 0x154   : > { %13889 = vrot.lane.b32.xlu1 %v16900_v57, %s21075_s2  ;;  %v13596_v50 = vunpack.i.l.bf16 %v13595_v37 }
 0x155   : > { %13884 = vrot.lane.b32.xlu0 %v13878_v39, %s21075_s2  ;;  %v2639_v39 = vsel %vm2630_vm5, %v2606_v47, %v13566_v55 }
 0x156   : > { %v16962_v4 = vpop.permute.xlu1 %13609  ;;  %v2672_v9 = vsel %vm2663_vm6, %v2639_v39, %v13502_v42  ;;  %v2673_v42 = vsel %vm2663_vm6, %v2640_v19, %v13576_v44 }
 0x157   : > { %v16968_v23 = vpop.permute.xlu0 %13604  ;;  %v2705_v17 = vsel %vm2696_vm7, %v2672_v9, %v13586_v3  ;;  %v2706_v25 = vsel %vm2696_vm7, %v2673_v42, %v13587_v32  ;;  %v13601_v3 = vunpack.i.l.bf16 %v16918_v40  ;;  %v13611_v38 = vunpack.i.l.bf16 %v16962_v4 }
 0x158   : > { %13899 = vrot.lane.b32.xlu1 %v13898_v29, %s21076_s23  ;;  %v13597_v29 = vunpack.i.h.bf16 %v13595_v37  ;;  %v2738_v63 = vsel %vm2729_vm8, %v2705_v17, %v13596_v50  ;;  %v13606_v14 = vunpack.i.l.bf16 %v16968_v23  ;;  %v13592_v37 = vunpack.i.h.bf16 %v16893_v53 }
 0x159   : > { %13894 = vrot.lane.b32.xlu0 %v13893_v33, %s21076_s23  ;;  %v2641_v33 = vsel %vm2630_vm5, %v2608_v48, %v13571_v27  ;;  %v13602_v27 = vunpack.i.h.bf16 %v16918_v40  ;;  %v2771_v11 = vsel %vm2762_vm9, %v2738_v63, %v13532_v12 }
 0x15a   : > { %v13620_v55 = vpop.permute.xlu1 %13619  ;;  %v2674_v31 = vsel %vm2663_vm6, %v2641_v33, %v13577_v28  ;;  %v2739_v48 = vsel %vm2729_vm8, %v2706_v25, %v13597_v29  ;;  %v13938_v29 = vpack.i.bf16 %v16987_v62, %v16925_v61  ;;  %v21162_v61 = vld [vmem:[#allocation81_spill] sm:$0xff]  ;;  %v21165_v25 = vrot.slane %v16399_v49, 2 }
 0x15b   : > { %v13615_v8 = vpop.permute.xlu0 %13614  ;;  %v2772_v28 = vsel %vm2762_vm9, %v2739_v48, %v13606_v14  ;;  %v13622_v34 = vunpack.i.h.bf16 %v13620_v55  ;;  %v13621_v35 = vunpack.i.l.bf16 %v13620_v55  ;;  %v2707_v12 = vsel %vm2696_vm7, %v2674_v31, %v13591_v7 }
 0x15c   : > { %13909 = vrot.lane.b32.xlu1 %v16935_v56, %s21077_s5  ;;  %v13617_v51 = vunpack.i.h.bf16 %v13615_v8  ;;  %v13616_v47 = vunpack.i.l.bf16 %v13615_v8  ;;  %v2740_v33 = vsel %vm2729_vm8, %v2707_v12, %v13601_v3  ;;  %v21164_v7 = vrot.slane %v16432_v1, 2 }
 0x15d   : > { %13904 = vrot.lane.b32.xlu0 %v16760_v20, %s21077_s5  ;;  %v13607_v20 = vunpack.i.h.bf16 %v16968_v23  ;;  %v2708_v23 = vsel %vm2696_vm7, %v2675_v2, %v13592_v37  ;;  %v21166_v3 = vrot.slane %v16412_v52, 2 }
 0x15e   : > { %v17011_v39 = vpop.permute.xlu1 %13629  ;;  %v2804_v40 = vsel %vm2795_vm10, %v2771_v11, %v13616_v47  ;;  %v2805_v10 = vsel %vm2795_vm10, %v2772_v28, %v13617_v51  ;;  %v2741_v55 = vsel %vm2729_vm8, %v2708_v23, %v13602_v27  ;;  %v17070_v27 = vsel %vm2232_vm2, %v21165_v25, %v21164_v7  ;;  %v21168_v11 = vld [vmem:[#allocation83_spill] sm:$0xff] }
 0x15f   : > { %v13625_v50 = vpop.permute.xlu0 %13624  ;;  %v2773_v8 = vsel %vm2762_vm9, %v2740_v33, %v13607_v20  ;;  %v2038_v52 = vrot.slane %v21168_v11, 1  ;;  %v13968_v33 = vpack.i.bf16 %v16945_v41, %v16914_v6  ;;  %v13632_v6 = vunpack.i.h.bf16 %v17011_v39  ;;  %v21171_v41 = vld [vmem:[#allocation71_spill] sm:$0xff] }
 0x160   : > { %v13627_v53 = vunpack.i.h.bf16 %v13625_v50  ;;  %v13626_v44 = vunpack.i.l.bf16 %v13625_v50  ;;  %13919 = vrot.lane.b32.xlu1 %v16980_v59, %s21078_s18  ;;  %v2806_v63 = vsel %vm2795_vm10, %v2773_v8, %v13621_v35 }
 0x161   : > { %13914 = vrot.lane.b32.xlu0 %v16935_v56, %s21078_s18  ;;  %v2774_v56 = vsel %vm2762_vm9, %v2741_v55, %v13611_v38 }
 0x162   : > { %v2837_v36 = vsel %vm20973_vm11, %v2804_v40, %v13626_v44  ;;  %v2838_v32 = vsel %vm20973_vm11, %v2805_v10, %v13627_v53  ;;  %v17029_v9 = vpop.permute.xlu1 %13639  ;;  %v2807_v14 = vsel %vm2795_vm10, %v2774_v56, %v13622_v34  ;;  %v21169_v53 = vld [vmem:[#allocation84_spill] sm:$0xff]  ;;  %v13631_v10 = vunpack.i.l.bf16 %v17011_v39 }
 0x163   : > { %v13635_v26 = vpop.permute.xlu0 %13634  ;;  %v2865_v17 = vpack.c.bf16 %v2838_v32, %v2837_v36  ;;  %v2041_v44 = vrot.slane %v21169_v53, 1  ;;  %v13642_v12 = vunpack.i.h.bf16 %v17029_v9  ;;  %v13641_v55 = vunpack.i.l.bf16 %v17029_v9 }
 0x164   : > { %v13637_v19 = vunpack.i.h.bf16 %v13635_v26  ;;  %v13636_v2 = vunpack.i.l.bf16 %v13635_v26  ;;  %13929 = vrot.lane.b32.xlu1 %v13928_v18, %s21080_s26  ;;  %v21170_v26 = vmov 0.0   ;;  %v2403_v56 = vrot.slane %v21168_v11, 2 }
 0x165   : > { %13924 = vrot.lane.b32.xlu0 %v13923_v46, %s21080_s26  ;;  %13065 = vmatprep.mubr.msk.bf16.mxu0 %vm2899_vm12, %v2865_v17  ;;  %v21163_v46 = vrot.slane %v21162_v61, 7  ;;  %v2610_v9 = vsel %vm2597_vm4, %v21171_v41, %v13631_v10 }
 0x166   : > { %v2840_v31 = vsel %vm20973_vm11, %v2807_v14, %v13637_v19  ;;  %v2839_v42 = vsel %vm20973_vm11, %v2806_v63, %v13636_v2  ;;  %v17050_v51 = vpop.permute.xlu1 %13649  ;;  %v2406_v19 = vrot.slane %v21169_v53, 2  ;;  %v13582_v2 = vunpack.i.h.bf16 %v16866_v13  ;;  %v21172_v63 = vld [vmem:[#allocation73_spill] sm:$0xff]  ;;  %v21173_v13 = vld [vmem:[#allocation74_spill] sm:$0xff] }
 0x167   : > { %v17052_v47 = vpop.permute.xlu0 %13644  ;;  %v2866_v60 = vpack.c.bf16 %v2840_v31, %v2839_v42  ;;  %v1565_v18 = vsel %vm1517_vm0, %v21163_v46, %v21161_v54  ;;  %v2613_v14 = vsel %vm2597_vm4, %v21172_v63, %v13642_v12  ;;  %v13652_v42 = vunpack.i.h.bf16 %v17050_v51 }
 0x168   : > { %13939 = vrot.lane.b32.xlu1 %v13938_v29, %s21084_s10  ;;  %v13958_v50 = vpack.i.bf16 %v1565_v18, %v21168_v11  ;;  %v2039_v28 = vrot.slane %v1565_v18, 1  ;;  %v13646_v36 = vunpack.i.l.bf16 %v17052_v47  ;;  %v2404_v8 = vrot.slane %v1565_v18, 2 }
 0x169   : > { %13934 = vrot.lane.b32.xlu0 %v16891_v21, %s21084_s10  ;;  %13066 = vmatmul.mubr.msk.bf16.gmra.mrb[8].mxu0 %vm2899_vm12, %v2866_v60  ;;  %v21167_v21 = vmov %v21164_v7  ;;  %v13651_v60 = vunpack.i.l.bf16 %v17050_v51  ;;  %v2612_v39 = vsel %vm2597_vm4, %v21173_v13, %v13641_v55  ;;  %v13647_v46 = vunpack.i.h.bf16 %v17052_v47 }
 0x16a   : > { %v17063_v37 = vpop.permute.xlu1 %13659  ;;  %v17077_v48 = vsel %vm2232_vm2, %v21167_v21, %v21166_v3  ;;  %v2042_v40 = vsel %vm1866_vm1, %v2039_v28, %v2041_v44  ;;  %v2643_v22 = vsel %vm2630_vm5, %v2610_v9, %v13646_v36  ;;  %v2405_v3 = vsel %vm2232_vm2, %v2403_v56, %v2404_v8 }
 0x16b   : > { %v17079_v38 = vpop.permute.xlu0 %13654  ;;  %v17087_v20 = vpack.i.bf16 %v17077_v48, %v17070_v27  ;;  %v13661_v18 = vunpack.i.l.bf16 %v17063_v37  ;;  %v2407_v21 = vsel %vm2232_vm2, %v2404_v8, %v2406_v19  ;;  %v13612_v11 = vunpack.i.h.bf16 %v16962_v4 }
 0x16c   : > { %13949 = vrot.lane.b32.xlu1 %v16900_v57, %s21088_s15  ;;  %v2040_v57 = vsel %vm1866_vm1, %v2038_v52, %v2039_v28  ;;  %v13657_v25 = vunpack.i.h.bf16 %v17079_v38  ;;  %v13656_v51 = vunpack.i.l.bf16 %v17079_v38  ;;  %v2676_v28 = vsel %vm2663_vm6, %v2643_v22, %v13582_v2 }
 0x16d   : > { %13944 = vrot.lane.b32.xlu0 %v13938_v29, %s21089_s13  ;;  %v17110_v17 = vpack.i.bf16 %v2042_v40, %v2040_v57  ;;  %v13988_v29 = vpack.i.bf16 %v17070_v27, %v16987_v62  ;;  %v2645_v53 = vsel %vm2630_vm5, %v2612_v39, %v13651_v60  ;;  %v2646_v38 = vsel %vm2630_vm5, %v2613_v14, %v13652_v42 }
 0x16e   : > { %v17091_v34 = vpop.permute.xlu1 %13669  ;;  %v2679_v4 = vsel %vm2663_vm6, %v2646_v38, %v13661_v18 }
 0x16f   : > { %v17093_v35 = vpop.permute.xlu0 %13664  ;;  %v13671_v8 = vunpack.i.l.bf16 %v17091_v34 }
 0x170   : > { %13959 = vrot.lane.b32.xlu1 %v13958_v50, %s21088_s15  ;;  %v13666_v54 = vunpack.i.l.bf16 %v17093_v35  ;;  %v13667_v52 = vunpack.i.h.bf16 %v17093_v35  ;;  %v2678_v35 = vsel %vm2663_vm6, %v2645_v53, %v13657_v25  ;;  %s15582_s15 = smov 16  }
 0x171   : > { %13954 = vrot.lane.b32.xlu0 %v17087_v20, %s21089_s13  ;;  %v2711_v18 = vsel %vm2696_vm7, %v2678_v35, %v13671_v8  ;;  %v13662_v8 = vunpack.i.h.bf16 %v17063_v37 }
 0x172   : > { %v17102_v23 = vpop.permute.xlu1 %13679  ;;  %v2709_v44 = vsel %vm2696_vm7, %v2676_v28, %v13666_v54  ;;  %v21175_v54 = vld [vmem:[#allocation68_spill] sm:$0xff]  ;;  %v13998_v28 = vpack.i.bf16 %v2407_v21, %v2405_v3 }
 0x173   : > { %v13675_v32 = vpop.permute.xlu0 %13674  ;;  %v13682_v2 = vunpack.i.h.bf16 %v17102_v23  ;;  %v13681_v41 = vunpack.i.l.bf16 %v17102_v23 }
 0x174   : > { %1818 = vrot.lane.b32.xlu1 %v21170_v26, %s21075_s2  ;;  %v13676_v7 = vunpack.i.l.bf16 %v13675_v32  ;;  %v13677_v57 = vunpack.i.h.bf16 %v13675_v32  ;;  %v13672_v32 = vunpack.i.h.bf16 %v17091_v34 }
 0x175   : > { %13964 = vrot.lane.b32.xlu0 %v13958_v50, %s21075_s2  ;;  %v21174_v50 = vld [vmem:[#allocation72_spill] sm:$0xff]  ;;  %s20984_s2 = smov 32  }
 0x176   : > { %v17123_v31 = vpop.permute.xlu1 %13689  ;;  %v2611_v47 = vsel %vm2597_vm4, %v21174_v50, %v13632_v6  ;;  %v2742_v12 = vsel %vm2729_vm8, %v2709_v44, %v13676_v7 }
 0x177   : > { %v17129_v61 = vpop.permute.xlu0 %13684  ;;  %v2644_v10 = vsel %vm2630_vm5, %v2611_v47, %v13647_v46  ;;  %v13691_v63 = vunpack.i.l.bf16 %v17123_v31  ;;  %v2775_v14 = vsel %vm2762_vm9, %v2742_v12, %v13612_v11  ;;  %v2744_v11 = vsel %vm2729_vm8, %v2711_v18, %v13681_v41 }
 0x178   : > { %2004 = vrot.lane.b32.xlu1 %v16952_v5, %s21076_s23  ;;  %v13686_v36 = vunpack.i.l.bf16 %v17129_v61 }
 0x179   : > { %13969 = vrot.lane.b32.xlu0 %v13968_v33, %s21076_s23  ;;  %v2677_v33 = vsel %vm2663_vm6, %v2644_v10, %v13656_v51  ;;  %s15584_s23 = smov 40  }
 0x17a   : > { %v13700_v5 = vpop.permute.xlu1 %13699  ;;  %v2710_v19 = vsel %vm2696_vm7, %v2677_v33, %v13667_v52 }
 0x17b   : > { %v13695_v40 = vpop.permute.xlu0 %13694  ;;  %v2743_v9 = vsel %vm2729_vm8, %v2710_v19, %v13677_v57  ;;  %v13702_v13 = vunpack.i.h.bf16 %v13700_v5  ;;  %v13701_v39 = vunpack.i.l.bf16 %v13700_v5 }
 0x17c   : > { %13979 = vrot.lane.b32.xlu1 %v17110_v17, %s21077_s5  ;;  %v13697_v55 = vunpack.i.h.bf16 %v13695_v40  ;;  %v13696_v56 = vunpack.i.l.bf16 %v13695_v40  ;;  %v2776_v60 = vsel %vm2762_vm9, %v2743_v9, %v13686_v36  ;;  %v21178_v9 = vld [vmem:[#allocation78_spill] sm:$0xff] }
 0x17d   : > { %13974 = vrot.lane.b32.xlu0 %v16980_v59, %s21077_s5  ;;  %v13687_v59 = vunpack.i.h.bf16 %v17129_v61  ;;  %v2712_v61 = vsel %vm2696_vm7, %v2679_v4, %v13672_v32  ;;  %s17416_s5 = scalar_lea.vmem %s21183_s24, %s15884_s28 }
 0x17e   : > { %v17164_v6 = vpop.permute.xlu1 %13709  ;;  %v2808_v23 = vsel %vm2795_vm10, %v2775_v14, %v13696_v56  ;;  %v2809_v46 = vsel %vm2795_vm10, %v2776_v60, %v13697_v55  ;;  %v2745_v50 = vsel %vm2729_vm8, %v2712_v61, %v13682_v2  ;;  %v21177_v2 = vld [vmem:[#allocation75_spill] sm:$0xff]  ;;  %v13692_v61 = vunpack.i.h.bf16 %v17123_v31 }
 0x17f   : > { %v13705_v42 = vpop.permute.xlu0 %13704  ;;  %v2778_v5 = vsel %vm2762_vm9, %v2745_v50, %v13691_v63  ;;  %v13711_v35 = vunpack.i.l.bf16 %v17164_v6  ;;  %v13712_v19 = vunpack.i.h.bf16 %v17164_v6 }
 0x180   : > { %v13707_v34 = vunpack.i.h.bf16 %v13705_v42  ;;  %v13706_v22 = vunpack.i.l.bf16 %v13705_v42  ;;  %2199 = vrot.lane.b32.xlu1 %v21175_v54, %s21078_s18  ;;  %v2811_v57 = vsel %vm2795_vm10, %v2778_v5, %v13702_v13  ;;  %v21179_v13 = vld [vmem:[#allocation77_spill] sm:$0xff] }
 0x181   : > { %13984 = vrot.lane.b32.xlu0 %v17110_v17, %s21078_s18  ;;  %v2777_v17 = vsel %vm2762_vm9, %v2744_v11, %v13687_v59  ;;  %v2614_v41 = vsel %vm2597_vm4, %v21177_v2, %v13711_v35  ;;  %s20975_s18 = smov 8  }
 0x182   : > { %v2841_v7 = vsel %vm20973_vm11, %v2808_v23, %v13706_v22  ;;  %v2842_v25 = vsel %vm20973_vm11, %v2809_v46, %v13707_v34  ;;  %v13720_v51 = vpop.permute.xlu1 %13719  ;;  %v2810_v44 = vsel %vm2795_vm10, %v2777_v17, %v13701_v39 }
 0x183   : > { %v13715_v47 = vpop.permute.xlu0 %13714  ;;  %v2867_v52 = vpack.c.bf16 %v2842_v25, %v2841_v7  ;;  %v13722_v33 = vunpack.i.h.bf16 %v13720_v51  ;;  %v21180_v7 = vld [vmem:[#allocation76_spill] sm:$0xff] }
 0x184   : > { %v13717_v53 = vunpack.i.h.bf16 %v13715_v47  ;;  %v13716_v38 = vunpack.i.l.bf16 %v13715_v47  ;;  %2370 = vrot.lane.b32.xlu1 %v17077_v48, %s21080_s26  ;;  %v21176_v48 = vld [vmem:[#allocation69_spill] sm:$0xff]  ;;  %v2615_v25 = vsel %vm2597_vm4, %v21180_v7, %v13712_v19 }
 0x185   : > { %13989 = vrot.lane.b32.xlu0 %v13988_v29, %s21080_s26  ;;  %13069 = vmatprep.mubr.msk.bf16.mxu0 %vm2899_vm12, %v2867_v52  ;;  %v14008_v12 = vpack.i.bf16 %v21175_v54, %v21176_v48  ;;  %v2617_v63 = vsel %vm2597_vm4, %v21178_v9, %v13722_v33  ;;  %s20982_s26 = smov 64  }
 0x186   : > { %v2844_v3 = vsel %vm20973_vm11, %v2811_v57, %v13717_v53  ;;  %v2843_v21 = vsel %vm20973_vm11, %v2810_v44, %v13716_v38  ;;  %v13730_v40 = vpop.permute.xlu1 %13729 }
 0x187   : > { %v13725_v10 = vpop.permute.xlu0 %13724  ;;  %v2868_v4 = vpack.c.bf16 %v2844_v3, %v2843_v21  ;;  %v13732_v42 = vunpack.i.h.bf16 %v13730_v40  ;;  %v13731_v59 = vunpack.i.l.bf16 %v13730_v40 }
 0x188   : > { %13999 = vrot.lane.b32.xlu1 %v13998_v28, %s21084_s10  ;;  %v13726_v56 = vunpack.i.l.bf16 %v13725_v10  ;;  %v13727_v37 = vunpack.i.h.bf16 %v13725_v10 }
 0x189   : > { %13994 = vrot.lane.b32.xlu0 %v17087_v20, %s21084_s10  ;;  %13070 = vmatmul.mubr.msk.bf16.gmra.mrb[12].mxu0 %vm2899_vm12, %v2868_v4  ;;  %v13721_v20 = vunpack.i.l.bf16 %v13720_v51  ;;  %v2650_v52 = vsel %vm2630_vm5, %v2617_v63, %v13732_v42  ;;  %s15587_s10 = smov 56  }
 0x18a   : > { %v17203_v62 = vpop.permute.xlu1 %13739  ;;  %v2647_v60 = vsel %vm2630_vm5, %v2614_v41, %v13726_v56  ;;  %v2648_v53 = vsel %vm2630_vm5, %v2615_v25, %v13727_v37 }
 0x18b   : > { %v13735_v27 = vpop.permute.xlu0 %13734  ;;  %v2616_v39 = vsel %vm2597_vm4, %v21179_v13, %v13721_v20  ;;  %v13741_v6 = vunpack.i.l.bf16 %v17203_v62  ;;  %v2680_v11 = vsel %vm2663_vm6, %v2647_v60, %v13662_v8 }
 0x18c   : > { %14009 = vrot.lane.b32.xlu1 %v14008_v12, %s21089_s13  ;;  %v13737_v46 = vunpack.i.h.bf16 %v13735_v27  ;;  %v13736_v18 = vunpack.i.l.bf16 %v13735_v27  ;;  %v2649_v47 = vsel %vm2630_vm5, %v2616_v39, %v13731_v59 }
 0x18d   : > { %14004 = vrot.lane.b32.xlu0 %v13998_v28, %s21089_s13  ;;  %v2683_v38 = vsel %vm2663_vm6, %v2650_v52, %v13741_v6 }
 0x18e   : > { %v17207_v29 = vpop.permute.xlu1 %13749  ;;  %v2682_v57 = vsel %vm2663_vm6, %v2649_v47, %v13737_v46  ;;  %v2681_v3 = vsel %vm2663_vm6, %v2648_v53, %v13736_v18 }
 0x18f   : > { %v13745_v36 = vpop.permute.xlu0 %13744  ;;  %v13752_v10 = vunpack.i.h.bf16 %v17207_v29  ;;  %v13751_v4 = vunpack.i.l.bf16 %v17207_v29 }
 0x190   : > { %v13746_v34 = vunpack.i.l.bf16 %v13745_v36  ;;  %v13747_v51 = vunpack.i.h.bf16 %v13745_v36 }
 0x191   : > { %v2716_v59 = vsel %vm2696_vm7, %v2683_v38, %v13752_v10 }
 0x192   : > { %v17210_v55 = vpop.permute.xlu1 %13759  ;;  %v2713_v28 = vsel %vm2696_vm7, %v2680_v11, %v13746_v34  ;;  %v2714_v12 = vsel %vm2696_vm7, %v2681_v3, %v13747_v51 }
 0x193   : > { %v13755_v32 = vpop.permute.xlu0 %13754  ;;  %v13762_v27 = vunpack.i.h.bf16 %v17210_v55  ;;  %v13761_v35 = vunpack.i.l.bf16 %v17210_v55  ;;  %v2715_v55 = vsel %vm2696_vm7, %v2682_v57, %v13751_v4  ;;  %v21181_v4 = vld [vmem:[#allocation79_spill] sm:$0xff] }
 0x194   : > { %v13756_v23 = vunpack.i.l.bf16 %v13755_v32  ;;  %v13757_v5 = vunpack.i.h.bf16 %v13755_v32 }
 0x195   : > { %v2749_v39 = vsel %vm2729_vm8, %v2716_v59, %v13762_v27 }
 0x196   : > { %v17218_v14 = vpop.permute.xlu1 %13769  ;;  %v2746_v31 = vsel %vm2729_vm8, %v2713_v28, %v13756_v23  ;;  %v2747_v33 = vsel %vm2729_vm8, %v2714_v12, %v13757_v5 }
 0x197   : > { %v13765_v22 = vpop.permute.xlu0 %13764  ;;  %v13771_v56 = vunpack.i.l.bf16 %v17218_v14  ;;  %v2779_v32 = vsel %vm2762_vm9, %v2746_v31, %v13692_v61 }
 0x198   : > { %v13766_v44 = vunpack.i.l.bf16 %v13765_v22  ;;  %v13767_v8 = vunpack.i.h.bf16 %v13765_v22  ;;  %v2748_v22 = vsel %vm2729_vm8, %v2715_v55, %v13761_v35 }
 0x199   : > { %v2782_v23 = vsel %vm2762_vm9, %v2749_v39, %v13771_v56 }
 0x19a   : > { %v13780_v50 = vpop.permute.xlu1 %13779  ;;  %v2780_v19 = vsel %vm2762_vm9, %v2747_v33, %v13766_v44  ;;  %v2781_v46 = vsel %vm2762_vm9, %v2748_v22, %v13767_v8 }
 0x19b   : > { %v13775_v17 = vpop.permute.xlu0 %13774  ;;  %v13782_v41 = vunpack.i.h.bf16 %v13780_v50  ;;  %v13781_v9 = vunpack.i.l.bf16 %v13780_v50 }
 0x19c   : > { %v13777_v21 = vunpack.i.h.bf16 %v13775_v17  ;;  %v13776_v40 = vunpack.i.l.bf16 %v13775_v17 }
 0x19d   : > { %v2814_v7 = vsel %vm2795_vm10, %v2781_v46, %v13781_v9  ;;  %v2815_v25 = vsel %vm2795_vm10, %v2782_v23, %v13782_v41  ;;  %v13772_v9 = vunpack.i.h.bf16 %v17218_v14 }
 0x19e   : > { %v17240_v36 = vpop.permute.xlu1 %13789  ;;  %v2812_v63 = vsel %vm2795_vm10, %v2779_v32, %v13776_v40  ;;  %v2813_v42 = vsel %vm2795_vm10, %v2780_v19, %v13777_v21  ;;  %v13742_v40 = vunpack.i.h.bf16 %v17203_v62 }
 0x19f   : > { %v13785_v20 = vpop.permute.xlu0 %13784  ;;  %v13791_v38 = vunpack.i.l.bf16 %v17240_v36  ;;  %v13792_v10 = vunpack.i.h.bf16 %v17240_v36 }
 0x1a0   : > { %v13787_v2 = vunpack.i.h.bf16 %v13785_v20  ;;  %v13786_v29 = vunpack.i.l.bf16 %v13785_v20 }
 0x1a1   : > { %v2618_v12 = vsel %vm2597_vm4, %v21181_v4, %v13791_v38 }
 0x1a2   : > { %v2845_v60 = vsel %vm20973_vm11, %v2812_v63, %v13786_v29  ;;  %v2846_v34 = vsel %vm20973_vm11, %v2813_v42, %v13787_v2  ;;  %v13800_v13 = vpop.permute.xlu1 %13799 }
 0x1a3   : > { %v13795_v37 = vpop.permute.xlu0 %13794  ;;  %v2869_v6 = vpack.c.bf16 %v2846_v34, %v2845_v60  ;;  %v13802_v31 = vunpack.i.h.bf16 %v13800_v13  ;;  %v13801_v21 = vunpack.i.l.bf16 %v13800_v13 }
 0x1a4   : > { %v13797_v18 = vunpack.i.h.bf16 %v13795_v37  ;;  %v13796_v61 = vunpack.i.l.bf16 %v13795_v37 }
 0x1a5   : > { %13073 = vmatprep.mubr.msk.bf16.mxu0 %vm2899_vm12, %v2869_v6  ;;  %v2621_v27 = vsel %vm2597_vm4, %v16279_v30, %v13802_v31  ;;  %v2620_v19 = vsel %vm2597_vm4, %v16282_v45, %v13801_v21  ;;  %v21182_v30 = vld [vmem:[#allocation80_spill] sm:$0xff] }
 0x1a6   : > { %v2848_v51 = vsel %vm20973_vm11, %v2815_v25, %v13797_v18  ;;  %v2847_v11 = vsel %vm20973_vm11, %v2814_v7, %v13796_v61  ;;  %v13810_v50 = vpop.permute.xlu1 %13809  ;;  %v2619_v63 = vsel %vm2597_vm4, %v21182_v30, %v13792_v10 }
 0x1a7   : > { %v13805_v47 = vpop.permute.xlu0 %13804  ;;  %v2870_v52 = vpack.c.bf16 %v2848_v51, %v2847_v11  ;;  %v13812_v33 = vunpack.i.h.bf16 %v13810_v50  ;;  %v13811_v56 = vunpack.i.l.bf16 %v13810_v50 }
 0x1a8   : > { %v13806_v57 = vunpack.i.l.bf16 %v13805_v47  ;;  %v13807_v62 = vunpack.i.h.bf16 %v13805_v47 }
 0x1a9   : > { %13074 = vmatmul.mubr.msk.bf16.gmra.mrb[16].mxu0 %vm2899_vm12, %v2870_v52  ;;  %v2653_v60 = vsel %vm2630_vm5, %v2620_v19, %v13811_v56  ;;  %v2654_v34 = vsel %vm2630_vm5, %v2621_v27, %v13812_v33 }
 0x1aa   : > { %v17263_v28 = vpop.permute.xlu1 %13819  ;;  %v2651_v32 = vsel %vm2630_vm5, %v2618_v12, %v13806_v57  ;;  %v2652_v39 = vsel %vm2630_vm5, %v2619_v63, %v13807_v62 }
 0x1ab   : > { %v13815_v5 = vpop.permute.xlu0 %13814  ;;  %v13821_v36 = vunpack.i.l.bf16 %v17263_v28  ;;  %v2684_v55 = vsel %vm2663_vm6, %v2651_v32, %v13742_v40 }
 0x1ac   : > { %v13817_v29 = vunpack.i.h.bf16 %v13815_v5  ;;  %v13816_v41 = vunpack.i.l.bf16 %v13815_v5 }
 0x1ad   : > { %v2687_v37 = vsel %vm2663_vm6, %v2654_v34, %v13821_v36 }
 0x1ae   : > { %v17265_v17 = vpop.permute.xlu1 %13829  ;;  %v2686_v23 = vsel %vm2663_vm6, %v2653_v60, %v13817_v29  ;;  %v2685_v46 = vsel %vm2663_vm6, %v2652_v39, %v13816_v41 }
 0x1af   : > { %v13825_v53 = vpop.permute.xlu0 %13824  ;;  %v13832_v7 = vunpack.i.h.bf16 %v17265_v17  ;;  %v13831_v25 = vunpack.i.l.bf16 %v17265_v17 }
 0x1b0   : > { %v13826_v20 = vunpack.i.l.bf16 %v13825_v53  ;;  %v13827_v42 = vunpack.i.h.bf16 %v13825_v53 }
 0x1b1   : > { %v2720_v12 = vsel %vm2696_vm7, %v2687_v37, %v13832_v7 }
 0x1b2   : > { %v17268_v44 = vpop.permute.xlu1 %13839  ;;  %v2717_v45 = vsel %vm2696_vm7, %v2684_v55, %v13826_v20  ;;  %v2718_v51 = vsel %vm2696_vm7, %v2685_v46, %v13827_v42  ;;  %v13822_v46 = vunpack.i.h.bf16 %v17263_v28 }
 0x1b3   : > { %v13835_v3 = vpop.permute.xlu0 %13834  ;;  %v13842_v11 = vunpack.i.h.bf16 %v17268_v44  ;;  %v13841_v47 = vunpack.i.l.bf16 %v17268_v44  ;;  %v2719_v44 = vsel %vm2696_vm7, %v2686_v23, %v13831_v25 }
 0x1b4   : > { %v13836_v2 = vunpack.i.l.bf16 %v13835_v3  ;;  %v13837_v13 = vunpack.i.h.bf16 %v13835_v3 }
 0x1b5   : > { %v2752_v32 = vsel %vm2729_vm8, %v2719_v44, %v13841_v47  ;;  %v2753_v20 = vsel %vm2729_vm8, %v2720_v12, %v13842_v11 }
 0x1b6   : > { %v17276_v35 = vpop.permute.xlu1 %13849  ;;  %v2750_v14 = vsel %vm2729_vm8, %v2717_v45, %v13836_v2  ;;  %v2751_v52 = vsel %vm2729_vm8, %v2718_v51, %v13837_v13 }
 0x1b7   : > { %v13845_v8 = vpop.permute.xlu0 %13844  ;;  %v13851_v5 = vunpack.i.l.bf16 %v17276_v35  ;;  %v2783_v53 = vsel %vm2762_vm9, %v2750_v14, %v13772_v9 }
 0x1b8   : > { %v13846_v6 = vunpack.i.l.bf16 %v13845_v8  ;;  %v13847_v31 = vunpack.i.h.bf16 %v13845_v8 }
 0x1b9   : > { %v2786_v62 = vsel %vm2762_vm9, %v2753_v20, %v13851_v5 }
 0x1ba   : > { %v13860_v59 = vpop.permute.xlu1 %13859  ;;  %v2784_v57 = vsel %vm2762_vm9, %v2751_v52, %v13846_v6  ;;  %v2785_v36 = vsel %vm2762_vm9, %v2752_v32, %v13847_v31 }
 0x1bb   : > { %v13855_v22 = vpop.permute.xlu0 %13854  ;;  %v13862_v21 = vunpack.i.h.bf16 %v13860_v59  ;;  %v13861_v40 = vunpack.i.l.bf16 %v13860_v59 }
 0x1bc   : > { %v13857_v18 = vunpack.i.h.bf16 %v13855_v22  ;;  %v13856_v61 = vunpack.i.l.bf16 %v13855_v22 }
 0x1bd   : > { %v2818_v41 = vsel %vm2795_vm10, %v2785_v36, %v13861_v40  ;;  %v2819_v9 = vsel %vm2795_vm10, %v2786_v62, %v13862_v21 }
 0x1be   : > { %v17298_v50 = vpop.permute.xlu1 %13869  ;;  %v2816_v10 = vsel %vm2795_vm10, %v2783_v53, %v13856_v61  ;;  %v2817_v4 = vsel %vm2795_vm10, %v2784_v57, %v13857_v18  ;;  %v13852_v57 = vunpack.i.h.bf16 %v17276_v35 }
 0x1bf   : > { %v13865_v38 = vpop.permute.xlu0 %13864  ;;  %v13871_v22 = vunpack.i.l.bf16 %v17298_v50  ;;  %v13872_v18 = vunpack.i.h.bf16 %v17298_v50 }
 0x1c0   : > { %v13867_v3 = vunpack.i.h.bf16 %v13865_v38  ;;  %v13866_v17 = vunpack.i.l.bf16 %v13865_v38 }
 0x1c1   : > { %v2622_v61 = vsel %vm2597_vm4, %v16326_v0, %v13871_v22 }
 0x1c2   : > { %v2849_v27 = vsel %vm20973_vm11, %v2816_v10, %v13866_v17  ;;  %v2850_v33 = vsel %vm20973_vm11, %v2817_v4, %v13867_v3  ;;  %v13880_v56 = vpop.permute.xlu1 %13879 }
 0x1c3   : > { %v13875_v8 = vpop.permute.xlu0 %13874  ;;  %v2871_v19 = vpack.c.bf16 %v2850_v33, %v2849_v27  ;;  %v13882_v39 = vunpack.i.h.bf16 %v13880_v56  ;;  %v13881_v23 = vunpack.i.l.bf16 %v13880_v56 }
 0x1c4   : > { %v13877_v2 = vunpack.i.h.bf16 %v13875_v8  ;;  %v13876_v29 = vunpack.i.l.bf16 %v13875_v8 }
 0x1c5   : > { %13077 = vmatprep.mubr.msk.bf16.mxu0 %vm2899_vm12, %v2871_v19  ;;  %v2625_v7 = vsel %vm2597_vm4, %v16350_v43, %v13882_v39  ;;  %v2624_v53 = vsel %vm2597_vm4, %v16338_v15, %v13881_v23  ;;  %v2623_v43 = vsel %vm2597_vm4, %v16346_v16, %v13872_v18 }
 0x1c6   : > { %v2852_v30 = vsel %vm20973_vm11, %v2819_v9, %v13877_v2  ;;  %v2851_v63 = vsel %vm20973_vm11, %v2818_v41, %v13876_v29  ;;  %v13890_v42 = vpop.permute.xlu1 %13889 }
 0x1c7   : > { %v13885_v55 = vpop.permute.xlu0 %13884  ;;  %v2872_v59 = vpack.c.bf16 %v2852_v30, %v2851_v63  ;;  %v13892_v51 = vunpack.i.h.bf16 %v13890_v42  ;;  %v13891_v11 = vunpack.i.l.bf16 %v13890_v42 }
 0x1c8   : > { %v13886_v14 = vunpack.i.l.bf16 %v13885_v55  ;;  %v13887_v28 = vunpack.i.h.bf16 %v13885_v55 }
 0x1c9   : > { %13078 = vmatmul.mubr.msk.bf16.gmra.mrb[20].mxu0 %vm2899_vm12, %v2872_v59  ;;  %v2657_v40 = vsel %vm2630_vm5, %v2624_v53, %v13891_v11  ;;  %v2658_v10 = vsel %vm2630_vm5, %v2625_v7, %v13892_v51 }
 0x1ca   : > { %v17321_v60 = vpop.permute.xlu1 %13899  ;;  %v2655_v47 = vsel %vm2630_vm5, %v2622_v61, %v13886_v14  ;;  %v2656_v12 = vsel %vm2630_vm5, %v2623_v43, %v13887_v28 }
 0x1cb   : > { %v13895_v34 = vpop.permute.xlu0 %13894  ;;  %v13901_v50 = vunpack.i.l.bf16 %v17321_v60  ;;  %v2688_v17 = vsel %vm2663_vm6, %v2655_v47, %v13822_v46 }
 0x1cc   : > { %v13897_v31 = vunpack.i.h.bf16 %v13895_v34  ;;  %v13896_v0 = vunpack.i.l.bf16 %v13895_v34 }
 0x1cd   : > { %v2691_v27 = vsel %vm2663_vm6, %v2658_v10, %v13901_v50 }
 0x1ce   : > { %v17323_v45 = vpop.permute.xlu1 %13909  ;;  %v2690_v16 = vsel %vm2663_vm6, %v2657_v40, %v13897_v31  ;;  %v2689_v56 = vsel %vm2663_vm6, %v2656_v12, %v13896_v0 }
 0x1cf   : > { %v13905_v13 = vpop.permute.xlu0 %13904  ;;  %v13912_v8 = vunpack.i.h.bf16 %v17323_v45  ;;  %v13911_v19 = vunpack.i.l.bf16 %v17323_v45 }
 0x1d0   : > { %v13906_v52 = vunpack.i.l.bf16 %v13905_v13  ;;  %v13907_v3 = vunpack.i.h.bf16 %v13905_v13 }
 0x1d1   : > { %v2724_v14 = vsel %vm2696_vm7, %v2691_v27, %v13912_v8 }
 0x1d2   : > { %v17326_v37 = vpop.permute.xlu1 %13919  ;;  %v2721_v15 = vsel %vm2696_vm7, %v2688_v17, %v13906_v52  ;;  %v2722_v62 = vsel %vm2696_vm7, %v2689_v56, %v13907_v3 }
 0x1d3   : > { %v13915_v6 = vpop.permute.xlu0 %13914  ;;  %v13922_v36 = vunpack.i.h.bf16 %v17326_v37  ;;  %v13921_v29 = vunpack.i.l.bf16 %v17326_v37  ;;  %v2723_v37 = vsel %vm2696_vm7, %v2690_v16, %v13911_v19 }
 0x1d4   : > { %v13916_v38 = vunpack.i.l.bf16 %v13915_v6  ;;  %v13917_v4 = vunpack.i.h.bf16 %v13915_v6 }
 0x1d5   : > { %v2756_v18 = vsel %vm2729_vm8, %v2723_v37, %v13921_v29  ;;  %v2757_v61 = vsel %vm2729_vm8, %v2724_v14, %v13922_v36 }
 0x1d6   : > { %v17334_v25 = vpop.permute.xlu1 %13929  ;;  %v2754_v35 = vsel %vm2729_vm8, %v2721_v15, %v13916_v38  ;;  %v2755_v41 = vsel %vm2729_vm8, %v2722_v62, %v13917_v4  ;;  %v13902_v62 = vunpack.i.h.bf16 %v17321_v60 }
 0x1d7   : > { %v13925_v5 = vpop.permute.xlu0 %13924  ;;  %v13931_v9 = vunpack.i.l.bf16 %v17334_v25  ;;  %v2787_v30 = vsel %vm2762_vm9, %v2754_v35, %v13852_v57  ;;  %v13932_v37 = vunpack.i.h.bf16 %v17334_v25 }
 0x1d8   : > { %v13926_v33 = vunpack.i.l.bf16 %v13925_v5  ;;  %v13927_v42 = vunpack.i.h.bf16 %v13925_v5 }
 0x1d9   : > { %v2790_v11 = vsel %vm2762_vm9, %v2757_v61, %v13931_v9 }
 0x1da   : > { %v13940_v21 = vpop.permute.xlu1 %13939  ;;  %v2788_v55 = vsel %vm2762_vm9, %v2755_v41, %v13926_v33  ;;  %v2789_v47 = vsel %vm2762_vm9, %v2756_v18, %v13927_v42 }
 0x1db   : > { %v13935_v44 = vpop.permute.xlu0 %13934  ;;  %v13942_v45 = vunpack.i.h.bf16 %v13940_v21  ;;  %v13941_v13 = vunpack.i.l.bf16 %v13940_v21 }
 0x1dc   : > { %v13937_v32 = vunpack.i.h.bf16 %v13935_v44  ;;  %v13936_v20 = vunpack.i.l.bf16 %v13935_v44 }
 0x1dd   : > { %v2822_v53 = vsel %vm2795_vm10, %v2789_v47, %v13941_v13  ;;  %v2823_v28 = vsel %vm2795_vm10, %v2790_v11, %v13942_v45 }
 0x1de   : > { %v13950_v2 = vpop.permute.xlu1 %13949  ;;  %v2820_v22 = vsel %vm2795_vm10, %v2787_v30, %v13936_v20  ;;  %v2821_v39 = vsel %vm2795_vm10, %v2788_v55, %v13937_v32 }
 0x1df   : > { %v13945_v63 = vpop.permute.xlu0 %13944  ;;  %v13951_v15 = vunpack.i.l.bf16 %v13950_v2  ;;  %v13952_v12 = vunpack.i.h.bf16 %v13950_v2 }
 0x1e0   : > { %v13947_v59 = vunpack.i.h.bf16 %v13945_v63  ;;  %v13946_v34 = vunpack.i.l.bf16 %v13945_v63 }
 0x1e1   : > { %v2626_v32 = vsel %vm2597_vm4, %v16369_v58, %v13951_v15  ;;  %v2627_v29 = vsel %vm2597_vm4, %v16366_v24, %v13952_v12 }
 0x1e2   : > { %v2853_v6 = vsel %vm20973_vm11, %v2820_v22, %v13946_v34  ;;  %v2854_v23 = vsel %vm20973_vm11, %v2821_v39, %v13947_v59  ;;  %v13960_v46 = vpop.permute.xlu1 %13959 }
 0x1e3   : > { %v13955_v7 = vpop.permute.xlu0 %13954  ;;  %v2873_v51 = vpack.c.bf16 %v2854_v23, %v2853_v6  ;;  %v13962_v17 = vunpack.i.h.bf16 %v13960_v46  ;;  %v13961_v40 = vunpack.i.l.bf16 %v13960_v46  ;;  %v17401_v46 = vld [vmem:[%s21056_s27] ss:$0 sm:$0xff] }
 0x1e4   : > { %v13957_v52 = vunpack.i.h.bf16 %v13955_v7  ;;  %v13956_v5 = vunpack.i.l.bf16 %v13955_v7 }
 0x1e5   : > { %13081 = vmatprep.mubr.msk.bf16.mxu0 %vm2899_vm12, %v2873_v51  ;;  %v2629_v4 = vsel %vm2597_vm4, %v16432_v1, %v13962_v17  ;;  %v2628_v35 = vsel %vm2597_vm4, %v16399_v49, %v13961_v40  ;;  %vm20969_vm4 = vcmask 261120  }
 0x1e6   : > { %v2856_v50 = vsel %vm20973_vm11, %v2823_v28, %v13957_v52  ;;  %v2855_v38 = vsel %vm20973_vm11, %v2822_v53, %v13956_v5  ;;  %v1819_v31 = vpop.permute.xlu1 %1818 }
 0x1e7   : > { %v13965_v0 = vpop.permute.xlu0 %13964  ;;  %v2874_v57 = vpack.c.bf16 %v2856_v50, %v2855_v38  ;;  %v2662_v20 = vsel %vm2630_vm5, %v2629_v4, %v1819_v31  ;;  %v2661_v49 = vsel %vm2630_vm5, %v2628_v35, %v1819_v31 }
 0x1e8   : > { %v13966_v44 = vunpack.i.l.bf16 %v13965_v0  ;;  %v13967_v33 = vunpack.i.h.bf16 %v13965_v0 }
 0x1e9   : > { %13082 = vmatmul.mubr.msk.bf16.gmra.mrb[24].mxu0 %vm2899_vm12, %v2874_v57 }
 0x1ea   : > { %v2005_v43 = vpop.permute.xlu1 %2004  ;;  %v2659_v1 = vsel %vm2630_vm5, %v2626_v32, %v13966_v44  ;;  %v2660_v58 = vsel %vm2630_vm5, %v2627_v29, %v13967_v33  ;;  %vm20966_vm5 = vcmask 326656  }
 0x1eb   : > { %v13970_v3 = vpop.permute.xlu0 %13969  ;;  %v2695_v63 = vsel %vm2663_vm6, %v2662_v20, %v2005_v43  ;;  %v2692_v55 = vsel %vm2663_vm6, %v2659_v1, %v13902_v62 }
 0x1ec   : > { %v13972_v16 = vunpack.i.h.bf16 %v13970_v3  ;;  %v13971_v36 = vunpack.i.l.bf16 %v13970_v3 }
 0x1ee   : > { %v13980_v21 = vpop.permute.xlu1 %13979  ;;  %v2694_v42 = vsel %vm2663_vm6, %v2661_v49, %v13972_v16  ;;  %v2693_v45 = vsel %vm2663_vm6, %v2660_v58, %v13971_v36  ;;  %vm20967_vm6 = vcmask 392192  }
 0x1ef   : > { %v13975_v10 = vpop.permute.xlu0 %13974  ;;  %v13982_v8 = vunpack.i.h.bf16 %v13980_v21  ;;  %v13981_v19 = vunpack.i.l.bf16 %v13980_v21 }
 0x1f0   : > { %v13976_v2 = vunpack.i.l.bf16 %v13975_v10  ;;  %v13977_v41 = vunpack.i.h.bf16 %v13975_v10 }
 0x1f1   : > { %v2727_v59 = vsel %vm2696_vm7, %v2694_v42, %v13981_v19  ;;  %v2728_v34 = vsel %vm2696_vm7, %v2695_v63, %v13982_v8 }
 0x1f2   : > { %v2200_v27 = vpop.permute.xlu1 %2199  ;;  %v2725_v13 = vsel %vm2696_vm7, %v2692_v55, %v13976_v2  ;;  %v2726_v14 = vsel %vm2696_vm7, %v2693_v45, %v13977_v41  ;;  %vm20968_vm7 = vcmask 457728  }
 0x1f3   : > { %v13985_v56 = vpop.permute.xlu0 %13984  ;;  %v2760_v18 = vsel %vm2729_vm8, %v2727_v59, %v2200_v27  ;;  %v2761_v61 = vsel %vm2729_vm8, %v2728_v34, %v2200_v27 }
 0x1f4   : > { %v13986_v9 = vunpack.i.l.bf16 %v13985_v56  ;;  %v13987_v24 = vunpack.i.h.bf16 %v13985_v56 }
 0x1f6   : > { %v2371_v30 = vpop.permute.xlu1 %2370  ;;  %v2758_v6 = vsel %vm2729_vm8, %v2725_v13, %v13986_v9  ;;  %v2759_v47 = vsel %vm2729_vm8, %v2726_v14, %v13987_v24  ;;  %vm4513_vm8 = vcmask 523264  }
 0x1f7   : > { %v13990_v60 = vpop.permute.xlu0 %13989  ;;  %v2794_v25 = vsel %vm2762_vm9, %v2761_v61, %v2371_v30  ;;  %v2791_v38 = vsel %vm2762_vm9, %v2758_v6, %v13932_v37 }
 0x1f8   : > { %v13992_v22 = vunpack.i.h.bf16 %v13990_v60  ;;  %v13991_v39 = vunpack.i.l.bf16 %v13990_v60 }
 0x1fa   : > { %v14000_v23 = vpop.permute.xlu1 %13999  ;;  %v2792_v28 = vsel %vm2762_vm9, %v2759_v47, %v13991_v39  ;;  %v2793_v50 = vsel %vm2762_vm9, %v2760_v18, %v13992_v22  ;;  %vm4605_vm9 = vcmask 588800  }
 0x1fb   : > { %v14002_v7 = vunpack.i.h.bf16 %v14000_v23  ;;  %v14001_v51 = vunpack.i.l.bf16 %v14000_v23  ;;  %v13995_v11 = vpop.permute.xlu0 %13994 }
 0x1fc   : > { %v13997_v52 = vunpack.i.h.bf16 %v13995_v11  ;;  %v13996_v5 = vunpack.i.l.bf16 %v13995_v11  ;;  %v13059_v53 = vpop.f32.mrb[0].mxu0 }
 0x1fd   : > { %v2997_v31 = vadd.f32 %v13059_v53, %v17401_v46  ;;  %v2988_v0 = vpop.f32.mrb[1].mxu0  ;;  %v2826_v57 = vsel %vm2795_vm10, %v2793_v50, %v14001_v51  ;;  %v2827_v43 = vsel %vm2795_vm10, %v2794_v25, %v14002_v7 }
 0x1fe   : > { %v2824_v3 = vsel %vm2795_vm10, %v2791_v38, %v13996_v5  ;;  %v2989_v17 = vadd.f32 %v17401_v46, %v2988_v0  ;;  %v13060_v21 = vpop.f32.mrb[2].mxu0  ;;  %v17419_v40 = vpop.permute.xlu1 %14009  ;;  %v2825_v10 = vsel %vm2795_vm10, %v2792_v28, %v13997_v52  ;;  %vm5283_vm10 = vcmask 58368  }
 0x1ff   : > { %v3117_v15 = vmax.f32 %v2997_v31, 0.0  ;;  %v3000_v4 = vadd.f32 %v13060_v21, %v17401_v46  ;;  %v14011_v44 = vunpack.i.l.bf16 %v17419_v40  ;;  %v14005_v12 = vpop.permute.xlu0 %14004  ;;  %v2991_v27 = vpop.f32.mrb[3].mxu0 }
 0x200   : > { %v3115_v35 = vmax.f32 %v2989_v17, 0.0  ;;  %v14007_v33 = vunpack.i.h.bf16 %v14005_v12  ;;  %v14006_v16 = vunpack.i.l.bf16 %v14005_v12  ;;  %v2992_v56 = vadd.f32 %v17401_v46, %v2991_v27 }
 0x201   : > { %3150 = vst.msk [vmem:[%s17416_s5 + $0x10] sm:$0xff] %vm3147_vm13, %v3117_v15  ;;  %v3215_v32 = vrot.slane %v3117_v15, 7  ;;  %v3118_v20 = vmax.f32 %v3000_v4, 0.0  ;;  %v2859_v8 = vsel %vm20973_vm11, %v2826_v57, %v14011_v44  ;;  %v2860_v19 = vsel %vm20973_vm11, %v2827_v43, %v14011_v44 }
 0x202   : > { %3148 = vst.msk [vmem:[%s17416_s5] sm:$0xff] %vm3147_vm13, %v3115_v35  ;;  %v2857_v62 = vsel %vm20973_vm11, %v2824_v3, %v14006_v16  ;;  %v2858_v1 = vsel %vm20973_vm11, %v2825_v10, %v14007_v33  ;;  %v3116_v36 = vmax.f32 %v2992_v56, 0.0  ;;  %v2876_v49 = vpack.c.bf16 %v2860_v19, %v2859_v8 }
 0x203   : > { %3151 = vst.msk [vmem:[%s17416_s5 + $0x18] sm:$0xff] %vm3147_vm13, %v3118_v20  ;;  %v3216_v2 = vrot.slane %v3118_v20, 7  ;;  %v2875_v29 = vpack.c.bf16 %v2858_v1, %v2857_v62  ;;  %v17436_v41 = vsel %vm1517_vm0, 0.0, %v3215_v32  ;;  %v3212_v30 = vrot.slane %v3115_v35, 7 }
 0x204   : > { %3149 = vst.msk [vmem:[%s17416_s5 + $0x8] sm:$0xff] %vm3147_vm13, %v3116_v36  ;;  %v3213_v9 = vrot.slane %v3116_v36, 7  ;;  %v3564_v55 = vrot.slane %v17436_v41, 1  ;;  %v3927_v39 = vrot.slane %v17436_v41, 2 }
 0x205   : > { %v17441_v58 = vsel %vm1517_vm0, %v3215_v32, %v3216_v2  ;;  %v3324_v63 = vsel %vm1517_vm0, %v3216_v2, 0.0  ;;  %13085 = vmatprep.mubr.msk.bf16.mxu0 %vm2899_vm12, %v2875_v29  ;;  %v17460_v37 = vsel %vm1517_vm0, 0.0, %v3212_v30  ;;  %v14910_v29 = vld [vmem:[%s21059_s17] sm:$0xff]  }
 0x206   : > { %v3565_v42 = vrot.slane %v17441_v58, 1  ;;  %v3567_v60 = vrot.slane %v3324_v63, 1  ;;  %13086 = vmatmul.mubr.msk.bf16.gmra.mrb[28].mxu0 %vm2899_vm12, %v2876_v49  ;;  %v17449_v59 = vsel %vm1517_vm0, %v3212_v30, %v3213_v9  ;;  %v14018_v34 = vpack.i.bf16 %v17441_v58, %v17436_v41  ;;  %13089 = vmatprep.subr.bf16.mxu1 %v14910_v29 }
 0x207   : > { %v3928_v24 = vrot.slane %v17441_v58, 2  ;;  %v3930_v45 = vrot.slane %v3324_v63, 2  ;;  %v14023_v6 = vpack.i.bf16 %v17449_v59, %v17460_v37  ;;  %v3323_v61 = vsel %vm1517_vm0, %v3213_v9, 0.0  ;;  %13090 = vmatpush3.bf16.msra.mxu1 %v14910_v29 }
 0x208   : > { %14019 = vrot.lane.b32.xlu0 %v14018_v34, %s15582_s15  ;;  %14014 = vrot.lane.b32.xlu1 %v14018_v34, %s20975_s18  ;;  %v3566_v13 = vsel %vm1866_vm1, %v3564_v55, %v3565_v42  ;;  %v3568_v22 = vsel %vm1866_vm1, %v3565_v42, %v3567_v60  ;;  %v3560_v51 = vrot.slane %v17449_v59, 1  ;;  %v3562_v11 = vrot.slane %v3323_v61, 1 }
 0x209   : > { %v14033_v14 = vpack.i.bf16 %v3568_v22, %v3566_v13  ;;  %v3929_v23 = vsel %vm2232_vm2, %v3927_v39, %v3928_v24  ;;  %v17466_v18 = vsel %vm2232_vm2, %v3928_v24, %v3930_v45  ;;  %v3559_v47 = vrot.slane %v17460_v37, 1  ;;  %v14911_v45 = vld [vmem:[%s21059_s17 + $0x8] sm:$0xff]   ;;  %v14912_v13 = vld [vmem:[%s21059_s17 + $0x10] sm:$0xff]  }
 0x20a   : > { %v14043_v7 = vpack.i.bf16 %v17466_v18, %v3929_v23  ;;  %v3923_v25 = vrot.slane %v17449_v59, 2  ;;  %v3925_v52 = vrot.slane %v3323_v61, 2  ;;  %v3563_v53 = vsel %vm1866_vm1, %v3560_v51, %v3562_v11  ;;  %13091 = vmatprep.subr.bf16.mxu1 %v14911_v45 }
 0x20b   : > { %v3561_v5 = vsel %vm1866_vm1, %v3559_v47, %v3560_v51  ;;  %v3922_v28 = vrot.slane %v17460_v37, 2  ;;  %13092 = vmatpush3.bf16.msra.mxu1 %v14911_v45  ;;  %v14913_v51 = vld [vmem:[%s21059_s17 + $0x18] sm:$0xff]   ;;  %vm5796_vm12 = vcmask 1042434  }
 0x20c   : > { %14034 = vrot.lane.b32.xlu1 %v14033_v14, %s15584_s23  ;;  %14024 = vrot.lane.b32.xlu0 %v14023_v6, %s20975_s18  ;;  %v14058_v50 = vpack.i.bf16 %v3563_v53, %v3561_v5  ;;  %v3926_v31 = vsel %vm2232_vm2, %v3923_v25, %v3925_v52 }
 0x20d   : > { %v3924_v38 = vsel %vm2232_vm2, %v3922_v28, %v3923_v25  ;;  %v14068_v57 = vpack.i.bf16 %v3929_v23, %v3926_v31  ;;  %13093 = vmatprep.subr.bf16.mxu1 %v14912_v13  ;;  %v14914_v28 = vld [vmem:[%s21059_s17 + $0x20] ss:$0 sps:$4 sm:$0xff]  }
 0x20e   : > { %v14063_v0 = vpack.i.bf16 %v3924_v38, %v21176_v48  ;;  %v14073_v12 = vpack.i.bf16 %v3926_v31, %v3924_v38 }
 0x20f   : > { %13094 = vmatpush3.bf16.msra.mxu1 %v14912_v13 }
 0x210   : > { %14044 = vrot.lane.b32.xlu1 %v14043_v7, %s20982_s26  ;;  %14029 = vrot.lane.b32.xlu0 %v14033_v14, %s20984_s2 }
 0x211   : > { %13095 = vmatprep.subr.bf16.mxu1 %v14913_v51 }
 0x213   : > { %13096 = vmatpush3.bf16.msra.mxu1 %v14913_v51 }
 0x214   : > { %14049 = vrot.lane.b32.xlu1 %v14033_v14, %s21089_s13  ;;  %14039 = vrot.lane.b32.xlu0 %v14043_v7, %s15587_s10 }
 0x215   : > { %13241 = vmatprep.subr.msk.bf16.mxu1 %vm4654_vm14, %v14914_v28 }
 0x218   : > { %14059 = vrot.lane.b32.xlu1 %v14058_v50, %s20984_s2  ;;  %14054 = vrot.lane.b32.xlu0 %v14058_v50, %s21089_s13 }
 0x21c   : > { %v13063_v43 = vpop.f32.mrb[4].mxu0  ;;  %14064 = vrot.lane.b32.xlu1 %v14063_v0, %s15588_s1  ;;  %14069 = vrot.lane.b32.xlu0 %v14068_v57, %s15588_s1  ;;  %v4656_v57 = vsel %vm4654_vm14, %v14914_v28, 0 }
 0x21d   : > { %v3013_v3 = vadd.f32 %v13063_v43, %v17401_v46  ;;  %v3004_v17 = vpop.f32.mrb[5].mxu0  ;;  %13098 = vmatpush3.bf16.msra.mxu1 %v4656_v57 }
 0x21e   : > { %v3005_v21 = vadd.f32 %v17401_v46, %v3004_v17  ;;  %v13064_v10 = vpop.f32.mrb[6].mxu0 }
 0x21f   : > { %v3121_v15 = vmax.f32 %v3013_v3, 0.0  ;;  %v3016_v4 = vadd.f32 %v13064_v10, %v17401_v46  ;;  %v3007_v44 = vpop.f32.mrb[7].mxu0 }
 0x220   : > { %v3119_v27 = vmax.f32 %v3005_v21, 0.0  ;;  %v3008_v35 = vadd.f32 %v17401_v46, %v3007_v44  ;;  %14074 = vrot.lane.b32.xlu1 %v14073_v12, %s15587_s10 }
 0x221   : > { %3154 = vst.msk [vmem:[%s17416_s5 + $0x30] sm:$0xff] %vm3147_vm13, %v3121_v15  ;;  %v3122_v33 = vmax.f32 %v3016_v4, 0.0  ;;  %v3221_v16 = vrot.slane %v3121_v15, 7 }
 0x222   : > { %3152 = vst.msk [vmem:[%s17416_s5 + $0x20] sm:$0xff] %vm3147_vm13, %v3119_v27  ;;  %v3120_v56 = vmax.f32 %v3008_v35, 0.0  ;;  %v3218_v8 = vrot.slane %v3119_v27, 7 }
 0x223   : > { %3155 = vst.msk [vmem:[%s17416_s5 + $0x38] sm:$0xff] %vm3147_vm13, %v3122_v33  ;;  %v3222_v32 = vrot.slane %v3122_v33, 7  ;;  %v17507_v1 = vsel %vm1517_vm0, 0.0, %v3221_v16 }
 0x224   : > { %3153 = vst.msk [vmem:[%s17416_s5 + $0x28] sm:$0xff] %vm3147_vm13, %v3120_v56  ;;  %v3219_v20 = vrot.slane %v3120_v56, 7  ;;  %v3574_v30 = vrot.slane %v17507_v1, 1  ;;  %v17520_v63 = vsel %vm1517_vm0, 0.0, %v3218_v8  ;;  %v3937_v39 = vrot.slane %v17507_v1, 2 }
 0x225   : > { %v17503_v19 = vsel %vm1517_vm0, %v3221_v16, %v3222_v32  ;;  %v3326_v62 = vsel %vm1517_vm0, %v3222_v32, 0.0  ;;  %v3569_v11 = vrot.slane %v17520_v63, 1  ;;  %v3932_v50 = vrot.slane %v17520_v63, 2 }
 0x226   : > { %v17510_v36 = vsel %vm1517_vm0, %v3218_v8, %v3219_v20  ;;  %v14083_v2 = vpack.i.bf16 %v17503_v19, %v17507_v1  ;;  %v3575_v49 = vrot.slane %v17503_v19, 1  ;;  %v3577_v9 = vrot.slane %v3326_v62, 1 }
 0x227   : > { %v14088_v42 = vpack.i.bf16 %v17510_v36, %v17520_v63  ;;  %v3938_v60 = vrot.slane %v17503_v19, 2  ;;  %v3940_v55 = vrot.slane %v3326_v62, 2  ;;  %v3325_v22 = vsel %vm1517_vm0, %v3219_v20, 0.0 }
 0x228   : > { %14084 = vrot.lane.b32.xlu1 %v14083_v2, %s15582_s15  ;;  %14079 = vrot.lane.b32.xlu0 %v14083_v2, %s20975_s18  ;;  %v3576_v34 = vsel %vm1866_vm1, %v3574_v30, %v3575_v49  ;;  %v3578_v24 = vsel %vm1866_vm1, %v3575_v49, %v3577_v9  ;;  %v3570_v6 = vrot.slane %v17510_v36, 1  ;;  %v3572_v23 = vrot.slane %v3325_v22, 1 }
 0x229   : > { %v14103_v14 = vpack.i.bf16 %v3578_v24, %v3576_v34  ;;  %v3939_v61 = vsel %vm2232_vm2, %v3937_v39, %v3938_v60  ;;  %v17536_v7 = vsel %vm2232_vm2, %v3938_v60, %v3940_v55  ;;  %v3933_v25 = vrot.slane %v17510_v36, 2 }
 0x22a   : > { %v14113_v47 = vpack.i.bf16 %v17536_v7, %v3939_v61  ;;  %v3935_v52 = vrot.slane %v3325_v22, 2  ;;  %v3571_v5 = vsel %vm1866_vm1, %v3569_v11, %v3570_v6  ;;  %v3573_v53 = vsel %vm1866_vm1, %v3570_v6, %v3572_v23 }
 0x22b   : > { %v14123_v38 = vpack.i.bf16 %v3573_v53, %v3571_v5  ;;  %v3934_v31 = vsel %vm2232_vm2, %v3932_v50, %v3933_v25 }
 0x22c   : > { %14089 = vrot.lane.b32.xlu1 %v14088_v42, %s15582_s15  ;;  %14094 = vrot.lane.b32.xlu0 %v14088_v42, %s20975_s18  ;;  %v3936_v0 = vsel %vm2232_vm2, %v3933_v25, %v3935_v52  ;;  %v14143_v8 = vpack.i.bf16 %v3934_v31, %v17466_v18 }
 0x22d   : > { %v14128_v43 = vpack.i.bf16 %v3936_v0, %v3934_v31  ;;  %v14148_v27 = vpack.i.bf16 %v3939_v61, %v3936_v0 }
 0x230   : > { %14104 = vrot.lane.b32.xlu1 %v14103_v14, %s15584_s23  ;;  %14099 = vrot.lane.b32.xlu0 %v14103_v14, %s20984_s2 }
 0x234   : > { %14114 = vrot.lane.b32.xlu1 %v14113_v47, %s20982_s26  ;;  %14109 = vrot.lane.b32.xlu0 %v14113_v47, %s15587_s10 }
 0x238   : > { %14119 = vrot.lane.b32.xlu1 %v14103_v14, %s21089_s13  ;;  %14124 = vrot.lane.b32.xlu0 %v14123_v38, %s15584_s23 }
 0x23c   : > { %v13067_v3 = vpop.f32.mrb[8].mxu0  ;;  %14129 = vrot.lane.b32.xlu1 %v14128_v43, %s20982_s26  ;;  %14134 = vrot.lane.b32.xlu0 %v14123_v38, %s21089_s13 }
 0x23d   : > { %v3029_v17 = vadd.f32 %v13067_v3, %v17401_v46  ;;  %v3020_v21 = vpop.f32.mrb[9].mxu0 }
 0x23e   : > { %v3021_v10 = vadd.f32 %v17401_v46, %v3020_v21  ;;  %v13068_v15 = vpop.f32.mrb[10].mxu0 }
 0x23f   : > { %v3125_v4 = vmax.f32 %v3029_v17, 0.0  ;;  %v3032_v44 = vadd.f32 %v13068_v15, %v17401_v46  ;;  %v3023_v12 = vpop.f32.mrb[11].mxu0 }
 0x240   : > { %v3123_v35 = vmax.f32 %v3021_v10, 0.0  ;;  %v3024_v33 = vadd.f32 %v17401_v46, %v3023_v12  ;;  %14139 = vrot.lane.b32.xlu1 %v14123_v38, %s20984_s2  ;;  %14149 = vrot.lane.b32.xlu0 %v14148_v27, %s15588_s1 }
 0x241   : > { %3158 = vst.msk [vmem:[%s17416_s5 + $0x50] sm:$0xff] %vm3147_vm13, %v3125_v4  ;;  %v3126_v16 = vmax.f32 %v3032_v44, 0.0  ;;  %v3227_v56 = vrot.slane %v3125_v4, 7 }
 0x242   : > { %3156 = vst.msk [vmem:[%s17416_s5 + $0x40] sm:$0xff] %vm3147_vm13, %v3123_v35  ;;  %v3124_v32 = vmax.f32 %v3024_v33, 0.0  ;;  %v3224_v2 = vrot.slane %v3123_v35, 7 }
 0x243   : > { %3159 = vst.msk [vmem:[%s17416_s5 + $0x58] sm:$0xff] %vm3147_vm13, %v3126_v16  ;;  %v3228_v20 = vrot.slane %v3126_v16, 7  ;;  %v17579_v9 = vsel %vm1517_vm0, 0.0, %v3227_v56 }
 0x244   : > { %3157 = vst.msk [vmem:[%s17416_s5 + $0x48] sm:$0xff] %vm3147_vm13, %v3124_v32  ;;  %v3225_v62 = vrot.slane %v3124_v32, 7  ;;  %14144 = vrot.lane.b32.xlu1 %v14143_v8, %s15588_s1  ;;  %v3584_v55 = vrot.slane %v17579_v9, 1  ;;  %v17591_v34 = vsel %vm1517_vm0, 0.0, %v3224_v2  ;;  %v3947_v14 = vrot.slane %v17579_v9, 2 }
 0x245   : > { %v17574_v29 = vsel %vm1517_vm0, %v3227_v56, %v3228_v20  ;;  %v3328_v49 = vsel %vm1517_vm0, %v3228_v20, 0.0  ;;  %v3579_v53 = vrot.slane %v17591_v34, 1  ;;  %v3942_v28 = vrot.slane %v17591_v34, 2 }
 0x246   : > { %v17582_v30 = vsel %vm1517_vm0, %v3224_v2, %v3225_v62  ;;  %v14158_v18 = vpack.i.bf16 %v17574_v29, %v17579_v9  ;;  %v3585_v42 = vrot.slane %v17574_v29, 1  ;;  %v3587_v60 = vrot.slane %v3328_v49, 1 }
 0x247   : > { %v14168_v24 = vpack.i.bf16 %v17582_v30, %v17591_v34  ;;  %v3948_v45 = vrot.slane %v17574_v29, 2  ;;  %v3950_v13 = vrot.slane %v3328_v49, 2  ;;  %v3327_v51 = vsel %vm1517_vm0, %v3225_v62, 0.0 }
 0x248   : > { %14154 = vrot.lane.b32.xlu1 %v14128_v43, %s15587_s10  ;;  %14159 = vrot.lane.b32.xlu0 %v14158_v18, %s20975_s18  ;;  %v3586_v22 = vsel %vm1866_vm1, %v3584_v55, %v3585_v42  ;;  %v3588_v39 = vsel %vm1866_vm1, %v3585_v42, %v3587_v60  ;;  %v3580_v47 = vrot.slane %v17582_v30, 1  ;;  %v3582_v25 = vrot.slane %v3327_v51, 1 }
 0x249   : > { %v14183_v6 = vpack.i.bf16 %v3588_v39, %v3586_v22  ;;  %v3949_v23 = vsel %vm2232_vm2, %v3947_v14, %v3948_v45  ;;  %v17603_v61 = vsel %vm2232_vm2, %v3948_v45, %v3950_v13  ;;  %v3943_v52 = vrot.slane %v17582_v30, 2 }
 0x24a   : > { %v14193_v11 = vpack.i.bf16 %v17603_v61, %v3949_v23  ;;  %v3945_v5 = vrot.slane %v3327_v51, 2  ;;  %v3581_v31 = vsel %vm1866_vm1, %v3579_v53, %v3580_v47  ;;  %v3583_v0 = vsel %vm1866_vm1, %v3580_v47, %v3582_v25 }
 0x24b   : > { %v3944_v50 = vsel %vm2232_vm2, %v3942_v28, %v3943_v52  ;;  %v14203_v43 = vpack.i.bf16 %v3583_v0, %v3581_v31 }
 0x24c   : > { %14164 = vrot.lane.b32.xlu1 %v14158_v18, %s15582_s15  ;;  %14169 = vrot.lane.b32.xlu0 %v14168_v24, %s15582_s15  ;;  %v3946_v38 = vsel %vm2232_vm2, %v3943_v52, %v3945_v5  ;;  %v14223_v20 = vpack.i.bf16 %v3944_v50, %v17536_v7 }
 0x24d   : > { %v14208_v57 = vpack.i.bf16 %v3946_v38, %v3944_v50  ;;  %v14228_v8 = vpack.i.bf16 %v3949_v23, %v3946_v38 }
 0x250   : > { %14184 = vrot.lane.b32.xlu1 %v14183_v6, %s15584_s23  ;;  %14174 = vrot.lane.b32.xlu0 %v14168_v24, %s20975_s18 }
 0x254   : > { %14194 = vrot.lane.b32.xlu1 %v14193_v11, %s20982_s26  ;;  %14179 = vrot.lane.b32.xlu0 %v14183_v6, %s20984_s2 }
 0x258   : > { %14199 = vrot.lane.b32.xlu1 %v14183_v6, %s21089_s13  ;;  %14189 = vrot.lane.b32.xlu0 %v14193_v11, %s15587_s10 }
 0x25c   : > { %v13071_v3 = vpop.f32.mrb[12].mxu0  ;;  %14209 = vrot.lane.b32.xlu1 %v14208_v57, %s20982_s26  ;;  %14204 = vrot.lane.b32.xlu0 %v14203_v43, %s15584_s23 }
 0x25d   : > { %v3045_v17 = vadd.f32 %v13071_v3, %v17401_v46  ;;  %v3036_v21 = vpop.f32.mrb[13].mxu0 }
 0x25e   : > { %v3037_v10 = vadd.f32 %v17401_v46, %v3036_v21  ;;  %v13072_v15 = vpop.f32.mrb[14].mxu0 }
 0x25f   : > { %v3129_v4 = vmax.f32 %v3045_v17, 0.0  ;;  %v3048_v44 = vadd.f32 %v13072_v15, %v17401_v46  ;;  %v3039_v12 = vpop.f32.mrb[15].mxu0 }
 0x260   : > { %v3127_v27 = vmax.f32 %v3037_v10, 0.0  ;;  %v3040_v35 = vadd.f32 %v17401_v46, %v3039_v12  ;;  %14219 = vrot.lane.b32.xlu1 %v14203_v43, %s20984_s2  ;;  %14214 = vrot.lane.b32.xlu0 %v14203_v43, %s21089_s13 }
 0x261   : > { %3162 = vst.msk [vmem:[%s17416_s5 + $0x70] sm:$0xff] %vm3147_vm13, %v3129_v4  ;;  %v3130_v33 = vmax.f32 %v3048_v44, 0.0  ;;  %v3233_v16 = vrot.slane %v3129_v4, 7 }
 0x262   : > { %3160 = vst.msk [vmem:[%s17416_s5 + $0x60] sm:$0xff] %vm3147_vm13, %v3127_v27  ;;  %v3128_v56 = vmax.f32 %v3040_v35, 0.0  ;;  %v3230_v2 = vrot.slane %v3127_v27, 7 }
 0x263   : > { %3163 = vst.msk [vmem:[%s17416_s5 + $0x78] sm:$0xff] %vm3147_vm13, %v3130_v33  ;;  %v3234_v32 = vrot.slane %v3130_v33, 7  ;;  %v17645_v42 = vsel %vm1517_vm0, 0.0, %v3233_v16 }
 0x264   : > { %3161 = vst.msk [vmem:[%s17416_s5 + $0x68] sm:$0xff] %vm3147_vm13, %v3128_v56  ;;  %v3231_v62 = vrot.slane %v3128_v56, 7  ;;  %14224 = vrot.lane.b32.xlu1 %v14223_v20, %s15588_s1  ;;  %14229 = vrot.lane.b32.xlu0 %v14228_v8, %s15588_s1  ;;  %v3594_v45 = vrot.slane %v17645_v42, 1  ;;  %v17657_v13 = vsel %vm1517_vm0, 0.0, %v3230_v2  ;;  %v3957_v51 = vrot.slane %v17645_v42, 2 }
 0x265   : > { %v17639_v49 = vsel %vm1517_vm0, %v3233_v16, %v3234_v32  ;;  %v3330_v18 = vsel %vm1517_vm0, %v3234_v32, 0.0  ;;  %v3589_v31 = vrot.slane %v17657_v13, 1  ;;  %v3952_v0 = vrot.slane %v17657_v13, 2 }
 0x266   : > { %v17648_v60 = vsel %vm1517_vm0, %v3230_v2, %v3231_v62  ;;  %v14238_v7 = vpack.i.bf16 %v17639_v49, %v17645_v42  ;;  %v3595_v55 = vrot.slane %v17639_v49, 1  ;;  %v3597_v24 = vrot.slane %v3330_v18, 1 }
 0x267   : > { %v14248_v22 = vpack.i.bf16 %v17648_v60, %v17657_v13  ;;  %v3958_v39 = vrot.slane %v17639_v49, 2  ;;  %v3960_v14 = vrot.slane %v3330_v18, 2  ;;  %v3329_v52 = vsel %vm1517_vm0, %v3231_v62, 0.0 }
 0x268   : > { %14234 = vrot.lane.b32.xlu1 %v14208_v57, %s15587_s10  ;;  %14239 = vrot.lane.b32.xlu0 %v14238_v7, %s20975_s18  ;;  %v3596_v6 = vsel %vm1866_vm1, %v3594_v45, %v3595_v55  ;;  %v3598_v23 = vsel %vm1866_vm1, %v3595_v55, %v3597_v24  ;;  %v3590_v53 = vrot.slane %v17648_v60, 1  ;;  %v3592_v28 = vrot.slane %v3329_v52, 1 }
 0x269   : > { %v14263_v11 = vpack.i.bf16 %v3598_v23, %v3596_v6  ;;  %v3959_v47 = vsel %vm2232_vm2, %v3957_v51, %v3958_v39  ;;  %v17669_v25 = vsel %vm2232_vm2, %v3958_v39, %v3960_v14  ;;  %v3953_v50 = vrot.slane %v17648_v60, 2 }
 0x26a   : > { %v14273_v5 = vpack.i.bf16 %v17669_v25, %v3959_v47  ;;  %v3955_v38 = vrot.slane %v3329_v52, 2  ;;  %v3591_v3 = vsel %vm1866_vm1, %v3589_v31, %v3590_v53  ;;  %v3593_v17 = vsel %vm1866_vm1, %v3590_v53, %v3592_v28 }
 0x26b   : > { %v3954_v57 = vsel %vm2232_vm2, %v3952_v0, %v3953_v50  ;;  %v14283_v4 = vpack.i.bf16 %v3593_v17, %v3591_v3 }
 0x26c   : > { %14244 = vrot.lane.b32.xlu1 %v14238_v7, %s15582_s15  ;;  %14249 = vrot.lane.b32.xlu0 %v14248_v22, %s15582_s15  ;;  %v3956_v43 = vsel %vm2232_vm2, %v3953_v50, %v3955_v38  ;;  %v14303_v18 = vpack.i.bf16 %v3954_v57, %v17603_v61 }
 0x26d   : > { %v14288_v15 = vpack.i.bf16 %v3956_v43, %v3954_v57 }
 0x270   : > { %14264 = vrot.lane.b32.xlu1 %v14263_v11, %s15584_s23  ;;  %14254 = vrot.lane.b32.xlu0 %v14248_v22, %s20975_s18  ;;  %v14308_v22 = vpack.i.bf16 %v3959_v47, %v3956_v43 }
 0x274   : > { %14274 = vrot.lane.b32.xlu1 %v14273_v5, %s20982_s26  ;;  %14259 = vrot.lane.b32.xlu0 %v14263_v11, %s20984_s2 }
 0x278   : > { %14279 = vrot.lane.b32.xlu1 %v14263_v11, %s21089_s13  ;;  %14269 = vrot.lane.b32.xlu0 %v14273_v5, %s15587_s10  ;;  %v17726_v5 = vunpack.i.h.bf16 %v17419_v40 }
 0x27a   : > { %v17687_v21 = vpop.permute.xlu0 %14019  ;;  %v17689_v10 = vpop.permute.xlu1 %14014  ;;  %21184 = vst [vmem:[#allocation70_spill] sm:$0xff] %v17726_v5 }
 0x27b   : > { %v14022_v50 = vunpack.i.h.bf16 %v17687_v21  ;;  %v14021_v38 = vunpack.i.l.bf16 %v17687_v21 }
 0x27c   : > { %v13075_v44 = vpop.f32.mrb[16].mxu0  ;;  %14289 = vrot.lane.b32.xlu1 %v14288_v15, %s20982_s26  ;;  %14284 = vrot.lane.b32.xlu0 %v14283_v4, %s15584_s23 }
 0x27d   : > { %v3061_v12 = vadd.f32 %v13075_v44, %v17401_v46  ;;  %v3052_v27 = vpop.f32.mrb[17].mxu0 }
 0x27e   : > { %v3053_v35 = vadd.f32 %v17401_v46, %v3052_v27  ;;  %v13076_v33 = vpop.f32.mrb[18].mxu0  ;;  %v17695_v56 = vpop.permute.xlu1 %14034 }
 0x27f   : > { %v3133_v16 = vmax.f32 %v3061_v12, 0.0  ;;  %v3064_v32 = vadd.f32 %v13076_v33, %v17401_v46  ;;  %v14025_v20 = vpop.permute.xlu0 %14024  ;;  %v3055_v62 = vpop.f32.mrb[19].mxu0 }
 0x280   : > { %v3131_v8 = vmax.f32 %v3053_v35, 0.0  ;;  %14299 = vrot.lane.b32.xlu1 %v14283_v4, %s20984_s2  ;;  %14294 = vrot.lane.b32.xlu0 %v14283_v4, %s21089_s13  ;;  %v3056_v24 = vadd.f32 %v17401_v46, %v3055_v62  ;;  %v14027_v61 = vunpack.i.h.bf16 %v14025_v20  ;;  %v14026_v23 = vunpack.i.l.bf16 %v14025_v20 }
 0x281   : > { %3166 = vst.msk [vmem:[%s17416_s5 + $0x90] sm:$0xff] %vm3147_vm13, %v3133_v16  ;;  %v3134_v2 = vmax.f32 %v3064_v32, 0.0  ;;  %v3239_v7 = vrot.slane %v3133_v16, 7 }
 0x282   : > { %3164 = vst.msk [vmem:[%s17416_s5 + $0x80] sm:$0xff] %vm3147_vm13, %v3131_v8  ;;  %v17708_v45 = vpop.permute.xlu1 %14044  ;;  %v3236_v11 = vrot.slane %v3131_v8, 7  ;;  %v3132_v47 = vmax.f32 %v3056_v24, 0.0  ;;  %v4285_v57 = vsel %vm3147_vm13, 0.0, %v14027_v61  ;;  %v4284_v40 = vsel %vm3147_vm13, 0.0, %v14026_v23 }
 0x283   : > { %3167 = vst.msk [vmem:[%s17416_s5 + $0x98] sm:$0xff] %vm3147_vm13, %v3134_v2  ;;  %v3240_v55 = vrot.slane %v3134_v2, 7  ;;  %v17716_v6 = vpop.permute.xlu0 %14029  ;;  %v17721_v51 = vsel %vm1517_vm0, 0.0, %v3239_v7  ;;  %v4318_v33 = vsel %vm20970_vm15, %v4285_v57, %v14022_v50  ;;  %v4317_v16 = vsel %vm20970_vm15, %v4284_v40, %v14021_v38 }
 0x284   : > { %14304 = vrot.lane.b32.xlu1 %v14303_v18, %s15588_s1  ;;  %14309 = vrot.lane.b32.xlu0 %v14308_v22, %s15588_s1  ;;  %3165 = vst.msk [vmem:[%s17416_s5 + $0x88] sm:$0xff] %vm3147_vm13, %v3132_v47  ;;  %v3237_v31 = vrot.slane %v3132_v47, 7  ;;  %v3604_v0 = vrot.slane %v17721_v51, 1  ;;  %v17741_v3 = vsel %vm1517_vm0, 0.0, %v3236_v11  ;;  %v4350_v24 = vsel %vm20973_vm11, %v4318_v33, %v17726_v5 }
 0x285   : > { %v17711_v39 = vsel %vm1517_vm0, %v3239_v7, %v3240_v55  ;;  %v17714_v14 = vsel %vm1517_vm0, %v3240_v55, 0.0  ;;  %v3962_v8 = vrot.slane %v17741_v3, 2  ;;  %v4349_v22 = vsel %vm20973_vm11, %v4317_v16, %v17726_v5 }
 0x286   : > { %v17723_v52 = vpop.permute.xlu1 %14049  ;;  %v3605_v53 = vrot.slane %v17711_v39, 1  ;;  %v3607_v28 = vrot.slane %v17714_v14, 1  ;;  %v14318_v43 = vpack.i.bf16 %v17711_v39, %v17721_v51  ;;  %v17744_v17 = vsel %vm1517_vm0, %v3236_v11, %v3237_v31 }
 0x287   : > { %v3331_v21 = vsel %vm1517_vm0, %v3237_v31, 0.0  ;;  %v17747_v4 = vpop.permute.xlu0 %14039  ;;  %v3963_v44 = vrot.slane %v17744_v17, 2  ;;  %v14328_v62 = vpack.i.bf16 %v17744_v17, %v17741_v3  ;;  %v3600_v2 = vrot.slane %v17744_v17, 1 }
 0x288   : > { %14314 = vrot.lane.b32.xlu1 %v14288_v15, %s15587_s10  ;;  %v3965_v12 = vrot.slane %v3331_v21, 2  ;;  %14319 = vrot.lane.b32.xlu0 %v14318_v43, %s20975_s18  ;;  %v3606_v27 = vsel %vm1866_vm1, %v3604_v0, %v3605_v53  ;;  %v3608_v35 = vsel %vm1866_vm1, %v3605_v53, %v3607_v28  ;;  %v3602_v18 = vrot.slane %v3331_v21, 1 }
 0x289   : > { %v17762_v55 = vpack.i.bf16 %v3608_v35, %v3606_v27  ;;  %v3964_v61 = vsel %vm2232_vm2, %v3962_v8, %v3963_v44  ;;  %v3599_v11 = vrot.slane %v17741_v3, 1  ;;  %v14037_v38 = vunpack.i.h.bf16 %v17695_v56 }
 0x28a   : > { %v14060_v15 = vpop.permute.xlu1 %14059  ;;  %v17771_v23 = vsel %vm2232_vm2, %v3963_v44, %v3965_v12  ;;  %v14036_v31 = vunpack.i.l.bf16 %v17695_v56  ;;  %v14047_v27 = vunpack.i.h.bf16 %v17708_v45  ;;  %v14046_v56 = vunpack.i.l.bf16 %v17708_v45 }
 0x28b   : > { %v14062_v32 = vunpack.i.h.bf16 %v14060_v15  ;;  %v14061_v20 = vunpack.i.l.bf16 %v14060_v15  ;;  %v17776_v28 = vpop.permute.xlu0 %14054  ;;  %v14353_v57 = vpack.i.bf16 %v17771_v23, %v3964_v61  ;;  %v3601_v40 = vsel %vm1866_vm1, %v3599_v11, %v3600_v2 }
 0x28c   : > { %14324 = vrot.lane.b32.xlu1 %v14318_v43, %s15582_s15  ;;  %14329 = vrot.lane.b32.xlu0 %v14328_v62, %s15582_s15  ;;  %v3603_v43 = vsel %vm1866_vm1, %v3600_v2, %v3602_v18  ;;  %v3968_v18 = vrot.slane %v17711_v39, 2 }
 0x28d   : > { %v4383_v47 = vsel %vm20969_vm4, %v4350_v24, %v14062_v32  ;;  %v4382_v53 = vsel %vm20969_vm4, %v4349_v22, %v14061_v20  ;;  %v14363_v8 = vpack.i.bf16 %v3603_v43, %v3601_v40  ;;  %v3970_v24 = vrot.slane %v17714_v14, 2 }
 0x28e   : > { %v17760_v7 = vpop.permute.xlu1 %14064  ;;  %v4415_v44 = vsel %vm20966_vm5, %v4382_v53, %v14036_v31  ;;  %v4416_v12 = vsel %vm20966_vm5, %v4383_v47, %v14037_v38  ;;  %v14368_v47 = vpack.i.bf16 %v3964_v61, %v17669_v25  ;;  %v3967_v38 = vrot.slane %v17721_v51, 2 }
 0x28f   : > { %v17779_v50 = vunpack.i.l.bf16 %v17760_v7  ;;  %v17800_v20 = vpop.permute.xlu0 %14069 }
 0x290   : > { %14344 = vrot.lane.b32.xlu1 %v17762_v55, %s15584_s23  ;;  %14334 = vrot.lane.b32.xlu0 %v14328_v62, %s20975_s18  ;;  %v3969_v61 = vsel %vm2232_vm2, %v3967_v38, %v3968_v18  ;;  %v14031_v38 = vunpack.i.l.bf16 %v17716_v6 }
 0x291   : > { %21185 = vst [vmem:[#allocation82_spill] sm:$0xff] %v17779_v50  ;;  %v4448_v35 = vsel %vm20967_vm6, %v4415_v44, %v17779_v50  ;;  %v4449_v33 = vsel %vm20967_vm6, %v4416_v12, %v17779_v50  ;;  %v17825_v44 = vsel %vm2232_vm2, %v3968_v18, %v3970_v24 }
 0x292   : > { %v14075_v0 = vpop.permute.xlu1 %14074 }
 0x293   : > { %v14077_v21 = vunpack.i.h.bf16 %v14075_v0  ;;  %v14076_v15 = vunpack.i.l.bf16 %v14075_v0 }
 0x294   : > { %14354 = vrot.lane.b32.xlu1 %v14353_v57, %s20982_s26  ;;  %14339 = vrot.lane.b32.xlu0 %v17762_v55, %s20984_s2 }
 0x295   : > { %v4481_v16 = vsel %vm20968_vm7, %v4448_v35, %v14076_v15  ;;  %v4482_v32 = vsel %vm20968_vm7, %v4449_v33, %v14077_v21  ;;  %v14016_v33 = vunpack.i.l.bf16 %v17689_v10 }
 0x296   : > { %v4514_v62 = vsel %vm4513_vm8, %v4481_v16, %v14046_v56  ;;  %v4515_v2 = vsel %vm4513_vm8, %v4482_v32, %v14047_v27  ;;  %v14017_v56 = vunpack.i.h.bf16 %v17689_v10  ;;  %v14373_v32 = vpack.i.bf16 %v3969_v61, %v17771_v23 }
 0x297   : > { %v4546_v45 = vpack.c.bf16 %v4515_v2, %v4514_v62  ;;  %v17837_v62 = vpack.i.bf16 %v17825_v44, %v3969_v61  ;;  %v14067_v61 = vunpack.i.h.bf16 %v17760_v7 }
 0x298   : > { %14364 = vrot.lane.b32.xlu1 %v14363_v8, %s20984_s2  ;;  %14349 = vrot.lane.b32.xlu0 %v14363_v8, %s15584_s23 }
 0x299   : > { %13099 = vmatprep.mubr.msk.bf16.mxu1 %vm4605_vm9, %v4546_v45 }
 0x29a   : > { %v17810_v22 = vpop.permute.xlu1 %14084  ;;  %v17812_v11 = vpop.permute.xlu0 %14079 }
 0x29c   : > { %v13079_v53 = vpop.f32.mrb[20].mxu0  ;;  %14369 = vrot.lane.b32.xlu1 %v14368_v47, %s15588_s1  ;;  %14359 = vrot.lane.b32.xlu0 %v14363_v8, %s21089_s13  ;;  %v4286_v47 = vsel %vm3147_vm13, %v17460_v37, %v14016_v33  ;;  %v14057_v37 = vunpack.i.h.bf16 %v17776_v28 }
 0x29d   : > { %v3077_v31 = vadd.f32 %v13079_v53, %v17401_v46  ;;  %v3068_v0 = vpop.f32.mrb[21].mxu0  ;;  %v14032_v53 = vunpack.i.h.bf16 %v17716_v6  ;;  %v14041_v6 = vunpack.i.l.bf16 %v17747_v4 }
 0x29e   : > { %v3069_v40 = vadd.f32 %v17401_v46, %v3068_v0  ;;  %v13080_v14 = vpop.f32.mrb[22].mxu0  ;;  %v14090_v15 = vpop.permute.xlu1 %14089 }
 0x29f   : > { %v3137_v43 = vmax.f32 %v3077_v31, 0.0  ;;  %v3080_v21 = vadd.f32 %v13080_v14, %v17401_v46  ;;  %v17821_v25 = vpop.permute.xlu0 %14094  ;;  %v3071_v27 = vpop.f32.mrb[23].mxu0  ;;  %v14092_v16 = vunpack.i.h.bf16 %v14090_v15  ;;  %v14091_v45 = vunpack.i.l.bf16 %v14090_v15 }
 0x2a0   : > { %v3135_v12 = vmax.f32 %v3069_v40, 0.0  ;;  %14379 = vrot.lane.b32.xlu1 %v14353_v57, %s15587_s10  ;;  %v3072_v18 = vadd.f32 %v17401_v46, %v3071_v27  ;;  %14374 = vrot.lane.b32.xlu0 %v14373_v32, %s15588_s1  ;;  %v4287_v46 = vsel %vm3147_vm13, %v17449_v59, %v14017_v56  ;;  %v14056_v15 = vunpack.i.l.bf16 %v17776_v28 }
 0x2a1   : > { %3170 = vst.msk [vmem:[%s17416_s5 + $0xb0] sm:$0xff] %vm3147_vm13, %v3137_v43  ;;  %v3138_v35 = vmax.f32 %v3080_v21, 0.0  ;;  %v17839_v8 = vrot.slane %v3137_v43, 7  ;;  %v4320_v31 = vsel %vm20970_vm15, %v4287_v46, %v14092_v16  ;;  %v4319_v0 = vsel %vm20970_vm15, %v4286_v47, %v14091_v45 }
 0x2a2   : > { %3168 = vst.msk [vmem:[%s17416_s5 + $0xa0] sm:$0xff] %vm3147_vm13, %v3135_v12  ;;  %v17846_v57 = vpop.permute.xlu1 %14104  ;;  %v3242_v24 = vrot.slane %v3135_v12, 7  ;;  %v3136_v40 = vmax.f32 %v3072_v18, 0.0  ;;  %v14042_v21 = vunpack.i.h.bf16 %v17747_v4  ;;  %v14096_v12 = vunpack.i.l.bf16 %v17821_v25 }
 0x2a3   : > { %3171 = vst.msk [vmem:[%s17416_s5 + $0xb8] sm:$0xff] %vm3147_vm13, %v3138_v35  ;;  %v17843_v2 = vrot.slane %v3138_v35, 7  ;;  %v17848_v10 = vpop.permute.xlu0 %14099  ;;  %v14071_v56 = vunpack.i.l.bf16 %v17800_v20  ;;  %v4351_v35 = vsel %vm20973_vm11, %v4319_v0, %v14056_v15  ;;  %v4352_v33 = vsel %vm20973_vm11, %v4320_v31, %v14057_v37 }
 0x2a4   : > { %14399 = vrot.lane.b32.xlu1 %v17837_v62, %s20982_s26  ;;  %v17874_v59 = vsel %vm1517_vm0, 0.0, %v3242_v24  ;;  %3169 = vst.msk [vmem:[%s17416_s5 + $0xa8] sm:$0xff] %vm3147_vm13, %v3136_v40  ;;  %v3243_v27 = vrot.slane %v3136_v40, 7  ;;  %v14097_v28 = vunpack.i.h.bf16 %v17821_v25  ;;  %v4288_v25 = vsel %vm3147_vm13, %v17436_v41, %v14096_v12 }
 0x2a5   : > { %v17854_v23 = vsel %vm1517_vm0, %v17839_v8, %v17843_v2  ;;  %21187 = vst [vmem:[#allocation83_spill] sm:$0xff] %v17874_v59  ;;  %v3609_v16 = vrot.slane %v17874_v59, 1  ;;  %v3972_v32 = vrot.slane %v17874_v59, 2 }
 0x2a6   : > { %21186 = vst [vmem:[#allocation81_spill] sm:$0xff] %v17854_v23  ;;  %v17866_v14 = vpop.permute.xlu1 %14114  ;;  %v17888_v4 = vsel %vm1517_vm0, %v3242_v24, %v3243_v27  ;;  %v3333_v7 = vsel %vm1517_vm0, %v3243_v27, 0.0  ;;  %v4385_v24 = vsel %vm20969_vm4, %v4352_v33, %v14032_v53 }
 0x2a7   : > { %v17868_v43 = vpop.permute.xlu0 %14109  ;;  %21188 = vst [vmem:[#allocation84_spill] sm:$0xff] %v17888_v4  ;;  %v3610_v47 = vrot.slane %v17888_v4, 1  ;;  %v3612_v46 = vrot.slane %v3333_v7, 1  ;;  %v3973_v0 = vrot.slane %v17888_v4, 2  ;;  %v3975_v31 = vrot.slane %v3333_v7, 2 }
 0x2a8   : > { %v14383_v40 = vpack.i.bf16 %v17888_v4, %v17874_v59  ;;  %v4384_v7 = vsel %vm20969_vm4, %v4351_v35, %v14031_v38 }
 0x2a9   : > { %v17901_v27 = vsel %vm2232_vm2, %v3972_v32, %v3973_v0  ;;  %v17904_v50 = vsel %vm2232_vm2, %v3973_v0, %v3975_v31  ;;  %v3611_v5 = vsel %vm1866_vm1, %v3609_v16, %v3610_v47  ;;  %v3613_v53 = vsel %vm1866_vm1, %v3610_v47, %v3612_v46 }
 0x2aa   : > { %v17891_v45 = vpop.permute.xlu1 %14119  ;;  %14384 = vrot.lane.b32.xlu0 %v14383_v40, %s15582_s15  ;;  %v17912_v12 = vpack.i.bf16 %v17904_v50, %v17901_v27  ;;  %v17917_v0 = vpack.i.bf16 %v3613_v53, %v3611_v5  ;;  %v14086_v31 = vunpack.i.l.bf16 %v17810_v22  ;;  %v17928_v47 = vsel %vm1517_vm0, 0.0, %v17839_v8 }
 0x2ab   : > { %v14125_v18 = vpop.permute.xlu0 %14124  ;;  %21189 = vst [vmem:[#allocation71_spill] sm:$0xff] %v17928_v47  ;;  %v4289_v46 = vsel %vm3147_vm13, %v17441_v58, %v14097_v28  ;;  %v14051_v8 = vunpack.i.l.bf16 %v17723_v52 }
 0x2ac   : > { %v14127_v37 = vunpack.i.h.bf16 %v14125_v18  ;;  %v14126_v15 = vunpack.i.l.bf16 %v14125_v18  ;;  %14409 = vrot.lane.b32.xlu1 %v17912_v12, %s20982_s26 }
 0x2ae   : > { %v4418_v41 = vsel %vm20966_vm5, %v4385_v24, %v14127_v37  ;;  %v14130_v33 = vpop.permute.xlu1 %14129  ;;  %v4417_v32 = vsel %vm20966_vm5, %v4384_v7, %v14126_v15  ;;  %14389 = vrot.lane.b32.xlu0 %v17917_v0, %s15584_s23  ;;  %v14418_v15 = vpack.i.bf16 %v17854_v23, %v17928_v47 }
 0x2af   : > { %v4451_v18 = vsel %vm20967_vm6, %v4418_v41, %v14071_v56  ;;  %v14132_v16 = vunpack.i.h.bf16 %v14130_v33  ;;  %v4450_v38 = vsel %vm20967_vm6, %v4417_v32, %v14067_v61  ;;  %v14131_v35 = vunpack.i.l.bf16 %v14130_v33  ;;  %v17924_v24 = vpop.permute.xlu0 %14134 }
 0x2b0   : > { %v4484_v37 = vsel %vm20968_vm7, %v4451_v18, %v14042_v21  ;;  %v4483_v5 = vsel %vm20968_vm7, %v4450_v38, %v14041_v6  ;;  %v4321_v61 = vsel %vm20970_vm15, %v4288_v25, %v14086_v31  ;;  %v14087_v6 = vunpack.i.h.bf16 %v17810_v22  ;;  %14419 = vrot.lane.b32.xlu1 %v14418_v15, %s15582_s15 }
 0x2b1   : > { %v4517_v56 = vsel %vm4513_vm8, %v4484_v37, %v14132_v16  ;;  %v4516_v21 = vsel %vm4513_vm8, %v4483_v5, %v14131_v35  ;;  %v17944_v41 = vsel %vm1517_vm0, %v17843_v2, 0.0  ;;  %v14052_v25 = vunpack.i.h.bf16 %v17723_v52 }
 0x2b2   : > { %v14140_v7 = vpop.permute.xlu1 %14139  ;;  %v4547_v28 = vpack.c.bf16 %v4517_v56, %v4516_v21  ;;  %v4322_v53 = vsel %vm20970_vm15, %v4289_v46, %v14087_v6  ;;  %v4353_v32 = vsel %vm20973_vm11, %v4321_v61, %v14051_v8  ;;  %v3615_v18 = vrot.slane %v17854_v23, 1  ;;  %14394 = vrot.lane.b32.xlu0 %v17837_v62, %s15587_s10 }
 0x2b3   : > { %v14141_v58 = vunpack.i.l.bf16 %v14140_v7  ;;  %v14142_v33 = vunpack.i.h.bf16 %v14140_v7  ;;  %v3617_v16 = vrot.slane %v17944_v41, 1  ;;  %v17955_v2 = vpop.permute.xlu0 %14149  ;;  %v14106_v52 = vunpack.i.l.bf16 %v17846_v57 }
 0x2b4   : > { %13100 = vmatmul.mubr.msk.bf16.vlgmr.msra.gmra.mrb[0].mxu1 %vm4605_vm9, %v4547_v28  ;;  %v3614_v38 = vrot.slane %v17928_v47, 1  ;;  %v4354_v35 = vsel %vm20973_vm11, %v4322_v53, %v14052_v25  ;;  %14429 = vrot.lane.b32.xlu1 %v17762_v55, %s21089_s13  ;;  %v14072_v37 = vunpack.i.h.bf16 %v17800_v20  ;;  %v14107_v46 = vunpack.i.h.bf16 %v17846_v57 }
 0x2b5   : > { %v4386_v22 = vsel %vm20969_vm4, %v4353_v32, %v14141_v58  ;;  %v4387_v62 = vsel %vm20969_vm4, %v4354_v35, %v14142_v33  ;;  %v3618_v55 = vsel %vm1866_vm1, %v3615_v18, %v3617_v16  ;;  %v14082_v20 = vunpack.i.h.bf16 %v17812_v11 }
 0x2b6   : > { %v17958_v31 = vpop.permute.xlu1 %14144  ;;  %v4419_v5 = vsel %vm20966_vm5, %v4386_v22, %v14106_v52  ;;  %14404 = vrot.lane.b32.xlu0 %v14383_v40, %s20975_s18  ;;  %v3616_v7 = vsel %vm1866_vm1, %v3614_v38, %v3615_v18  ;;  %v4420_v28 = vsel %vm20966_vm5, %v4387_v62, %v14107_v46  ;;  %v17981_v40 = vld [vmem:[%s21056_s27] ss:$0 sm:$0xff]  ;;  %v14081_v33 = vunpack.i.l.bf16 %v17812_v11 }
 0x2b7   : > { %v14146_v56 = vunpack.i.l.bf16 %v17958_v31  ;;  %v4452_v57 = vsel %vm20967_vm6, %v4419_v5, %v14072_v37  ;;  %v17987_v16 = vpack.i.bf16 %v3618_v55, %v3616_v7  ;;  %v14117_v5 = vunpack.i.h.bf16 %v17866_v14 }
 0x2b8   : > { %14439 = vrot.lane.b32.xlu1 %v17917_v0, %s20984_s2 }
 0x2b9   : > { %v4453_v32 = vsel %vm20967_vm6, %v4420_v28, %v14146_v56  ;;  %v14116_v56 = vunpack.i.l.bf16 %v17866_v14 }
 0x2ba   : > { %v14155_v61 = vpop.permute.xlu1 %14154  ;;  %v17971_v21 = vpop.permute.xlu0 %14159  ;;  %14414 = vrot.lane.b32.xlu0 %v14418_v15, %s20975_s18  ;;  %v4291_v15 = vsel %vm3147_vm13, %v17510_v36, %v14082_v20  ;;  %v3980_v36 = vrot.slane %v17944_v41, 2  ;;  %v14147_v41 = vunpack.i.h.bf16 %v17958_v31 }
 0x2bb   : > { %v14157_v8 = vunpack.i.h.bf16 %v14155_v61  ;;  %v14156_v6 = vunpack.i.l.bf16 %v14155_v61 }
 0x2bc   : > { %v13083_v58 = vpop.f32.mrb[24].mxu0  ;;  %14449 = vrot.lane.b32.xlu1 %v17987_v16, %s15584_s23 }
 0x2bd   : > { %v3093_v25 = vadd.f32 %v17981_v40, %v13083_v58  ;;  %v3084_v53 = vpop.f32.mrb[25].mxu0  ;;  %v4485_v18 = vsel %vm20968_vm7, %v4452_v57, %v14156_v6  ;;  %v4486_v52 = vsel %vm20968_vm7, %v4453_v32, %v14157_v8  ;;  %v4290_v8 = vsel %vm3147_vm13, %v17520_v63, %v14081_v33 }
 0x2be   : > { %v13084_v22 = vpop.f32.mrb[26].mxu0  ;;  %v3085_v35 = vadd.f32 %v17981_v40, %v3084_v53  ;;  %v17993_v62 = vpop.permute.xlu1 %14164  ;;  %v3978_v6 = vrot.slane %v17854_v23, 2  ;;  %v4518_v14 = vsel %vm4513_vm8, %v4485_v18, %v14116_v56  ;;  %v4519_v58 = vsel %vm4513_vm8, %v4486_v52, %v14117_v5 }
 0x2bf   : > { %v3141_v38 = vmax.f32 %v3093_v25, 0.0  ;;  %v3096_v37 = vadd.f32 %v17981_v40, %v13084_v22  ;;  %v14170_v11 = vpop.permute.xlu0 %14169  ;;  %v3087_v46 = vpop.f32.mrb[27].mxu0  ;;  %v14458_v63 = vpack.i.bf16 %v17901_v27, %v17825_v44  ;;  %v3977_v53 = vrot.slane %v17928_v47, 2 }
 0x2c0   : > { %v3139_v61 = vmax.f32 %v3085_v35, 0.0  ;;  %v3088_v55 = vadd.f32 %v17981_v40, %v3087_v46  ;;  %v14101_v18 = vunpack.i.l.bf16 %v17848_v10  ;;  %v4548_v44 = vpack.c.bf16 %v4519_v58, %v4518_v14 }
 0x2c1   : > { %3174 = vst.msk [vmem:[%s17416_s5 + $0xd0] sm:$0xff] %vm3147_vm13, %v3141_v38  ;;  %v3142_v7 = vmax.f32 %v3096_v37, 0.0  ;;  %v18010_v20 = vrot.slane %v3141_v38, 7  ;;  %14459 = vrot.lane.b32.xlu1 %v14458_v63, %s15588_s1  ;;  %v18039_v35 = vsel %vm2232_vm2, %v3977_v53, %v3978_v6  ;;  %v14172_v37 = vunpack.i.h.bf16 %v14170_v11 }
 0x2c2   : > { %3172 = vst.msk [vmem:[%s17416_s5 + $0xc0] sm:$0xff] %vm3147_vm13, %v3139_v61  ;;  %v18020_v57 = vpop.permute.xlu1 %14184  ;;  %v3248_v33 = vrot.slane %v3139_v61, 7  ;;  %v3140_v32 = vmax.f32 %v3088_v55, 0.0  ;;  %v14171_v5 = vunpack.i.l.bf16 %v14170_v11  ;;  %13103 = vmatprep.mubr.msk.bf16.mxu1 %vm4605_vm9, %v4548_v44  ;;  %v14137_v14 = vunpack.i.h.bf16 %v17924_v24 }
 0x2c3   : > { %3175 = vst.msk [vmem:[%s17416_s5 + $0xd8] sm:$0xff] %vm3147_vm13, %v3142_v7  ;;  %v18016_v28 = vrot.slane %v3142_v7, 7  ;;  %v18022_v25 = vpop.permute.xlu0 %14174  ;;  %v18047_v7 = vsel %vm2232_vm2, %v3978_v6, %v3980_v36  ;;  %v14136_v58 = vunpack.i.l.bf16 %v17924_v24  ;;  %v14151_v53 = vunpack.i.l.bf16 %v17955_v2 }
 0x2c4   : > { %3173 = vst.msk [vmem:[%s17416_s5 + $0xc8] sm:$0xff] %vm3147_vm13, %v3140_v32  ;;  %v3249_v56 = vrot.slane %v3140_v32, 7  ;;  %v18053_v63 = vsel %vm1517_vm0, 0.0, %v3248_v33  ;;  %v14162_v6 = vunpack.i.h.bf16 %v17971_v21  ;;  %v18067_v38 = vpack.i.bf16 %v18047_v7, %v18039_v35 }
 0x2c5   : > { %v18031_v52 = vsel %vm1517_vm0, %v18010_v20, %v18016_v28  ;;  %14469 = vrot.lane.b32.xlu1 %v17912_v12, %s15587_s10  ;;  %v3982_v11 = vrot.slane %v18053_v63, 2  ;;  %v4323_v55 = vsel %vm20970_vm15, %v4290_v8, %v14171_v5  ;;  %v14176_v27 = vunpack.i.l.bf16 %v18022_v25 }
 0x2c6   : > { %v18042_v46 = vpop.permute.xlu1 %14194  ;;  %v18058_v32 = vsel %vm1517_vm0, %v3248_v33, %v3249_v56  ;;  %v3335_v44 = vsel %vm1517_vm0, %v3249_v56, 0.0  ;;  %v4324_v33 = vsel %vm20970_vm15, %v4291_v15, %v14172_v37  ;;  %v4355_v37 = vsel %vm20973_vm11, %v4323_v55, %v14136_v58 }
 0x2c7   : > { %v18044_v61 = vpop.permute.xlu0 %14179  ;;  %21190 = vst [vmem:[#allocation73_spill] sm:$0xff] %v18058_v32  ;;  %v3983_v36 = vrot.slane %v18058_v32, 2  ;;  %v3985_v24 = vrot.slane %v3335_v44, 2  ;;  %v18074_v56 = vpack.i.bf16 %v18058_v32, %v18053_v63  ;;  %v4356_v5 = vsel %vm20973_vm11, %v4324_v33, %v14137_v14 }
 0x2c8   : > { %v18102_v47 = vsel %vm3147_vm13, %v17582_v30, %v14162_v6  ;;  %v14166_v23 = vunpack.i.l.bf16 %v17993_v62  ;;  %v3620_v14 = vrot.slane %v18058_v32, 1  ;;  %v3622_v58 = vrot.slane %v3335_v44, 1 }
 0x2c9   : > { %14479 = vrot.lane.b32.xlu1 %v18067_v38, %s20982_s26  ;;  %14424 = vrot.lane.b32.xlu0 %v18074_v56, %s15582_s15  ;;  %v18088_v15 = vsel %vm2232_vm2, %v3982_v11, %v3983_v36  ;;  %v18091_v8 = vsel %vm2232_vm2, %v3983_v36, %v3985_v24  ;;  %v14161_v11 = vunpack.i.l.bf16 %v17971_v21  ;;  %v14177_v36 = vunpack.i.h.bf16 %v18022_v25 }
 0x2ca   : > { %v18076_v12 = vpop.permute.xlu1 %14199  ;;  %v18098_v31 = vpack.i.bf16 %v18091_v8, %v18088_v15  ;;  %v18110_v59 = vsel %vm1517_vm0, 0.0, %v18010_v20  ;;  %v18114_v30 = vsel %vm1517_vm0, %v18016_v28, 0.0  ;;  %v4388_v21 = vsel %vm20969_vm4, %v4355_v37, %v14101_v18 }
 0x2cb   : > { %v18078_v22 = vpop.permute.xlu0 %14189  ;;  %v21191_v25 = vunpack.i.h.bf16 %v17848_v10  ;;  %v3619_v6 = vrot.slane %v18053_v63, 1  ;;  %v4292_v20 = vsel %vm3147_vm13, %v17507_v1, %v14176_v27  ;;  %v4293_v32 = vsel %vm3147_vm13, %v17503_v19, %v14177_v36 }
 0x2cc   : > { %v18135_v10 = vpack.i.bf16 %v18031_v52, %v18110_v59  ;;  %v3623_v27 = vsel %vm1866_vm1, %v3620_v14, %v3622_v58  ;;  %v21193_v36 = vunpack.i.h.bf16 %v17868_v43 }
 0x2cd   : > { %14489 = vrot.lane.b32.xlu1 %v18098_v31, %s20982_s26  ;;  %14434 = vrot.lane.b32.xlu0 %v17917_v0, %s21089_s13  ;;  %v4389_v44 = vsel %vm20969_vm4, %v4356_v5, %v21191_v25 }
 0x2ce   : > { %v14210_v24 = vpop.permute.xlu1 %14209 }
 0x2cf   : > { %v14205_v55 = vpop.permute.xlu0 %14204  ;;  %v14212_v25 = vunpack.i.h.bf16 %v14210_v24  ;;  %v14211_v1 = vunpack.i.l.bf16 %v14210_v24 }
 0x2d0   : > { %v14207_v33 = vunpack.i.h.bf16 %v14205_v55  ;;  %v14206_v4 = vunpack.i.l.bf16 %v14205_v55 }
 0x2d1   : > { %14499 = vrot.lane.b32.xlu1 %v18135_v10, %s15582_s15  ;;  %14444 = vrot.lane.b32.xlu0 %v17987_v16, %s20984_s2 }
 0x2d2   : > { %v4421_v28 = vsel %vm20966_vm5, %v4388_v21, %v14206_v4  ;;  %v4422_v55 = vsel %vm20966_vm5, %v4389_v44, %v14207_v33  ;;  %v14220_v37 = vpop.permute.xlu1 %14219  ;;  %v3621_v4 = vsel %vm1866_vm1, %v3619_v6, %v3620_v14  ;;  %v4325_v33 = vsel %vm20970_vm15, %v4292_v20, %v14166_v23 }
 0x2d3   : > { %v4454_v0 = vsel %vm20967_vm6, %v4421_v28, %v14147_v41  ;;  %v4455_v18 = vsel %vm20967_vm6, %v4422_v55, %v14151_v53  ;;  %v18137_v5 = vpop.permute.xlu0 %14214  ;;  %v14221_v19 = vunpack.i.l.bf16 %v14220_v37  ;;  %v21192_v41 = vunpack.i.l.bf16 %v17868_v43 }
 0x2d4   : > { %v4488_v24 = vsel %vm20968_vm7, %v4455_v18, %v21193_v36  ;;  %v18154_v14 = vsel %vm3147_vm13, %v17591_v34, %v14161_v11  ;;  %v14167_v23 = vunpack.i.h.bf16 %v17993_v62  ;;  %v3624_v44 = vrot.slane %v18110_v59, 1 }
 0x2d5   : > { %v4487_v53 = vsel %vm20968_vm7, %v4454_v0, %v21192_v41  ;;  %v4521_v21 = vsel %vm4513_vm8, %v4488_v24, %v14212_v25  ;;  %v3625_v6 = vrot.slane %v18031_v52, 1  ;;  %v18161_v20 = vpack.i.bf16 %v3623_v27, %v3621_v4  ;;  %14509 = vrot.lane.b32.xlu1 %v17987_v16, %s21089_s13 }
 0x2d6   : > { %v4520_v58 = vsel %vm4513_vm8, %v4487_v53, %v14211_v1  ;;  %v18163_v28 = vpop.permute.xlu1 %14224  ;;  %v3987_v34 = vrot.slane %v18110_v59, 2  ;;  %v3627_v11 = vrot.slane %v18114_v30, 1  ;;  %v4326_v62 = vsel %vm20970_vm15, %v4293_v32, %v14167_v23 }
 0x2d7   : > { %v18165_v43 = vpop.permute.xlu0 %14229  ;;  %v4549_v55 = vpack.c.bf16 %v4521_v21, %v4520_v58  ;;  %v21194_v0 = vunpack.i.l.bf16 %v17891_v45  ;;  %v3988_v25 = vrot.slane %v18031_v52, 2  ;;  %v3990_v1 = vrot.slane %v18114_v30, 2  ;;  %14454 = vrot.lane.b32.xlu0 %v18161_v20, %s15584_s23 }
 0x2d8   : > { %v14222_v4 = vunpack.i.h.bf16 %v14220_v37  ;;  %v14187_v32 = vunpack.i.h.bf16 %v18020_v57  ;;  %v14186_v53 = vunpack.i.l.bf16 %v18020_v57  ;;  %v3626_v58 = vsel %vm1866_vm1, %v3624_v44, %v3625_v6 }
 0x2d9   : > { %v4357_v18 = vsel %vm20973_vm11, %v4325_v33, %v21194_v0  ;;  %v13087_v41 = vpop.f32.mrb[28].mxu0  ;;  %v14197_v33 = vunpack.i.h.bf16 %v18042_v46  ;;  %13104 = vmatmul.mubr.msk.bf16.gmra.mrb[4].mxu1 %vm4605_vm9, %v4549_v55  ;;  %14519 = vrot.lane.b32.xlu1 %v18161_v20, %s20984_s2  ;;  %v21196_v44 = vpack.i.bf16 %v18039_v35, %v17904_v50 }
 0x2da   : > { %v4390_v27 = vsel %vm20969_vm4, %v4357_v18, %v14221_v19  ;;  %v3109_v30 = vadd.f32 %v17981_v40, %v13087_v41  ;;  %v3100_v37 = vpop.f32.mrb[29].mxu0  ;;  %v21195_v19 = vunpack.i.h.bf16 %v17891_v45  ;;  %v14235_v24 = vpop.permute.xlu1 %14234  ;;  %v3628_v18 = vsel %vm1866_vm1, %v3625_v6, %v3627_v11 }
 0x2db   : > { %v3101_v16 = vadd.f32 %v17981_v40, %v3100_v37  ;;  %v18189_v23 = vpop.permute.xlu0 %14239  ;;  %v4423_v57 = vsel %vm20966_vm5, %v4390_v27, %v14186_v53  ;;  %v14236_v55 = vunpack.i.l.bf16 %v14235_v24  ;;  %v13088_v0 = vpop.f32.mrb[30].mxu0  ;;  %14464 = vrot.lane.b32.xlu0 %v21196_v44, %s15588_s1  ;;  %v21197_v37 = vunpack.i.h.bf16 %v17955_v2 }
 0x2dc   : > { %v4358_v36 = vsel %vm20973_vm11, %v4326_v62, %v21195_v19  ;;  %v3145_v21 = vmax.f32 %v3109_v30, 0.0  ;;  %v14226_v62 = vunpack.i.l.bf16 %v18163_v28  ;;  %v3112_v27 = vadd.f32 %v17981_v40, %v13088_v0  ;;  %v3103_v53 = vpop.f32.mrb[31].mxu0 }
 0x2dd   : > { %v4391_v45 = vsel %vm20969_vm4, %v4358_v36, %v14222_v4  ;;  %v3143_v41 = vmax.f32 %v3101_v16, 0.0  ;;  %v14196_v30 = vunpack.i.l.bf16 %v18042_v46  ;;  %v14237_v4 = vunpack.i.h.bf16 %v14235_v24 }
 0x2de   : > { %3178 = vst.msk [vmem:[%s17416_s5 + $0xf0] sm:$0xff] %vm3147_vm13, %v3145_v21  ;;  %v4456_v50 = vsel %vm20967_vm6, %v4423_v57, %v21197_v37  ;;  %v3146_v35 = vmax.f32 %v3112_v27, 0.0  ;;  %v3104_v19 = vadd.f32 %v17981_v40, %v3103_v53  ;;  %v18214_v36 = vpack.i.bf16 %v3628_v18, %v3626_v58  ;;  %v18216_v46 = vpop.permute.xlu1 %14244 }
 0x2df   : > { %3176 = vst.msk [vmem:[%s17416_s5 + $0xe0] sm:$0xff] %vm3147_vm13, %v3143_v41  ;;  %v14250_v16 = vpop.permute.xlu0 %14249  ;;  %v4424_v24 = vsel %vm20966_vm5, %v4391_v45, %v14187_v32  ;;  %v4489_v6 = vsel %vm20968_vm7, %v4456_v50, %v14236_v55  ;;  %v3257_v11 = vrot.slane %v3145_v21, 7  ;;  %14474 = vrot.lane.b32.xlu0 %v18067_v38, %s15587_s10  ;;  %v14538_v40 = vpack.i.bf16 %v18088_v15, %v18047_v7 }
 0x2e0   : > { %v4457_v2 = vsel %vm20967_vm6, %v4424_v24, %v14226_v62  ;;  %3179 = vst.msk [vmem:[%s17416_s5 + $0xf8] sm:$0xff] %vm3147_vm13, %v3146_v35  ;;  %v3258_v57 = vrot.slane %v3146_v35, 7  ;;  %14529 = vrot.lane.b32.xlu1 %v18214_v36, %s15584_s23  ;;  %v3144_v58 = vmax.f32 %v3104_v19, 0.0  ;;  %v18233_v55 = vsel %vm2232_vm2, %v3987_v34, %v3988_v25 }
 0x2e1   : > { %v4490_v32 = vsel %vm20968_vm7, %v4457_v2, %v14237_v4  ;;  %v3254_v21 = vrot.slane %v3143_v41, 7  ;;  %v4522_v45 = vsel %vm4513_vm8, %v4489_v6, %v14196_v30  ;;  %v18242_v38 = vsel %vm2232_vm2, %v3988_v25, %v3990_v1 }
 0x2e2   : > { %v18236_v18 = vsel %vm1517_vm0, %v3257_v11, %v3258_v57  ;;  %v18239_v62 = vpop.permute.xlu1 %14264  ;;  %v14217_v15 = vunpack.i.h.bf16 %v18137_v5  ;;  %v14216_v53 = vunpack.i.l.bf16 %v18137_v5  ;;  %3177 = vst.msk [vmem:[%s17416_s5 + $0xe8] sm:$0xff] %vm3147_vm13, %v3144_v58  ;;  %v3255_v41 = vrot.slane %v3144_v58, 7  ;;  %s18643_s5 = scalar_lea.vmem %s21211_s19, %s15884_s28 }
 0x2e3   : > { %v14255_v27 = vpop.permute.xlu0 %14254  ;;  %14484 = vrot.lane.b32.xlu0 %v18074_v56, %s20975_s18  ;;  %v4523_v30 = vsel %vm4513_vm8, %v4490_v32, %v14197_v33  ;;  %v14252_v1 = vunpack.i.h.bf16 %v14250_v16  ;;  %v18257_v4 = vpack.i.bf16 %v18242_v38, %v18233_v55  ;;  %v18260_v5 = vsel %vm1517_vm0, 0.0, %v3254_v21 }
 0x2e4   : > { %14539 = vrot.lane.b32.xlu1 %v14538_v40, %s15588_s1  ;;  %v4550_v6 = vpack.c.bf16 %v4523_v30, %v4522_v45  ;;  %v18263_v37 = vsel %vm1517_vm0, %v3254_v21, %v3255_v41  ;;  %v18266_v50 = vsel %vm1517_vm0, %v3255_v41, 0.0  ;;  %v14251_v56 = vunpack.i.l.bf16 %v14250_v16 }
 0x2e5   : > { %21198 = vst [vmem:[#allocation74_spill] sm:$0xff] %v18263_v37  ;;  %v3338_v19 = vsel %vm1517_vm0, %v3258_v57, 0.0  ;;  %v3993_v24 = vrot.slane %v18263_v37, 2  ;;  %v3995_v2 = vrot.slane %v18266_v50, 2  ;;  %v3322_v40 = vsel %vm1517_vm0, 0.0, %v3257_v11 }
 0x2e6   : > { %v18268_v35 = vpop.permute.xlu1 %14274  ;;  %13107 = vmatprep.mubr.msk.bf16.mxu1 %vm4605_vm9, %v4550_v6  ;;  %v14257_v32 = vunpack.i.h.bf16 %v14255_v27  ;;  %v14256_v58 = vunpack.i.l.bf16 %v14255_v27  ;;  %v3992_v16 = vrot.slane %v18260_v5, 2  ;;  %v14247_v57 = vunpack.i.h.bf16 %v18216_v46 }
 0x2e7   : > { %v18270_v33 = vpop.permute.xlu0 %14259  ;;  %14494 = vrot.lane.b32.xlu0 %v18135_v10, %s20975_s18  ;;  %v14246_v21 = vunpack.i.l.bf16 %v18216_v46  ;;  %v4328_v45 = vsel %vm20970_vm15, %v18102_v47, %v14252_v1  ;;  %v3729_v41 = vrot.slane %v18236_v18, 1  ;;  %v3731_v11 = vrot.slane %v3338_v19, 1 }
 0x2e8   : > { %14549 = vrot.lane.b32.xlu1 %v18098_v31, %s15587_s10  ;;  %v4327_v27 = vsel %vm20970_vm15, %v18154_v14, %v14251_v56  ;;  %v18291_v31 = vpack.i.bf16 %v18263_v37, %v18260_v5  ;;  %v3728_v6 = vrot.slane %v3322_v40, 1  ;;  %v3629_v46 = vrot.slane %v18260_v5, 1 }
 0x2e9   : > { %v18299_v0 = vsel %vm2232_vm2, %v3992_v16, %v3993_v24  ;;  %v18302_v47 = vsel %vm2232_vm2, %v3993_v24, %v3995_v2  ;;  %v4091_v1 = vrot.slane %v18236_v18, 2  ;;  %v4297_v14 = vsel %vm3147_vm13, %v17574_v29, %v14257_v32 }
 0x2ea   : > { %v18293_v10 = vpop.permute.xlu1 %14279  ;;  %v4296_v56 = vsel %vm3147_vm13, %v17579_v9, %v14256_v58  ;;  %v18314_v16 = vpack.i.bf16 %v18236_v18, %v3322_v40  ;;  %v4093_v44 = vrot.slane %v3338_v19, 2  ;;  %v3630_v24 = vrot.slane %v18263_v37, 1 }
 0x2eb   : > { %v18295_v30 = vpop.permute.xlu0 %14269  ;;  %14504 = vrot.lane.b32.xlu0 %v18291_v31, %s15582_s15  ;;  %v4359_v2 = vsel %vm20973_vm11, %v4327_v27, %v14216_v53  ;;  %v4360_v7 = vsel %vm20973_vm11, %v4328_v45, %v14217_v15  ;;  %v3632_v29 = vrot.slane %v18266_v50, 1  ;;  %v18322_v9 = vpack.i.bf16 %v18302_v47, %v18299_v0 }
 0x2ec   : > { %14559 = vrot.lane.b32.xlu1 %v18257_v4, %s20982_s26  ;;  %v3730_v25 = vsel %vm1866_vm1, %v3728_v6, %v3729_v41  ;;  %v3732_v18 = vsel %vm1866_vm1, %v3729_v41, %v3731_v11  ;;  %v4330_v19 = vsel %vm20970_vm15, %v4297_v14, %v14247_v57  ;;  %v4329_v34 = vsel %vm20970_vm15, %v4296_v56, %v14246_v21 }
 0x2ed   : > { %v4090_v27 = vrot.slane %v3322_v40, 2  ;;  %v21199_v15 = vunpack.i.l.bf16 %v18044_v61  ;;  %v21200_v45 = vunpack.i.h.bf16 %v18044_v61  ;;  %v18338_v57 = vpack.i.bf16 %v3732_v18, %v3730_v25 }
 0x2ee   : > { %v14290_v32 = vpop.permute.xlu1 %14289  ;;  %v3631_v11 = vsel %vm1866_vm1, %v3629_v46, %v3630_v24  ;;  %v21201_v6 = vunpack.i.h.bf16 %v18163_v28  ;;  %v21202_v14 = vunpack.i.l.bf16 %v18165_v43  ;;  %v4094_v25 = vsel %vm2232_vm2, %v4091_v1, %v4093_v44 }
 0x2ef   : > { %v14285_v58 = vpop.permute.xlu0 %14284  ;;  %14514 = vrot.lane.b32.xlu0 %v18161_v20, %s21089_s13  ;;  %v4392_v50 = vsel %vm20969_vm4, %v4359_v2, %v21199_v15  ;;  %v4393_v41 = vsel %vm20969_vm4, %v4360_v7, %v21200_v45  ;;  %v4092_v7 = vsel %vm2232_vm2, %v4090_v27, %v4091_v1  ;;  %v14291_v18 = vunpack.i.l.bf16 %v14290_v32 }
 0x2f0   : > { %v14287_v37 = vunpack.i.h.bf16 %v14285_v58  ;;  %v14286_v53 = vunpack.i.l.bf16 %v14285_v58  ;;  %14569 = vrot.lane.b32.xlu1 %v18322_v9, %s20982_s26  ;;  %v14292_v58 = vunpack.i.h.bf16 %v14290_v32  ;;  %v3633_v46 = vsel %vm1866_vm1, %v3630_v24, %v3632_v29 }
 0x2f1   : > { %v21204_v27 = vunpack.i.h.bf16 %v18078_v22  ;;  %v18364_v1 = vpack.i.bf16 %v4094_v25, %v4092_v7  ;;  %v14202_v32 = vunpack.i.h.bf16 %v18076_v12  ;;  %v21205_v24 = vunpack.i.l.bf16 %v18076_v12 }
 0x2f2   : > { %v4425_v21 = vsel %vm20966_vm5, %v4392_v50, %v14286_v53  ;;  %v4426_v40 = vsel %vm20966_vm5, %v4393_v41, %v14287_v37  ;;  %v14300_v2 = vpop.permute.xlu1 %14299  ;;  %v21203_v53 = vunpack.i.l.bf16 %v18078_v22 }
 0x2f3   : > { %v4458_v20 = vsel %vm20967_vm6, %v4425_v21, %v21201_v6  ;;  %v4459_v56 = vsel %vm20967_vm6, %v4426_v40, %v21202_v14  ;;  %v18349_v61 = vpop.permute.xlu0 %14294  ;;  %v14301_v37 = vunpack.i.l.bf16 %v14300_v2  ;;  %14524 = vrot.lane.b32.xlu0 %v18214_v36, %s20984_s2  ;;  %v14302_v28 = vunpack.i.h.bf16 %v14300_v2 }
 0x2f4   : > { %14579 = vrot.lane.b32.xlu1 %v18314_v16, %s15582_s15  ;;  %v4491_v15 = vsel %vm20968_vm7, %v4458_v20, %v21203_v53  ;;  %v4492_v44 = vsel %vm20968_vm7, %v4459_v56, %v21204_v27  ;;  %v4361_v29 = vsel %vm20973_vm11, %v4329_v34, %v21205_v24  ;;  %v18373_v21 = vpack.i.bf16 %v3633_v46, %v3631_v11 }
 0x2f5   : > { %v4524_v50 = vsel %vm4513_vm8, %v4491_v15, %v14291_v18  ;;  %v4525_v45 = vsel %vm4513_vm8, %v4492_v44, %v14292_v58  ;;  %v4394_v41 = vsel %vm20969_vm4, %v4361_v29, %v14301_v37  ;;  %v14266_v6 = vunpack.i.l.bf16 %v18239_v62 }
 0x2f6   : > { %v18375_v40 = vpop.permute.xlu1 %14304  ;;  %v4551_v22 = vpack.c.bf16 %v4525_v45, %v4524_v50  ;;  %v4362_v20 = vsel %vm20973_vm11, %v4330_v19, %v14202_v32  ;;  %v14267_v11 = vunpack.i.h.bf16 %v18239_v62  ;;  %v14232_v19 = vunpack.i.h.bf16 %v18165_v43 }
 0x2f7   : > { %v18379_v14 = vpop.permute.xlu0 %14309  ;;  %v4395_v12 = vsel %vm20969_vm4, %v4362_v20, %v14302_v28  ;;  %14534 = vrot.lane.b32.xlu0 %v18373_v21, %s15584_s23  ;;  %v14306_v34 = vunpack.i.l.bf16 %v18375_v40  ;;  %v4427_v56 = vsel %vm20966_vm5, %v4394_v41, %v14266_v6  ;;  %v14543_v2 = vpack.i.bf16 %v18233_v55, %v18091_v8 }
 0x2f8   : > { %14584 = vrot.lane.b32.xlu1 %v18214_v36, %s21089_s13  ;;  %13108 = vmatmul.mubr.msk.bf16.gmra.mrb[8].mxu1 %vm4605_vm9, %v4551_v22  ;;  %v4428_v25 = vsel %vm20966_vm5, %v4395_v12, %v14267_v11  ;;  %v14277_v18 = vunpack.i.h.bf16 %v18268_v35  ;;  %v14276_v37 = vunpack.i.l.bf16 %v18268_v35  ;;  %v4460_v43 = vsel %vm20967_vm6, %v4427_v56, %v14232_v19 }
 0x2f9   : > { %v4461_v62 = vsel %vm20967_vm6, %v4428_v25, %v14306_v34  ;;  %v14608_v44 = vpack.i.bf16 %v18299_v0, %v18242_v38  ;;  %v14242_v24 = vunpack.i.h.bf16 %v18189_v23  ;;  %v14241_v29 = vunpack.i.l.bf16 %v18189_v23 }
 0x2fa   : > { %v14315_v7 = vpop.permute.xlu1 %14314  ;;  %v14262_v23 = vunpack.i.h.bf16 %v18270_v33  ;;  %v14296_v11 = vunpack.i.l.bf16 %v18349_v61  ;;  %v14281_v56 = vunpack.i.l.bf16 %v18293_v10 }
 0x2fb   : > { %v14317_v36 = vunpack.i.h.bf16 %v14315_v7  ;;  %v14316_v58 = vunpack.i.l.bf16 %v14315_v7  ;;  %14544 = vrot.lane.b32.xlu0 %v14543_v2, %s15588_s1  ;;  %v18403_v46 = vpop.permute.xlu0 %14319  ;;  %v4299_v6 = vsel %vm3147_vm13, %v17648_v60, %v14242_v24  ;;  %v4298_v0 = vsel %vm3147_vm13, %v17657_v13, %v14241_v29 }
 0x2fc   : > { %14594 = vrot.lane.b32.xlu1 %v18373_v21, %s20984_s2  ;;  %v14282_v60 = vunpack.i.h.bf16 %v18293_v10  ;;  %v14297_v13 = vunpack.i.h.bf16 %v18349_v61  ;;  %v14271_v2 = vunpack.i.l.bf16 %v18295_v30 }
 0x2fd   : > { %v4493_v8 = vsel %vm20968_vm7, %v4460_v43, %v14316_v58  ;;  %v4494_v55 = vsel %vm20968_vm7, %v4461_v62, %v14317_v36 }
 0x2fe   : > { %v14325_v28 = vpop.permute.xlu1 %14324  ;;  %v4526_v53 = vsel %vm4513_vm8, %v4493_v8, %v14276_v37  ;;  %v4527_v35 = vsel %vm4513_vm8, %v4494_v55, %v14277_v18  ;;  %v14311_v18 = vunpack.i.l.bf16 %v18379_v14 }
 0x2ff   : > { %v4552_v15 = vpack.c.bf16 %v4527_v35, %v4526_v53  ;;  %14554 = vrot.lane.b32.xlu0 %v18257_v4, %s15587_s10  ;;  %v14330_v27 = vpop.permute.xlu0 %14329  ;;  %v14326_v19 = vunpack.i.l.bf16 %v14325_v28  ;;  %v14327_v10 = vunpack.i.h.bf16 %v14325_v28 }
 0x300   : > { %14604 = vrot.lane.b32.xlu1 %v18338_v57, %s15584_s23  ;;  %v14332_v50 = vunpack.i.h.bf16 %v14330_v27  ;;  %v14331_v45 = vunpack.i.l.bf16 %v14330_v27 }
 0x301   : > { %13111 = vmatprep.mubr.msk.bf16.mxu1 %vm4605_vm9, %v4552_v15 }
 0x302   : > { %v18414_v32 = vpop.permute.xlu1 %14344  ;;  %v4331_v20 = vsel %vm20970_vm15, %v4298_v0, %v14331_v45  ;;  %v4332_v12 = vsel %vm20970_vm15, %v4299_v6, %v14332_v50 }
 0x303   : > { %14564 = vrot.lane.b32.xlu0 %v18291_v31, %s20975_s18  ;;  %v14335_v4 = vpop.permute.xlu0 %14334  ;;  %v14261_v31 = vunpack.i.l.bf16 %v18270_v33  ;;  %v14272_v33 = vunpack.i.h.bf16 %v18295_v30  ;;  %v4363_v7 = vsel %vm20973_vm11, %v4331_v20, %v14296_v11  ;;  %v4364_v25 = vsel %vm20973_vm11, %v4332_v12, %v14297_v13 }
 0x304   : > { %14609 = vrot.lane.b32.xlu1 %v14608_v44, %s15588_s1  ;;  %v14336_v41 = vunpack.i.l.bf16 %v14335_v4  ;;  %v14337_v38 = vunpack.i.h.bf16 %v14335_v4  ;;  %v14347_v37 = vunpack.i.h.bf16 %v18414_v32  ;;  %v14346_v45 = vunpack.i.l.bf16 %v18414_v32 }
 0x305   : > { %v4396_v53 = vsel %vm20969_vm4, %v4363_v7, %v14261_v31 }
 0x306   : > { %v14355_v22 = vpop.permute.xlu1 %14354  ;;  %v4301_v36 = vsel %vm3147_vm13, %v17639_v49, %v14337_v38 }
 0x307   : > { %14574 = vrot.lane.b32.xlu0 %v18314_v16, %s20975_s18  ;;  %v18433_v34 = vpop.permute.xlu0 %14339  ;;  %v4334_v8 = vsel %vm20970_vm15, %v4301_v36, %v14327_v10  ;;  %v14357_v28 = vunpack.i.h.bf16 %v14355_v22  ;;  %v14356_v44 = vunpack.i.l.bf16 %v14355_v22  ;;  %v14321_v10 = vunpack.i.l.bf16 %v18403_v46 }
 0x308   : > { %14614 = vrot.lane.b32.xlu1 %v18322_v9, %s15587_s10  ;;  %v4300_v9 = vsel %vm3147_vm13, %v17645_v42, %v14336_v41  ;;  %v14307_v42 = vunpack.i.h.bf16 %v18375_v40  ;;  %v4397_v40 = vsel %vm20969_vm4, %v4364_v25, %v14262_v23  ;;  %v4366_v4 = vsel %vm20973_vm11, %v4334_v8, %v14282_v60 }
 0x309   : > { %v4333_v61 = vsel %vm20970_vm15, %v4300_v9, %v14326_v19  ;;  %v14312_v60 = vunpack.i.h.bf16 %v18379_v14  ;;  %v14342_v8 = vunpack.i.h.bf16 %v18433_v34 }
 0x30a   : > { %v14365_v16 = vpop.permute.xlu1 %14364  ;;  %v4365_v35 = vsel %vm20973_vm11, %v4333_v61, %v14281_v56 }
 0x30b   : > { %3511 = vrot.lane.b32.xlu0 %v21170_v26, %s15582_s15  ;;  %v14366_v58 = vunpack.i.l.bf16 %v14365_v16  ;;  %v14350_v30 = vpop.permute.xlu0 %14349  ;;  %v14367_v55 = vunpack.i.h.bf16 %v14365_v16 }
 0x30c   : > { %14624 = vrot.lane.b32.xlu1 %v18364_v1, %s20982_s26  ;;  %v14352_v62 = vunpack.i.h.bf16 %v14350_v30  ;;  %v14351_v43 = vunpack.i.l.bf16 %v14350_v30 }
 0x30d   : > { %v4398_v24 = vsel %vm20969_vm4, %v4365_v35, %v14366_v58  ;;  %v4399_v38 = vsel %vm20969_vm4, %v4366_v4, %v14367_v55  ;;  %v14341_v55 = vunpack.i.l.bf16 %v18433_v34 }
 0x30e   : > { %v18455_v49 = vpop.permute.xlu1 %14369  ;;  %v4429_v15 = vsel %vm20966_vm5, %v4396_v53, %v14351_v43  ;;  %v4430_v27 = vsel %vm20966_vm5, %v4397_v40, %v14352_v62  ;;  %v4431_v31 = vsel %vm20966_vm5, %v4398_v24, %v14346_v45  ;;  %v4432_v13 = vsel %vm20966_vm5, %v4399_v38, %v14347_v37 }
 0x30f   : > { %14589 = vrot.lane.b32.xlu0 %v18373_v21, %s21089_s13  ;;  %v4462_v29 = vsel %vm20967_vm6, %v4429_v15, %v14307_v42  ;;  %v4463_v50 = vsel %vm20967_vm6, %v4430_v27, %v14311_v18  ;;  %v14371_v21 = vunpack.i.l.bf16 %v18455_v49  ;;  %v14360_v11 = vpop.permute.xlu0 %14359  ;;  %v4464_v56 = vsel %vm20967_vm6, %v4431_v31, %v14312_v60 }
 0x310   : > { %v4495_v6 = vsel %vm20968_vm7, %v4462_v29, %v14271_v2  ;;  %v4496_v0 = vsel %vm20968_vm7, %v4463_v50, %v14272_v33  ;;  %v14322_v42 = vunpack.i.h.bf16 %v18403_v46  ;;  %v4302_v37 = vsel %vm3147_vm13, %v17741_v3, %v14321_v10 }
 0x311   : > { %v4528_v22 = vsel %vm4513_vm8, %v4495_v6, %v14356_v44  ;;  %v4529_v23 = vsel %vm4513_vm8, %v4496_v0, %v14357_v28  ;;  %v4465_v16 = vsel %vm20967_vm6, %v4432_v13, %v14371_v21  ;;  %v14362_v62 = vunpack.i.h.bf16 %v14360_v11 }
 0x312   : > { %v14380_v41 = vpop.permute.xlu1 %14379  ;;  %v4553_v12 = vpack.c.bf16 %v4529_v23, %v4528_v22  ;;  %v4303_v18 = vsel %vm3147_vm13, %v17744_v17, %v14322_v42  ;;  %v14372_v24 = vunpack.i.h.bf16 %v18455_v49 }
 0x313   : > { %14599 = vrot.lane.b32.xlu0 %v18338_v57, %s20984_s2  ;;  %v14382_v32 = vunpack.i.h.bf16 %v14380_v41  ;;  %v14381_v20 = vunpack.i.l.bf16 %v14380_v41  ;;  %v18490_v36 = vpop.permute.xlu0 %14374 }
 0x314   : > { %13112 = vmatmul.mubr.msk.bf16.gmra.mrb[12].mxu1 %vm4605_vm9, %v4553_v12  ;;  %v14376_v29 = vunpack.i.l.bf16 %v18490_v36 }
 0x315   : > { %v4497_v2 = vsel %vm20968_vm7, %v4464_v56, %v14381_v20  ;;  %v4498_v57 = vsel %vm20968_vm7, %v4465_v16, %v14382_v32 }
 0x316   : > { %v14400_v9 = vpop.permute.xlu1 %14399 }
 0x317   : > { %v14402_v33 = vunpack.i.h.bf16 %v14400_v9  ;;  %v14401_v19 = vunpack.i.l.bf16 %v14400_v9  ;;  %3889 = vrot.lane.b32.xlu0 %v21175_v54, %s15584_s23 }
 0x319   : > { %v4530_v14 = vsel %vm4513_vm8, %v4497_v2, %v14401_v19  ;;  %v4531_v7 = vsel %vm4513_vm8, %v4498_v57, %v14402_v33 }
 0x31a   : > { %v4554_v25 = vpack.c.bf16 %v4531_v7, %v4530_v14 }
 0x31b   : > { %4057 = vrot.lane.b32.xlu0 %v18302_v47, %s15588_s1  ;;  %v14361_v47 = vunpack.i.l.bf16 %v14360_v11 }
 0x31c   : > { %13115 = vmatprep.mubr.msk.bf16.mxu1 %vm4605_vm9, %v4554_v25  ;;  %v14385_v61 = vpop.permute.xlu0 %14384 }
 0x31d   : > { %v14387_v58 = vunpack.i.h.bf16 %v14385_v61  ;;  %v14386_v30 = vunpack.i.l.bf16 %v14385_v61 }
 0x31e   : > { %v14410_v43 = vpop.permute.xlu1 %14409 }
 0x31f   : > { %14619 = vrot.lane.b32.xlu0 %v18364_v1, %s15587_s10  ;;  %v4335_v46 = vsel %vm20970_vm15, %v4302_v37, %v14386_v30  ;;  %v4336_v53 = vsel %vm20970_vm15, %v4303_v18, %v14387_v58  ;;  %v14412_v41 = vunpack.i.h.bf16 %v14410_v43  ;;  %v14411_v6 = vunpack.i.l.bf16 %v14410_v43 }
 0x320   : > { %v4367_v1 = vsel %vm20973_vm11, %v4335_v46, %v14361_v47  ;;  %v4368_v40 = vsel %vm20973_vm11, %v4336_v53, %v14362_v62  ;;  %v14390_v28 = vpop.permute.xlu0 %14389 }
 0x321   : > { %v14392_v3 = vunpack.i.h.bf16 %v14390_v28  ;;  %v14391_v17 = vunpack.i.l.bf16 %v14390_v28  ;;  %v4400_v35 = vsel %vm20969_vm4, %v4367_v1, %v14341_v55  ;;  %v4401_v15 = vsel %vm20969_vm4, %v4368_v40, %v14342_v8 }
 0x322   : > { %v14420_v27 = vpop.permute.xlu1 %14419  ;;  %v14377_v8 = vunpack.i.h.bf16 %v18490_v36 }
 0x323   : > { %4251 = vrot.lane.b32.xlu0 %v21176_v48, %s20982_s26  ;;  %v4433_v34 = vsel %vm20966_vm5, %v4400_v35, %v14391_v17  ;;  %v4434_v44 = vsel %vm20966_vm5, %v4401_v15, %v14392_v3  ;;  %v14421_v16 = vunpack.i.l.bf16 %v14420_v27  ;;  %v14422_v33 = vunpack.i.h.bf16 %v14420_v27 }
 0x324   : > { %v14395_v50 = vpop.permute.xlu0 %14394  ;;  %v4466_v0 = vsel %vm20967_vm6, %v4433_v34, %v14372_v24  ;;  %v4467_v38 = vsel %vm20967_vm6, %v4434_v44, %v14376_v29 }
 0x325   : > { %v14397_v45 = vunpack.i.h.bf16 %v14395_v50  ;;  %v14396_v4 = vunpack.i.l.bf16 %v14395_v50 }
 0x326   : > { %v14430_v21 = vpop.permute.xlu1 %14429 }
 0x327   : > { %v4499_v22 = vsel %vm20968_vm7, %v4466_v0, %v14396_v4  ;;  %v4500_v23 = vsel %vm20968_vm7, %v4467_v38, %v14397_v45  ;;  %v14431_v2 = vunpack.i.l.bf16 %v14430_v21  ;;  %v14432_v25 = vunpack.i.h.bf16 %v14430_v21 }
 0x328   : > { %v14405_v31 = vpop.permute.xlu0 %14404  ;;  %v4532_v32 = vsel %vm4513_vm8, %v4499_v22, %v14411_v6  ;;  %v4533_v49 = vsel %vm4513_vm8, %v4500_v23, %v14412_v41  ;;  %v21206_v23 = vld [vmem:[#allocation83_spill] sm:$0xff] }
 0x329   : > { %v4555_v20 = vpack.c.bf16 %v4533_v49, %v4532_v32  ;;  %v14406_v12 = vunpack.i.l.bf16 %v14405_v31  ;;  %v14407_v13 = vunpack.i.h.bf16 %v14405_v31 }
 0x32a   : > { %v14440_v60 = vpop.permute.xlu1 %14439 }
 0x32b   : > { %13116 = vmatmul.mubr.msk.bf16.gmra.mrb[16].mxu1 %vm4605_vm9, %v4555_v20  ;;  %v4304_v11 = vsel %vm3147_vm13, %v17721_v51, %v14406_v12  ;;  %v4305_v56 = vsel %vm3147_vm13, %v17711_v39, %v14407_v13  ;;  %v14441_v7 = vunpack.i.l.bf16 %v14440_v60  ;;  %v14442_v61 = vunpack.i.h.bf16 %v14440_v60 }
 0x32c   : > { %v4337_v19 = vsel %vm20970_vm15, %v4304_v11, %v14421_v16  ;;  %v4338_v14 = vsel %vm20970_vm15, %v4305_v56, %v14422_v33  ;;  %v14415_v58 = vpop.permute.xlu0 %14414  ;;  %v21207_v11 = vld [vmem:[#allocation84_spill] sm:$0xff] }
 0x32d   : > { %v4369_v42 = vsel %vm20973_vm11, %v4337_v19, %v14431_v2  ;;  %v4370_v51 = vsel %vm20973_vm11, %v4338_v14, %v14432_v25  ;;  %v14416_v45 = vunpack.i.l.bf16 %v14415_v58  ;;  %v14417_v0 = vunpack.i.h.bf16 %v14415_v58 }
 0x32e   : > { %v14450_v9 = vpop.permute.xlu1 %14449  ;;  %v4402_v39 = vsel %vm20969_vm4, %v4369_v42, %v14441_v7  ;;  %v4403_v55 = vsel %vm20969_vm4, %v4370_v51, %v14442_v61 }
 0x32f   : > { %v14451_v10 = vunpack.i.l.bf16 %v14450_v9  ;;  %v14452_v30 = vunpack.i.h.bf16 %v14450_v9  ;;  %v4306_v31 = vsel %vm3147_vm13, %v21206_v23, %v14416_v45  ;;  %v4307_v9 = vsel %vm3147_vm13, %v21207_v11, %v14417_v0 }
 0x331   : > { %v4435_v62 = vsel %vm20966_vm5, %v4402_v39, %v14451_v10  ;;  %v4436_v46 = vsel %vm20966_vm5, %v4403_v55, %v14452_v30 }
 0x332   : > { %v4468_v28 = vsel %vm20967_vm6, %v4435_v62, %v14377_v8 }
 0x333   : > { %v18529_v57 = vpop.permute.xlu1 %14459 }
 0x334   : > { %v14461_v37 = vunpack.i.l.bf16 %v18529_v57  ;;  %v14462_v25 = vunpack.i.h.bf16 %v18529_v57 }
 0x336   : > { %v4469_v40 = vsel %vm20967_vm6, %v4436_v46, %v14461_v37 }
 0x337   : > { %v14470_v18 = vpop.permute.xlu1 %14469 }
 0x338   : > { %v14472_v47 = vunpack.i.h.bf16 %v14470_v18  ;;  %v14471_v43 = vunpack.i.l.bf16 %v14470_v18 }
 0x33a   : > { %v4501_v35 = vsel %vm20968_vm7, %v4468_v28, %v14471_v43  ;;  %v4502_v15 = vsel %vm20968_vm7, %v4469_v40, %v14472_v47 }
 0x33b   : > { %v14480_v53 = vpop.permute.xlu1 %14479  ;;  %v14425_v1 = vpop.permute.xlu0 %14424 }
 0x33c   : > { %v14482_v3 = vunpack.i.h.bf16 %v14480_v53  ;;  %v14481_v17 = vunpack.i.l.bf16 %v14480_v53  ;;  %v14426_v4 = vunpack.i.l.bf16 %v14425_v1  ;;  %v14427_v21 = vunpack.i.h.bf16 %v14425_v1 }
 0x33e   : > { %v4534_v27 = vsel %vm4513_vm8, %v4501_v35, %v14481_v17  ;;  %v4535_v36 = vsel %vm4513_vm8, %v4502_v15, %v14482_v3  ;;  %v4339_v20 = vsel %vm20970_vm15, %v4306_v31, %v14426_v4  ;;  %v4340_v33 = vsel %vm20970_vm15, %v4307_v9, %v14427_v21  ;;  %v21208_v15 = vld [vmem:[#allocation81_spill] sm:$0xff] }
 0x33f   : > { %v14490_v34 = vpop.permute.xlu1 %14489  ;;  %v14435_v44 = vpop.permute.xlu0 %14434  ;;  %v4556_v24 = vpack.c.bf16 %v4535_v36, %v4534_v27  ;;  %v21209_v36 = vld [vmem:[#allocation71_spill] sm:$0xff] }
 0x340   : > { %v14436_v38 = vunpack.i.l.bf16 %v14435_v44  ;;  %v14437_v32 = vunpack.i.h.bf16 %v14435_v44  ;;  %v14492_v18 = vunpack.i.h.bf16 %v14490_v34  ;;  %v14491_v39 = vunpack.i.l.bf16 %v14490_v34 }
 0x341   : > { %13119 = vmatprep.mubr.msk.bf16.mxu1 %vm4605_vm9, %v4556_v24 }
 0x342   : > { %v4371_v16 = vsel %vm20973_vm11, %v4339_v20, %v14436_v38  ;;  %v4372_v14 = vsel %vm20973_vm11, %v4340_v33, %v14437_v32 }
 0x343   : > { %v14500_v29 = vpop.permute.xlu1 %14499  ;;  %v14445_v50 = vpop.permute.xlu0 %14444 }
 0x344   : > { %v14446_v22 = vunpack.i.l.bf16 %v14445_v50  ;;  %v14447_v12 = vunpack.i.h.bf16 %v14445_v50  ;;  %v14502_v40 = vunpack.i.h.bf16 %v14500_v29  ;;  %v14501_v28 = vunpack.i.l.bf16 %v14500_v29 }
 0x346   : > { %v4404_v19 = vsel %vm20969_vm4, %v4371_v16, %v14446_v22  ;;  %v4405_v42 = vsel %vm20969_vm4, %v4372_v14, %v14447_v12 }
 0x347   : > { %v14510_v41 = vpop.permute.xlu1 %14509 }
 0x348   : > { %v14512_v17 = vunpack.i.h.bf16 %v14510_v41  ;;  %v14511_v35 = vunpack.i.l.bf16 %v14510_v41 }
 0x349   : > { %v14455_v6 = vpop.permute.xlu0 %14454 }
 0x34a   : > { %v14456_v49 = vunpack.i.l.bf16 %v14455_v6  ;;  %v14457_v56 = vunpack.i.h.bf16 %v14455_v6 }
 0x34b   : > { %v14520_v60 = vpop.permute.xlu1 %14519 }
 0x34c   : > { %v4437_v7 = vsel %vm20966_vm5, %v4404_v19, %v14456_v49  ;;  %v4438_v51 = vsel %vm20966_vm5, %v4405_v42, %v14457_v56  ;;  %v14522_v44 = vunpack.i.h.bf16 %v14520_v60  ;;  %v14521_v24 = vunpack.i.l.bf16 %v14520_v60 }
 0x34d   : > { %v14465_v13 = vpop.permute.xlu0 %14464  ;;  %v4470_v62 = vsel %vm20967_vm6, %v4437_v7, %v14462_v25 }
 0x34e   : > { %v14466_v2 = vunpack.i.l.bf16 %v14465_v13  ;;  %v14467_v21 = vunpack.i.h.bf16 %v14465_v13 }
 0x350   : > { %v4471_v37 = vsel %vm20967_vm6, %v4438_v51, %v14466_v2 }
 0x351   : > { %v14475_v61 = vpop.permute.xlu0 %14474 }
 0x352   : > { %v14530_v10 = vpop.permute.xlu1 %14529  ;;  %v14477_v58 = vunpack.i.h.bf16 %v14475_v61  ;;  %v14476_v30 = vunpack.i.l.bf16 %v14475_v61 }
 0x353   : > { %v14532_v29 = vunpack.i.h.bf16 %v14530_v10  ;;  %v14531_v0 = vunpack.i.l.bf16 %v14530_v10 }
 0x354   : > { %v4503_v47 = vsel %vm20968_vm7, %v4470_v62, %v14476_v30  ;;  %v4504_v43 = vsel %vm20968_vm7, %v4471_v37, %v14477_v58 }
 0x355   : > { %v14485_v57 = vpop.permute.xlu0 %14484  ;;  %v4536_v55 = vsel %vm4513_vm8, %v4503_v47, %v14491_v39  ;;  %v4537_v46 = vsel %vm4513_vm8, %v4504_v43, %v14492_v18 }
 0x356   : > { %v18564_v8 = vpop.permute.xlu1 %14539  ;;  %v14487_v53 = vunpack.i.h.bf16 %v14485_v57  ;;  %v14486_v1 = vunpack.i.l.bf16 %v14485_v57  ;;  %v4557_v3 = vpack.c.bf16 %v4537_v46, %v4536_v55 }
 0x357   : > { %v14541_v22 = vunpack.i.l.bf16 %v18564_v8 }
 0x358   : > { %v4309_v27 = vsel %vm3147_vm13, %v21208_v15, %v14487_v53  ;;  %v4308_v34 = vsel %vm3147_vm13, %v21209_v36, %v14486_v1  ;;  %13120 = vmatmul.mubr.msk.bf16.gmra.mrb[20].mxu1 %vm4605_vm9, %v4557_v3 }
 0x359   : > { %v4342_v50 = vsel %vm20970_vm15, %v4309_v27, %v14502_v40  ;;  %v4341_v45 = vsel %vm20970_vm15, %v4308_v34, %v14501_v28  ;;  %v14495_v6 = vpop.permute.xlu0 %14494  ;;  %v21210_v28 = vld [vmem:[#allocation73_spill] sm:$0xff] }
 0x35a   : > { %v14550_v4 = vpop.permute.xlu1 %14549  ;;  %v4374_v41 = vsel %vm20973_vm11, %v4342_v50, %v14512_v17  ;;  %v4373_v38 = vsel %vm20973_vm11, %v4341_v45, %v14511_v35  ;;  %v14496_v51 = vunpack.i.l.bf16 %v14495_v6  ;;  %v14497_v39 = vunpack.i.h.bf16 %v14495_v6 }
 0x35b   : > { %v4406_v23 = vsel %vm20969_vm4, %v4373_v38, %v14521_v24  ;;  %v4407_v31 = vsel %vm20969_vm4, %v4374_v41, %v14522_v44  ;;  %v14552_v32 = vunpack.i.h.bf16 %v14550_v4  ;;  %v14551_v49 = vunpack.i.l.bf16 %v14550_v4 }
 0x35c   : > { %v4439_v20 = vsel %vm20966_vm5, %v4406_v23, %v14531_v0  ;;  %v4440_v12 = vsel %vm20966_vm5, %v4407_v31, %v14532_v29  ;;  %v4310_v43 = vsel %vm3147_vm13, %v18053_v63, %v14496_v51  ;;  %v4311_v3 = vsel %vm3147_vm13, %v21210_v28, %v14497_v39 }
 0x35d   : > { %v4472_v60 = vsel %vm20967_vm6, %v4439_v20, %v14467_v21  ;;  %v4473_v11 = vsel %vm20967_vm6, %v4440_v12, %v14541_v22  ;;  %v14505_v16 = vpop.permute.xlu0 %14504  ;;  %v14542_v44 = vunpack.i.h.bf16 %v18564_v8 }
 0x35e   : > { %v14560_v9 = vpop.permute.xlu1 %14559  ;;  %v4505_v13 = vsel %vm20968_vm7, %v4472_v60, %v14551_v49  ;;  %v4506_v56 = vsel %vm20968_vm7, %v4473_v11, %v14552_v32  ;;  %v14506_v58 = vunpack.i.l.bf16 %v14505_v16  ;;  %v14507_v62 = vunpack.i.h.bf16 %v14505_v16 }
 0x35f   : > { %v14562_v33 = vunpack.i.h.bf16 %v14560_v9  ;;  %v14561_v19 = vunpack.i.l.bf16 %v14560_v9 }
 0x360   : > { %v4343_v46 = vsel %vm20970_vm15, %v4310_v43, %v14506_v58  ;;  %v4344_v15 = vsel %vm20970_vm15, %v4311_v3, %v14507_v62 }
 0x361   : > { %v4538_v2 = vsel %vm4513_vm8, %v4505_v13, %v14561_v19  ;;  %v4539_v14 = vsel %vm4513_vm8, %v4506_v56, %v14562_v33  ;;  %v14515_v25 = vpop.permute.xlu0 %14514 }
 0x362   : > { %v14570_v7 = vpop.permute.xlu1 %14569  ;;  %v4558_v42 = vpack.c.bf16 %v4539_v14, %v4538_v2  ;;  %v14516_v37 = vunpack.i.l.bf16 %v14515_v25  ;;  %v14517_v57 = vunpack.i.h.bf16 %v14515_v25 }
 0x363   : > { %v14572_v0 = vunpack.i.h.bf16 %v14570_v7  ;;  %v14571_v41 = vunpack.i.l.bf16 %v14570_v7 }
 0x364   : > { %13123 = vmatprep.mubr.msk.bf16.mxu1 %vm4605_vm9, %v4558_v42  ;;  %v4375_v17 = vsel %vm20973_vm11, %v4343_v46, %v14516_v37  ;;  %v4376_v63 = vsel %vm20973_vm11, %v4344_v15, %v14517_v57 }
 0x365   : > { %v14525_v61 = vpop.permute.xlu0 %14524 }
 0x366   : > { %v14580_v10 = vpop.permute.xlu1 %14579  ;;  %v14526_v47 = vunpack.i.l.bf16 %v14525_v61  ;;  %v14527_v53 = vunpack.i.h.bf16 %v14525_v61 }
 0x367   : > { %v14582_v60 = vunpack.i.h.bf16 %v14580_v10  ;;  %v14581_v11 = vunpack.i.l.bf16 %v14580_v10 }
 0x368   : > { %v4408_v27 = vsel %vm20969_vm4, %v4375_v17, %v14526_v47  ;;  %v4409_v24 = vsel %vm20969_vm4, %v4376_v63, %v14527_v53 }
 0x369   : > { %v14535_v18 = vpop.permute.xlu0 %14534 }
 0x36a   : > { %v14585_v30 = vpop.permute.xlu1 %14584  ;;  %v14536_v55 = vunpack.i.l.bf16 %v14535_v18  ;;  %v14537_v35 = vunpack.i.h.bf16 %v14535_v18 }
 0x36b   : > { %v14587_v16 = vunpack.i.h.bf16 %v14585_v30  ;;  %v14586_v13 = vunpack.i.l.bf16 %v14585_v30 }
 0x36c   : > { %v4441_v34 = vsel %vm20966_vm5, %v4408_v27, %v14536_v55  ;;  %v4442_v4 = vsel %vm20966_vm5, %v4409_v24, %v14537_v35  ;;  %v4951_v27 = vlaneseq  ;;  %v18634_v24 = vld [vmem:[%s21061_s4] ss:$0 sm:$0xff] }
 0x36d   : > { %v14545_v40 = vpop.permute.xlu0 %14544  ;;  %v4474_v21 = vsel %vm20967_vm6, %v4441_v34, %v14542_v44  ;;  %v15589_v34 = vmov 1983009808  }
 0x36e   : > { %v14595_v1 = vpop.permute.xlu1 %14594  ;;  %v14546_v36 = vunpack.i.l.bf16 %v14545_v40  ;;  %v4949_v44 = vunpack.c.l.s4 %v15589_v34 }
 0x36f   : > { %v14597_v19 = vunpack.i.h.bf16 %v14595_v1  ;;  %v14596_v2 = vunpack.i.l.bf16 %v14595_v1 }
 0x370   : > { %v4475_v38 = vsel %vm20967_vm6, %v4442_v4, %v14546_v36  ;;  %v4952_v4 = vshrl.u32 %v4951_v27, 7 }
 0x371   : > { %v14555_v45 = vpop.permute.xlu0 %14554 }
 0x372   : > { %v14605_v50 = vpop.permute.xlu1 %14604  ;;  %v14557_v6 = vunpack.i.h.bf16 %v14555_v45  ;;  %v14556_v29 = vunpack.i.l.bf16 %v14555_v45 }
 0x373   : > { %v14607_v10 = vunpack.i.h.bf16 %v14605_v50  ;;  %v14606_v61 = vunpack.i.l.bf16 %v14605_v50 }
 0x374   : > { %v4507_v22 = vsel %vm20968_vm7, %v4474_v21, %v14556_v29  ;;  %v4508_v23 = vsel %vm20968_vm7, %v4475_v38, %v14557_v6  ;;  %v4950_v21 = vunpack.c.0.s8 %v4949_v44 }
 0x375   : > { %v14565_v8 = vpop.permute.xlu0 %14564  ;;  %v4540_v32 = vsel %vm4513_vm8, %v4507_v22, %v14571_v41  ;;  %v4541_v49 = vsel %vm4513_vm8, %v4508_v23, %v14572_v0 }
 0x376   : > { %v18606_v31 = vpop.permute.xlu1 %14609  ;;  %v14567_v20 = vunpack.i.h.bf16 %v14565_v8  ;;  %v14566_v12 = vunpack.i.l.bf16 %v14565_v8  ;;  %v4559_v9 = vpack.c.bf16 %v4541_v49, %v4540_v32  ;;  %v21212_v32 = vld [vmem:[#allocation74_spill] sm:$0xff] }
 0x377   : > { %v14611_v30 = vunpack.i.l.bf16 %v18606_v31 }
 0x378   : > { %v4313_v56 = vsel %vm3147_vm13, %v18031_v52, %v14567_v20  ;;  %v4312_v33 = vsel %vm3147_vm13, %v18110_v59, %v14566_v12  ;;  %13124 = vmatmul.mubr.msk.bf16.gmra.mrb[24].mxu1 %vm4605_vm9, %v4559_v9  ;;  %v14547_v52 = vunpack.i.h.bf16 %v14545_v40 }
 0x379   : > { %v4346_v14 = vsel %vm20970_vm15, %v4313_v56, %v14582_v60  ;;  %v4345_v7 = vsel %vm20970_vm15, %v4312_v33, %v14581_v11  ;;  %v14575_v42 = vpop.permute.xlu0 %14574 }
 0x37a   : > { %v14615_v25 = vpop.permute.xlu1 %14614  ;;  %v4378_v51 = vsel %vm20973_vm11, %v4346_v14, %v14587_v16  ;;  %v4377_v58 = vsel %vm20973_vm11, %v4345_v7, %v14586_v13  ;;  %v14576_v36 = vunpack.i.l.bf16 %v14575_v42  ;;  %v14577_v50 = vunpack.i.h.bf16 %v14575_v42 }
 0x37b   : > { %v4410_v59 = vsel %vm20969_vm4, %v4377_v58, %v14596_v2  ;;  %v4411_v18 = vsel %vm20969_vm4, %v4378_v51, %v14597_v19  ;;  %v14617_v39 = vunpack.i.h.bf16 %v14615_v25  ;;  %v14616_v37 = vunpack.i.l.bf16 %v14615_v25 }
 0x37c   : > { %v4443_v62 = vsel %vm20966_vm5, %v4410_v59, %v14606_v61  ;;  %v4444_v47 = vsel %vm20966_vm5, %v4411_v18, %v14607_v10  ;;  %v4314_v6 = vsel %vm3147_vm13, %v18260_v5, %v14576_v36  ;;  %v4315_v49 = vsel %vm3147_vm13, %v21212_v32, %v14577_v50 }
 0x37d   : > { %v4476_v43 = vsel %vm20967_vm6, %v4443_v62, %v14547_v52  ;;  %v4477_v57 = vsel %vm20967_vm6, %v4444_v47, %v14611_v30  ;;  %v18626_v46 = vpop.permute.xlu0 %3511  ;;  %v18656_v19 = vsub.s32 %v4950_v21, %v4952_v4  ;;  %v14612_v62 = vunpack.i.h.bf16 %v18606_v31 }
 0x37e   : > { %v14625_v55 = vpop.permute.xlu1 %14624  ;;  %v4509_v53 = vsel %vm20968_vm7, %v4476_v43, %v14616_v37  ;;  %v4510_v1 = vsel %vm20968_vm7, %v4477_v57, %v14617_v39  ;;  %v4347_v11 = vsel %vm20970_vm15, %v4314_v6, %v18626_v46  ;;  %v4348_v14 = vsel %vm20970_vm15, %v4315_v49, %v18626_v46 }
 0x37f   : > { %v14627_v40 = vunpack.i.h.bf16 %v14625_v55  ;;  %v14626_v28 = vunpack.i.l.bf16 %v14625_v55 }
 0x381   : > { %v4542_v3 = vsel %vm4513_vm8, %v4509_v53, %v14626_v28  ;;  %v4543_v17 = vsel %vm4513_vm8, %v4510_v1, %v14627_v40  ;;  %v14590_v35 = vpop.permute.xlu0 %14589 }
 0x382   : > { %v4560_v15 = vpack.c.bf16 %v4543_v17, %v4542_v3  ;;  %v14591_v29 = vunpack.i.l.bf16 %v14590_v35  ;;  %v14592_v20 = vunpack.i.h.bf16 %v14590_v35 }
 0x384   : > { %13127 = vmatprep.mubr.msk.bf16.mxu1 %vm4605_vm9, %v4560_v15  ;;  %v4379_v56 = vsel %vm20973_vm11, %v4347_v11, %v14591_v29  ;;  %v4380_v61 = vsel %vm20973_vm11, %v4348_v14, %v14592_v20 }
 0x385   : > { %v14600_v63 = vpop.permute.xlu0 %14599 }
 0x386   : > { %v14601_v22 = vunpack.i.l.bf16 %v14600_v63  ;;  %v14602_v9 = vunpack.i.h.bf16 %v14600_v63 }
 0x387   : > { %v13101_v45 = vpop.f32.mrb[0].mxu1 }
 0x388   : > { %v4701_v41 = vadd.f32 %v13101_v45, %v18634_v24  ;;  %v4692_v38 = vpop.f32.mrb[1].mxu1  ;;  %v4412_v7 = vsel %vm20969_vm4, %v4379_v56, %v14601_v22  ;;  %v4413_v30 = vsel %vm20969_vm4, %v4380_v61, %v14602_v9  ;;  %vm5806_vm4 = vcmask 1047559  }
 0x389   : > { %v18638_v0 = vpop.permute.xlu0 %3889  ;;  %v4693_v23 = vadd.f32 %v18634_v24, %v4692_v38  ;;  %v13102_v8 = vpop.f32.mrb[2].mxu1 }
 0x38a   : > { %v4821_v5 = vmax.f32 %v4701_v41, 0.0  ;;  %v4704_v12 = vadd.f32 %v13102_v8, %v18634_v24  ;;  %v4695_v60 = vpop.f32.mrb[3].mxu1  ;;  %v4445_v59 = vsel %vm20966_vm5, %v4412_v7, %v18638_v0  ;;  %v4446_v28 = vsel %vm20966_vm5, %v4413_v30, %v18638_v0 }
 0x38b   : > { %v4819_v16 = vmax.f32 %v4693_v23, 0.0  ;;  %v4696_v13 = vadd.f32 %v18634_v24, %v4695_v60  ;;  %v4478_v53 = vsel %vm20967_vm6, %v4445_v59, %v14612_v62  ;;  %vm20972_vm5 = vcmask 1044484  }
 0x38c   : > { %4853 = vst.msk [vmem:[%s18643_s5 + $0x10] sm:$0xff] %vm3147_vm13, %v4821_v5  ;;  %v4884_v33 = vsel %vm3147_vm13, %v4821_v5, -inf  ;;  %v4822_v2 = vmax.f32 %v4704_v12, 0.0 }
 0x38d   : > { %4851 = vst.msk [vmem:[%s18643_s5] sm:$0xff] %vm3147_vm13, %v4819_v16  ;;  %v4883_v25 = vsel %vm3147_vm13, %v4819_v16, -inf  ;;  %v4820_v42 = vmax.f32 %v4696_v13, 0.0  ;;  %v4058_v10 = vpop.permute.xlu0 %4057 }
 0x38e   : > { %v4885_v51 = vmax.f32 %v4883_v25, %v4884_v33  ;;  %4854 = vst.msk [vmem:[%s18643_s5 + $0x18] sm:$0xff] %vm3147_vm13, %v4822_v2  ;;  %v4887_v58 = vsel %vm3147_vm13, %v4822_v2, -inf  ;;  %v4479_v9 = vsel %vm20967_vm6, %v4446_v28, %v4058_v10  ;;  %vm20974_vm6 = vcmask 1045509  }
 0x38f   : > { %4852 = vst.msk [vmem:[%s18643_s5 + $0x8] sm:$0xff] %vm3147_vm13, %v4820_v42  ;;  %v4886_v52 = vsel %vm3147_vm13, %v4820_v42, -inf }
 0x390   : > { %v4947_v18 = vcombine.high %v4885_v51, %v4885_v51  ;;  %v4954_v39 = vrot.slane %v4885_v51, %v18656_v19  ;;  %v4888_v37 = vmax.f32 %v4886_v52, %v4887_v58 }
 0x391   : > { %v14620_v3 = vpop.permute.xlu0 %14619 }
 0x392   : > { %v4961_v47 = vrot.slane %v4947_v18, %v18656_v19  ;;  %v4962_v43 = vcombine.high %v4954_v39, %v4954_v39  ;;  %v5284_v57 = vsel %vm5283_vm10, %v4954_v39, -inf  ;;  %v4964_v55 = vcombine.high %v4888_v37, %v4888_v37 }
 0x393   : > { %v5285_v1 = vrot.slane %v5284_v57, 4  ;;  %v4971_v40 = vrot.slane %v4888_v37, %v18656_v19  ;;  %v14622_v4 = vunpack.i.h.bf16 %v14620_v3  ;;  %v14621_v8 = vunpack.i.l.bf16 %v14620_v3 }
 0x394   : > { %v4963_v17 = vcombine.high %v4961_v47, %v4961_v47  ;;  %v5291_v35 = vsel %vm5283_vm10, %v4962_v43, -inf  ;;  %v5298_v31 = vsel %vm5283_vm10, %v4961_v47, -inf  ;;  %v4978_v15 = vrot.slane %v4964_v55, %v18656_v19 }
 0x395   : > { %v5286_v27 = vmax.f32 %v5284_v57, %v5285_v1  ;;  %v5292_v36 = vrot.slane %v5291_v35, 4  ;;  %v5299_v63 = vrot.slane %v5298_v31, 4  ;;  %v4979_v34 = vcombine.high %v4971_v40, %v4971_v40  ;;  %v18691_v58 = vpop.permute.xlu0 %4251 }
 0x396   : > { %v5305_v44 = vsel %vm5283_vm10, %v4963_v17, -inf  ;;  %v5312_v50 = vsel %vm5283_vm10, %v4971_v40, -inf  ;;  %v5326_v45 = vsel %vm5283_vm10, %v4978_v15, -inf  ;;  %v4511_v25 = vsel %vm20968_vm7, %v4478_v53, %v14621_v8 }
 0x397   : > { %v5287_v6 = vrot.slane %v5286_v27, 2  ;;  %v5293_v29 = vmax.f32 %v5291_v35, %v5292_v36  ;;  %v5300_v41 = vmax.f32 %v5298_v31, %v5299_v63  ;;  %v5306_v38 = vrot.slane %v5305_v44, 4 }
 0x398   : > { %v5313_v21 = vrot.slane %v5312_v50, 4  ;;  %v5319_v22 = vsel %vm5283_vm10, %v4979_v34, -inf  ;;  %v5327_v23 = vrot.slane %v5326_v45, 4  ;;  %v4512_v52 = vsel %vm20968_vm7, %v4479_v9, %v14622_v4 }
 0x399   : > { %v5288_v32 = vmax.f32 %v5286_v27, %v5287_v6  ;;  %v5294_v49 = vrot.slane %v5293_v29, 2  ;;  %v5301_v20 = vrot.slane %v5300_v41, 2  ;;  %v5307_v5 = vmax.f32 %v5305_v44, %v5306_v38 }
 0x39a   : > { %v5314_v12 = vmax.f32 %v5312_v50, %v5313_v21  ;;  %v5320_v60 = vrot.slane %v5319_v22, 4  ;;  %v5328_v11 = vmax.f32 %v5326_v45, %v5327_v23  ;;  %v4980_v30 = vcombine.high %v4978_v15, %v4978_v15 }
 0x39b   : > { %v5289_v16 = vrot.slane %v5288_v32, 1  ;;  %v5295_v13 = vmax.f32 %v5293_v29, %v5294_v49  ;;  %v5302_v56 = vmax.f32 %v5300_v41, %v5301_v20  ;;  %v5308_v33 = vrot.slane %v5307_v5, 2 }
 0x39c   : > { %v5315_v2 = vrot.slane %v5314_v12, 2  ;;  %v5321_v14 = vmax.f32 %v5319_v22, %v5320_v60  ;;  %v5329_v7 = vrot.slane %v5328_v11, 2  ;;  %v4544_v55 = vsel %vm4513_vm8, %v4511_v25, %v18691_v58 }
 0x39d   : > { %v5296_v42 = vrot.slane %v5295_v13, 1  ;;  %v5303_v61 = vrot.slane %v5302_v56, 1  ;;  %v5309_v51 = vmax.f32 %v5307_v5, %v5308_v33  ;;  %v5290_v39 = vmax.f32 %v5288_v32, %v5289_v16 }
 0x39e   : > { %v5316_v59 = vmax.f32 %v5314_v12, %v5315_v2  ;;  %v5322_v18 = vrot.slane %v5321_v14, 2  ;;  %v5330_v10 = vmax.f32 %v5328_v11, %v5329_v7  ;;  %v4545_v28 = vsel %vm4513_vm8, %v4512_v52, %v18691_v58 }
 0x39f   : > { %v5297_v37 = vmax.f32 %v5295_v13, %v5296_v42  ;;  %v5304_v62 = vmax.f32 %v5302_v56, %v5303_v61  ;;  %v5310_v47 = vrot.slane %v5309_v51, 1  ;;  %v5333_v31 = vsel %vm5283_vm10, %v4980_v30, -inf }
 0x3a0   : > { %v5317_v43 = vrot.slane %v5316_v59, 1  ;;  %v5323_v57 = vmax.f32 %v5321_v14, %v5322_v18  ;;  %v5331_v40 = vrot.slane %v5330_v10, 1  ;;  %v4561_v15 = vpack.c.bf16 %v4545_v28, %v4544_v55 }
 0x3a1   : > { %v5311_v53 = vmax.f32 %v5309_v51, %v5310_v47  ;;  %v5797_v1 = vsel %vm5796_vm12, %v5297_v37, %v5290_v39  ;;  %vm5804_vm7 = vcmask 1046534   ;;  %v5334_v44 = vrot.slane %v5333_v31, 4 }
 0x3a2   : > { %v5799_v3 = vsel %vm20971_vm3, %v5304_v62, %v5797_v1  ;;  %v5318_v17 = vmax.f32 %v5316_v59, %v5317_v43  ;;  %v5324_v35 = vrot.slane %v5323_v57, 1  ;;  %v5332_v34 = vmax.f32 %v5330_v10, %v5331_v40  ;;  %13128 = vmatmul.mubr.msk.bf16.gmra.mrb[28].mxu1 %vm4605_vm9, %v4561_v15 }
 0x3a3   : > { %v5801_v27 = vsel %vm20972_vm5, %v5311_v53, %v5799_v3  ;;  %v5335_v4 = vmax.f32 %v5333_v31, %v5334_v44 }
 0x3a4   : > { %v5325_v36 = vmax.f32 %v5323_v57, %v5324_v35  ;;  %v5803_v63 = vsel %vm20974_vm6, %v5318_v17, %v5801_v27 }
 0x3a5   : > { %v5336_v32 = vrot.slane %v5335_v4, 2 }
 0x3a6   : > { %v5805_v50 = vsel %vm5804_vm7, %v5325_v36, %v5803_v63 }
 0x3a7   : > { %v18706_v45 = vsel %vm5806_vm4, %v5332_v34, %v5805_v50  ;;  %v18721_v13 = vmax.f32 %v5335_v4, %v5336_v32 }
 0x3a9   : > { %v5338_v51 = vrot.slane %v18721_v13, 1 }
 0x3ac   : > { %v13105_v6 = vpop.f32.mrb[4].mxu1 }
 0x3ad   : > { %v4717_v29 = vadd.f32 %v13105_v6, %v18634_v24  ;;  %v4708_v41 = vpop.f32.mrb[5].mxu1 }
 0x3ae   : > { %v4709_v38 = vadd.f32 %v18634_v24, %v4708_v41  ;;  %v13106_v21 = vpop.f32.mrb[6].mxu1 }
 0x3af   : > { %v4825_v22 = vmax.f32 %v4717_v29, 0.0  ;;  %v4720_v23 = vadd.f32 %v13106_v21, %v18634_v24  ;;  %v4711_v8 = vpop.f32.mrb[7].mxu1 }
 0x3b0   : > { %v4823_v49 = vmax.f32 %v4709_v38, 0.0  ;;  %v4712_v20 = vadd.f32 %v18634_v24, %v4711_v8 }
 0x3b1   : > { %4857 = vst.msk [vmem:[%s18643_s5 + $0x30] sm:$0xff] %vm3147_vm13, %v4825_v22  ;;  %v4890_v5 = vsel %vm3147_vm13, %v4825_v22, -inf  ;;  %v4826_v12 = vmax.f32 %v4720_v23, 0.0 }
 0x3b2   : > { %4855 = vst.msk [vmem:[%s18643_s5 + $0x20] sm:$0xff] %vm3147_vm13, %v4823_v49  ;;  %v4889_v60 = vsel %vm3147_vm13, %v4823_v49, -inf  ;;  %v4824_v11 = vmax.f32 %v4712_v20, 0.0 }
 0x3b3   : > { %v4891_v9 = vmax.f32 %v4889_v60, %v4890_v5  ;;  %4858 = vst.msk [vmem:[%s18643_s5 + $0x38] sm:$0xff] %vm3147_vm13, %v4826_v12  ;;  %v4893_v16 = vsel %vm3147_vm13, %v4826_v12, -inf }
 0x3b4   : > { %4856 = vst.msk [vmem:[%s18643_s5 + $0x28] sm:$0xff] %vm3147_vm13, %v4824_v11  ;;  %v4892_v56 = vsel %vm3147_vm13, %v4824_v11, -inf }
 0x3b5   : > { %v4981_v33 = vcombine.high %v4891_v9, %v4891_v9  ;;  %v4988_v2 = vrot.slane %v4891_v9, %v18656_v19  ;;  %v4894_v14 = vmax.f32 %v4892_v56, %v4893_v16 }
 0x3b7   : > { %v4995_v7 = vrot.slane %v4981_v33, %v18656_v19  ;;  %v4996_v25 = vcombine.high %v4988_v2, %v4988_v2  ;;  %v5340_v42 = vsel %vm5283_vm10, %v4988_v2, -inf  ;;  %v4998_v61 = vcombine.high %v4894_v14, %v4894_v14 }
 0x3b8   : > { %v5341_v52 = vrot.slane %v5340_v42, 4  ;;  %v5005_v30 = vrot.slane %v4894_v14, %v18656_v19 }
 0x3b9   : > { %v4997_v59 = vcombine.high %v4995_v7, %v4995_v7  ;;  %v5347_v18 = vsel %vm5283_vm10, %v4996_v25, -inf  ;;  %v5354_v10 = vsel %vm5283_vm10, %v4995_v7, -inf  ;;  %v5012_v39 = vrot.slane %v4998_v61, %v18656_v19 }
 0x3ba   : > { %v5342_v37 = vmax.f32 %v5340_v42, %v5341_v52  ;;  %v5348_v62 = vrot.slane %v5347_v18, 4  ;;  %v5355_v47 = vrot.slane %v5354_v10, 4  ;;  %v5013_v43 = vcombine.high %v5005_v30, %v5005_v30 }
 0x3bb   : > { %v5361_v57 = vsel %vm5283_vm10, %v4997_v59, -inf  ;;  %v5014_v55 = vcombine.high %v5012_v39, %v5012_v39  ;;  %v5368_v53 = vsel %vm5283_vm10, %v5005_v30, -inf  ;;  %v5382_v1 = vsel %vm5283_vm10, %v5012_v39, -inf }
 0x3bc   : > { %v5343_v40 = vrot.slane %v5342_v37, 2  ;;  %v5349_v28 = vmax.f32 %v5347_v18, %v5348_v62  ;;  %v5356_v3 = vmax.f32 %v5354_v10, %v5355_v47  ;;  %v5362_v17 = vrot.slane %v5361_v57, 4 }
 0x3bd   : > { %v5369_v35 = vrot.slane %v5368_v53, 4  ;;  %v5375_v31 = vsel %vm5283_vm10, %v5013_v43, -inf  ;;  %v5383_v15 = vrot.slane %v5382_v1, 4  ;;  %v5389_v27 = vsel %vm5283_vm10, %v5014_v55, -inf }
 0x3be   : > { %v5344_v36 = vmax.f32 %v5342_v37, %v5343_v40  ;;  %v5350_v63 = vrot.slane %v5349_v28, 2  ;;  %v5357_v34 = vrot.slane %v5356_v3, 2  ;;  %v5363_v44 = vmax.f32 %v5361_v57, %v5362_v17 }
 0x3bf   : > { %v5370_v50 = vmax.f32 %v5368_v53, %v5369_v35  ;;  %v5376_v4 = vrot.slane %v5375_v31, 4  ;;  %v5384_v6 = vmax.f32 %v5382_v1, %v5383_v15  ;;  %v5390_v29 = vrot.slane %v5389_v27, 4 }
 0x3c0   : > { %v5345_v41 = vrot.slane %v5344_v36, 1  ;;  %v5351_v38 = vmax.f32 %v5349_v28, %v5350_v63  ;;  %v5358_v21 = vmax.f32 %v5356_v3, %v5357_v34  ;;  %v5364_v22 = vrot.slane %v5363_v44, 2 }
 0x3c1   : > { %v5371_v23 = vrot.slane %v5370_v50, 2  ;;  %v5377_v8 = vmax.f32 %v5375_v31, %v5376_v4  ;;  %v5385_v32 = vrot.slane %v5384_v6, 2  ;;  %v5391_v49 = vmax.f32 %v5389_v27, %v5390_v29 }
 0x3c2   : > { %v5352_v20 = vrot.slane %v5351_v38, 1  ;;  %v5359_v5 = vrot.slane %v5358_v21, 1  ;;  %v5365_v12 = vmax.f32 %v5363_v44, %v5364_v22  ;;  %v5346_v56 = vmax.f32 %v5344_v36, %v5345_v41 }
 0x3c3   : > { %v5372_v60 = vmax.f32 %v5370_v50, %v5371_v23  ;;  %v5378_v11 = vrot.slane %v5377_v8, 2  ;;  %v5386_v9 = vmax.f32 %v5384_v6, %v5385_v32  ;;  %v5392_v16 = vrot.slane %v5391_v49, 2 }
 0x3c4   : > { %v5353_v33 = vmax.f32 %v5351_v38, %v5352_v20  ;;  %v5360_v2 = vmax.f32 %v5358_v21, %v5359_v5  ;;  %v5366_v14 = vrot.slane %v5365_v12, 1  ;;  %v5339_v61 = vmax.f32 %v18721_v13, %v5338_v51 }
 0x3c5   : > { %v5373_v7 = vrot.slane %v5372_v60, 1  ;;  %v5379_v25 = vmax.f32 %v5377_v8, %v5378_v11  ;;  %v5393_v42 = vmax.f32 %v5391_v49, %v5392_v16  ;;  %v5387_v59 = vrot.slane %v5386_v9, 1 }
 0x3c6   : > { %v5367_v52 = vmax.f32 %v5365_v12, %v5366_v14  ;;  %v5808_v30 = vsel %vm5796_vm12, %v5353_v33, %v5346_v56  ;;  %v18745_v47 = vsel %vm1517_vm0, 0.0, %v18706_v45  ;;  %v5874_v13 = vsel %vm1517_vm0, %v5339_v61, 0.0 }
 0x3c7   : > { %v5809_v18 = vsel %vm20971_vm3, %v5360_v2, %v5808_v30  ;;  %v5374_v10 = vmax.f32 %v5372_v60, %v5373_v7  ;;  %v5380_v39 = vrot.slane %v5379_v25, 1  ;;  %v5394_v37 = vrot.slane %v5393_v42, 1 }
 0x3c8   : > { %v5810_v62 = vsel %vm20972_vm5, %v5367_v52, %v5809_v18  ;;  %v5388_v51 = vmax.f32 %v5386_v9, %v5387_v59  ;;  %v5942_v1 = vrot.slane %v18745_v47, 1  ;;  %v6033_v40 = vrot.slane %v18745_v47, 2 }
 0x3c9   : > { %v5381_v43 = vmax.f32 %v5379_v25, %v5380_v39  ;;  %v5811_v57 = vsel %vm20974_vm6, %v5374_v10, %v5810_v62  ;;  %v5395_v55 = vmax.f32 %v5393_v42, %v5394_v37  ;;  %v5943_v45 = vrot.slane %v5874_v13, 1 }
 0x3ca   : > { %v6034_v35 = vrot.slane %v5874_v13, 2 }
 0x3cb   : > { %v5812_v53 = vsel %vm5804_vm7, %v5381_v43, %v5811_v57  ;;  %v13109_v28 = vpop.f32.mrb[8].mxu1  ;;  %v5875_v17 = vsel %vm1517_vm0, %v5395_v55, 0.0  ;;  %v5944_v21 = vsel %vm1866_vm1, %v5942_v1, %v5943_v45 }
 0x3cc   : > { %v5813_v3 = vsel %vm5806_vm4, %v5388_v51, %v5812_v53  ;;  %v4733_v31 = vadd.f32 %v13109_v28, %v18634_v24  ;;  %v4724_v15 = vpop.f32.mrb[9].mxu1  ;;  %v5946_v36 = vrot.slane %v5875_v17, 1  ;;  %v6037_v63 = vrot.slane %v5875_v17, 2 }
 0x3cd   : > { %v18756_v27 = vsel %vm1517_vm0, 0.0, %v5813_v3  ;;  %v4725_v34 = vadd.f32 %v18634_v24, %v4724_v15  ;;  %v13110_v44 = vpop.f32.mrb[10].mxu1  ;;  %v6035_v22 = vsel %vm2232_vm2, %v6033_v40, %v6034_v35 }
 0x3ce   : > { %v14628_v50 = vpack.i.bf16 %v18756_v27, %v18745_v47  ;;  %v5945_v4 = vrot.slane %v18756_v27, 1  ;;  %v6036_v6 = vrot.slane %v18756_v27, 2  ;;  %v4829_v29 = vmax.f32 %v4733_v31, 0.0  ;;  %v4727_v38 = vpop.f32.mrb[11].mxu1 }
 0x3cf   : > { %v4736_v41 = vadd.f32 %v13110_v44, %v18634_v24  ;;  %v4827_v23 = vmax.f32 %v4725_v34, 0.0  ;;  %v4728_v8 = vadd.f32 %v18634_v24, %v4727_v38 }
 0x3d0   : > { %14629 = vrot.lane.b32.xlu1 %v14628_v50, %s20975_s18  ;;  %v18769_v32 = vsel %vm1866_vm1, %v5945_v4, %v5946_v36  ;;  %v18772_v49 = vsel %vm2232_vm2, %v6036_v6, %v6037_v63  ;;  %4861 = vst.msk [vmem:[%s18643_s5 + $0x50] sm:$0xff] %vm3147_vm13, %v4829_v29  ;;  %v4896_v20 = vsel %vm3147_vm13, %v4829_v29, -inf }
 0x3d1   : > { %v4830_v5 = vmax.f32 %v4736_v41, 0.0  ;;  %v14633_v12 = vpack.i.bf16 %v18769_v32, %v5944_v21  ;;  %4859 = vst.msk [vmem:[%s18643_s5 + $0x40] sm:$0xff] %vm3147_vm13, %v4827_v23  ;;  %v4895_v60 = vsel %vm3147_vm13, %v4827_v23, -inf  ;;  %v4828_v11 = vmax.f32 %v4728_v8, 0.0 }
 0x3d2   : > { %v14643_v9 = vpack.i.bf16 %v18772_v49, %v6035_v22  ;;  %v4897_v16 = vmax.f32 %v4895_v60, %v4896_v20 }
 0x3d3   : > { %4862 = vst.msk [vmem:[%s18643_s5 + $0x58] sm:$0xff] %vm3147_vm13, %v4830_v5  ;;  %v4899_v56 = vsel %vm3147_vm13, %v4830_v5, -inf  ;;  %4860 = vst.msk [vmem:[%s18643_s5 + $0x48] sm:$0xff] %vm3147_vm13, %v4828_v11  ;;  %v4898_v33 = vsel %vm3147_vm13, %v4828_v11, -inf }
 0x3d4   : > { %14634 = vrot.lane.b32.xlu1 %v14633_v12, %s21089_s13  ;;  %v5015_v2 = vcombine.high %v4897_v16, %v4897_v16  ;;  %v5022_v14 = vrot.slane %v4897_v16, %v18656_v19  ;;  %v4900_v7 = vmax.f32 %v4898_v33, %v4899_v56 }
 0x3d6   : > { %v5029_v25 = vrot.slane %v5015_v2, %v18656_v19  ;;  %v5030_v42 = vcombine.high %v5022_v14, %v5022_v14  ;;  %v5396_v61 = vsel %vm5283_vm10, %v5022_v14, -inf  ;;  %v5032_v52 = vcombine.high %v4900_v7, %v4900_v7 }
 0x3d7   : > { %v5397_v30 = vrot.slane %v5396_v61, 4  ;;  %v5039_v59 = vrot.slane %v4900_v7, %v18656_v19 }
 0x3d8   : > { %14639 = vrot.lane.b32.xlu1 %v14633_v12, %s20984_s2  ;;  %v5031_v18 = vcombine.high %v5029_v25, %v5029_v25  ;;  %v5403_v10 = vsel %vm5283_vm10, %v5030_v42, -inf  ;;  %v5410_v39 = vsel %vm5283_vm10, %v5029_v25, -inf  ;;  %v5046_v37 = vrot.slane %v5032_v52, %v18656_v19 }
 0x3d9   : > { %v5398_v62 = vmax.f32 %v5396_v61, %v5397_v30  ;;  %v5404_v43 = vrot.slane %v5403_v10, 4  ;;  %v5411_v57 = vrot.slane %v5410_v39, 4  ;;  %v5047_v13 = vcombine.high %v5039_v59, %v5039_v59 }
 0x3da   : > { %v5417_v51 = vsel %vm5283_vm10, %v5031_v18, -inf  ;;  %v5048_v55 = vcombine.high %v5046_v37, %v5046_v37  ;;  %v5424_v53 = vsel %vm5283_vm10, %v5039_v59, -inf  ;;  %v5438_v1 = vsel %vm5283_vm10, %v5046_v37, -inf }
 0x3db   : > { %v5399_v40 = vrot.slane %v5398_v62, 2  ;;  %v5405_v28 = vmax.f32 %v5403_v10, %v5404_v43  ;;  %v5412_v3 = vmax.f32 %v5410_v39, %v5411_v57  ;;  %v5418_v17 = vrot.slane %v5417_v51, 4 }
 0x3dc   : > { %14644 = vrot.lane.b32.xlu1 %v14643_v9, %s15588_s1  ;;  %v5425_v45 = vrot.slane %v5424_v53, 4  ;;  %v5431_v35 = vsel %vm5283_vm10, %v5047_v13, -inf  ;;  %v5439_v31 = vrot.slane %v5438_v1, 4  ;;  %v5445_v15 = vsel %vm5283_vm10, %v5048_v55, -inf }
 0x3dd   : > { %v5400_v36 = vmax.f32 %v5398_v62, %v5399_v40  ;;  %v5406_v63 = vrot.slane %v5405_v28, 2  ;;  %v5413_v34 = vrot.slane %v5412_v3, 2  ;;  %v5419_v44 = vmax.f32 %v5417_v51, %v5418_v17 }
 0x3de   : > { %v5426_v50 = vmax.f32 %v5424_v53, %v5425_v45  ;;  %v5432_v4 = vrot.slane %v5431_v35, 4  ;;  %v5440_v6 = vmax.f32 %v5438_v1, %v5439_v31  ;;  %v5446_v29 = vrot.slane %v5445_v15, 4 }
 0x3df   : > { %v5401_v41 = vrot.slane %v5400_v36, 1  ;;  %v5407_v38 = vmax.f32 %v5405_v28, %v5406_v63  ;;  %v5414_v21 = vmax.f32 %v5412_v3, %v5413_v34  ;;  %v5420_v22 = vrot.slane %v5419_v44, 2 }
 0x3e0   : > { %14649 = vrot.lane.b32.xlu1 %v14643_v9, %s15587_s10  ;;  %v5427_v23 = vrot.slane %v5426_v50, 2  ;;  %v5433_v8 = vmax.f32 %v5431_v35, %v5432_v4  ;;  %v5441_v20 = vrot.slane %v5440_v6, 2  ;;  %v5447_v5 = vmax.f32 %v5445_v15, %v5446_v29 }
 0x3e1   : > { %v5408_v12 = vrot.slane %v5407_v38, 1  ;;  %v5415_v60 = vrot.slane %v5414_v21, 1  ;;  %v5421_v11 = vmax.f32 %v5419_v44, %v5420_v22  ;;  %v5402_v14 = vmax.f32 %v5400_v36, %v5401_v41 }
 0x3e2   : > { %v5428_v16 = vmax.f32 %v5426_v50, %v5427_v23  ;;  %v5434_v56 = vrot.slane %v5433_v8, 2  ;;  %v5442_v33 = vmax.f32 %v5440_v6, %v5441_v20  ;;  %v5448_v2 = vrot.slane %v5447_v5, 2 }
 0x3e3   : > { %v5409_v7 = vmax.f32 %v5407_v38, %v5408_v12  ;;  %v5416_v25 = vmax.f32 %v5414_v21, %v5415_v60  ;;  %v5422_v42 = vrot.slane %v5421_v11, 1 }
 0x3e4   : > { %v5429_v61 = vrot.slane %v5428_v16, 1  ;;  %v5435_v52 = vmax.f32 %v5433_v8, %v5434_v56  ;;  %v5449_v30 = vmax.f32 %v5447_v5, %v5448_v2  ;;  %v5443_v18 = vrot.slane %v5442_v33, 1 }
 0x3e5   : > { %v5423_v59 = vmax.f32 %v5421_v11, %v5422_v42  ;;  %v5814_v9 = vsel %vm5796_vm12, %v5409_v7, %v5402_v14 }
 0x3e6   : > { %v5815_v10 = vsel %vm20971_vm3, %v5416_v25, %v5814_v9  ;;  %v5430_v39 = vmax.f32 %v5428_v16, %v5429_v61  ;;  %v5436_v37 = vrot.slane %v5435_v52, 1  ;;  %v5450_v62 = vrot.slane %v5449_v30, 1 }
 0x3e7   : > { %v5816_v43 = vsel %vm20972_vm5, %v5423_v59, %v5815_v10  ;;  %v13113_v51 = vpop.f32.mrb[12].mxu1  ;;  %v5444_v55 = vmax.f32 %v5442_v33, %v5443_v18 }
 0x3e8   : > { %v5437_v57 = vmax.f32 %v5435_v52, %v5436_v37  ;;  %v5817_v13 = vsel %vm20974_vm6, %v5430_v39, %v5816_v43  ;;  %v5451_v53 = vmax.f32 %v5449_v30, %v5450_v62  ;;  %v4749_v1 = vadd.f32 %v13113_v51, %v18634_v24  ;;  %v4740_v40 = vpop.f32.mrb[13].mxu1 }
 0x3e9   : > { %v4741_v28 = vadd.f32 %v18634_v24, %v4740_v40  ;;  %v13114_v3 = vpop.f32.mrb[14].mxu1 }
 0x3ea   : > { %v5818_v17 = vsel %vm5804_vm7, %v5437_v57, %v5817_v13  ;;  %v4833_v45 = vmax.f32 %v4749_v1, 0.0  ;;  %v4752_v35 = vadd.f32 %v13114_v3, %v18634_v24  ;;  %v4743_v31 = vpop.f32.mrb[15].mxu1  ;;  %v5876_v36 = vsel %vm1517_vm0, %v5451_v53, 0.0 }
 0x3eb   : > { %v5819_v15 = vsel %vm5806_vm4, %v5444_v55, %v5818_v17  ;;  %v4831_v63 = vmax.f32 %v4741_v28, 0.0  ;;  %v4744_v34 = vadd.f32 %v18634_v24, %v4743_v31  ;;  %v5949_v50 = vrot.slane %v5876_v36, 1 }
 0x3ec   : > { %v18816_v44 = vsel %vm1517_vm0, 0.0, %v5819_v15  ;;  %4865 = vst.msk [vmem:[%s18643_s5 + $0x70] sm:$0xff] %vm3147_vm13, %v4833_v45  ;;  %v4902_v4 = vsel %vm3147_vm13, %v4833_v45, -inf  ;;  %v4834_v6 = vmax.f32 %v4752_v35, 0.0  ;;  %v6040_v23 = vrot.slane %v5876_v36, 2 }
 0x3ed   : > { %v14653_v29 = vpack.i.bf16 %v18816_v44, %v18756_v27  ;;  %v5948_v41 = vrot.slane %v18816_v44, 1  ;;  %4863 = vst.msk [vmem:[%s18643_s5 + $0x60] sm:$0xff] %vm3147_vm13, %v4831_v63  ;;  %v4901_v38 = vsel %vm3147_vm13, %v4831_v63, -inf  ;;  %v4832_v21 = vmax.f32 %v4744_v34, 0.0 }
 0x3ee   : > { %v6039_v22 = vrot.slane %v18816_v44, 2  ;;  %v4903_v8 = vmax.f32 %v4901_v38, %v4902_v4  ;;  %4866 = vst.msk [vmem:[%s18643_s5 + $0x78] sm:$0xff] %vm3147_vm13, %v4834_v6  ;;  %v4905_v20 = vsel %vm3147_vm13, %v4834_v6, -inf }
 0x3ef   : > { %14654 = vrot.lane.b32.xlu1 %v14653_v29, %s15582_s15  ;;  %v18833_v5 = vsel %vm1866_vm1, %v5948_v41, %v5949_v50  ;;  %4864 = vst.msk [vmem:[%s18643_s5 + $0x68] sm:$0xff] %vm3147_vm13, %v4832_v21  ;;  %v4904_v12 = vsel %vm3147_vm13, %v4832_v21, -inf }
 0x3f0   : > { %v14658_v60 = vpack.i.bf16 %v18833_v5, %v18769_v32  ;;  %v18841_v11 = vsel %vm2232_vm2, %v6039_v22, %v6040_v23  ;;  %v5049_v16 = vcombine.high %v4903_v8, %v4903_v8  ;;  %v5056_v56 = vrot.slane %v4903_v8, %v18656_v19 }
 0x3f1   : > { %v4906_v33 = vmax.f32 %v4904_v12, %v4905_v20  ;;  %v14663_v2 = vpack.i.bf16 %v18841_v11, %v18772_v49 }
 0x3f2   : > { %v5063_v14 = vrot.slane %v5049_v16, %v18656_v19  ;;  %v5064_v7 = vcombine.high %v5056_v56, %v5056_v56  ;;  %v5452_v25 = vsel %vm5283_vm10, %v5056_v56, -inf }
 0x3f3   : > { %v5066_v42 = vcombine.high %v4906_v33, %v4906_v33  ;;  %14659 = vrot.lane.b32.xlu1 %v14658_v60, %s15584_s23  ;;  %v5453_v61 = vrot.slane %v5452_v25, 4  ;;  %v5073_v32 = vrot.slane %v4906_v33, %v18656_v19 }
 0x3f4   : > { %v5065_v52 = vcombine.high %v5063_v14, %v5063_v14  ;;  %v5459_v30 = vsel %vm5283_vm10, %v5064_v7, -inf  ;;  %v5466_v59 = vsel %vm5283_vm10, %v5063_v14, -inf }
 0x3f5   : > { %v5080_v9 = vrot.slane %v5066_v42, %v18656_v19  ;;  %v5454_v18 = vmax.f32 %v5452_v25, %v5453_v61  ;;  %v5460_v49 = vrot.slane %v5459_v30, 4  ;;  %v5467_v10 = vrot.slane %v5466_v59, 4 }
 0x3f6   : > { %v5081_v39 = vcombine.high %v5073_v32, %v5073_v32  ;;  %v5473_v37 = vsel %vm5283_vm10, %v5065_v52, -inf  ;;  %v5480_v43 = vsel %vm5283_vm10, %v5073_v32, -inf }
 0x3f7   : > { %v5082_v62 = vcombine.high %v5080_v9, %v5080_v9  ;;  %v5494_v57 = vsel %vm5283_vm10, %v5080_v9, -inf  ;;  %14664 = vrot.lane.b32.xlu1 %v14663_v2, %s20982_s26  ;;  %v5455_v13 = vrot.slane %v5454_v18, 2  ;;  %v5461_v51 = vmax.f32 %v5459_v30, %v5460_v49 }
 0x3f8   : > { %v5468_v55 = vmax.f32 %v5466_v59, %v5467_v10  ;;  %v5474_v53 = vrot.slane %v5473_v37, 4  ;;  %v5481_v1 = vrot.slane %v5480_v43, 4  ;;  %v5487_v40 = vsel %vm5283_vm10, %v5081_v39, -inf }
 0x3f9   : > { %v5495_v28 = vrot.slane %v5494_v57, 4  ;;  %v5501_v3 = vsel %vm5283_vm10, %v5082_v62, -inf  ;;  %v5456_v17 = vmax.f32 %v5454_v18, %v5455_v13  ;;  %v5462_v45 = vrot.slane %v5461_v51, 2 }
 0x3fa   : > { %v5469_v35 = vrot.slane %v5468_v55, 2  ;;  %v5475_v31 = vmax.f32 %v5473_v37, %v5474_v53  ;;  %v5482_v15 = vmax.f32 %v5480_v43, %v5481_v1  ;;  %v5488_v36 = vrot.slane %v5487_v40, 4 }
 0x3fb   : > { %v5496_v63 = vmax.f32 %v5494_v57, %v5495_v28  ;;  %v5502_v34 = vrot.slane %v5501_v3, 4  ;;  %v5457_v50 = vrot.slane %v5456_v17, 1  ;;  %v5463_v4 = vmax.f32 %v5461_v51, %v5462_v45 }
 0x3fc   : > { %v5470_v6 = vmax.f32 %v5468_v55, %v5469_v35  ;;  %v5476_v29 = vrot.slane %v5475_v31, 2  ;;  %v5483_v41 = vrot.slane %v5482_v15, 2  ;;  %v5489_v38 = vmax.f32 %v5487_v40, %v5488_v36 }
 0x3fd   : > { %v5497_v21 = vrot.slane %v5496_v63, 2  ;;  %v5503_v22 = vmax.f32 %v5501_v3, %v5502_v34  ;;  %v5464_v23 = vrot.slane %v5463_v4, 1  ;;  %v5458_v33 = vmax.f32 %v5456_v17, %v5457_v50 }
 0x3fe   : > { %v5471_v8 = vrot.slane %v5470_v6, 1  ;;  %v5477_v20 = vmax.f32 %v5475_v31, %v5476_v29  ;;  %v5484_v12 = vmax.f32 %v5482_v15, %v5483_v41  ;;  %v5490_v60 = vrot.slane %v5489_v38, 2  ;;  %v13117_v32 = vpop.f32.mrb[16].mxu1 }
 0x3ff   : > { %v5498_v16 = vmax.f32 %v5496_v63, %v5497_v21  ;;  %v5504_v56 = vrot.slane %v5503_v22, 2  ;;  %v5465_v2 = vmax.f32 %v5463_v4, %v5464_v23  ;;  %v4765_v9 = vadd.f32 %v13117_v32, %v18634_v24  ;;  %v4756_v18 = vpop.f32.mrb[17].mxu1 }
 0x400   : > { %v5472_v14 = vmax.f32 %v5470_v6, %v5471_v8  ;;  %v5478_v7 = vrot.slane %v5477_v20, 1  ;;  %v5485_v25 = vrot.slane %v5484_v12, 1  ;;  %v5491_v42 = vmax.f32 %v5489_v38, %v5490_v60  ;;  %v13118_v37 = vpop.f32.mrb[18].mxu1 }
 0x401   : > { %v5505_v61 = vmax.f32 %v5503_v22, %v5504_v56  ;;  %v5820_v30 = vsel %vm5796_vm12, %v5465_v2, %v5458_v33  ;;  %v5499_v59 = vrot.slane %v5498_v16, 1  ;;  %v4837_v57 = vmax.f32 %v4765_v9, 0.0  ;;  %v4759_v51 = vpop.f32.mrb[19].mxu1 }
 0x402   : > { %v5479_v52 = vmax.f32 %v5477_v20, %v5478_v7  ;;  %v5821_v49 = vsel %vm20971_vm3, %v5472_v14, %v5820_v30  ;;  %v5486_v10 = vmax.f32 %v5484_v12, %v5485_v25  ;;  %v5492_v39 = vrot.slane %v5491_v42, 1 }
 0x403   : > { %v5506_v62 = vrot.slane %v5505_v61, 1  ;;  %v4757_v13 = vadd.f32 %v18634_v24, %v4756_v18  ;;  %v4768_v1 = vadd.f32 %v13118_v37, %v18634_v24  ;;  %v4760_v40 = vadd.f32 %v18634_v24, %v4759_v51  ;;  %4869 = vst.msk [vmem:[%s18643_s5 + $0x90] sm:$0xff] %vm3147_vm13, %v4837_v57 }
 0x404   : > { %v5822_v43 = vsel %vm20972_vm5, %v5479_v52, %v5821_v49  ;;  %v5493_v55 = vmax.f32 %v5491_v42, %v5492_v39  ;;  %v5500_v28 = vmax.f32 %v5498_v16, %v5499_v59  ;;  %v4908_v17 = vsel %vm3147_vm13, %v4837_v57, -inf }
 0x405   : > { %v5823_v53 = vsel %vm20974_vm6, %v5486_v10, %v5822_v43  ;;  %v5507_v3 = vmax.f32 %v5505_v61, %v5506_v62  ;;  %v4835_v45 = vmax.f32 %v4757_v13, 0.0  ;;  %v4838_v35 = vmax.f32 %v4768_v1, 0.0 }
 0x406   : > { %v4836_v31 = vmax.f32 %v4760_v40, 0.0  ;;  %v5824_v15 = vsel %vm5804_vm7, %v5493_v55, %v5823_v53 }
 0x407   : > { %4867 = vst.msk [vmem:[%s18643_s5 + $0x80] sm:$0xff] %vm3147_vm13, %v4835_v45  ;;  %v4907_v36 = vsel %vm3147_vm13, %v4835_v45, -inf  ;;  %v5825_v63 = vsel %vm5806_vm4, %v5500_v28, %v5824_v15  ;;  %v18876_v24 = vsel %vm1517_vm0, %v5507_v3, 0.0  ;;  %4870 = vst.msk [vmem:[%s18643_s5 + $0x98] sm:$0xff] %vm3147_vm13, %v4838_v35  ;;  %v4911_v50 = vsel %vm3147_vm13, %v4838_v35, -inf }
 0x408   : > { %v4909_v34 = vmax.f32 %v4907_v36, %v4908_v17  ;;  %4868 = vst.msk [vmem:[%s18643_s5 + $0x88] sm:$0xff] %vm3147_vm13, %v4836_v31  ;;  %v4910_v4 = vsel %vm3147_vm13, %v4836_v31, -inf  ;;  %v18885_v6 = vsel %vm1517_vm0, 0.0, %v5825_v63  ;;  %v5952_v21 = vrot.slane %v18876_v24, 1 }
 0x409   : > { %v4912_v29 = vmax.f32 %v4910_v4, %v4911_v50  ;;  %v14668_v41 = vpack.i.bf16 %v18885_v6, %v18816_v44  ;;  %v5951_v38 = vrot.slane %v18885_v6, 1  ;;  %v6042_v60 = vrot.slane %v18885_v6, 2 }
 0x40a   : > { %v5083_v22 = vcombine.high %v4909_v34, %v4909_v34  ;;  %v5090_v23 = vrot.slane %v4909_v34, %v18656_v19 }
 0x40b   : > { %v5100_v8 = vcombine.high %v4912_v29, %v4912_v29  ;;  %v5107_v20 = vrot.slane %v4912_v29, %v18656_v19  ;;  %14669 = vrot.lane.b32.xlu0 %v14668_v41, %s20975_s18  ;;  %v18895_v12 = vsel %vm1866_vm1, %v5951_v38, %v5952_v21  ;;  %v6043_v38 = vrot.slane %v18876_v24, 2 }
 0x40c   : > { %v5097_v16 = vrot.slane %v5083_v22, %v18656_v19  ;;  %v5098_v56 = vcombine.high %v5090_v23, %v5090_v23  ;;  %v5508_v33 = vsel %vm5283_vm10, %v5090_v23, -inf  ;;  %v14673_v2 = vpack.i.bf16 %v18895_v12, %v18833_v5 }
 0x40d   : > { %v5509_v14 = vrot.slane %v5508_v33, 4  ;;  %v5114_v7 = vrot.slane %v5100_v8, %v18656_v19  ;;  %v5115_v25 = vcombine.high %v5107_v20, %v5107_v20  ;;  %v5536_v42 = vsel %vm5283_vm10, %v5107_v20, -inf }
 0x40e   : > { %v5099_v61 = vcombine.high %v5097_v16, %v5097_v16  ;;  %v5515_v32 = vsel %vm5283_vm10, %v5098_v56, -inf  ;;  %v5522_v52 = vsel %vm5283_vm10, %v5097_v16, -inf  ;;  %v5537_v30 = vrot.slane %v5536_v42, 4 }
 0x40f   : > { %v5510_v59 = vmax.f32 %v5508_v33, %v5509_v14  ;;  %v5516_v9 = vrot.slane %v5515_v32, 4  ;;  %v5523_v18 = vrot.slane %v5522_v52, 4  ;;  %v5116_v49 = vcombine.high %v5114_v7, %v5114_v7  ;;  %14674 = vrot.lane.b32.xlu0 %v14673_v2, %s21089_s13 }
 0x410   : > { %v5529_v5 = vsel %vm5283_vm10, %v5099_v61, -inf  ;;  %v5538_v10 = vmax.f32 %v5536_v42, %v5537_v30  ;;  %v5543_v39 = vsel %vm5283_vm10, %v5115_v25, -inf  ;;  %v5550_v37 = vsel %vm5283_vm10, %v5114_v7, -inf }
 0x411   : > { %v5511_v62 = vrot.slane %v5510_v59, 2  ;;  %v5517_v43 = vmax.f32 %v5515_v32, %v5516_v9  ;;  %v5524_v57 = vmax.f32 %v5522_v52, %v5523_v18  ;;  %v5530_v13 = vrot.slane %v5529_v5, 4  ;;  %v14915_v9 = vld [vmem:[%s21058_s21] sm:$0xff]  }
 0x412   : > { %v5539_v51 = vrot.slane %v5538_v10, 2  ;;  %v5544_v55 = vrot.slane %v5543_v39, 4  ;;  %v5551_v53 = vrot.slane %v5550_v37, 4  ;;  %v5557_v1 = vsel %vm5283_vm10, %v5116_v49, -inf  ;;  %13131 = vmatprep.subr.bf16.mxu0 %v14915_v9 }
 0x413   : > { %v5512_v40 = vmax.f32 %v5510_v59, %v5511_v62  ;;  %v5518_v28 = vrot.slane %v5517_v43, 2  ;;  %v5525_v3 = vrot.slane %v5524_v57, 2  ;;  %v5531_v17 = vmax.f32 %v5529_v5, %v5530_v13  ;;  %14679 = vrot.lane.b32.xlu0 %v14673_v2, %s20984_s2  ;;  %13132 = vmatpush3.bf16.msra.mxu0 %v14915_v9  ;;  %v14917_v13 = vld [vmem:[%s21058_s21 + $0x10] sm:$0xff]  }
 0x414   : > { %v5540_v45 = vmax.f32 %v5538_v10, %v5539_v51  ;;  %v5545_v35 = vmax.f32 %v5543_v39, %v5544_v55  ;;  %v5552_v31 = vmax.f32 %v5550_v37, %v5551_v53  ;;  %v5558_v15 = vrot.slane %v5557_v1, 4  ;;  %v14916_v37 = vld [vmem:[%s21058_s21 + $0x8] sm:$0xff]  }
 0x415   : > { %v5513_v36 = vrot.slane %v5512_v40, 1  ;;  %v5519_v63 = vmax.f32 %v5517_v43, %v5518_v28  ;;  %v5526_v34 = vmax.f32 %v5524_v57, %v5525_v3  ;;  %v5532_v50 = vrot.slane %v5531_v17, 2  ;;  %13133 = vmatprep.subr.bf16.mxu0 %v14916_v37 }
 0x416   : > { %v5546_v4 = vrot.slane %v5545_v35, 2  ;;  %v5553_v29 = vrot.slane %v5552_v31, 2  ;;  %v5559_v41 = vmax.f32 %v5557_v1, %v5558_v15  ;;  %v5541_v8 = vrot.slane %v5540_v45, 1  ;;  %v14919_v15 = vld [vmem:[%s21058_s21 + $0x20] ss:$0 sps:$4 sm:$0xff]  }
 0x417   : > { %v5520_v21 = vrot.slane %v5519_v63, 1  ;;  %v5527_v22 = vrot.slane %v5526_v34, 1  ;;  %v5533_v23 = vmax.f32 %v5531_v17, %v5532_v50  ;;  %v5514_v20 = vmax.f32 %v5512_v40, %v5513_v36  ;;  %13134 = vmatpush3.bf16.msra.mxu0 %v14916_v37 }
 0x418   : > { %v5547_v16 = vmax.f32 %v5545_v35, %v5546_v4  ;;  %v5554_v56 = vmax.f32 %v5552_v31, %v5553_v29  ;;  %v5560_v33 = vrot.slane %v5559_v41, 2  ;;  %v6044_v52 = vsel %vm2232_vm2, %v6042_v60, %v6043_v38  ;;  %13135 = vmatprep.subr.bf16.mxu0 %v14917_v13 }
 0x419   : > { %v5521_v14 = vmax.f32 %v5519_v63, %v5520_v21  ;;  %v5528_v7 = vmax.f32 %v5526_v34, %v5527_v22  ;;  %v5534_v25 = vrot.slane %v5533_v23, 1  ;;  %v14683_v59 = vpack.i.bf16 %v6044_v52, %v18841_v11  ;;  %v18950_v34 = vld [vmem:[%s21061_s4] ss:$0 sm:$0xff]  ;;  %s21403_s4 = sld [smem:[#allocation49_spill]] }
 0x41a   : > { %v5548_v42 = vrot.slane %v5547_v16, 1  ;;  %v5555_v61 = vrot.slane %v5554_v56, 1  ;;  %v5561_v32 = vmax.f32 %v5559_v41, %v5560_v33  ;;  %v5542_v49 = vmax.f32 %v5540_v45, %v5541_v8  ;;  %v14918_v45 = vld [vmem:[%s21058_s21 + $0x18] sm:$0xff]  }
 0x41b   : > { %v5535_v30 = vmax.f32 %v5533_v23, %v5534_v25  ;;  %v5826_v24 = vsel %vm5796_vm12, %v5521_v14, %v5514_v20  ;;  %14684 = vrot.lane.b32.xlu0 %v14683_v59, %s15588_s1  ;;  %13136 = vmatpush3.bf16.msra.mxu0 %v14917_v13  ;;  %v6247_v63 = vsel %vm4654_vm14, %v14919_v15, 0 }
 0x41c   : > { %v5827_v18 = vsel %vm20971_vm3, %v5528_v7, %v5826_v24  ;;  %v5562_v5 = vrot.slane %v5561_v32, 1  ;;  %v5549_v10 = vmax.f32 %v5547_v16, %v5548_v42  ;;  %v5556_v62 = vmax.f32 %v5554_v56, %v5555_v61  ;;  %13137 = vmatprep.subr.bf16.mxu0 %v14918_v45 }
 0x41d   : > { %v5828_v39 = vsel %vm20972_vm5, %v5535_v30, %v5827_v18 }
 0x41e   : > { %v5563_v60 = vmax.f32 %v5561_v32, %v5562_v5  ;;  %v5829_v43 = vsel %vm20974_vm6, %v5542_v49, %v5828_v39 }
 0x41f   : > { %v5830_v11 = vsel %vm5804_vm7, %v5549_v10, %v5829_v43  ;;  %14689 = vrot.lane.b32.xlu0 %v14683_v59, %s15587_s10  ;;  %13138 = vmatpush3.bf16.msra.mxu0 %v14918_v45 }
 0x420   : > { %v5831_v2 = vsel %vm5806_vm4, %v5556_v62, %v5830_v11  ;;  %v5878_v57 = vsel %vm1517_vm0, %v5563_v60, 0.0  ;;  %13242 = vmatprep.subr.msk.bf16.mxu0 %vm4654_vm14, %v14919_v15  ;;  %vm21214_vm14 = vcmask 261120  }
 0x421   : > { %v18927_v51 = vsel %vm1517_vm0, 0.0, %v5831_v2  ;;  %v5955_v53 = vrot.slane %v5878_v57, 1  ;;  %v6046_v40 = vrot.slane %v5878_v57, 2 }
 0x422   : > { %v5954_v55 = vrot.slane %v18927_v51, 1  ;;  %v6045_v1 = vrot.slane %v18927_v51, 2  ;;  %v14693_v28 = vpack.i.bf16 %v18927_v51, %v18885_v6 }
 0x423   : > { %13140 = vmatpush3.bf16.msra.mxu0 %v6247_v63 }
 0x424   : > { %v18935_v3 = vsel %vm1866_vm1, %v5954_v55, %v5955_v53  ;;  %v18938_v17 = vsel %vm2232_vm2, %v6045_v1, %v6046_v40  ;;  %14694 = vrot.lane.b32.xlu0 %v14693_v28, %s15582_s15 }
 0x425   : > { %v14698_v35 = vpack.i.bf16 %v18935_v3, %v18895_v12  ;;  %v14703_v31 = vpack.i.bf16 %v18938_v17, %v6044_v52 }
 0x428   : > { %14699 = vrot.lane.b32.xlu0 %v14698_v35, %s15584_s23 }
 0x42b   : > { %v13121_v36 = vpop.f32.mrb[20].mxu1 }
 0x42c   : > { %v4781_v12 = vadd.f32 %v18950_v34, %v13121_v36  ;;  %v4772_v50 = vpop.f32.mrb[21].mxu1  ;;  %14704 = vrot.lane.b32.xlu0 %v14703_v31, %s20982_s26 }
 0x42d   : > { %v4773_v4 = vadd.f32 %v18950_v34, %v4772_v50  ;;  %v13122_v29 = vpop.f32.mrb[22].mxu1 }
 0x42e   : > { %v4841_v41 = vmax.f32 %v4781_v12, 0.0  ;;  %v4784_v38 = vadd.f32 %v18950_v34, %v13122_v29  ;;  %v4775_v21 = vpop.f32.mrb[23].mxu1 }
 0x42f   : > { %v4839_v22 = vmax.f32 %v4773_v4, 0.0  ;;  %v4776_v23 = vadd.f32 %v18950_v34, %v4775_v21 }
 0x430   : > { %4873 = vst.msk [vmem:[%s18643_s5 + $0xb0] sm:$0xff] %vm3147_vm13, %v4841_v41  ;;  %v4914_v8 = vsel %vm3147_vm13, %v4841_v41, -inf  ;;  %v4842_v20 = vmax.f32 %v4784_v38, 0.0 }
 0x431   : > { %4871 = vst.msk [vmem:[%s18643_s5 + $0xa0] sm:$0xff] %vm3147_vm13, %v4839_v22  ;;  %v4913_v16 = vsel %vm3147_vm13, %v4839_v22, -inf  ;;  %v4840_v56 = vmax.f32 %v4776_v23, 0.0 }
 0x432   : > { %v4915_v33 = vmax.f32 %v4913_v16, %v4914_v8  ;;  %4874 = vst.msk [vmem:[%s18643_s5 + $0xb8] sm:$0xff] %vm3147_vm13, %v4842_v20  ;;  %v4917_v14 = vsel %vm3147_vm13, %v4842_v20, -inf }
 0x433   : > { %4872 = vst.msk [vmem:[%s18643_s5 + $0xa8] sm:$0xff] %vm3147_vm13, %v4840_v56  ;;  %v4916_v7 = vsel %vm3147_vm13, %v4840_v56, -inf }
 0x434   : > { %v5117_v25 = vcombine.high %v4915_v33, %v4915_v33  ;;  %v5124_v42 = vrot.slane %v4915_v33, %v18656_v19  ;;  %v4918_v61 = vmax.f32 %v4916_v7, %v4917_v14 }
 0x436   : > { %v5131_v32 = vrot.slane %v5117_v25, %v18656_v19  ;;  %v5132_v52 = vcombine.high %v5124_v42, %v5124_v42  ;;  %v5564_v30 = vsel %vm5283_vm10, %v5124_v42, -inf  ;;  %v5134_v24 = vcombine.high %v4918_v61, %v4918_v61 }
 0x437   : > { %v5565_v59 = vrot.slane %v5564_v30, 4  ;;  %v5141_v9 = vrot.slane %v4918_v61, %v18656_v19 }
 0x438   : > { %v5133_v18 = vcombine.high %v5131_v32, %v5131_v32  ;;  %v5571_v49 = vsel %vm5283_vm10, %v5132_v52, -inf  ;;  %v5578_v5 = vsel %vm5283_vm10, %v5131_v32, -inf  ;;  %v5148_v10 = vrot.slane %v5134_v24, %v18656_v19 }
 0x439   : > { %v5566_v39 = vmax.f32 %v5564_v30, %v5565_v59  ;;  %v5572_v37 = vrot.slane %v5571_v49, 4  ;;  %v5579_v62 = vrot.slane %v5578_v5, 4  ;;  %v5149_v60 = vcombine.high %v5141_v9, %v5141_v9 }
 0x43a   : > { %v5585_v43 = vsel %vm5283_vm10, %v5133_v18, -inf  ;;  %v5150_v11 = vcombine.high %v5148_v10, %v5148_v10  ;;  %v5592_v2 = vsel %vm5283_vm10, %v5141_v9, -inf  ;;  %v5606_v57 = vsel %vm5283_vm10, %v5148_v10, -inf }
 0x43b   : > { %v5567_v13 = vrot.slane %v5566_v39, 2  ;;  %v5573_v55 = vmax.f32 %v5571_v49, %v5572_v37  ;;  %v5580_v53 = vmax.f32 %v5578_v5, %v5579_v62  ;;  %v5586_v1 = vrot.slane %v5585_v43, 4 }
 0x43c   : > { %v5593_v40 = vrot.slane %v5592_v2, 4  ;;  %v5599_v28 = vsel %vm5283_vm10, %v5149_v60, -inf  ;;  %v5607_v45 = vrot.slane %v5606_v57, 4  ;;  %v5613_v35 = vsel %vm5283_vm10, %v5150_v11, -inf }
 0x43d   : > { %v5568_v31 = vmax.f32 %v5566_v39, %v5567_v13  ;;  %v5574_v15 = vrot.slane %v5573_v55, 2  ;;  %v5581_v36 = vrot.slane %v5580_v53, 2  ;;  %v5587_v63 = vmax.f32 %v5585_v43, %v5586_v1 }
 0x43e   : > { %v5594_v12 = vmax.f32 %v5592_v2, %v5593_v40  ;;  %v5600_v50 = vrot.slane %v5599_v28, 4  ;;  %v5608_v4 = vmax.f32 %v5606_v57, %v5607_v45  ;;  %v5614_v29 = vrot.slane %v5613_v35, 4 }
 0x43f   : > { %v5569_v41 = vrot.slane %v5568_v31, 1  ;;  %v5575_v38 = vmax.f32 %v5573_v55, %v5574_v15  ;;  %v5582_v21 = vmax.f32 %v5580_v53, %v5581_v36  ;;  %v5588_v22 = vrot.slane %v5587_v63, 2 }
 0x440   : > { %v5595_v23 = vrot.slane %v5594_v12, 2  ;;  %v5601_v8 = vmax.f32 %v5599_v28, %v5600_v50  ;;  %v5609_v20 = vrot.slane %v5608_v4, 2  ;;  %v5615_v16 = vmax.f32 %v5613_v35, %v5614_v29 }
 0x441   : > { %v5576_v33 = vrot.slane %v5575_v38, 1  ;;  %v5583_v14 = vrot.slane %v5582_v21, 1  ;;  %v5589_v7 = vmax.f32 %v5587_v63, %v5588_v22  ;;  %v5570_v52 = vmax.f32 %v5568_v31, %v5569_v41 }
 0x442   : > { %v18981_v56 = vpop.permute.xlu1 %14629  ;;  %v5596_v25 = vmax.f32 %v5594_v12, %v5595_v23  ;;  %v5602_v42 = vrot.slane %v5601_v8, 2  ;;  %v5610_v61 = vmax.f32 %v5608_v4, %v5609_v20  ;;  %v5616_v32 = vrot.slane %v5615_v16, 2 }
 0x443   : > { %v5577_v30 = vmax.f32 %v5575_v38, %v5576_v33  ;;  %v5584_v24 = vmax.f32 %v5582_v21, %v5583_v14  ;;  %v5590_v59 = vrot.slane %v5589_v7, 1  ;;  %v14632_v20 = vunpack.i.h.bf16 %v18981_v56 }
 0x444   : > { %v5597_v9 = vrot.slane %v5596_v25, 1  ;;  %v5603_v18 = vmax.f32 %v5601_v8, %v5602_v42  ;;  %v5617_v49 = vmax.f32 %v5615_v16, %v5616_v32  ;;  %v5611_v37 = vrot.slane %v5610_v61, 1 }
 0x445   : > { %v5591_v10 = vmax.f32 %v5589_v7, %v5590_v59  ;;  %v5832_v39 = vsel %vm5796_vm12, %v5577_v30, %v5570_v52  ;;  %v14631_v16 = vunpack.i.l.bf16 %v18981_v56  ;;  %v19029_v59 = vsel %vm3147_vm13, %v18745_v47, %v14632_v20 }
 0x446   : > { %v18983_v5 = vpop.permute.xlu1 %14634  ;;  %v5833_v62 = vsel %vm20971_vm3, %v5584_v24, %v5832_v39  ;;  %v5598_v60 = vmax.f32 %v5596_v25, %v5597_v9  ;;  %v5604_v43 = vrot.slane %v5603_v18, 1  ;;  %v5618_v11 = vrot.slane %v5617_v49, 1 }
 0x447   : > { %v5834_v2 = vsel %vm20972_vm5, %v5591_v10, %v5833_v62  ;;  %v5612_v53 = vmax.f32 %v5610_v61, %v5611_v37  ;;  %v14636_v47 = vunpack.i.l.bf16 %v18983_v5 }
 0x448   : > { %v5605_v57 = vmax.f32 %v5603_v18, %v5604_v43  ;;  %v5835_v13 = vsel %vm20974_vm6, %v5598_v60, %v5834_v2  ;;  %v5619_v1 = vmax.f32 %v5617_v49, %v5618_v11  ;;  %v19037_v49 = vsel %vm3147_vm13, 0.0, %v14631_v16 }
 0x44a   : > { %v18989_v55 = vpop.permute.xlu1 %14639  ;;  %v5836_v40 = vsel %vm5804_vm7, %v5605_v57, %v5835_v13  ;;  %v5879_v35 = vsel %vm1517_vm0, %v5619_v1, 0.0 }
 0x44b   : > { %v13125_v28 = vpop.f32.mrb[24].mxu1  ;;  %v5837_v45 = vsel %vm5806_vm4, %v5612_v53, %v5836_v40  ;;  %v5958_v4 = vrot.slane %v5879_v35, 1  ;;  %v6049_v29 = vrot.slane %v5879_v35, 2  ;;  %v14641_v60 = vunpack.i.l.bf16 %v18989_v55 }
 0x44c   : > { %v4797_v31 = vadd.f32 %v18950_v34, %v13125_v28  ;;  %v4788_v15 = vpop.f32.mrb[25].mxu1  ;;  %v18996_v36 = vsel %vm1517_vm0, 0.0, %v5837_v45 }
 0x44d   : > { %v4789_v63 = vadd.f32 %v18950_v34, %v4788_v15  ;;  %v13126_v12 = vpop.f32.mrb[26].mxu1  ;;  %v14708_v50 = vpack.i.bf16 %v18996_v36, %v18927_v51  ;;  %v5957_v23 = vrot.slane %v18996_v36, 1  ;;  %v6048_v8 = vrot.slane %v18996_v36, 2 }
 0x44e   : > { %v4845_v41 = vmax.f32 %v4797_v31, 0.0  ;;  %v4800_v38 = vadd.f32 %v18950_v34, %v13126_v12  ;;  %v19002_v21 = vpop.permute.xlu1 %14644  ;;  %v4791_v22 = vpop.f32.mrb[27].mxu1 }
 0x44f   : > { %v4843_v33 = vmax.f32 %v4789_v63, 0.0  ;;  %v4792_v14 = vadd.f32 %v18950_v34, %v4791_v22  ;;  %14709 = vrot.lane.b32.xlu1 %v14708_v50, %s20975_s18  ;;  %v19014_v42 = vsel %vm1866_vm1, %v5957_v23, %v5958_v4  ;;  %v19017_v61 = vsel %vm2232_vm2, %v6048_v8, %v6049_v29 }
 0x450   : > { %4877 = vst.msk [vmem:[%s18643_s5 + $0xd0] sm:$0xff] %vm3147_vm13, %v4845_v41  ;;  %v4920_v7 = vsel %vm3147_vm13, %v4845_v41, -inf  ;;  %v4846_v25 = vmax.f32 %v4800_v38, 0.0  ;;  %v14713_v24 = vpack.i.bf16 %v19014_v42, %v18935_v3  ;;  %v14723_v18 = vpack.i.bf16 %v19017_v61, %v18938_v17 }
 0x451   : > { %4875 = vst.msk [vmem:[%s18643_s5 + $0xc0] sm:$0xff] %vm3147_vm13, %v4843_v33  ;;  %v4919_v56 = vsel %vm3147_vm13, %v4843_v33, -inf  ;;  %v4844_v32 = vmax.f32 %v4792_v14, 0.0  ;;  %v14642_v3 = vunpack.i.h.bf16 %v18989_v55  ;;  %v14646_v43 = vunpack.i.l.bf16 %v19002_v21 }
 0x452   : > { %v4921_v52 = vmax.f32 %v4919_v56, %v4920_v7  ;;  %4878 = vst.msk [vmem:[%s18643_s5 + $0xd8] sm:$0xff] %vm3147_vm13, %v4846_v25  ;;  %v4923_v30 = vsel %vm3147_vm13, %v4846_v25, -inf  ;;  %v19040_v62 = vpop.permute.xlu1 %14649 }
 0x453   : > { %4876 = vst.msk [vmem:[%s18643_s5 + $0xc8] sm:$0xff] %vm3147_vm13, %v4844_v32  ;;  %v4922_v9 = vsel %vm3147_vm13, %v4844_v32, -inf  ;;  %14714 = vrot.lane.b32.xlu1 %v14713_v24, %s21089_s13  ;;  %v14652_v1 = vunpack.i.h.bf16 %v19040_v62  ;;  %v14651_v40 = vunpack.i.l.bf16 %v19040_v62 }
 0x454   : > { %v5151_v10 = vcombine.high %v4921_v52, %v4921_v52  ;;  %v5158_v39 = vrot.slane %v4921_v52, %v18656_v19  ;;  %v4924_v37 = vmax.f32 %v4922_v9, %v4923_v30 }
 0x456   : > { %v5165_v17 = vrot.slane %v5151_v10, %v18656_v19  ;;  %v5166_v11 = vcombine.high %v5158_v39, %v5158_v39  ;;  %v5620_v2 = vsel %vm5283_vm10, %v5158_v39, -inf  ;;  %v5168_v57 = vcombine.high %v4924_v37, %v4924_v37 }
 0x457   : > { %v5621_v13 = vrot.slane %v5620_v2, 4  ;;  %v5175_v53 = vrot.slane %v4924_v37, %v18656_v19  ;;  %14719 = vrot.lane.b32.xlu1 %v14713_v24, %s20984_s2 }
 0x458   : > { %v5167_v28 = vcombine.high %v5165_v17, %v5165_v17  ;;  %v5627_v45 = vsel %vm5283_vm10, %v5166_v11, -inf  ;;  %v5634_v35 = vsel %vm5283_vm10, %v5165_v17, -inf  ;;  %v5182_v31 = vrot.slane %v5168_v57, %v18656_v19 }
 0x459   : > { %v5622_v15 = vmax.f32 %v5620_v2, %v5621_v13  ;;  %v5628_v63 = vrot.slane %v5627_v45, 4  ;;  %v5635_v12 = vrot.slane %v5634_v35, 4  ;;  %v5183_v50 = vcombine.high %v5175_v53, %v5175_v53 }
 0x45a   : > { %v5641_v4 = vsel %vm5283_vm10, %v5167_v28, -inf  ;;  %v5184_v29 = vcombine.high %v5182_v31, %v5182_v31  ;;  %v5648_v41 = vsel %vm5283_vm10, %v5175_v53, -inf  ;;  %v5662_v38 = vsel %vm5283_vm10, %v5182_v31, -inf }
 0x45b   : > { %v5623_v22 = vrot.slane %v5622_v15, 2  ;;  %v5629_v23 = vmax.f32 %v5627_v45, %v5628_v63  ;;  %v5636_v8 = vmax.f32 %v5634_v35, %v5635_v12  ;;  %v5642_v20 = vrot.slane %v5641_v4, 4  ;;  %14724 = vrot.lane.b32.xlu1 %v14723_v18, %s15588_s1 }
 0x45c   : > { %v5649_v16 = vrot.slane %v5648_v41, 4  ;;  %v5655_v33 = vsel %vm5283_vm10, %v5183_v50, -inf  ;;  %v5663_v14 = vrot.slane %v5662_v38, 4  ;;  %v5669_v7 = vsel %vm5283_vm10, %v5184_v29, -inf }
 0x45d   : > { %v5624_v25 = vmax.f32 %v5622_v15, %v5623_v22  ;;  %v5630_v56 = vrot.slane %v5629_v23, 2  ;;  %v5637_v32 = vrot.slane %v5636_v8, 2  ;;  %v5643_v52 = vmax.f32 %v5641_v4, %v5642_v20 }
 0x45e   : > { %v5650_v30 = vmax.f32 %v5648_v41, %v5649_v16  ;;  %v5656_v24 = vrot.slane %v5655_v33, 4  ;;  %v5664_v9 = vmax.f32 %v5662_v38, %v5663_v14  ;;  %v5670_v10 = vrot.slane %v5669_v7, 4 }
 0x45f   : > { %v5625_v39 = vrot.slane %v5624_v25, 1  ;;  %v5631_v37 = vmax.f32 %v5629_v23, %v5630_v56  ;;  %v5638_v17 = vmax.f32 %v5636_v8, %v5637_v32  ;;  %v5644_v11 = vrot.slane %v5643_v52, 2  ;;  %14729 = vrot.lane.b32.xlu1 %v14723_v18, %s15587_s10 }
 0x460   : > { %v5651_v2 = vrot.slane %v5650_v30, 2  ;;  %v5657_v57 = vmax.f32 %v5655_v33, %v5656_v24  ;;  %v5665_v13 = vrot.slane %v5664_v9, 2  ;;  %v5671_v53 = vmax.f32 %v5669_v7, %v5670_v10 }
 0x461   : > { %v14655_v28 = vpop.permute.xlu1 %14654  ;;  %v5626_v45 = vmax.f32 %v5624_v25, %v5625_v39  ;;  %v5632_v35 = vrot.slane %v5631_v37, 1  ;;  %v5639_v31 = vrot.slane %v5638_v17, 1  ;;  %v5645_v15 = vmax.f32 %v5643_v52, %v5644_v11 }
 0x462   : > { %v5652_v63 = vmax.f32 %v5650_v30, %v5651_v2  ;;  %v5658_v12 = vrot.slane %v5657_v57, 2  ;;  %v5666_v50 = vmax.f32 %v5664_v9, %v5665_v13  ;;  %v14657_v4 = vunpack.i.h.bf16 %v14655_v28  ;;  %v21213_v9 = vld [vmem:[#allocation70_spill] sm:$0xff] }
 0x463   : > { %v5633_v29 = vmax.f32 %v5631_v37, %v5632_v35  ;;  %v5640_v41 = vmax.f32 %v5638_v17, %v5639_v31  ;;  %v5646_v38 = vrot.slane %v5645_v15, 1  ;;  %v14656_v22 = vunpack.i.l.bf16 %v14655_v28 }
 0x464   : > { %v5653_v23 = vrot.slane %v5652_v63, 1  ;;  %v5659_v8 = vmax.f32 %v5657_v57, %v5658_v12  ;;  %v5667_v20 = vrot.slane %v5666_v50, 1  ;;  %v6132_v16 = vsel %vm20970_vm15, %v19029_v59, %v14657_v4 }
 0x465   : > { %v14660_v18 = vpop.permute.xlu1 %14659  ;;  %v5647_v33 = vmax.f32 %v5645_v15, %v5646_v38  ;;  %v5838_v14 = vsel %vm5796_vm12, %v5633_v29, %v5626_v45  ;;  %v6131_v7 = vsel %vm20970_vm15, %v19037_v49, %v14656_v22  ;;  %v6140_v25 = vsel %vm20973_vm11, %v6132_v16, %v14636_v47  ;;  %vm21215_vm15 = vmmov %vm21214_vm14  ;;  %v21218_v45 = vld [vmem:[#allocation82_spill] sm:$0xff] }
 0x466   : > { %v5839_v56 = vsel %vm20971_vm3, %v5640_v41, %v5838_v14  ;;  %v5654_v32 = vmax.f32 %v5652_v63, %v5653_v23  ;;  %v5660_v52 = vrot.slane %v5659_v8, 1  ;;  %v5668_v30 = vmax.f32 %v5666_v50, %v5667_v20 }
 0x467   : > { %v5840_v24 = vsel %vm20972_vm5, %v5647_v33, %v5839_v56  ;;  %v6139_v59 = vsel %vm20973_vm11, %v6131_v7, %v21213_v9  ;;  %v14662_v10 = vunpack.i.h.bf16 %v14660_v18  ;;  %v14661_v39 = vunpack.i.l.bf16 %v14660_v18 }
 0x468   : > { %v5661_v37 = vmax.f32 %v5659_v8, %v5660_v52  ;;  %v5841_v17 = vsel %vm20974_vm6, %v5654_v32, %v5840_v24  ;;  %v6147_v49 = vsel %vm21214_vm14, %v6139_v59, %v14641_v60  ;;  %v6148_v47 = vsel %vm21215_vm15, %v6140_v25, %v14642_v3 }
 0x469   : > { %v14665_v11 = vpop.permute.xlu1 %14664  ;;  %vm21216_vm3 = vcmask 326656   ;;  %vm21219_vm11 = vcmask 392192   ;;  %v5672_v15 = vrot.slane %v5671_v53, 2  ;;  %vm21221_vm15 = vcmask 457728  }
 0x46a   : > { %v6155_v2 = vsel %vm21216_vm3, %v6147_v49, %v14661_v39  ;;  %vm21217_vm5 = vmmov %vm21216_vm3  ;;  %v14667_v13 = vunpack.i.h.bf16 %v14665_v11  ;;  %v14666_v28 = vunpack.i.l.bf16 %v14665_v11  ;;  %v5842_v60 = vsel %vm5804_vm7, %v5661_v37, %v5841_v17 }
 0x46b   : > { %v6156_v57 = vsel %vm21217_vm5, %v6148_v47, %v14662_v10  ;;  %v6163_v35 = vsel %vm21219_vm11, %v6155_v2, %v21218_v45  ;;  %vm21220_vm6 = vmmov %vm21219_vm11  ;;  %v5843_v63 = vsel %vm5806_vm4, %v5668_v30, %v5842_v60  ;;  %vm21223_vm11 = vcmask 1043459  }
 0x46c   : > { %v6164_v31 = vsel %vm21220_vm6, %v6156_v57, %v14646_v43  ;;  %v6171_v55 = vsel %vm21221_vm15, %v6163_v35, %v14651_v40  ;;  %vm21222_vm3 = vmmov %vm21221_vm15  ;;  %v19100_v4 = vsel %vm1517_vm0, 0.0, %v5843_v63  ;;  %v5673_v43 = vmax.f32 %v5671_v53, %v5672_v15 }
 0x46d   : > { %v6172_v3 = vsel %vm21222_vm3, %v6164_v31, %v14652_v1  ;;  %v6179_v12 = vsel %vm4513_vm8, %v6171_v55, %v14666_v28  ;;  %v14733_v29 = vpack.i.bf16 %v19100_v4, %v18996_v36  ;;  %v5960_v1 = vrot.slane %v19100_v4, 1 }
 0x46e   : > { %v6180_v50 = vsel %vm4513_vm8, %v6172_v3, %v14667_v13  ;;  %v5674_v38 = vrot.slane %v5673_v43, 1  ;;  %v6051_v40 = vrot.slane %v19100_v4, 2  ;;  %vm21224_vm5 = vcmask 1044484  }
 0x46f   : > { %v6187_v41 = vpack.c.bf16 %v6180_v50, %v6179_v12  ;;  %14734 = vrot.lane.b32.xlu1 %v14733_v29, %s15582_s15  ;;  %vm21225_vm6 = vcmask 1045509   ;;  %vm21230_vm15 = vcmask 261120  }
 0x470   : > { %v5675_v62 = vmax.f32 %v5673_v43, %v5674_v38  ;;  %vm21231_vm3 = vmmov %vm21230_vm15 }
 0x471   : > { %13141 = vmatprep.mubr.msk.bf16.mxu0 %vm4605_vm9, %v6187_v41 }
 0x472   : > { %v5880_v22 = vsel %vm1517_vm0, %v5675_v62, 0.0 }
 0x473   : > { %v5961_v23 = vrot.slane %v5880_v22, 1  ;;  %v6052_v8 = vrot.slane %v5880_v22, 2 }
 0x475   : > { %v19110_v53 = vsel %vm1866_vm1, %v5960_v1, %v5961_v23  ;;  %v19113_v20 = vsel %vm2232_vm2, %v6051_v40, %v6052_v8  ;;  %v13129_v33 = vpop.f32.mrb[28].mxu1 }
 0x476   : > { %v14738_v16 = vpack.i.bf16 %v19110_v53, %v19014_v42  ;;  %5975 = vrot.lane.b32.xlu0 %v19110_v53, %s21089_s13  ;;  %v14743_v18 = vpack.i.bf16 %v19113_v20, %v19017_v61  ;;  %v4813_v14 = vadd.f32 %v18950_v34, %v13129_v33  ;;  %v4804_v7 = vpop.f32.mrb[29].mxu1  ;;  %s19259_s13 = sand.u32 1, %s15520_s16  }
 0x477   : > { %v4805_v25 = vadd.f32 %v18950_v34, %v4804_v7  ;;  %v13130_v56 = vpop.f32.mrb[30].mxu1  ;;  %s12222_s28 = sshll.u32 %s19259_s13, 6 }
 0x478   : > { %14739 = vrot.lane.b32.xlu1 %v14738_v16, %s15584_s23  ;;  %v4849_v42 = vmax.f32 %v4813_v14, 0.0  ;;  %v4816_v32 = vadd.f32 %v18950_v34, %v13130_v56  ;;  %v4807_v52 = vpop.f32.mrb[31].mxu1 }
 0x479   : > { %v4847_v61 = vmax.f32 %v4805_v25, 0.0  ;;  %v4808_v30 = vadd.f32 %v18950_v34, %v4807_v52 }
 0x47a   : > { %6066 = vrot.lane.b32.xlu0 %v19113_v20, %s15588_s1  ;;  %4881 = vst.msk [vmem:[%s18643_s5 + $0xf0] sm:$0xff] %vm3147_vm13, %v4849_v42  ;;  %v4926_v24 = vsel %vm3147_vm13, %v4849_v42, -inf  ;;  %v4850_v9 = vmax.f32 %v4816_v32, 0.0 }
 0x47b   : > { %4879 = vst.msk [vmem:[%s18643_s5 + $0xe0] sm:$0xff] %vm3147_vm13, %v4847_v61  ;;  %v4925_v59 = vsel %vm3147_vm13, %v4847_v61, -inf  ;;  %v4848_v10 = vmax.f32 %v4808_v30, 0.0 }
 0x47c   : > { %14744 = vrot.lane.b32.xlu1 %v14743_v18, %s20982_s26  ;;  %v4927_v39 = vmax.f32 %v4925_v59, %v4926_v24  ;;  %4882 = vst.msk [vmem:[%s18643_s5 + $0xf8] sm:$0xff] %vm3147_vm13, %v4850_v9  ;;  %v4929_v37 = vsel %vm3147_vm13, %v4850_v9, -inf }
 0x47d   : > { %4880 = vst.msk [vmem:[%s18643_s5 + $0xe8] sm:$0xff] %vm3147_vm13, %v4848_v10  ;;  %v4928_v34 = vsel %vm3147_vm13, %v4848_v10, -inf  ;;  %v19142_v11 = vpop.permute.xlu0 %14669  ;;  %s15592_s5 = smov 112  }
 0x47e   : > { %v5185_v17 = vcombine.high %v4927_v39, %v4927_v39  ;;  %v5192_v49 = vrot.slane %v4927_v39, %v18656_v19  ;;  %v4930_v47 = vmax.f32 %v4928_v34, %v4929_v37 }
 0x480   : > { %v5199_v2 = vrot.slane %v5185_v17, %v18656_v19  ;;  %v5200_v57 = vcombine.high %v5192_v49, %v5192_v49  ;;  %v5676_v13 = vsel %vm5283_vm10, %v5192_v49, -inf  ;;  %v5202_v28 = vcombine.high %v4930_v47, %v4930_v47 }
 0x481   : > { %v5677_v45 = vrot.slane %v5676_v13, 4  ;;  %v5209_v35 = vrot.slane %v4930_v47, %v18656_v19  ;;  %v19153_v62 = vpop.permute.xlu0 %14674 }
 0x482   : > { %v5201_v31 = vcombine.high %v5199_v2, %v5199_v2  ;;  %v5683_v60 = vsel %vm5283_vm10, %v5200_v57, -inf  ;;  %v5690_v15 = vsel %vm5283_vm10, %v5199_v2, -inf  ;;  %v5216_v55 = vrot.slane %v5202_v28, %v18656_v19 }
 0x483   : > { %v5678_v3 = vmax.f32 %v5676_v13, %v5677_v45  ;;  %v5684_v63 = vrot.slane %v5683_v60, 4  ;;  %v5691_v12 = vrot.slane %v5690_v15, 4  ;;  %v5217_v50 = vcombine.high %v5209_v35, %v5209_v35 }
 0x484   : > { %v5697_v43 = vsel %vm5283_vm10, %v5201_v31, -inf  ;;  %v5218_v29 = vcombine.high %v5216_v55, %v5216_v55  ;;  %v5704_v41 = vsel %vm5283_vm10, %v5209_v35, -inf  ;;  %v5718_v38 = vsel %vm5283_vm10, %v5216_v55, -inf }
 0x485   : > { %v5679_v1 = vrot.slane %v5678_v3, 2  ;;  %v5685_v40 = vmax.f32 %v5683_v60, %v5684_v63  ;;  %v5692_v22 = vmax.f32 %v5690_v15, %v5691_v12  ;;  %v5698_v23 = vrot.slane %v5697_v43, 4  ;;  %v19157_v17 = vpop.permute.xlu0 %14679 }
 0x486   : > { %v5705_v8 = vrot.slane %v5704_v41, 4  ;;  %v5711_v16 = vsel %vm5283_vm10, %v5217_v50, -inf  ;;  %v5719_v18 = vrot.slane %v5718_v38, 4  ;;  %v5725_v33 = vsel %vm5283_vm10, %v5218_v29, -inf }
 0x487   : > { %v5680_v14 = vmax.f32 %v5678_v3, %v5679_v1  ;;  %v5686_v7 = vrot.slane %v5685_v40, 2  ;;  %v5693_v25 = vrot.slane %v5692_v22, 2  ;;  %v5699_v56 = vmax.f32 %v5697_v43, %v5698_v23 }
 0x488   : > { %v5706_v42 = vmax.f32 %v5704_v41, %v5705_v8  ;;  %v5712_v32 = vrot.slane %v5711_v16, 4  ;;  %v5720_v52 = vmax.f32 %v5718_v38, %v5719_v18  ;;  %v5726_v61 = vrot.slane %v5725_v33, 4 }
 0x489   : > { %v5681_v30 = vrot.slane %v5680_v14, 1  ;;  %v5687_v24 = vmax.f32 %v5685_v40, %v5686_v7  ;;  %v5694_v9 = vmax.f32 %v5692_v22, %v5693_v25  ;;  %v5700_v59 = vrot.slane %v5699_v56, 2 }
 0x48a   : > { %v5707_v10 = vrot.slane %v5706_v42, 2  ;;  %v5713_v39 = vmax.f32 %v5711_v16, %v5712_v32  ;;  %v5721_v37 = vrot.slane %v5720_v52, 2  ;;  %v5727_v34 = vmax.f32 %v5725_v33, %v5726_v61 }
 0x48b   : > { %v5688_v49 = vrot.slane %v5687_v24, 1  ;;  %v5695_v47 = vrot.slane %v5694_v9, 1  ;;  %v5701_v2 = vmax.f32 %v5699_v56, %v5700_v59  ;;  %v5682_v35 = vmax.f32 %v5680_v14, %v5681_v30 }
 0x48c   : > { %v5708_v57 = vmax.f32 %v5706_v42, %v5707_v10  ;;  %v5714_v13 = vrot.slane %v5713_v39, 2  ;;  %v5722_v28 = vmax.f32 %v5720_v52, %v5721_v37  ;;  %v5728_v45 = vrot.slane %v5727_v34, 2 }
 0x48d   : > { %v5689_v31 = vmax.f32 %v5687_v24, %v5688_v49  ;;  %v5696_v60 = vmax.f32 %v5694_v9, %v5695_v47  ;;  %v5702_v15 = vrot.slane %v5701_v2, 1  ;;  %v19159_v12 = vpop.permute.xlu0 %14684  ;;  %v14672_v16 = vunpack.i.h.bf16 %v19142_v11 }
 0x48e   : > { %v5709_v55 = vrot.slane %v5708_v57, 1  ;;  %v5715_v3 = vmax.f32 %v5713_v39, %v5714_v13  ;;  %v5729_v63 = vmax.f32 %v5727_v34, %v5728_v45  ;;  %v5723_v29 = vrot.slane %v5722_v28, 1 }
 0x48f   : > { %v5703_v50 = vmax.f32 %v5701_v2, %v5702_v15  ;;  %v5844_v43 = vsel %vm5796_vm12, %v5689_v31, %v5682_v35  ;;  %v14671_v25 = vunpack.i.l.bf16 %v19142_v11  ;;  %v14637_v56 = vunpack.i.h.bf16 %v18983_v5 }
 0x490   : > { %v5845_v41 = vsel %vm21223_vm11, %v5696_v60, %v5844_v43  ;;  %v5710_v38 = vmax.f32 %v5708_v57, %v5709_v55  ;;  %v5716_v1 = vrot.slane %v5715_v3, 1  ;;  %v5730_v22 = vrot.slane %v5729_v63, 1 }
 0x491   : > { %v5846_v40 = vsel %vm21224_vm5, %v5703_v50, %v5845_v41  ;;  %v14690_v18 = vpop.permute.xlu0 %14689  ;;  %v5724_v33 = vmax.f32 %v5722_v28, %v5723_v29  ;;  %v6126_v24 = vsel %vm3147_vm13, %v18816_v44, %v14672_v16  ;;  %v6125_v5 = vsel %vm3147_vm13, %v18756_v27, %v14671_v25 }
 0x492   : > { %v5717_v23 = vmax.f32 %v5715_v3, %v5716_v1  ;;  %v5847_v8 = vsel %vm21225_vm6, %v5710_v38, %v5846_v40  ;;  %v5731_v14 = vmax.f32 %v5729_v63, %v5730_v22  ;;  %v14676_v11 = vunpack.i.l.bf16 %v19153_v62 }
 0x493   : > { %v14682_v34 = vunpack.i.h.bf16 %v19157_v17  ;;  %v14681_v44 = vunpack.i.l.bf16 %v19157_v17  ;;  %vm21228_vm10 = vcmask 195584   ;;  %v14647_v17 = vunpack.i.h.bf16 %v19002_v21 }
 0x494   : > { %v5848_v7 = vsel %vm5804_vm7, %v5717_v23, %v5847_v8  ;;  %v5881_v32 = vsel %vm1517_vm0, %v5731_v14, 0.0  ;;  %vm21229_vm14 = vmmov %vm21228_vm10  ;;  %v14686_v3 = vunpack.i.l.bf16 %v19159_v12  ;;  %v14691_v50 = vunpack.i.l.bf16 %v14690_v18 }
 0x495   : > { %v5849_v42 = vsel %vm5806_vm4, %v5724_v33, %v5848_v7  ;;  %v5986_v61 = vrot.slane %v5881_v32, 1  ;;  %v6076_v30 = vrot.slane %v5881_v32, 2  ;;  %vm21226_vm4 = vcmask 130048  }
 0x496   : > { %v5873_v52 = vsel %vm1517_vm0, 0.0, %v5849_v42  ;;  %v14695_v9 = vpop.permute.xlu0 %14694  ;;  %vm21227_vm7 = vmmov %vm21226_vm4  ;;  %vm21232_vm11 = vcmask 326656   ;;  %vm21234_vm6 = vcmask 392192  }
 0x497   : > { %v5985_v59 = vrot.slane %v5873_v52, 1  ;;  %v6075_v10 = vrot.slane %v5873_v52, 2  ;;  %v14748_v39 = vpack.i.bf16 %v5873_v52, %v19100_v4  ;;  %v14697_v37 = vunpack.i.h.bf16 %v14695_v9  ;;  %vm21233_vm5 = vmmov %vm21232_vm11 }
 0x498   : > { %v14696_v49 = vunpack.i.l.bf16 %v14695_v9 }
 0x499   : > { %v5987_v47 = vsel %vm1866_vm1, %v5985_v59, %v5986_v61  ;;  %v6077_v2 = vsel %vm2232_vm2, %v6075_v10, %v6076_v30  ;;  %14749 = vrot.lane.b32.xlu0 %v14748_v39, %s20975_s18  ;;  %v6134_v57 = vsel %vm21226_vm4, %v6126_v24, %v14697_v37  ;;  %vm21235_vm4 = vmmov %vm21234_vm6  ;;  %v14677_v10 = vunpack.i.h.bf16 %v19153_v62  ;;  %s20977_s18 = smov 80  }
 0x49a   : > { %v14753_v13 = vpack.i.bf16 %v5987_v47, %v19110_v53  ;;  %v14758_v28 = vpack.i.bf16 %v6077_v2, %v19113_v20  ;;  %v6133_v27 = vsel %vm21227_vm7, %v6125_v5, %v14696_v49  ;;  %v6142_v45 = vsel %vm21228_vm10, %v6134_v57, %v14676_v11  ;;  %v14700_v35 = vpop.permute.xlu0 %14699 }
 0x49b   : > { %v6141_v31 = vsel %vm21229_vm14, %v6133_v27, %v14637_v56  ;;  %v14702_v60 = vunpack.i.h.bf16 %v14700_v35  ;;  %v14701_v15 = vunpack.i.l.bf16 %v14700_v35  ;;  %v6150_v55 = vsel %vm21230_vm15, %v6142_v45, %v14682_v34 }
 0x49c   : > { %v6149_v63 = vsel %vm21231_vm3, %v6141_v31, %v14681_v44  ;;  %v14692_v53 = vunpack.i.h.bf16 %v14690_v18  ;;  %vm21236_vm7 = vcmask 457728   ;;  %vm21238_vm14 = vcmask 130048  }
 0x49d   : > { %5926 = vrot.lane.b32.xlu0 %v5873_v52, %s15582_s15  ;;  %v6157_v20 = vsel %vm21232_vm11, %v6149_v63, %v14701_v15  ;;  %v6158_v43 = vsel %vm21233_vm5, %v6150_v55, %v14702_v60  ;;  %vm21237_vm10 = vmmov %vm21236_vm7  ;;  %vm21240_vm3 = vcmask 195584   ;;  %vm21242_vm5 = vcmask 261120  }
 0x49e   : > { %v6165_v29 = vsel %vm21234_vm6, %v6157_v20, %v14647_v17  ;;  %v6166_v41 = vsel %vm21235_vm4, %v6158_v43, %v14686_v3  ;;  %v14705_v38 = vpop.permute.xlu0 %14704  ;;  %vm21239_vm15 = vmmov %vm21238_vm14  ;;  %v14687_v44 = vunpack.i.h.bf16 %v19159_v12  ;;  %vm21244_vm4 = vcmask 326656  }
 0x49f   : > { %v14707_v1 = vunpack.i.h.bf16 %v14705_v38  ;;  %v14706_v40 = vunpack.i.l.bf16 %v14705_v38  ;;  %v6173_v21 = vsel %vm21236_vm7, %v6165_v29, %v14691_v50  ;;  %v6174_v22 = vsel %vm21237_vm10, %v6166_v41, %v14692_v53  ;;  %vm21241_vm11 = vmmov %vm21240_vm3 }
 0x4a0   : > { %vm21243_vm6 = vmmov %vm21242_vm5  ;;  %vm21246_vm10 = vcmask 392192  }
 0x4a1   : > { %14754 = vrot.lane.b32.xlu0 %v14753_v13, %s20984_s2  ;;  %v6181_v23 = vsel %vm4513_vm8, %v6173_v21, %v14706_v40  ;;  %v6182_v8 = vsel %vm4513_vm8, %v6174_v22, %v14707_v1  ;;  %vm21245_vm7 = vmmov %vm21244_vm4 }
 0x4a2   : > { %v6188_v16 = vpack.c.bf16 %v6182_v8, %v6181_v23 }
 0x4a4   : > { %13142 = vmatmul.mubr.msk.bf16.vlgmr.msra.gmra.mrb[32].mxu0 %vm4605_vm9, %v6188_v16 }
 0x4a5   : > { %6024 = vrot.lane.b32.xlu0 %v5987_v47, %s15584_s23  ;;  %s19273_s23 = scalar_lea.vmem [#allocation2], %s12222_s28 }
 0x4a9   : > { %14759 = vrot.lane.b32.xlu0 %v14758_v28, %s15587_s10  ;;  %s20980_s10 = smov 96  }
 0x4ad   : > { %6114 = vrot.lane.b32.xlu0 %v6077_v2, %s20982_s26 }
 0x4c1   : > { %v14710_v18 = vpop.permute.xlu1 %14709 }
 0x4c2   : > { %v14712_v56 = vunpack.i.h.bf16 %v14710_v18  ;;  %v14711_v42 = vunpack.i.l.bf16 %v14710_v18 }
 0x4c4   : > { %v6128_v30 = vsel %vm3147_vm13, %v18927_v51, %v14712_v56  ;;  %v6127_v24 = vsel %vm3147_vm13, %v18885_v6, %v14711_v42 }
 0x4c5   : > { %v14715_v33 = vpop.permute.xlu1 %14714 }
 0x4c6   : > { %v14716_v39 = vunpack.i.l.bf16 %v14715_v33  ;;  %v14717_v23 = vunpack.i.h.bf16 %v14715_v33 }
 0x4c9   : > { %v14720_v14 = vpop.permute.xlu1 %14719 }
 0x4ca   : > { %v14722_v11 = vunpack.i.h.bf16 %v14720_v14  ;;  %v14721_v34 = vunpack.i.l.bf16 %v14720_v14 }
 0x4cd   : > { %v19207_v7 = vpop.permute.xlu1 %14724 }
 0x4ce   : > { %v14726_v57 = vunpack.i.l.bf16 %v19207_v7  ;;  %v14727_v42 = vunpack.i.h.bf16 %v19207_v7 }
 0x4d1   : > { %v14730_v25 = vpop.permute.xlu1 %14729 }
 0x4d2   : > { %v14732_v13 = vunpack.i.h.bf16 %v14730_v25  ;;  %v14731_v62 = vunpack.i.l.bf16 %v14730_v25 }
 0x4e1   : > { %v14735_v32 = vpop.permute.xlu1 %14734 }
 0x4e2   : > { %v14737_v52 = vunpack.i.h.bf16 %v14735_v32  ;;  %v14736_v61 = vunpack.i.l.bf16 %v14735_v32 }
 0x4e4   : > { %v6135_v9 = vsel %vm21238_vm14, %v6127_v24, %v14736_v61  ;;  %v6136_v59 = vsel %vm21239_vm15, %v6128_v30, %v14737_v52  ;;  %vm21247_vm14 = vmmov %vm21246_vm10  ;;  %vm21248_vm15 = vcmask 457728   ;;  %v14920_v24 = vld [vmem:[%s21057_s25] sm:$0xff]  }
 0x4e5   : > { %v6143_v37 = vsel %vm21240_vm3, %v6135_v9, %v14677_v10  ;;  %v6144_v5 = vsel %vm21241_vm11, %v6136_v59, %v14716_v39  ;;  %vm21249_vm3 = vmmov %vm21248_vm15  ;;  %vm21250_vm11 = vcmask 130048  }
 0x4e6   : > { %v6151_v47 = vsel %vm21242_vm5, %v6143_v37, %v14721_v34  ;;  %v6152_v51 = vsel %vm21243_vm6, %v6144_v5, %v14722_v11  ;;  %vm21251_vm5 = vmmov %vm21250_vm11  ;;  %vm21252_vm6 = vcmask 195584   ;;  %v19262_v5 = vld [vmem:[%s21260_s12] ss:$0 sm:$0xff]  ;;  %v14921_v34 = vld [vmem:[%s21057_s25 + $0x8] sm:$0xff]  }
 0x4e8   : > { %v5976_v53 = vpop.permute.xlu0 %5975 }
 0x4ea   : > { %v14740_v49 = vpop.permute.xlu1 %14739 }
 0x4eb   : > { %v14742_v2 = vunpack.i.h.bf16 %v14740_v49  ;;  %v14741_v6 = vunpack.i.l.bf16 %v14740_v49 }
 0x4ec   : > { %v6067_v50 = vpop.permute.xlu0 %6066 }
 0x4ed   : > { %v6159_v28 = vsel %vm21244_vm4, %v6151_v47, %v14741_v6  ;;  %v6160_v27 = vsel %vm21245_vm7, %v6152_v51, %v14742_v2  ;;  %vm21253_vm4 = vmmov %vm21252_vm6  ;;  %vm21254_vm7 = vcmask 261120  }
 0x4ee   : > { %v6167_v45 = vsel %vm21246_vm10, %v6159_v28, %v14687_v44  ;;  %v6168_v35 = vsel %vm21247_vm14, %v6160_v27, %v14726_v57  ;;  %v14745_v31 = vpop.permute.xlu1 %14744  ;;  %vm21255_vm10 = vmmov %vm21254_vm7 }
 0x4ef   : > { %v14747_v60 = vunpack.i.h.bf16 %v14745_v31  ;;  %v14746_v15 = vunpack.i.l.bf16 %v14745_v31  ;;  %v6175_v55 = vsel %vm21248_vm15, %v6167_v45, %v14731_v62  ;;  %v6176_v17 = vsel %vm21249_vm3, %v6168_v35, %v14732_v13  ;;  %v14922_v35 = vld [vmem:[%s21057_s25 + $0x10] sm:$0xff]  }
 0x4f0   : > { %vm21258_vm15 = vcmask 392192  }
 0x4f1   : > { %v6183_v12 = vsel %vm4513_vm8, %v6175_v55, %v14746_v15  ;;  %v6184_v3 = vsel %vm4513_vm8, %v6176_v17, %v14747_v60  ;;  %vm21259_vm3 = vmmov %vm21258_vm15 }
 0x4f2   : > { %v6189_v63 = vpack.c.bf16 %v6184_v3, %v6183_v12 }
 0x4f4   : > { %13145 = vmatprep.mubr.msk.bf16.mxu0 %vm4605_vm9, %v6189_v63  ;;  %v14923_v63 = vld [vmem:[%s21057_s25 + $0x18] sm:$0xff]  }
 0x50b   : > { %v14750_v20 = vpop.permute.xlu0 %14749 }
 0x50c   : > { %v14752_v43 = vunpack.i.h.bf16 %v14750_v20  ;;  %v14751_v29 = vunpack.i.l.bf16 %v14750_v20 }
 0x50e   : > { %v6130_v38 = vsel %vm3147_vm13, %v19100_v4, %v14752_v43  ;;  %v6129_v1 = vsel %vm3147_vm13, %v18996_v36, %v14751_v29  ;;  %vm21256_vm13 = vcmask 326656  }
 0x50f   : > { %v5927_v41 = vpop.permute.xlu0 %5926  ;;  %v6138_v40 = vsel %vm21250_vm11, %v6130_v38, %v18626_v46  ;;  %vm21257_vm14 = vmmov %vm21256_vm13  ;;  %vm21261_vm11 = vcmask 457728  }
 0x510   : > { %v6137_v21 = vsel %vm21251_vm5, %v6129_v1, %v5927_v41  ;;  %v6146_v14 = vsel %vm21253_vm4, %v6138_v40, %v5976_v53  ;;  %vm21262_vm5 = vmmov %vm21261_vm11 }
 0x511   : > { %v6145_v18 = vsel %vm21252_vm6, %v6137_v21, %v14717_v23 }
 0x513   : > { %v14755_v22 = vpop.permute.xlu0 %14754 }
 0x514   : > { %v14757_v8 = vunpack.i.h.bf16 %v14755_v22  ;;  %v14756_v16 = vunpack.i.l.bf16 %v14755_v22 }
 0x516   : > { %v6154_v25 = vsel %vm21254_vm7, %v6146_v14, %v14757_v8  ;;  %v6153_v56 = vsel %vm21255_vm10, %v6145_v18, %v14756_v16 }
 0x517   : > { %v6025_v4 = vpop.permute.xlu0 %6024  ;;  %v6162_v36 = vsel %vm21256_vm13, %v6154_v25, %v18638_v0  ;;  %v15590_v0 = vmov 0   ;;  %v14924_v25 = vld [vmem:[%s21057_s25 + $0x20] sm:$0xff]  }
 0x518   : > { %v6161_v46 = vsel %vm21257_vm14, %v6153_v56, %v6025_v4  ;;  %v6170_v30 = vsel %vm21259_vm3, %v6162_v36, %v6067_v50  ;;  %6768 = vmatprep.subr.bf16.mxu1 %v15590_v0  ;;  %7323 = vmatprep.subr.bf16.mxu0 %v15590_v0 }
 0x519   : > { %v6169_v61 = vsel %vm21258_vm15, %v6161_v46, %v14727_v42  ;;  %6769 = vmatpush1.bf16.msra.mxu1 %v14920_v24 }
 0x51a   : > { %6770 = vmatprep.subr.bf16.mxu1 %v15590_v0 }
 0x51b   : > { %v14760_v33 = vpop.permute.xlu0 %14759 }
 0x51c   : > { %v14762_v32 = vunpack.i.h.bf16 %v14760_v33  ;;  %v14761_v52 = vunpack.i.l.bf16 %v14760_v33 }
 0x51d   : > { %6771 = vmatpush1.bf16.msra.mxu1 %v14921_v34 }
 0x51e   : > { %v6177_v9 = vsel %vm21261_vm11, %v6169_v61, %v14761_v52  ;;  %v6178_v59 = vsel %vm21262_vm5, %v6170_v30, %v14762_v32  ;;  %6772 = vmatprep.subr.bf16.mxu1 %v15590_v0  ;;  %vm6642_vm11 = vcmask 654336   ;;  %vm6651_vm5 = vcmask 785408  }
 0x51f   : > { %v6115_v7 = vpop.permute.xlu0 %6114  ;;  %v6186_v10 = vsel %vm4513_vm8, %v6178_v59, %v18691_v58 }
 0x520   : > { %v6185_v39 = vsel %vm4513_vm8, %v6177_v9, %v6115_v7 }
 0x521   : > { %v6190_v37 = vpack.c.bf16 %v6186_v10, %v6185_v39  ;;  %6773 = vmatpush1.bf16.msra.mxu1 %v14922_v35  ;;  %v14925_v39 = vld [vmem:[%s21057_s25 + $0x28] sm:$0xff]  }
 0x522   : > { %6774 = vmatprep.subr.bf16.mxu1 %v15590_v0 }
 0x523   : > { %13146 = vmatmul.mubr.msk.bf16.gmra.mrb[36].mxu0 %vm4605_vm9, %v6190_v37  ;;  %vm21263_vm9 = vcmask 130048  }
 0x524   : > { %vm21264_vm6 = vmmov %vm21263_vm9 }
 0x525   : > { %vm21265_vm4 = vmmov %vm21264_vm6  ;;  %6775 = vmatpush1.bf16.msra.mxu1 %v14923_v63 }
 0x526   : > { %vm21266_vm7 = vmmov %vm21265_vm4  ;;  %6776 = vmatprep.subr.bf16.mxu1 %v15590_v0 }
 0x527   : > { %vm21267_vm10 = vmmov %vm21265_vm4 }
 0x528   : > { %vm21268_vm13 = vmmov %vm21265_vm4 }
 0x529   : > { %6777 = vmatpush1.bf16.msra.mxu1 %v14924_v25  ;;  %vm21269_vm14 = vmmov %vm21265_vm4 }
 0x52a   : > { %6778 = vmatprep.subr.bf16.mxu1 %v15590_v0  ;;  %vm21270_vm15 = vmmov %vm21265_vm4 }
 0x52b   : > { %vm21271_vm3 = vmmov %vm21265_vm4 }
 0x52d   : > { %6779 = vmatpush1.bf16.msra.mxu1 %v14925_v39 }
 0x52e   : > { %6780 = vmatprep.subr.bf16.mxu1 %v15590_v0 }
 0x577   : > { %v13143_v11 = vpop.f32.mrb[32].mxu0 }
 0x578   : > { %v6292_v49 = vadd.f32 %v13143_v11, %v19262_v5  ;;  %v6283_v58 = vpop.f32.mrb[33].mxu0 }
 0x579   : > { %v6284_v47 = vadd.f32 %v19262_v5, %v6283_v58  ;;  %v13144_v51 = vpop.f32.mrb[34].mxu0 }
 0x57a   : > { %v6316_v2 = vmax.f32 %v6292_v49, 0.0  ;;  %v6295_v6 = vadd.f32 %v13144_v51, %v19262_v5  ;;  %v6286_v44 = vpop.f32.mrb[35].mxu0  ;;  %v14926_v51 = vld [vmem:[%s21057_s25 + $0x30] sm:$0xff]  }
 0x57b   : > { %v6314_v57 = vmax.f32 %v6284_v47, 0.0  ;;  %v6287_v13 = vadd.f32 %v19262_v5, %v6286_v44  ;;  %6781 = vmatpush1.bf16.msra.mxu1 %v14926_v51  ;;  %v14927_v44 = vld [vmem:[%s21057_s25 + $0x38] sm:$0xff]  }
 0x57c   : > { %6324 = vst.msk [vmem:[%s19273_s23 + $0x10] sm:$0xff] %vm21263_vm9, %v6316_v2  ;;  %v6340_v62 = vrot.slane %v6316_v2, 7  ;;  %v6317_v28 = vmax.f32 %v6295_v6, 0.0  ;;  %6782 = vmatprep.subr.bf16.mxu1 %v15590_v0  ;;  %vm21272_vm9 = vmmov %vm21271_vm3 }
 0x57d   : > { %6322 = vst.msk [vmem:[%s19273_s23] sm:$0xff] %vm21264_vm6, %v6314_v57  ;;  %v6338_v27 = vrot.slane %v6314_v57, 7  ;;  %v6315_v45 = vmax.f32 %v6287_v13, 0.0  ;;  %v14928_v57 = vld [vmem:[%s21057_s25 + $0x40] sm:$0xff]   ;;  %vm21273_vm6 = vmmov %vm21271_vm3 }
 0x57e   : > { %6325 = vst.msk [vmem:[%s19273_s23 + $0x18] sm:$0xff] %vm21265_vm4, %v6317_v28  ;;  %v6341_v31 = vrot.slane %v6317_v28, 7  ;;  %v19283_v60 = vsel %vm1517_vm0, 0.0, %v6340_v62  ;;  %v6364_v15 = vsel %vm1517_vm0, %v6340_v62, 0.0  ;;  %vm6660_vm4 = vcmask 916480  }
 0x57f   : > { %6323 = vst.msk [vmem:[%s19273_s23 + $0x8] sm:$0xff] %vm21266_vm7, %v6315_v45  ;;  %v19289_v55 = vsel %vm1517_vm0, 0.0, %v6338_v27  ;;  %v6362_v17 = vsel %vm1517_vm0, %v6338_v27, 0.0  ;;  %v6439_v53 = vrot.slane %v19283_v60, 1  ;;  %v6440_v50 = vrot.slane %v6364_v15, 1  ;;  %6783 = vmatpush1.bf16.msra.mxu1 %v14927_v44 }
 0x580   : > { %v19293_v12 = vsel %vm1517_vm0, 0.0, %v6341_v31  ;;  %v6365_v3 = vsel %vm1517_vm0, %v6341_v31, 0.0  ;;  %v6536_v20 = vrot.slane %v19283_v60, 2  ;;  %v6537_v43 = vrot.slane %v6364_v15, 2  ;;  %6784 = vmatprep.subr.bf16.mxu1 %v15590_v0 }
 0x581   : > { %v6433_v29 = vrot.slane %v19289_v55, 1  ;;  %v6434_v41 = vrot.slane %v6362_v17, 1  ;;  %v6339_v38 = vrot.slane %v6315_v45, 7  ;;  %v14763_v1 = vpack.i.bf16 %v19293_v12, %v19283_v60 }
 0x582   : > { %v6530_v40 = vrot.slane %v19289_v55, 2  ;;  %v6531_v21 = vrot.slane %v6362_v17, 2  ;;  %v6442_v22 = vrot.slane %v19293_v12, 1  ;;  %v6443_v23 = vrot.slane %v6365_v3, 1 }
 0x583   : > { %v6539_v8 = vrot.slane %v19293_v12, 2  ;;  %v6540_v16 = vrot.slane %v6365_v3, 2  ;;  %v19308_v18 = vsel %vm1517_vm0, 0.0, %v6339_v38  ;;  %v6363_v14 = vsel %vm1517_vm0, %v6339_v38, 0.0  ;;  %14764 = vrot.lane.b32.xlu0 %v14763_v1, %s15582_s15  ;;  %6785 = vmatpush1.bf16.msra.mxu1 %v14928_v57 }
 0x584   : > { %v6436_v4 = vrot.slane %v19308_v18, 1  ;;  %v6437_v56 = vrot.slane %v6363_v14, 1  ;;  %v6533_v36 = vrot.slane %v19308_v18, 2  ;;  %v6534_v46 = vrot.slane %v6363_v14, 2 }
 0x585   : > { %v14768_v42 = vpack.i.bf16 %v19308_v18, %v19289_v55  ;;  %v14773_v33 = vpack.i.bf16 %v19283_v60, %v19308_v18  ;;  %v6538_v32 = vsel %vm2232_vm2, %v6536_v20, %v6537_v43  ;;  %v6435_v52 = vsel %vm1866_vm1, %v6433_v29, %v6434_v41 }
 0x586   : > { %v6535_v61 = vsel %vm2232_vm2, %v6533_v36, %v6534_v46  ;;  %v6532_v30 = vsel %vm2232_vm2, %v6530_v40, %v6531_v21  ;;  %v6441_v24 = vsel %vm1866_vm1, %v6439_v53, %v6440_v50  ;;  %v6438_v9 = vsel %vm1866_vm1, %v6436_v4, %v6437_v56 }
 0x587   : > { %14769 = vrot.lane.b32.xlu1 %v14768_v42, %s15582_s15  ;;  %14774 = vrot.lane.b32.xlu0 %v14773_v33, %s20984_s2  ;;  %v6670_v59 = vpack.c.bf16 %v6538_v32, %v6535_v61  ;;  %v14803_v7 = vpack.i.bf16 %v6441_v24, %v6438_v9  ;;  %v14798_v10 = vpack.i.bf16 %v6438_v9, %v6435_v52  ;;  %vm21274_vm7 = vcmask 261120  }
 0x588   : > { %v14808_v37 = vpack.i.bf16 %v6535_v61, %v6532_v30  ;;  %v14818_v11 = vpack.i.bf16 %v6538_v32, %v6535_v61  ;;  %v14778_v34 = vpack.i.bf16 %v6435_v52, %v21175_v54  ;;  %v14783_v49 = vpack.i.bf16 %v6532_v30, %v21176_v48 }
 0x589   : > { %12301 = vmatprep.mubr.msk.bf16.mxu1 %vm21267_vm10, %v6670_v59  ;;  %v19333_v58 = vsel %vm1866_vm1, %v6442_v22, %v6443_v23  ;;  %v19336_v47 = vsel %vm2232_vm2, %v6539_v8, %v6540_v16  ;;  %vm21275_vm10 = vmmov %vm21274_vm7 }
 0x58a   : > { %v14788_v2 = vpack.i.bf16 %v19333_v58, %v6441_v24  ;;  %v14793_v6 = vpack.i.bf16 %v19336_v47, %v6538_v32 }
 0x58b   : > { %14779 = vrot.lane.b32.xlu1 %v14778_v34, %s15588_s1  ;;  %14784 = vrot.lane.b32.xlu0 %v14783_v49, %s20980_s10 }
 0x58f   : > { %14789 = vrot.lane.b32.xlu1 %v14788_v2, %s20982_s26  ;;  %14794 = vrot.lane.b32.xlu0 %v14793_v6, %s15592_s5 }
 0x593   : > { %14804 = vrot.lane.b32.xlu1 %v14803_v7, %s20977_s18  ;;  %14799 = vrot.lane.b32.xlu0 %v14798_v10, %s20982_s26 }
 0x597   : > { %14809 = vrot.lane.b32.xlu1 %v14808_v37, %s15592_s5  ;;  %14814 = vrot.lane.b32.xlu0 %v14803_v7, %s15588_s1 }
 0x59b   : > { %14819 = vrot.lane.b32.xlu1 %v14818_v11, %s20980_s10 }
 0x5f5   : > { %v19356_v27 = vpop.permute.xlu0 %14764 }
 0x5f6   : > { %v13147_v13 = vpop.f32.mrb[36].mxu0 }
 0x5f7   : > { %v6308_v62 = vadd.f32 %v13147_v13, %v19262_v5  ;;  %v6299_v28 = vpop.f32.mrb[37].mxu0 }
 0x5f8   : > { %v6300_v45 = vadd.f32 %v19262_v5, %v6299_v28  ;;  %v13148_v35 = vpop.f32.mrb[38].mxu0 }
 0x5f9   : > { %v6320_v31 = vmax.f32 %v6308_v62, 0.0  ;;  %v6311_v15 = vadd.f32 %v13148_v35, %v19262_v5  ;;  %v6302_v17 = vpop.f32.mrb[39].mxu0  ;;  %v14770_v20 = vpop.permute.xlu1 %14769 }
 0x5fa   : > { %v6318_v3 = vmax.f32 %v6300_v45, 0.0  ;;  %v6303_v63 = vadd.f32 %v19262_v5, %v6302_v17  ;;  %v14775_v43 = vpop.permute.xlu0 %14774  ;;  %v14772_v22 = vunpack.i.h.bf16 %v14770_v20  ;;  %v14771_v23 = vunpack.i.l.bf16 %v14770_v20 }
 0x5fb   : > { %6328 = vst.msk [vmem:[%s19273_s23 + $0x30] sm:$0xff] %vm21268_vm13, %v6320_v31  ;;  %v6344_v53 = vrot.slane %v6320_v31, 7  ;;  %v6321_v50 = vmax.f32 %v6311_v15, 0.0  ;;  %v14777_v56 = vunpack.i.h.bf16 %v14775_v43  ;;  %v14776_v30 = vunpack.i.l.bf16 %v14775_v43 }
 0x5fc   : > { %6326 = vst.msk [vmem:[%s19273_s23 + $0x20] sm:$0xff] %vm21269_vm14, %v6318_v3  ;;  %v6342_v29 = vrot.slane %v6318_v3, 7  ;;  %v6319_v41 = vmax.f32 %v6303_v63, 0.0  ;;  %v6611_v24 = vsel %vm21272_vm9, %v19289_v55, %v14772_v22  ;;  %v6610_v9 = vsel %vm21273_vm6, 0.0, %v14771_v23 }
 0x5fd   : > { %v19366_v38 = vsel %vm1517_vm0, 0.0, %v6344_v53  ;;  %v19369_v1 = vsel %vm1517_vm0, %v6344_v53, 0.0  ;;  %6329 = vst.msk [vmem:[%s19273_s23 + $0x38] sm:$0xff] %vm21270_vm15, %v6321_v50  ;;  %v6345_v40 = vrot.slane %v6321_v50, 7  ;;  %v14780_v8 = vpop.permute.xlu1 %14779  ;;  %v6618_v2 = vsel %vm21274_vm7, %v6610_v9, %v14776_v30 }
 0x5fe   : > { %6327 = vst.msk [vmem:[%s19273_s23 + $0x28] sm:$0xff] %vm21271_vm3, %v6319_v41  ;;  %v19376_v5 = vsel %vm1517_vm0, 0.0, %v6342_v29  ;;  %v19379_v21 = vsel %vm1517_vm0, %v6342_v29, 0.0  ;;  %v19381_v16 = vpop.permute.xlu0 %14784  ;;  %v6451_v14 = vrot.slane %v19366_v38, 1  ;;  %v6452_v25 = vrot.slane %v19369_v1, 1 }
 0x5ff   : > { %v19386_v4 = vsel %vm1517_vm0, 0.0, %v6345_v40  ;;  %v6548_v36 = vrot.slane %v19366_v38, 2  ;;  %v6549_v46 = vrot.slane %v19369_v1, 2  ;;  %v6445_v42 = vrot.slane %v19376_v5, 1 }
 0x600   : > { %v19392_v33 = vsel %vm1517_vm0, %v6345_v40, 0.0  ;;  %v6446_v32 = vrot.slane %v19379_v21, 1  ;;  %v6542_v52 = vrot.slane %v19376_v5, 2  ;;  %v6343_v61 = vrot.slane %v6319_v41, 7 }
 0x601   : > { %v14823_v59 = vpack.i.bf16 %v19376_v5, %v19293_v12  ;;  %v14828_v7 = vpack.i.bf16 %v19386_v4, %v19366_v38  ;;  %v19403_v10 = vpop.permute.xlu1 %14789  ;;  %v14782_v34 = vunpack.i.h.bf16 %v14780_v8  ;;  %v14781_v55 = vunpack.i.l.bf16 %v14780_v8 }
 0x602   : > { %v19405_v39 = vpop.permute.xlu0 %14794  ;;  %v19408_v37 = vsel %vm1517_vm0, 0.0, %v6343_v61  ;;  %v6367_v11 = vsel %vm1517_vm0, %v6343_v61, 0.0  ;;  %v6543_v49 = vrot.slane %v19379_v21, 2  ;;  %v6479_v51 = vrot.slane %v19386_v4, 1 }
 0x603   : > { %v6619_v6 = vsel %vm21275_vm10, %v6611_v24, %v14777_v56  ;;  %14824 = vrot.lane.b32.xlu1 %v14823_v59, %s20984_s2  ;;  %14829 = vrot.lane.b32.xlu0 %v14828_v7, %s15582_s15  ;;  %v6480_v44 = vrot.slane %v19392_v33, 1  ;;  %v6575_v57 = vrot.slane %v19386_v4, 2  ;;  %v6448_v13 = vrot.slane %v19408_v37, 1 }
 0x604   : > { %v6449_v62 = vrot.slane %v6367_v11, 1  ;;  %v6576_v28 = vrot.slane %v19392_v33, 2  ;;  %v6545_v45 = vrot.slane %v19408_v37, 2  ;;  %v14833_v35 = vpack.i.bf16 %v21170_v26, %v19386_v4 }
 0x605   : > { %v14843_v31 = vpack.i.bf16 %v19366_v38, %v19408_v37  ;;  %v14805_v15 = vpop.permute.xlu1 %14804  ;;  %v6546_v3 = vrot.slane %v6367_v11, 2  ;;  %vm21276_vm13 = vcmask 392192   ;;  %v6447_v50 = vsel %vm1866_vm1, %v6445_v42, %v6446_v32 }
 0x606   : > { %v14800_v17 = vpop.permute.xlu0 %14799  ;;  %v6627_v63 = vsel %vm21276_vm13, %v6619_v6, %v14782_v34  ;;  %vm21277_vm14 = vmmov %vm21276_vm13  ;;  %v14787_v20 = vunpack.i.h.bf16 %v19381_v16  ;;  %v14786_v43 = vunpack.i.l.bf16 %v19381_v16  ;;  %v14838_v29 = vpack.i.bf16 %v19408_v37, %v19376_v5 }
 0x607   : > { %v6626_v53 = vsel %vm21277_vm14, %v6618_v2, %v14781_v55  ;;  %14834 = vrot.lane.b32.xlu1 %v14833_v35, %s20984_s2  ;;  %14844 = vrot.lane.b32.xlu0 %v14843_v31, %s20984_s2  ;;  %v14802_v41 = vunpack.i.h.bf16 %v14800_v17  ;;  %v14848_v40 = vpack.i.bf16 %v6447_v50, %v19333_v58  ;;  %v14807_v21 = vunpack.i.h.bf16 %v14805_v15  ;;  %vm21283_vm6 = vmmov %vm21276_vm13 }
 0x608   : > { %v14801_v22 = vunpack.i.l.bf16 %v14800_v17  ;;  %v6450_v23 = vsel %vm1866_vm1, %v6448_v13, %v6449_v62  ;;  %v14806_v8 = vunpack.i.l.bf16 %v14805_v15  ;;  %v6544_v32 = vsel %vm2232_vm2, %v6542_v52, %v6543_v49 }
 0x609   : > { %v6635_v4 = vsel %vm4513_vm8, %v6627_v63, %v14802_v41  ;;  %v14810_v56 = vpop.permute.xlu1 %14809  ;;  %v14863_v42 = vpack.i.bf16 %v6450_v23, %v6447_v50  ;;  %v6453_v9 = vsel %vm1866_vm1, %v6451_v14, %v6452_v25  ;;  %v19453_v11 = vsel %vm2232_vm2, %v6545_v45, %v6546_v3 }
 0x60a   : > { %v6634_v16 = vsel %vm4513_vm8, %v6626_v53, %v14801_v22  ;;  %v6644_v33 = vsel %vm6642_vm11, %v6635_v4, %v14807_v21  ;;  %v14812_v61 = vunpack.i.h.bf16 %v14810_v56  ;;  %v14811_v30 = vunpack.i.l.bf16 %v14810_v56 }
 0x60b   : > { %14839 = vrot.lane.b32.xlu1 %v14838_v29, %s15582_s15  ;;  %14849 = vrot.lane.b32.xlu0 %v14848_v40, %s20977_s18  ;;  %v6643_v58 = vsel %vm6642_vm11, %v6634_v16, %v14806_v8  ;;  %v6653_v24 = vsel %vm6651_vm5, %v6644_v33, %v14787_v20  ;;  %v14868_v7 = vpack.i.bf16 %v6453_v9, %v6450_v23 }
 0x60c   : > { %v6652_v59 = vsel %vm6651_vm5, %v6643_v58, %v14786_v43  ;;  %v6662_v52 = vsel %vm6660_vm4, %v6653_v24, %v14812_v61  ;;  %v14858_v34 = vpack.i.bf16 %v6544_v32, %v19336_v47  ;;  %v14873_v49 = vpack.i.bf16 %v19453_v11, %v6544_v32 }
 0x60d   : > { %v6661_v55 = vsel %vm6660_vm4, %v6652_v59, %v14811_v30  ;;  %v6481_v2 = vsel %vm1866_vm1, %v6479_v51, %v6480_v44  ;;  %v6672_v13 = vpack.c.bf16 %v6544_v32, %v19336_v47  ;;  %v19467_v25 = vsel %vm2232_vm2, %v6548_v36, %v6549_v46  ;;  %vm21278_vm1 = vmmov %vm21271_vm3  ;;  %v14815_v46 = vpop.permute.xlu0 %14814  ;;  %v14820_v44 = vpop.permute.xlu1 %14819 }
 0x60e   : > { %v6669_v6 = vpack.c.bf16 %v6662_v52, %v6661_v55  ;;  %v14878_v14 = vpack.i.bf16 %v6481_v2, %v6453_v9  ;;  %v14893_v62 = vpack.i.bf16 %v19467_v25, %v19453_v11  ;;  %v19472_v51 = vsel %vm2232_vm2, %v6575_v57, %v6576_v28  ;;  %vm21279_vm2 = vmmov %vm21278_vm1 }
 0x60f   : > { %14854 = vrot.lane.b32.xlu1 %v14848_v40, %s15588_s1  ;;  %14859 = vrot.lane.b32.xlu0 %v14858_v34, %s20980_s10  ;;  %v6674_v47 = vpack.c.bf16 %v19467_v25, %v19453_v11  ;;  %v14898_v1 = vpack.i.bf16 %v19472_v51, %v19467_v25  ;;  %v14883_v36 = vpack.i.bf16 %v21175_v54, %v6481_v2  ;;  %v14767_v57 = vunpack.i.h.bf16 %v19356_v27  ;;  %vm21280_vm15 = vmmov %vm21278_vm1 }
 0x610   : > { %6801 = vmatmul.mubr.bf16.vlgmr.msra.gmra.mrb[32].mxu1 %v6669_v6  ;;  %v14766_v28 = vunpack.i.l.bf16 %v19356_v27  ;;  %vm21281_vm3 = vmmov %vm21274_vm7  ;;  %v14817_v43 = vunpack.i.h.bf16 %v14815_v46  ;;  %v14816_v27 = vunpack.i.l.bf16 %v14815_v46  ;;  %v14792_v40 = vunpack.i.h.bf16 %v19403_v10 }
 0x611   : > { %12302 = vmatprep.mubr.msk.bf16.mxu1 %vm21278_vm1, %v6672_v13  ;;  %v6613_v17 = vsel %vm21279_vm2, %v19283_v60, %v14767_v57  ;;  %vm21282_vm9 = vmmov %vm21281_vm3  ;;  %v14791_v60 = vunpack.i.l.bf16 %v19403_v10  ;;  %v14822_v56 = vunpack.i.h.bf16 %v14820_v44  ;;  %v14797_v58 = vunpack.i.h.bf16 %v19405_v39 }
 0x612   : > { %v6612_v3 = vsel %vm21280_vm15, %v19308_v18, %v14766_v28  ;;  %vm21284_vm7 = vmmov %vm21283_vm6  ;;  %v14796_v10 = vunpack.i.l.bf16 %v19405_v39 }
 0x613   : > { %14869 = vrot.lane.b32.xlu1 %v14868_v7, %s20977_s18  ;;  %14864 = vrot.lane.b32.xlu0 %v14863_v42, %s20982_s26  ;;  %v14821_v42 = vunpack.i.l.bf16 %v14820_v44  ;;  %vm21285_vm10 = vmmov %vm21278_vm1 }
 0x614   : > { %vm21286_vm13 = vmmov %vm21278_vm1 }
 0x615   : > { %vm21287_vm14 = vmmov %vm21281_vm3 }
 0x616   : > { %vm21288_vm1 = vmmov %vm21281_vm3 }
 0x617   : > { %14874 = vrot.lane.b32.xlu1 %v14873_v49, %s15592_s5  ;;  %14884 = vrot.lane.b32.xlu0 %v14883_v36, %s20977_s18  ;;  %vm21289_vm2 = vmmov %vm21283_vm6 }
 0x618   : > { %vm21290_vm15 = vmmov %vm21289_vm2 }
 0x61b   : > { %14879 = vrot.lane.b32.xlu1 %v14878_v14, %s20982_s26  ;;  %14889 = vrot.lane.b32.xlu0 %v14868_v7, %s15588_s1 }
 0x61f   : > { %14894 = vrot.lane.b32.xlu1 %v14893_v62, %s20980_s10  ;;  %14899 = vrot.lane.b32.xlu0 %v14898_v1, %s15592_s5 }
 0x623   : > { %7130 = vrot.lane.b32.xlu0 %v21175_v54, %s15588_s1  ;;  %7161 = vrot.lane.b32.xlu1 %v21175_v54, %s20977_s18  ;;  %s19572_s18 = scalar_lea.vmem [#allocation4], %s12222_s28  ;;  %s21322_s28 = smov 80  }
 0x627   : > { %7170 = vrot.lane.b32.xlu0 %v21176_v48, %s20980_s10 }
 0x675   : > { %v14825_v45 = vpop.permute.xlu1 %14824  ;;  %v19496_v35 = vpop.permute.xlu0 %14829 }
 0x676   : > { %v14827_v31 = vunpack.i.h.bf16 %v14825_v45  ;;  %v14826_v15 = vunpack.i.l.bf16 %v14825_v45 }
 0x678   : > { %v6621_v63 = vsel %vm21281_vm3, %v6613_v17, %v14827_v31  ;;  %v6620_v53 = vsel %vm21282_vm9, %v6612_v3, %v14826_v15  ;;  %vm21291_vm3 = vmmov %vm21285_vm10 }
 0x679   : > { %v19504_v50 = vpop.permute.xlu1 %14834  ;;  %v14845_v20 = vpop.permute.xlu0 %14844  ;;  %v6629_v29 = vsel %vm21283_vm6, %v6621_v63, %v14817_v43  ;;  %v6628_v41 = vsel %vm21284_vm7, %v6620_v53, %v14816_v27  ;;  %v14832_v43 = vunpack.i.h.bf16 %v19496_v35  ;;  %v14831_v27 = vunpack.i.l.bf16 %v19496_v35  ;;  %vm21292_vm9 = vmmov %vm21291_vm3 }
 0x67a   : > { %v6636_v16 = vsel %vm4513_vm8, %v6628_v41, %v14791_v60  ;;  %v6637_v33 = vsel %vm4513_vm8, %v6629_v29, %v14792_v40  ;;  %v14847_v6 = vunpack.i.h.bf16 %v14845_v20  ;;  %v14846_v39 = vunpack.i.l.bf16 %v14845_v20  ;;  %vm21293_vm6 = vmmov %vm21291_vm3 }
 0x67b   : > { %v14837_v25 = vunpack.i.h.bf16 %v19504_v50  ;;  %v6676_v35 = vpack.c.bf16 %v21176_v48, %v19472_v51  ;;  %vm21294_vm7 = vmmov %vm21288_vm1 }
 0x67d   : > { %v14840_v21 = vpop.permute.xlu1 %14839  ;;  %v14850_v22 = vpop.permute.xlu0 %14849 }
 0x67e   : > { %v14842_v18 = vunpack.i.h.bf16 %v14840_v21  ;;  %v14841_v23 = vunpack.i.l.bf16 %v14840_v21  ;;  %v14852_v8 = vunpack.i.h.bf16 %v14850_v22  ;;  %v14851_v4 = vunpack.i.l.bf16 %v14850_v22 }
 0x680   : > { %v6645_v32 = vsel %vm6642_vm11, %v6636_v16, %v14851_v4  ;;  %v6646_v61 = vsel %vm6642_vm11, %v6637_v33, %v14852_v8  ;;  %v6615_v52 = vsel %vm21285_vm10, %v19376_v5, %v14842_v18  ;;  %v6614_v7 = vsel %vm21286_vm13, %v19293_v12, %v14841_v23  ;;  %vm21295_vm10 = vmmov %vm21288_vm1 }
 0x681   : > { %v14855_v30 = vpop.permute.xlu1 %14854  ;;  %v14860_v24 = vpop.permute.xlu0 %14859  ;;  %v6654_v9 = vsel %vm6651_vm5, %v6645_v32, %v14821_v42  ;;  %v6655_v59 = vsel %vm6651_vm5, %v6646_v61, %v14822_v56  ;;  %v6622_v1 = vsel %vm21287_vm14, %v6614_v7, %v14846_v39  ;;  %v6623_v36 = vsel %vm21288_vm1, %v6615_v52, %v14847_v6  ;;  %vm21296_vm13 = vmmov %vm21289_vm2 }
 0x682   : > { %v14857_v34 = vunpack.i.h.bf16 %v14855_v30  ;;  %v14856_v55 = vunpack.i.l.bf16 %v14855_v30  ;;  %v6663_v49 = vsel %vm6660_vm4, %v6654_v9, %v14796_v10  ;;  %v6664_v2 = vsel %vm6660_vm4, %v6655_v59, %v14797_v58  ;;  %vm21297_vm14 = vmmov %vm21289_vm2 }
 0x683   : > { %v6671_v13 = vpack.c.bf16 %v6664_v2, %v6663_v49  ;;  %v14862_v15 = vunpack.i.h.bf16 %v14860_v24  ;;  %v14861_v17 = vunpack.i.l.bf16 %v14860_v24  ;;  %v6617_v8 = vsel %vm21292_vm9, %v19366_v38, %v14832_v43  ;;  %vm21298_vm1 = vmmov %vm21291_vm3 }
 0x684   : > { %v6630_v12 = vsel %vm21289_vm2, %v6622_v1, %v14856_v55  ;;  %v6631_v44 = vsel %vm21290_vm15, %v6623_v36, %v14857_v34  ;;  %v6616_v4 = vsel %vm21293_vm6, %v19408_v37, %v14831_v27  ;;  %v6625_v16 = vsel %vm21294_vm7, %v6617_v8, %v14837_v25  ;;  %vm21300_vm2 = vmmov %vm21298_vm1 }
 0x685   : > { %v14870_v14 = vpop.permute.xlu1 %14869  ;;  %v14865_v62 = vpop.permute.xlu0 %14864  ;;  %6809 = vmatmul.mubr.bf16.gmra.mrb[36].mxu1 %v6671_v13  ;;  %vm21301_vm15 = vmmov %vm21298_vm1  ;;  %vm6949_vm6 = vcmask 123904   ;;  %vm21304_vm7 = vcmask 1043459  }
 0x686   : > { %v14867_v46 = vunpack.i.h.bf16 %v14865_v62  ;;  %v14866_v5 = vunpack.i.l.bf16 %v14865_v62  ;;  %v14872_v57 = vunpack.i.h.bf16 %v14870_v14  ;;  %v14871_v28 = vunpack.i.l.bf16 %v14870_v14  ;;  %12303 = vmatprep.mubr.msk.bf16.mxu1 %vm21291_vm3, %v6674_v47  ;;  %v19566_v62 = vld [vmem:[%s21299_s20] ss:$0 sm:$0xff]  ;;  %vm21302_vm3 = vmmov %vm21298_vm1 }
 0x687   : > { %v14836_v47 = vunpack.i.l.bf16 %v19504_v50  ;;  %vm21303_vm9 = vmmov %vm21298_vm1 }
 0x688   : > { %v6638_v45 = vsel %vm4513_vm8, %v6630_v12, %v14866_v5  ;;  %v6639_v31 = vsel %vm4513_vm8, %v6631_v44, %v14867_v46 }
 0x689   : > { %v14875_v3 = vpop.permute.xlu1 %14874  ;;  %v14885_v63 = vpop.permute.xlu0 %14884  ;;  %v6647_v53 = vsel %vm6642_vm11, %v6638_v45, %v14871_v28  ;;  %v6648_v20 = vsel %vm6642_vm11, %v6639_v31, %v14872_v57  ;;  %v6624_v33 = vsel %vm21295_vm10, %v6616_v4, %v14836_v47  ;;  %vm21305_vm10 = vcmask 1044484  }
 0x68a   : > { %v14877_v29 = vunpack.i.h.bf16 %v14875_v3  ;;  %v14876_v11 = vunpack.i.l.bf16 %v14875_v3  ;;  %v6656_v41 = vsel %vm6651_vm5, %v6647_v53, %v14861_v17  ;;  %v6657_v40 = vsel %vm6651_vm5, %v6648_v20, %v14862_v15 }
 0x68b   : > { %v14887_v38 = vunpack.i.h.bf16 %v14885_v63  ;;  %v14886_v10 = vunpack.i.l.bf16 %v14885_v63 }
 0x68c   : > { %v6665_v60 = vsel %vm6660_vm4, %v6656_v41, %v14876_v11  ;;  %v6666_v21 = vsel %vm6660_vm4, %v6657_v40, %v14877_v29 }
 0x68d   : > { %v14880_v22 = vpop.permute.xlu1 %14879  ;;  %v14890_v18 = vpop.permute.xlu0 %14889  ;;  %v6673_v23 = vpack.c.bf16 %v6666_v21, %v6665_v60 }
 0x68e   : > { %v14892_v56 = vunpack.i.h.bf16 %v14890_v18  ;;  %v14891_v42 = vunpack.i.l.bf16 %v14890_v18  ;;  %v14882_v32 = vunpack.i.h.bf16 %v14880_v22  ;;  %v14881_v61 = vunpack.i.l.bf16 %v14880_v22 }
 0x68f   : > { %6817 = vmatmul.mubr.bf16.gmra.mrb[40].mxu1 %v6673_v23 }
 0x690   : > { %v6632_v58 = vsel %vm21296_vm13, %v6624_v33, %v14891_v42  ;;  %v6633_v51 = vsel %vm21297_vm14, %v6625_v16, %v14892_v56  ;;  %12304 = vmatprep.mubr.msk.bf16.mxu1 %vm21298_vm1, %v6676_v35  ;;  %vm21306_vm13 = vcmask 1044480   ;;  %vm21307_vm14 = vmmov %vm21298_vm1 }
 0x691   : > { %v6640_v37 = vsel %vm4513_vm8, %v6632_v58, %v14881_v61  ;;  %v6641_v30 = vsel %vm4513_vm8, %v6633_v51, %v14882_v32  ;;  %v14895_v24 = vpop.permute.xlu1 %14894  ;;  %v14900_v9 = vpop.permute.xlu0 %14899 }
 0x692   : > { %v14897_v59 = vunpack.i.h.bf16 %v14895_v24  ;;  %v14896_v52 = vunpack.i.l.bf16 %v14895_v24  ;;  %v14902_v7 = vunpack.i.h.bf16 %v14900_v9  ;;  %v14901_v34 = vunpack.i.l.bf16 %v14900_v9 }
 0x693   : > { %v6649_v55 = vsel %vm6642_vm11, %v6640_v37, %v14886_v10  ;;  %v6650_v49 = vsel %vm6642_vm11, %v6641_v30, %v14887_v38 }
 0x694   : > { %v6658_v2 = vsel %vm6651_vm5, %v6649_v55, %v14896_v52  ;;  %v6659_v6 = vsel %vm6651_vm5, %v6650_v49, %v14897_v59 }
 0x695   : > { %v6667_v39 = vsel %vm6660_vm4, %v6658_v2, %v14901_v34  ;;  %v6668_v13 = vsel %vm6660_vm4, %v6659_v6, %v14902_v7 }
 0x696   : > { %v6675_v14 = vpack.c.bf16 %v6668_v13, %v6667_v39 }
 0x698   : > { %6825 = vmatmul.mubr.bf16.gmra.mrb[44].mxu1 %v6675_v14 }
 0x6e3   : > { %v6802_v1 = vpop.f32.mrb[32].mxu1 }
 0x6e4   : > { %v6803_v36 = vadd.f32 %v19566_v62, %v6802_v1  ;;  %v6804_v46 = vpop.f32.mrb[33].mxu1 }
 0x6e5   : > { %v6805_v5 = vpop.f32.mrb[34].mxu1 }
 0x6e6   : > { %v6833_v12 = vmax.f32 %v6803_v36, 0.0  ;;  %v6806_v44 = vadd.f32 %v19566_v62, %v6805_v5  ;;  %v6807_v57 = vpop.f32.mrb[35].mxu1 }
 0x6e8   : > { %6841 = vst.msk [vmem:[%s19572_s18] sm:$0xff] %vm21300_vm2, %v6833_v12  ;;  %v6834_v28 = vmax.f32 %v6806_v44, 0.0  ;;  %v6849_v45 = vsel %vm21301_vm15, %v6833_v12, -inf  ;;  %vm21308_vm2 = vmmov %vm21298_vm1 }
 0x6e9   : > { %vm21309_vm15 = vmmov %vm21298_vm1 }
 0x6ea   : > { %6842 = vst.msk [vmem:[%s19572_s18 + $0x8] sm:$0xff] %vm21302_vm3, %v6834_v28  ;;  %v6850_v31 = vsel %vm21303_vm9, %v6834_v28, -inf  ;;  %vm21310_vm3 = vmmov %vm21298_vm1 }
 0x6eb   : > { %v6851_v15 = vmax.f32 %v6849_v45, %v6850_v31  ;;  %vm21311_vm9 = vmmov %vm21298_vm1 }
 0x6ed   : > { %v6865_v17 = vcombine.high %v6851_v15, %v6851_v15  ;;  %v6872_v3 = vrot.slane %v6851_v15, %v18656_v19 }
 0x6ef   : > { %v6879_v63 = vrot.slane %v6865_v17, %v18656_v19  ;;  %v6880_v53 = vcombine.high %v6872_v3, %v6872_v3  ;;  %v6950_v20 = vsel %vm6949_vm6, %v6872_v3, -inf }
 0x6f0   : > { %v6951_v43 = vrot.slane %v6950_v20, 4 }
 0x6f1   : > { %v6881_v27 = vcombine.high %v6879_v63, %v6879_v63  ;;  %v6957_v29 = vsel %vm6949_vm6, %v6880_v53, -inf  ;;  %v6964_v11 = vsel %vm6949_vm6, %v6879_v63, -inf }
 0x6f2   : > { %v6952_v47 = vmax.f32 %v6950_v20, %v6951_v43  ;;  %v6958_v41 = vrot.slane %v6957_v29, 4  ;;  %v6965_v40 = vrot.slane %v6964_v11, 4 }
 0x6f3   : > { %v6971_v60 = vsel %vm6949_vm6, %v6881_v27, -inf }
 0x6f4   : > { %v6953_v21 = vrot.slane %v6952_v47, 2  ;;  %v6959_v22 = vmax.f32 %v6957_v29, %v6958_v41  ;;  %v6966_v18 = vmax.f32 %v6964_v11, %v6965_v40  ;;  %v6972_v23 = vrot.slane %v6971_v60, 4 }
 0x6f6   : > { %v6954_v35 = vmax.f32 %v6952_v47, %v6953_v21  ;;  %v6960_v8 = vrot.slane %v6959_v22, 2  ;;  %v6967_v4 = vrot.slane %v6966_v18, 2  ;;  %v6973_v56 = vmax.f32 %v6971_v60, %v6972_v23 }
 0x6f8   : > { %v6955_v42 = vrot.slane %v6954_v35, 1  ;;  %v6961_v16 = vmax.f32 %v6959_v22, %v6960_v8  ;;  %v6968_v33 = vmax.f32 %v6966_v18, %v6967_v4  ;;  %v6974_v32 = vrot.slane %v6973_v56, 2 }
 0x6fa   : > { %v6962_v61 = vrot.slane %v6961_v16, 1  ;;  %v6969_v58 = vrot.slane %v6968_v33, 1  ;;  %v6975_v51 = vmax.f32 %v6973_v56, %v6974_v32  ;;  %v6956_v38 = vmax.f32 %v6954_v35, %v6955_v42 }
 0x6fc   : > { %v6963_v10 = vmax.f32 %v6961_v16, %v6962_v61  ;;  %v6970_v37 = vmax.f32 %v6968_v33, %v6969_v58  ;;  %v6976_v30 = vrot.slane %v6975_v51, 1 }
 0x6fe   : > { %v6977_v24 = vmax.f32 %v6975_v51, %v6976_v30  ;;  %v7078_v9 = vsel %vm5796_vm12, %v6963_v10, %v6956_v38 }
 0x6ff   : > { %v7079_v59 = vsel %vm21304_vm7, %v6970_v37, %v7078_v9  ;;  %vm21312_vm7 = vmmov %vm21298_vm1 }
 0x700   : > { %v7080_v52 = vsel %vm21305_vm10, %v6977_v24, %v7079_v59  ;;  %vm21313_vm10 = vmmov %vm21298_vm1 }
 0x701   : > { %v7094_v7 = vsel %vm1517_vm0, 0.0, %v7080_v52 }
 0x702   : > { %v19591_v34 = vsel %vm21306_vm13, %v7094_v7, 0.0  ;;  %vm21314_vm13 = vmmov %vm21298_vm1 }
 0x703   : > { %7106 = vrot.lane.b32.xlu1 %v19591_v34, %s15582_s15  ;;  %v7127_v55 = vrot.slane %v19591_v34, 1  ;;  %v7167_v49 = vrot.slane %v19591_v34, 2 }
 0x705   : > { %7143 = vrot.lane.b32.xlu0 %v7127_v55, %s20982_s26 }
 0x707   : > { %7132 = vrot.lane.b32.xlu1 %v7127_v55, %s15588_s1 }
 0x709   : > { %7183 = vrot.lane.b32.xlu0 %v7167_v49, %s15592_s5 }
 0x70b   : > { %7172 = vrot.lane.b32.xlu1 %v7167_v49, %s20980_s10 }
 0x758   : > { %v6810_v2 = vpop.f32.mrb[36].mxu1 }
 0x759   : > { %v6811_v6 = vadd.f32 %v19566_v62, %v6810_v2  ;;  %v6812_v39 = vpop.f32.mrb[37].mxu1 }
 0x75a   : > { %v6813_v13 = vpop.f32.mrb[38].mxu1 }
 0x75b   : > { %v6835_v14 = vmax.f32 %v6811_v6, 0.0  ;;  %v6814_v1 = vadd.f32 %v19566_v62, %v6813_v13  ;;  %v6815_v36 = vpop.f32.mrb[39].mxu1 }
 0x75d   : > { %6843 = vst.msk [vmem:[%s19572_s18 + $0x10] sm:$0xff] %vm21307_vm14, %v6835_v14  ;;  %v6836_v46 = vmax.f32 %v6814_v1, 0.0  ;;  %v6852_v5 = vsel %vm21298_vm1, %v6835_v14, -inf  ;;  %vm21315_vm14 = vmmov %vm21298_vm1 }
 0x75f   : > { %6844 = vst.msk [vmem:[%s19572_s18 + $0x18] sm:$0xff] %vm21308_vm2, %v6836_v46  ;;  %v6853_v12 = vsel %vm21309_vm15, %v6836_v46, -inf  ;;  %vm21316_vm2 = vmmov %vm21298_vm1  ;;  %vm21317_vm15 = vcmask 1043459  }
 0x760   : > { %v6854_v44 = vmax.f32 %v6852_v5, %v6853_v12 }
 0x762   : > { %v6818_v57 = vpop.f32.mrb[40].mxu1  ;;  %v6882_v28 = vcombine.high %v6854_v44, %v6854_v44  ;;  %v6889_v45 = vrot.slane %v6854_v44, %v18656_v19 }
 0x763   : > { %v6819_v31 = vadd.f32 %v19566_v62, %v6818_v57  ;;  %v6820_v15 = vpop.f32.mrb[41].mxu1 }
 0x764   : > { %v6821_v17 = vpop.f32.mrb[42].mxu1  ;;  %v6896_v3 = vrot.slane %v6882_v28, %v18656_v19  ;;  %v6897_v63 = vcombine.high %v6889_v45, %v6889_v45  ;;  %v6978_v53 = vsel %vm6949_vm6, %v6889_v45, -inf }
 0x765   : > { %v6837_v20 = vmax.f32 %v6819_v31, 0.0  ;;  %v6823_v43 = vpop.f32.mrb[43].mxu1  ;;  %v6979_v27 = vrot.slane %v6978_v53, 4  ;;  %v6822_v29 = vadd.f32 %v19566_v62, %v6821_v17 }
 0x766   : > { %v6898_v11 = vcombine.high %v6896_v3, %v6896_v3  ;;  %v6985_v47 = vsel %vm6949_vm6, %v6897_v63, -inf  ;;  %v6992_v41 = vsel %vm6949_vm6, %v6896_v3, -inf }
 0x767   : > { %6845 = vst.msk [vmem:[%s19572_s18 + $0x20] sm:$0xff] %vm21310_vm3, %v6837_v20  ;;  %v6980_v40 = vmax.f32 %v6978_v53, %v6979_v27  ;;  %v6986_v60 = vrot.slane %v6985_v47, 4  ;;  %v6993_v21 = vrot.slane %v6992_v41, 4  ;;  %v6838_v22 = vmax.f32 %v6822_v29, 0.0 }
 0x768   : > { %v6999_v18 = vsel %vm6949_vm6, %v6898_v11, -inf  ;;  %v6855_v56 = vsel %vm21312_vm7, %v6837_v20, -inf  ;;  %v14929_v11 = vld [vmem:[%s15644_s29] sm:$0xff]   ;;  %vm21318_vm3 = vcmask 1044484  }
 0x769   : > { %v6981_v23 = vrot.slane %v6980_v40, 2  ;;  %v6987_v35 = vmax.f32 %v6985_v47, %v6986_v60  ;;  %v6994_v8 = vmax.f32 %v6992_v41, %v6993_v21  ;;  %v7000_v4 = vrot.slane %v6999_v18, 4  ;;  %6846 = vst.msk [vmem:[%s19572_s18 + $0x28] sm:$0xff] %vm21311_vm9, %v6838_v22  ;;  %7324 = vmatpush1.bf16.msra.mxu0 %v14929_v11  ;;  %vm21321_vm7 = vmmov %vm21318_vm3 }
 0x76a   : > { %v6856_v42 = vsel %vm21313_vm10, %v6838_v22, -inf  ;;  %7325 = vmatprep.subr.bf16.mxu0 %v15590_v0  ;;  %vm21319_vm9 = vcmask 1044480  }
 0x76b   : > { %v6826_v16 = vpop.f32.mrb[44].mxu1  ;;  %v6982_v33 = vmax.f32 %v6980_v40, %v6981_v23  ;;  %v6988_v32 = vrot.slane %v6987_v35, 2  ;;  %v6995_v61 = vrot.slane %v6994_v8, 2  ;;  %v7001_v58 = vmax.f32 %v6999_v18, %v7000_v4  ;;  %vm21323_vm10 = vmmov %vm21319_vm9 }
 0x76c   : > { %v6828_v51 = vpop.f32.mrb[45].mxu1  ;;  %v6857_v38 = vmax.f32 %v6855_v56, %v6856_v42  ;;  %v6827_v10 = vadd.f32 %v19566_v62, %v6826_v16 }
 0x76d   : > { %v6829_v37 = vpop.f32.mrb[46].mxu1  ;;  %v6983_v30 = vrot.slane %v6982_v33, 1  ;;  %v6989_v24 = vmax.f32 %v6987_v35, %v6988_v32  ;;  %v6996_v9 = vmax.f32 %v6994_v8, %v6995_v61  ;;  %v7002_v59 = vrot.slane %v7001_v58, 2 }
 0x76e   : > { %v6831_v52 = vpop.f32.mrb[47].mxu1  ;;  %v6899_v7 = vcombine.high %v6857_v38, %v6857_v38  ;;  %v6906_v55 = vrot.slane %v6857_v38, %v18656_v19  ;;  %v6839_v49 = vmax.f32 %v6827_v10, 0.0  ;;  %v6830_v2 = vadd.f32 %v19566_v62, %v6829_v37 }
 0x76f   : > { %v6984_v6 = vmax.f32 %v6982_v33, %v6983_v30  ;;  %v6990_v39 = vrot.slane %v6989_v24, 1  ;;  %v6997_v13 = vrot.slane %v6996_v9, 1  ;;  %v7003_v14 = vmax.f32 %v7001_v58, %v7002_v59  ;;  %v14930_v52 = vld [vmem:[%s15644_s29 + $0x8] sm:$0xff]  }
 0x770   : > { %v6913_v1 = vrot.slane %v6899_v7, %v18656_v19  ;;  %v6914_v36 = vcombine.high %v6906_v55, %v6906_v55  ;;  %v7006_v46 = vsel %vm6949_vm6, %v6906_v55, -inf  ;;  %6847 = vst.msk [vmem:[%s19572_s18 + $0x30] sm:$0xff] %vm21314_vm13, %v6839_v49  ;;  %v6858_v5 = vsel %vm21315_vm14, %v6839_v49, -inf  ;;  %7326 = vmatpush1.bf16.msra.mxu0 %v14930_v52  ;;  %vm21325_vm14 = vmmov %vm21318_vm3 }
 0x771   : > { %v6991_v12 = vmax.f32 %v6989_v24, %v6990_v39  ;;  %v7007_v44 = vrot.slane %v7006_v46, 4  ;;  %v6840_v57 = vmax.f32 %v6830_v2, 0.0  ;;  %v6998_v28 = vmax.f32 %v6996_v9, %v6997_v13  ;;  %7327 = vmatprep.subr.bf16.mxu0 %v15590_v0 }
 0x772   : > { %v6915_v62 = vcombine.high %v6913_v1, %v6913_v1  ;;  %v7013_v45 = vsel %vm6949_vm6, %v6914_v36, -inf  ;;  %v7020_v31 = vsel %vm6949_vm6, %v6913_v1, -inf  ;;  %v7004_v15 = vrot.slane %v7003_v14, 1  ;;  %v14931_v1 = vld [vmem:[%s15644_s29 + $0x10] sm:$0xff]  }
 0x773   : > { %v7008_v17 = vmax.f32 %v7006_v46, %v7007_v44  ;;  %v7014_v3 = vrot.slane %v7013_v45, 4  ;;  %v7021_v63 = vrot.slane %v7020_v31, 4  ;;  %6848 = vst.msk [vmem:[%s19572_s18 + $0x38] sm:$0xff] %vm21298_vm1, %v6840_v57  ;;  %v6859_v53 = vsel %vm21316_vm2, %v6840_v57, -inf  ;;  %vm21326_vm1 = vmmov %vm21319_vm9 }
 0x774   : > { %v7027_v20 = vsel %vm6949_vm6, %v6915_v62, -inf  ;;  %v6860_v43 = vmax.f32 %v6858_v5, %v6859_v53  ;;  %v7005_v27 = vmax.f32 %v7003_v14, %v7004_v15  ;;  %v7081_v29 = vsel %vm5796_vm12, %v6991_v12, %v6984_v6  ;;  %7328 = vmatpush1.bf16.msra.mxu0 %v14931_v1 }
 0x775   : > { %v7009_v47 = vrot.slane %v7008_v17, 2  ;;  %v7015_v41 = vmax.f32 %v7013_v45, %v7014_v3  ;;  %v7022_v40 = vmax.f32 %v7020_v31, %v7021_v63  ;;  %v7028_v60 = vrot.slane %v7027_v20, 4  ;;  %7329 = vmatprep.subr.bf16.mxu0 %v15590_v0 }
 0x776   : > { %v6916_v21 = vcombine.high %v6860_v43, %v6860_v43  ;;  %v6923_v22 = vrot.slane %v6860_v43, %v18656_v19  ;;  %v7082_v18 = vsel %vm21317_vm15, %v6998_v28, %v7081_v29 }
 0x777   : > { %v7010_v23 = vmax.f32 %v7008_v17, %v7009_v47  ;;  %v7016_v35 = vrot.slane %v7015_v41, 2  ;;  %v7023_v8 = vrot.slane %v7022_v40, 2  ;;  %v7029_v4 = vmax.f32 %v7027_v20, %v7028_v60 }
 0x778   : > { %v6930_v56 = vrot.slane %v6916_v21, %v18656_v19  ;;  %v6931_v42 = vcombine.high %v6923_v22, %v6923_v22  ;;  %v7034_v16 = vsel %vm6949_vm6, %v6923_v22, -inf  ;;  %v7083_v58 = vsel %vm21318_vm3, %v7005_v27, %v7082_v18  ;;  %v14932_v27 = vld [vmem:[%s15644_s29 + $0x18] sm:$0xff]  }
 0x779   : > { %v7011_v33 = vrot.slane %v7010_v23, 1  ;;  %v7017_v32 = vmax.f32 %v7015_v41, %v7016_v35  ;;  %v7024_v61 = vmax.f32 %v7022_v40, %v7023_v8  ;;  %v7035_v38 = vrot.slane %v7034_v16, 4  ;;  %7330 = vmatpush1.bf16.msra.mxu0 %v14932_v27 }
 0x77a   : > { %v6932_v51 = vcombine.high %v6930_v56, %v6930_v56  ;;  %v7041_v10 = vsel %vm6949_vm6, %v6931_v42, -inf  ;;  %v7048_v37 = vsel %vm6949_vm6, %v6930_v56, -inf  ;;  %v7030_v9 = vrot.slane %v7029_v4, 2  ;;  %7331 = vmatprep.subr.bf16.mxu0 %v15590_v0  ;;  %v14933_v42 = vld [vmem:[%s15644_s29 + $0x20] sm:$0xff]  }
 0x77b   : > { %v7018_v30 = vrot.slane %v7017_v32, 1  ;;  %v7025_v24 = vrot.slane %v7024_v61, 1  ;;  %v7042_v59 = vrot.slane %v7041_v10, 4  ;;  %v7036_v7 = vmax.f32 %v7034_v16, %v7035_v38 }
 0x77c   : > { %v7049_v55 = vrot.slane %v7048_v37, 4  ;;  %v7055_v49 = vsel %vm6949_vm6, %v6932_v51, -inf  ;;  %v7095_v2 = vsel %vm1517_vm0, 0.0, %v7083_v58  ;;  %v7012_v36 = vmax.f32 %v7010_v23, %v7011_v33  ;;  %vm21320_vm6 = vmmov %vm21317_vm15  ;;  %v14934_v58 = vld [vmem:[%s15644_s29 + $0x28] sm:$0xff]  }
 0x77d   : > { %v7019_v6 = vmax.f32 %v7017_v32, %v7018_v30  ;;  %v7043_v39 = vmax.f32 %v7041_v10, %v7042_v59  ;;  %v7056_v13 = vrot.slane %v7055_v49, 4  ;;  %v19651_v14 = vsel %vm21319_vm9, %v7095_v2, 0.0  ;;  %vm21324_vm13 = vmmov %vm21320_vm6  ;;  %7332 = vmatpush1.bf16.msra.mxu0 %v14933_v42  ;;  %v14936_v59 = vld [vmem:[%s15644_s29 + $0x38] sm:$0xff]  }
 0x77e   : > { %v7037_v46 = vrot.slane %v7036_v7, 2  ;;  %v7050_v5 = vmax.f32 %v7048_v37, %v7049_v55  ;;  %7108 = vrot.lane.b32.xlu0 %v19651_v14, %s15582_s15  ;;  %7118 = vrot.lane.b32.xlu1 %v19651_v14, %s20984_s2  ;;  %v7026_v57 = vmax.f32 %v7024_v61, %v7025_v24  ;;  %v7031_v28 = vmax.f32 %v7029_v4, %v7030_v9  ;;  %v14935_v24 = vld [vmem:[%s15644_s29 + $0x30] sm:$0xff]   ;;  %v7162_v55 = vpop.permute.xlu1 %7161  ;;  %vm21327_vm15 = vmmov %vm21316_vm2 }
 0x77f   : > { %v7044_v12 = vrot.slane %v7043_v39, 2  ;;  %v7057_v44 = vmax.f32 %v7055_v49, %v7056_v13  ;;  %v7128_v31 = vrot.slane %v19651_v14, 1  ;;  %v7084_v15 = vsel %vm5796_vm12, %v7019_v6, %v7012_v36  ;;  %7333 = vmatprep.subr.bf16.mxu0 %v15590_v0  ;;  %vm21329_vm9 = vmmov %vm21316_vm2 }
 0x780   : > { %v7038_v62 = vmax.f32 %v7036_v7, %v7037_v46  ;;  %v7051_v45 = vrot.slane %v7050_v5, 2  ;;  %v7032_v63 = vrot.slane %v7031_v28, 1  ;;  %v7085_v43 = vsel %vm21320_vm6, %v7026_v57, %v7084_v15  ;;  %v14937_v7 = vld [vmem:[%s15644_s29 + $0x40] sm:$0xff]  }
 0x781   : > { %v7045_v17 = vmax.f32 %v7043_v39, %v7044_v12  ;;  %v7058_v3 = vrot.slane %v7057_v44, 2  ;;  %v7168_v40 = vrot.slane %v19651_v14, 2  ;;  %7334 = vmatpush1.bf16.msra.mxu0 %v14934_v58  ;;  %vm21328_vm3 = vcmask 261120  }
 0x782   : > { %v7039_v53 = vrot.slane %v7038_v62, 1  ;;  %v7052_v20 = vmax.f32 %v7050_v5, %v7051_v45  ;;  %7134 = vrot.lane.b32.xlu0 %v7128_v31, %s15588_s1  ;;  %7145 = vrot.lane.b32.xlu1 %v7128_v31, %s20982_s26  ;;  %v7033_v47 = vmax.f32 %v7031_v28, %v7032_v63  ;;  %v7107_v2 = vpop.permute.xlu1 %7106  ;;  %vm21330_vm6 = vcmask 392192  }
 0x783   : > { %v7046_v29 = vrot.slane %v7045_v17, 1  ;;  %v7059_v11 = vmax.f32 %v7057_v44, %v7058_v3  ;;  %7335 = vmatprep.subr.bf16.mxu0 %v15590_v0 }
 0x784   : > { %v7053_v41 = vrot.slane %v7052_v20, 1  ;;  %v7040_v60 = vmax.f32 %v7038_v62, %v7039_v53  ;;  %v7086_v18 = vsel %vm21321_vm7, %v7033_v47, %v7085_v43  ;;  %v7195_v53 = vsel %vm21329_vm9, 0.0, %v7107_v2  ;;  %vm21331_vm7 = vmmov %vm21328_vm3 }
 0x785   : > { %v7047_v21 = vmax.f32 %v7045_v17, %v7046_v29  ;;  %v7060_v22 = vrot.slane %v7059_v11, 1  ;;  %v7096_v35 = vsel %vm1517_vm0, 0.0, %v7086_v18  ;;  %7336 = vmatpush1.bf16.msra.mxu0 %v14935_v24 }
 0x786   : > { %v7054_v23 = vmax.f32 %v7052_v20, %v7053_v41  ;;  %7155 = vrot.lane.b32.xlu0 %v7128_v31, %s21322_s28  ;;  %7185 = vrot.lane.b32.xlu1 %v7168_v40, %s15592_s5  ;;  %v19673_v56 = vsel %vm21323_vm10, %v7096_v35, 0.0  ;;  %v7133_v39 = vpop.permute.xlu1 %7132  ;;  %vm21332_vm10 = vmmov %vm21316_vm2 }
 0x787   : > { %v7061_v8 = vmax.f32 %v7059_v11, %v7060_v22  ;;  %v7087_v4 = vsel %vm5796_vm12, %v7047_v21, %v7040_v60  ;;  %v7169_v32 = vrot.slane %v19673_v56, 2  ;;  %v7129_v38 = vrot.slane %v19673_v56, 1  ;;  %7337 = vmatprep.subr.bf16.mxu0 %v15590_v0 }
 0x788   : > { %v7088_v16 = vsel %vm21324_vm13, %v7054_v23, %v7087_v4  ;;  %vm21333_vm13 = vmmov %vm21330_vm6 }
 0x789   : > { %v7089_v33 = vsel %vm21325_vm14, %v7061_v8, %v7088_v16  ;;  %v12306_v37 = vcombine.low %v7168_v40, %v7169_v32  ;;  %7338 = vmatpush1.bf16.msra.mxu0 %v14936_v59  ;;  %vm21334_vm14 = vmmov %vm21316_vm2 }
 0x78a   : > { %7174 = vrot.lane.b32.xlu0 %v7168_v40, %s20980_s10  ;;  %7110 = vrot.lane.b32.xlu1 %v19673_v56, %s15582_s15  ;;  %v7097_v61 = vsel %vm1517_vm0, 0.0, %v7089_v33  ;;  %v7173_v1 = vpop.permute.xlu1 %7172 }
 0x78b   : > { %v7101_v51 = vsel %vm21326_vm1, %v7097_v61, 0.0  ;;  %7339 = vmatprep.subr.bf16.mxu0 %v15590_v0  ;;  %v7131_v0 = vpop.permute.xlu0 %7130  ;;  %vm21335_vm1 = vmmov %vm21328_vm3 }
 0x78c   : > { %v7182_v10 = vrot.slane %v7101_v51, 2  ;;  %v7142_v52 = vrot.slane %v7101_v51, 1  ;;  %vm21341_vm9 = vmmov %vm21335_vm1 }
 0x78d   : > { %7340 = vmatpush1.bf16.msra.mxu0 %v14937_v7  ;;  %v14938_v7 = vld [vmem:[%s21062_s3 + $0x80] sm:$0xff]  }
 0x78e   : > { %7120 = vrot.lane.b32.xlu0 %v19673_v56, %s20984_s2  ;;  %7136 = vrot.lane.b32.xlu1 %v7129_v38, %s15588_s1  ;;  %v12308_v30 = vcombine.low %v7182_v10, %v21176_v48  ;;  %s20979_s1 = sshll.u32 %s19259_s13, 4 }
 0x78f   : > { %13149 = vmatprep.subr.bf16.mxu0 %v21170_v26  ;;  %v7171_v49 = vpop.permute.xlu0 %7170 }
 0x790   : > { %v7240_v9 = vpack.c.bf16 %v12308_v30, %v12306_v37 }
 0x792   : > { %7147 = vrot.lane.b32.xlu0 %v7129_v38, %s20982_s26  ;;  %7157 = vrot.lane.b32.xlu1 %v7129_v38, %s21322_s28 }
 0x793   : > { %12319 = vmatprep.mubr.msk.bf16.mxu0 %vm21316_vm2, %v7240_v9  ;;  %v7144_v6 = vpop.permute.xlu0 %7143  ;;  %vm21336_vm2 = vmmov %vm21335_vm1 }
 0x796   : > { %7112 = vrot.lane.b32.xlu0 %v7101_v51, %s15582_s15  ;;  %7176 = vrot.lane.b32.xlu1 %v7169_v32, %s20980_s10  ;;  %s21339_s15 = sld [smem:[#allocation43_spill]] }
 0x797   : > { %v7184_v13 = vpop.permute.xlu0 %7183 }
 0x79a   : > { %7159 = vrot.lane.b32.xlu0 %v7142_v52, %s21322_s28  ;;  %7122 = vrot.lane.b32.xlu1 %v7101_v51, %s20984_s2  ;;  %s21354_s28 = sld [smem:[#allocation31_spill]] }
 0x79e   : > { %7187 = vrot.lane.b32.xlu0 %v7169_v32, %s15592_s5  ;;  %7149 = vrot.lane.b32.xlu1 %v7142_v52, %s20982_s26  ;;  %v14903_v52 = vpack.i.bf16 %v21170_v26, %v21176_v48 }
 0x7a2   : > { %7189 = vrot.lane.b32.xlu1 %v7182_v10, %s15592_s5  ;;  %14904 = vrot.lane.b32.xlu0 %v14903_v52, %s20982_s26  ;;  %s19758_s5 = scalar_lea.vmem [#allocation6], %s20979_s1 }
 0x7a6   : > { %7442 = vrot.lane.b32.xlu1 %v21175_v54, %s20984_s2 }
 0x7aa   : > { %7419 = vrot.lane.b32.xlu1 %v21175_v54, %s20980_s10 }
 0x7f0   : > { %v7109_v36 = vpop.permute.xlu0 %7108  ;;  %v7119_v46 = vpop.permute.xlu1 %7118 }
 0x7f1   : > { %v7196_v15 = vsel %vm21327_vm15, %v19591_v34, %v7109_v36  ;;  %v7199_v43 = vsel %vm21331_vm7, %v7195_v53, %v7119_v46  ;;  %vm21337_vm15 = vmmov %vm21330_vm6 }
 0x7f2   : > { %v7203_v41 = vsel %vm21333_vm13, %v7199_v43, %v7131_v0  ;;  %v14939_v0 = vld [vmem:[%s21062_s3 + $0x88] sm:$0xff]  }
 0x7f3   : > { %v7207_v23 = vsel %vm4513_vm8, %v7203_v41, %v7144_v6 }
 0x7f4   : > { %v7135_v5 = vpop.permute.xlu0 %7134  ;;  %v7146_v12 = vpop.permute.xlu1 %7145 }
 0x7f8   : > { %v7156_v44 = vpop.permute.xlu0 %7155  ;;  %v7186_v57 = vpop.permute.xlu1 %7185 }
 0x7f9   : > { %v7211_v8 = vsel %vm6642_vm11, %v7207_v23, %v7156_v44 }
 0x7fc   : > { %v7175_v28 = vpop.permute.xlu0 %7174  ;;  %v7111_v62 = vpop.permute.xlu1 %7110 }
 0x7fd   : > { %v7197_v34 = vsel %vm21334_vm14, %v19651_v14, %v7111_v62  ;;  %vm21346_vm14 = vmmov %vm21335_vm1 }
 0x800   : > { %v7121_v45 = vpop.permute.xlu0 %7120  ;;  %v7137_v31 = vpop.permute.xlu1 %7136 }
 0x801   : > { %v7200_v17 = vsel %vm21328_vm3, %v7196_v15, %v7121_v45  ;;  %vm21338_vm3 = vmmov %vm21330_vm6 }
 0x802   : > { %v7204_v20 = vsel %vm21330_vm6, %v7200_v17, %v7133_v39  ;;  %vm21342_vm6 = vcmask 1044480  }
 0x803   : > { %v7208_v11 = vsel %vm4513_vm8, %v7204_v20, %v7146_v12  ;;  %vm21343_vm7 = vmmov %vm21342_vm6 }
 0x804   : > { %v7148_v3 = vpop.permute.xlu0 %7147  ;;  %v7158_v63 = vpop.permute.xlu1 %7157  ;;  %vm21345_vm13 = vmmov %vm21342_vm6 }
 0x805   : > { %v7212_v21 = vsel %vm6642_vm11, %v7208_v11, %v7158_v63  ;;  %v14941_v63 = vld [vmem:[%s21062_s3] sm:$0xff]  }
 0x806   : > { %v7216_v14 = vsel %vm6651_vm5, %v7212_v21, %v7173_v1 }
 0x807   : > { %v7220_v58 = vsel %vm6660_vm4, %v7216_v14, %v7186_v57 }
 0x808   : > { %v7113_v27 = vpop.permute.xlu0 %7112  ;;  %v7177_v29 = vpop.permute.xlu1 %7176 }
 0x809   : > { %v7198_v47 = vsel %vm21332_vm10, %v19673_v56, %v7113_v27  ;;  %vm21344_vm10 = vmmov %vm21342_vm6 }
 0x80a   : > { %v7202_v22 = vsel %vm21335_vm1, %v7198_v47, %v14837_v25  ;;  %v7215_v25 = vsel %vm6651_vm5, %v7211_v8, %v7171_v49  ;;  %v14946_v8 = vld [vmem:[%s21062_s3 + $0x58] sm:$0xff]  }
 0x80b   : > { %v7206_v42 = vsel %vm21338_vm3, %v7202_v22, %v7137_v31  ;;  %v7219_v10 = vsel %vm6660_vm4, %v7215_v25, %v7184_v13  ;;  %v14944_v22 = vld [vmem:[%s21062_s3 + $0x50] sm:$0xff]   ;;  %v14951_v25 = vld [vmem:[%s21062_s3 + $0x28] sm:$0xff]   ;;  %vm21349_vm3 = vmmov %vm21335_vm1 }
 0x80c   : > { %v7160_v40 = vpop.permute.xlu0 %7159  ;;  %v7123_v60 = vpop.permute.xlu1 %7122  ;;  %v12305_v24 = vcombine.low %v7219_v10, %v7220_v58  ;;  %v14954_v58 = vld [vmem:[%s21062_s3 + $0x78] sm:$0xff]  }
 0x80d   : > { %v7201_v18 = vsel %vm21336_vm2, %v7197_v34, %v7123_v60  ;;  %v14942_v34 = vld [vmem:[%s21062_s3 + $0x48] sm:$0xff]   ;;  %vm21347_vm2 = vmmov %vm21335_vm1 }
 0x80e   : > { %v7205_v35 = vsel %vm21337_vm15, %v7201_v18, %v7135_v5  ;;  %v14945_v18 = vld [vmem:[%s21062_s3 + $0x10] sm:$0xff]   ;;  %vm21348_vm15 = vmmov %vm21335_vm1 }
 0x80f   : > { %v7209_v4 = vsel %vm4513_vm8, %v7205_v35, %v7148_v3  ;;  %v14940_v3 = vld [vmem:[%s21062_s3 + $0x40] sm:$0xff]  }
 0x810   : > { %v7213_v56 = vsel %vm6642_vm11, %v7209_v4, %v7160_v40  ;;  %v7150_v16 = vpop.permute.xlu1 %7149  ;;  %v7188_v33 = vpop.permute.xlu0 %7187  ;;  %12708 = vmatprep.subr.bf16.mxu1 %v14940_v3  ;;  %v14943_v40 = vld [vmem:[%s21062_s3 + $0x8] sm:$0xff]   ;;  %v14947_v4 = vld [vmem:[%s21062_s3 + $0x18] sm:$0xff]  }
 0x811   : > { %v7210_v50 = vsel %vm4513_vm8, %v7206_v42, %v7150_v16  ;;  %v7217_v32 = vsel %vm6651_vm5, %v7213_v56, %v7175_v28  ;;  %12709 = vmatpush3.bf16.msra.mxu1 %v14941_v63  ;;  %v14948_v42 = vld [vmem:[%s21062_s3 + $0x60] sm:$0xff]  }
 0x812   : > { %v7214_v61 = vsel %vm6642_vm11, %v7210_v50, %v7162_v55  ;;  %v7221_v37 = vsel %vm6660_vm4, %v7217_v32, %v7188_v33  ;;  %vm15594_vm11 = vmmov 0   ;;  %v12309_v55 = vld [vmem:[%s21339_s15] ss:$0 sm:$0xff]  ;;  %12710 = vmatprep.subr.bf16.mxu1 %v14942_v34  ;;  %v14950_v50 = vld [vmem:[%s21062_s3 + $0x68] sm:$0xff]   ;;  %v14952_v33 = vld [vmem:[%s21062_s3 + $0x70] sm:$0xff]   ;;  %s21355_s15 = sld [smem:[#allocation44_spill]] }
 0x813   : > { %v7218_v51 = vsel %vm6651_vm5, %v7214_v61, %v7177_v29  ;;  %v14949_v16 = vld [vmem:[%s21062_s3 + $0x20] sm:$0xff]   ;;  %v14953_v32 = vld [vmem:[%s21062_s3 + $0x30] sm:$0xff]  }
 0x814   : > { %v7190_v38 = vpop.permute.xlu1 %7189  ;;  %v14905_v10 = vpop.permute.xlu0 %14904 }
 0x815   : > { %v7222_v30 = vsel %vm6660_vm4, %v7218_v51, %v7190_v38  ;;  %vm21340_vm4 = vmmov %vm21335_vm1  ;;  %12711 = vmatpush3.bf16.msra.mxu1 %v14943_v40  ;;  %v14955_v51 = vld [vmem:[%s21062_s3 + $0x38] sm:$0xff]   ;;  %v19860_v40 = vunpack.i.h.bf16 %v14905_v10 }
 0x816   : > { %v12307_v9 = vcombine.low %v7221_v37, %v7222_v30  ;;  %12712 = vmatprep.subr.bf16.mxu1 %v14944_v22 }
 0x818   : > { %v7239_v59 = vpack.c.bf16 %v12307_v9, %v12305_v24  ;;  %v19834_v38 = vpop.permute.xlu1 %7442 }
 0x819   : > { %12713 = vmatpush3.bf16.msra.mxu1 %v14945_v18 }
 0x81a   : > { %7356 = vmatmul.mubr.bf16.vlgmr.msra.gmra.mrb[40].mxu0 %v7239_v59  ;;  %12714 = vmatprep.subr.bf16.mxu1 %v14946_v8 }
 0x81b   : > { %13150 = vmatpush3.bf16.msra.mxu0 %v14938_v7  ;;  %13153 = vmatprep.mubr.msk.bf16.mxu0 %vm15594_vm11, %v21170_v26 }
 0x81c   : > { %13151 = vmatprep.subr.bf16.mxu0 %v21170_v26  ;;  %v19836_v37 = vpop.permute.xlu1 %7419 }
 0x81d   : > { %12715 = vmatpush3.bf16.msra.mxu1 %v14947_v4 }
 0x81e   : > { %12716 = vmatprep.subr.bf16.mxu1 %v14948_v42 }
 0x81f   : > { %13152 = vmatpush3.bf16.msra.mxu0 %v14939_v0 }
 0x821   : > { %12717 = vmatpush3.bf16.msra.mxu1 %v14949_v16 }
 0x822   : > { %12718 = vmatprep.subr.bf16.mxu1 %v14950_v50 }
 0x825   : > { %12719 = vmatpush3.bf16.msra.mxu1 %v14951_v25 }
 0x826   : > { %12720 = vmatprep.subr.bf16.mxu1 %v14952_v33 }
 0x829   : > { %12721 = vmatpush3.bf16.msra.mxu1 %v14953_v32 }
 0x82a   : > { %12722 = vmatprep.subr.bf16.mxu1 %v14954_v58 }
 0x82d   : > { %12723 = vmatpush3.bf16.msra.mxu1 %v14955_v51  ;;  %v14956_v51 = vld [vmem:[%s21354_s28 + $0x80] sm:$0xff]  }
 0x82e   : > { %13157 = vmatprep.subr.bf16.mxu1 %v21170_v26 }
 0x8ed   : > { %v7357_v49 = vpop.f32.mrb[40].mxu0 }
 0x8ee   : > { %v7358_v2 = vadd.f32 %v12309_v55, %v7357_v49  ;;  %v7359_v6 = vpop.f32.mrb[41].mxu0 }
 0x8ef   : > { %v7360_v39 = vpop.f32.mrb[42].mxu0 }
 0x8f0   : > { %v7364_v13 = vmax.f32 %v7358_v2, 0.0  ;;  %v7361_v1 = vadd.f32 %v12309_v55, %v7360_v39  ;;  %v7362_v36 = vpop.f32.mrb[43].mxu0 }
 0x8f2   : > { %v7368_v46 = vcombine.high %v7364_v13, %v7364_v13  ;;  %7370 = vst.msk [vmem:[%s19758_s5] sm:$0xff] %vm21340_vm4, %v7364_v13  ;;  %v7372_v5 = vrot.slane %v7364_v13, 7  ;;  %v7365_v12 = vmax.f32 %v7361_v1, 0.0  ;;  %vm21350_vm4 = vmmov %vm21335_vm1 }
 0x8f4   : > { %v7373_v44 = vrot.slane %v7368_v46, 7  ;;  %v7369_v57 = vcombine.high %v7365_v12, %v7365_v12  ;;  %7371 = vst.msk [vmem:[%s19758_s5 + $0x8] sm:$0xff] %vm21341_vm9, %v7365_v12  ;;  %v7374_v28 = vrot.slane %v7365_v12, 7  ;;  %v7380_v62 = vsel %vm1517_vm0, 0.0, %v7372_v5  ;;  %vm21351_vm9 = vmmov %vm21335_vm1 }
 0x8f5   : > { %v19766_v45 = vsel %vm21342_vm6, %v7380_v62, 0.0  ;;  %v19840_v12 = vunpack.i.l.bf16 %v14905_v10  ;;  %vm21352_vm6 = vmmov %vm21335_vm1  ;;  %v14957_v10 = vld [vmem:[%s21354_s28 + $0x88] sm:$0xff]  }
 0x8f6   : > { %v7375_v31 = vrot.slane %v7369_v57, 7  ;;  %7392 = vrot.lane.b32.xlu0 %v19766_v45, %s20984_s2  ;;  %v7381_v15 = vsel %vm1517_vm0, 0.0, %v7373_v44  ;;  %v7382_v17 = vsel %vm1517_vm0, 0.0, %v7374_v28  ;;  %v7448_v41 = vrot.slane %v19766_v45, 2 }
 0x8f7   : > { %v19775_v53 = vsel %vm21343_vm7, %v7381_v15, 0.0  ;;  %v19778_v20 = vsel %vm21344_vm10, %v7382_v17, 0.0  ;;  %v7416_v35 = vrot.slane %v19766_v45, 1  ;;  %vm21353_vm7 = vmmov %vm21335_vm1 }
 0x8f8   : > { %v7383_v43 = vsel %vm1517_vm0, 0.0, %v7375_v31  ;;  %7394 = vrot.lane.b32.xlu1 %v19775_v53, %s20984_s2  ;;  %v7449_v27 = vrot.slane %v19775_v53, 2  ;;  %v7450_v29 = vrot.slane %v19778_v20, 2  ;;  %v7417_v14 = vrot.slane %v19775_v53, 1 }
 0x8f9   : > { %v19786_v11 = vsel %vm21345_vm13, %v7383_v43, 0.0  ;;  %v7418_v56 = vrot.slane %v19778_v20, 1  ;;  %vm21356_vm13 = vmmov %vm21344_vm10 }
 0x8fa   : > { %v7463_v47 = vrot.slane %v19786_v11, 2  ;;  %7396 = vrot.lane.b32.xlu0 %v19778_v20, %s20984_s2  ;;  %v7514_v60 = vcombine.low %v7449_v27, %v7450_v29  ;;  %v7431_v61 = vrot.slane %v19786_v11, 1 }
 0x8fc   : > { %7453 = vrot.lane.b32.xlu1 %v7448_v41, %s20982_s26  ;;  %v7517_v21 = vcombine.low %v7463_v47, %v21176_v48  ;;  %v7491_v3 = vsel %vm21350_vm4, %v7431_v61, %v19834_v38  ;;  %vm21361_vm4 = vmmov %vm21347_vm2 }
 0x8fe   : > { %7404 = vrot.lane.b32.xlu0 %v19775_v53, %s20982_s26  ;;  %v7526_v23 = vpack.c.bf16 %v7517_v21, %v7514_v60 }
 0x900   : > { %7406 = vrot.lane.b32.xlu1 %v19778_v20, %s20982_s26  ;;  %13154 = vmatmul.mubr.msk.bf16.vlgmr.msra.gmra.mrb[44].mxu0 %vm21346_vm14, %v7526_v23  ;;  %vm21357_vm14 = vmmov %vm21344_vm10 }
 0x902   : > { %7421 = vrot.lane.b32.xlu0 %v7416_v35, %s20980_s10 }
 0x904   : > { %7464 = vrot.lane.b32.xlu1 %v7448_v41, %s20980_s10 }
 0x906   : > { %7436 = vrot.lane.b32.xlu0 %v7417_v14, %s20984_s2 }
 0x908   : > { %7438 = vrot.lane.b32.xlu1 %v7418_v56, %s20984_s2 }
 0x90a   : > { %7455 = vrot.lane.b32.xlu0 %v7449_v27, %s20982_s26 }
 0x90c   : > { %7398 = vrot.lane.b32.xlu1 %v19786_v11, %s20984_s2 }
 0x90e   : > { %7408 = vrot.lane.b32.xlu0 %v19786_v11, %s20982_s26 }
 0x910   : > { %7457 = vrot.lane.b32.xlu1 %v7450_v29, %s20982_s26 }
 0x912   : > { %7466 = vrot.lane.b32.xlu0 %v7449_v27, %s20980_s10 }
 0x914   : > { %7468 = vrot.lane.b32.xlu1 %v7450_v29, %s20980_s10 }
 0x916   : > { %7440 = vrot.lane.b32.xlu0 %v7431_v61, %s20984_s2 }
 0x918   : > { %7423 = vrot.lane.b32.xlu1 %v7417_v14, %s20980_s10 }
 0x91a   : > { %7470 = vrot.lane.b32.xlu0 %v7463_v47, %s20980_s10 }
 0x91e   : > { %7425 = vrot.lane.b32.xlu0 %v7418_v56, %s20980_s10 }
 0x968   : > { %v7393_v30 = vpop.permute.xlu0 %7392 }
 0x969   : > { %v7476_v43 = vsel %vm21351_vm9, 0.0, %v7393_v30  ;;  %vm21362_vm9 = vmmov %vm21347_vm2 }
 0x96a   : > { %v7395_v24 = vpop.permute.xlu1 %7394 }
 0x96b   : > { %v7477_v17 = vsel %vm21349_vm3, %v19766_v45, %v7395_v24  ;;  %v12324_v24 = vld [vmem:[%s21355_s15] ss:$0 sm:$0xff]  ;;  %vm21360_vm3 = vmmov %vm21347_vm2  ;;  %s21367_s15 = sld [smem:[#allocation32_spill]] }
 0x96c   : > { %v7397_v9 = vpop.permute.xlu0 %7396 }
 0x96d   : > { %v7478_v23 = vsel %vm21353_vm7, %v19775_v53, %v7397_v9  ;;  %vm21364_vm7 = vmmov %vm21347_vm2 }
 0x96e   : > { %v7454_v59 = vpop.permute.xlu1 %7453 }
 0x970   : > { %v7405_v52 = vpop.permute.xlu0 %7404 }
 0x971   : > { %v7480_v60 = vsel %vm4513_vm8, %v7476_v43, %v7405_v52  ;;  %s21368_s1 = smov %s21367_s15 }
 0x972   : > { %v7407_v7 = vpop.permute.xlu1 %7406 }
 0x973   : > { %v7481_v27 = vsel %vm4513_vm8, %v7477_v17, %v7407_v7 }
 0x974   : > { %v7422_v0 = vpop.permute.xlu0 %7421 }
 0x976   : > { %v7465_v55 = vpop.permute.xlu1 %7464 }
 0x978   : > { %v7437_v49 = vpop.permute.xlu0 %7436 }
 0x979   : > { %v7488_v46 = vsel %vm21335_vm1, %v7416_v35, %v7437_v49  ;;  %v7485_v35 = vsel %vm6651_vm5, %v7481_v27, %v7422_v0  ;;  %v14960_v27 = vld [vmem:[%s21354_s28 + $0x48] sm:$0xff]   ;;  %vm21358_vm1 = vmmov %vm21344_vm10 }
 0x97a   : > { %v7439_v2 = vpop.permute.xlu1 %7438  ;;  %v7492_v62 = vsel %vm4513_vm8, %v7488_v46, %v19840_v12  ;;  %v14958_v46 = vld [vmem:[%s21354_s28 + $0x40] sm:$0xff]  }
 0x97b   : > { %v7489_v5 = vsel %vm21347_vm2, %v7417_v14, %v7439_v2  ;;  %v7496_v41 = vsel %vm6651_vm5, %v7492_v62, %v7465_v55  ;;  %12733 = vmatprep.subr.bf16.mxu0 %v14958_v46 }
 0x97c   : > { %v7456_v6 = vpop.permute.xlu0 %7455  ;;  %v7493_v31 = vsel %vm4513_vm8, %v7489_v5, %v7454_v59 }
 0x97e   : > { %v7399_v39 = vpop.permute.xlu1 %7398 }
 0x97f   : > { %v7479_v47 = vsel %vm21352_vm6, %v19778_v20, %v7399_v39  ;;  %vm21363_vm6 = vmmov %vm21347_vm2 }
 0x980   : > { %v7409_v13 = vpop.permute.xlu0 %7408  ;;  %v7483_v4 = vsel %vm4513_vm8, %v7479_v47, %v19860_v40 }
 0x981   : > { %v7482_v20 = vsel %vm4513_vm8, %v7478_v23, %v7409_v13 }
 0x982   : > { %v7458_v1 = vpop.permute.xlu1 %7457 }
 0x983   : > { %v7495_v29 = vsel %vm4513_vm8, %v7491_v3, %v7458_v1 }
 0x984   : > { %v7467_v36 = vpop.permute.xlu0 %7466 }
 0x985   : > { %v7497_v63 = vsel %vm6651_vm5, %v7493_v31, %v7467_v36  ;;  %v14959_v31 = vld [vmem:[%s21354_s28] sm:$0xff]  }
 0x986   : > { %v7469_v44 = vpop.permute.xlu1 %7468  ;;  %v12321_v21 = vcombine.low %v7496_v41, %v7497_v63  ;;  %12734 = vmatpush3.bf16.msra.mxu0 %v14959_v31 }
 0x987   : > { %12735 = vmatprep.subr.bf16.mxu0 %v14960_v27 }
 0x988   : > { %v7441_v57 = vpop.permute.xlu0 %7440 }
 0x989   : > { %v7490_v28 = vsel %vm21348_vm15, %v7418_v56, %v7441_v57  ;;  %v7484_v56 = vsel %vm6651_vm5, %v7480_v60, %v19836_v37  ;;  %v14962_v60 = vld [vmem:[%s21354_s28 + $0x50] sm:$0xff]   ;;  %vm21359_vm15 = vmmov %vm21347_vm2 }
 0x98a   : > { %v7494_v15 = vsel %vm4513_vm8, %v7490_v28, %v7456_v6  ;;  %v7424_v22 = vpop.permute.xlu1 %7423  ;;  %v12320_v50 = vcombine.low %v7484_v56, %v7485_v35  ;;  %v14967_v56 = vld [vmem:[%s21354_s28 + $0x20] sm:$0xff]  }
 0x98b   : > { %v7498_v34 = vsel %vm6651_vm5, %v7494_v15, %v7469_v44  ;;  %v7486_v42 = vsel %vm6651_vm5, %v7482_v20, %v7424_v22  ;;  %v14963_v20 = vld [vmem:[%s21354_s28 + $0x10] sm:$0xff]  }
 0x98c   : > { %v7471_v11 = vpop.permute.xlu0 %7470 }
 0x98d   : > { %v7499_v45 = vsel %vm6651_vm5, %v7495_v29, %v7471_v11 }
 0x98e   : > { %v12323_v18 = vcombine.low %v7498_v34, %v7499_v45  ;;  %v14961_v34 = vld [vmem:[%s21354_s28 + $0x8] sm:$0xff]  }
 0x98f   : > { %12736 = vmatpush3.bf16.msra.mxu0 %v14961_v34 }
 0x990   : > { %v7426_v8 = vpop.permute.xlu0 %7425  ;;  %v7525_v14 = vpack.c.bf16 %v12323_v18, %v12321_v21  ;;  %12737 = vmatprep.subr.bf16.mxu0 %v14962_v60 }
 0x991   : > { %v7487_v16 = vsel %vm6651_vm5, %v7483_v4, %v7426_v8  ;;  %v14964_v8 = vld [vmem:[%s21354_s28 + $0x58] sm:$0xff]  }
 0x992   : > { %v12322_v53 = vcombine.low %v7486_v42, %v7487_v16  ;;  %7713 = vmatprep.mubr.bf16.mxu1 %v7525_v14  ;;  %v14965_v4 = vld [vmem:[%s21354_s28 + $0x18] sm:$0xff]   ;;  %v14966_v14 = vld [vmem:[%s21354_s28 + $0x60] sm:$0xff]   ;;  %v14968_v42 = vld [vmem:[%s21354_s28 + $0x68] sm:$0xff]  }
 0x993   : > { %12738 = vmatpush3.bf16.msra.mxu0 %v14963_v20 }
 0x994   : > { %v7524_v25 = vpack.c.bf16 %v12322_v53, %v12320_v50  ;;  %12739 = vmatprep.subr.bf16.mxu0 %v14964_v8  ;;  %v14969_v50 = vld [vmem:[%s21354_s28 + $0x28] sm:$0xff]  }
 0x996   : > { %7714 = vmatmul.mubr.bf16.vlgmr.msra.gmra.mrb[48].mxu1 %v7524_v25  ;;  %v14970_v25 = vld [vmem:[%s21354_s28 + $0x70] sm:$0xff]  }
 0x997   : > { %13161 = vmatprep.mubr.msk.bf16.mxu1 %vm15594_vm11, %v21170_v26  ;;  %13158 = vmatpush3.bf16.msra.mxu1 %v14956_v51 }
 0x998   : > { %13159 = vmatprep.subr.bf16.mxu1 %v21170_v26  ;;  %12740 = vmatpush3.bf16.msra.mxu0 %v14965_v4 }
 0x999   : > { %12741 = vmatprep.subr.bf16.mxu0 %v14966_v14 }
 0x99b   : > { %13160 = vmatpush3.bf16.msra.mxu1 %v14957_v10 }
 0x99c   : > { %12742 = vmatpush3.bf16.msra.mxu0 %v14967_v56 }
 0x99d   : > { %12743 = vmatprep.subr.bf16.mxu0 %v14968_v42 }
 0x9a0   : > { %12744 = vmatpush3.bf16.msra.mxu0 %v14969_v50 }
 0x9a1   : > { %12745 = vmatprep.subr.bf16.mxu0 %v14970_v25 }
 0x9d3   : > { %v7756_v33 = vpop.f32.mrb[44].mxu0 }
 0x9d4   : > { %v13155_v32 = vpop.f32.mrb[45].mxu0 }
 0x9d5   : > { %v7759_v61 = vpop.f32.mrb[46].mxu0 }
 0x9d6   : > { %v13156_v58 = vpop.f32.mrb[47].mxu0 }
 0x9d7   : > { %v14973_v58 = vld [vmem:[%s21354_s28 + $0x38] sm:$0xff]  }
 0xa69   : > { %v12724_v30 = vpop.f32.mrb[48].mxu1 }
 0xa6a   : > { %v12725_v9 = vpop.f32.mrb[49].mxu1 }
 0xa6b   : > { %v12726_v59 = vadd.f32 %v12725_v9, %v12724_v30  ;;  %v12727_v52 = vpop.f32.mrb[50].mxu1 }
 0xa6c   : > { %v12728_v7 = vpop.f32.mrb[51].mxu1 }
 0xa6d   : > { %v7716_v0 = vadd.f32 %v12726_v59, %v12324_v24  ;;  %v12729_v55 = vadd.f32 %v12728_v7, %v12727_v52 }
 0xa6f   : > { %v7757_v49 = vadd.f32 %v7756_v33, %v7716_v0  ;;  %v7719_v2 = vadd.f32 %v12729_v55, %v12324_v24  ;;  %v14971_v33 = vld [vmem:[%s21354_s28 + $0x30] sm:$0xff]  }
 0xa70   : > { %12746 = vmatpush3.bf16.msra.mxu0 %v14971_v33 }
 0xa71   : > { %v7763_v6 = vmax.f32 %v7757_v49, 0.0  ;;  %v7760_v39 = vadd.f32 %v7759_v61, %v7719_v2  ;;  %v14972_v61 = vld [vmem:[%s21354_s28 + $0x78] sm:$0xff]  }
 0xa72   : > { %12747 = vmatprep.subr.bf16.mxu0 %v14972_v61  ;;  %v14974_v61 = vld [vmem:[%s21367_s15 + $0x80] sm:$0xff]  }
 0xa73   : > { %v7767_v13 = vcombine.high %v7763_v6, %v7763_v6  ;;  %v7764_v1 = vmax.f32 %v7760_v39, 0.0  ;;  %v7769_v36 = vrot.slane %v7763_v6, 7 }
 0xa74   : > { %12748 = vmatpush3.bf16.msra.mxu0 %v14973_v58  ;;  %v14975_v58 = vld [vmem:[%s21368_s1 + $0x88] sm:$0xff]  }
 0xa75   : > { %v7770_v5 = vrot.slane %v7767_v13, 7  ;;  %v7768_v44 = vcombine.high %v7764_v1, %v7764_v1  ;;  %v7771_v57 = vrot.slane %v7764_v1, 7  ;;  %v7777_v28 = vsel %vm1517_vm0, 0.0, %v7769_v36  ;;  %13165 = vmatprep.subr.bf16.mxu0 %v21170_v26 }
 0xa76   : > { %v19882_v62 = vsel %vm21344_vm10, %v7777_v28, 0.0  ;;  %vm21365_vm10 = vmmov %vm21347_vm2 }
 0xa77   : > { %v7772_v15 = vrot.slane %v7768_v44, 7  ;;  %7789 = vrot.lane.b32.xlu0 %v19882_v62, %s20984_s2  ;;  %v7778_v17 = vsel %vm1517_vm0, 0.0, %v7770_v5  ;;  %v7779_v3 = vsel %vm1517_vm0, 0.0, %v7771_v57  ;;  %v7836_v21 = vrot.slane %v19882_v62, 2 }
 0xa78   : > { %v19890_v63 = vsel %vm21356_vm13, %v7778_v17, 0.0  ;;  %v19893_v43 = vsel %vm21357_vm14, %v7779_v3, 0.0  ;;  %v7810_v16 = vrot.slane %v19882_v62, 1  ;;  %vm21366_vm13 = vmmov %vm21347_vm2 }
 0xa79   : > { %v7780_v29 = vsel %vm1517_vm0, 0.0, %v7772_v15  ;;  %7791 = vrot.lane.b32.xlu1 %v19890_v63, %s20984_s2  ;;  %v7837_v11 = vrot.slane %v19890_v63, 2  ;;  %v7838_v47 = vrot.slane %v19893_v43, 2  ;;  %v7811_v35 = vrot.slane %v19890_v63, 1  ;;  %vm21371_vm14 = vmmov %vm21347_vm2 }
 0xa7a   : > { %v19902_v41 = vsel %vm21358_vm1, %v7780_v29, 0.0  ;;  %v7812_v53 = vrot.slane %v19893_v43, 1  ;;  %vm21372_vm1 = vmmov %vm21347_vm2 }
 0xa7b   : > { %v7848_v45 = vrot.slane %v19902_v41, 2  ;;  %7793 = vrot.lane.b32.xlu0 %v19893_v43, %s20984_s2  ;;  %v7899_v22 = vcombine.low %v7837_v11, %v7838_v47  ;;  %v7822_v32 = vrot.slane %v19902_v41, 1 }
 0xa7d   : > { %7801 = vrot.lane.b32.xlu1 %v19890_v63, %s20982_s26  ;;  %v7902_v18 = vcombine.low %v7848_v45, %v21176_v48  ;;  %v7876_v15 = vsel %vm21362_vm9, %v7822_v32, %v19834_v38  ;;  %vm21379_vm9 = vmmov %vm21372_vm1 }
 0xa7f   : > { %7839 = vrot.lane.b32.xlu0 %v7836_v21, %s20982_s26  ;;  %v7911_v23 = vpack.c.bf16 %v7902_v18, %v7899_v22 }
 0xa81   : > { %13162 = vmatmul.mubr.msk.bf16.vlgmr.msra.gmra.mrb[52].mxu1 %vm21347_vm2, %v7911_v23  ;;  %7827 = vrot.lane.b32.xlu1 %v7811_v35, %s20984_s2  ;;  %vm21373_vm2 = vcmask 1044480  }
 0xa83   : > { %7803 = vrot.lane.b32.xlu0 %v19893_v43, %s20982_s26 }
 0xa85   : > { %7795 = vrot.lane.b32.xlu1 %v19902_v41, %s20984_s2 }
 0xa87   : > { %7849 = vrot.lane.b32.xlu0 %v7836_v21, %s20980_s10 }
 0xa89   : > { %7841 = vrot.lane.b32.xlu1 %v7837_v11, %s20982_s26 }
 0xa8b   : > { %7813 = vrot.lane.b32.xlu0 %v7810_v16, %s20980_s10 }
 0xa8d   : > { %7805 = vrot.lane.b32.xlu1 %v19902_v41, %s20982_s26 }
 0xa8f   : > { %7829 = vrot.lane.b32.xlu0 %v7812_v53, %s20984_s2 }
 0xa91   : > { %7851 = vrot.lane.b32.xlu1 %v7837_v11, %s20980_s10 }
 0xa93   : > { %7843 = vrot.lane.b32.xlu0 %v7838_v47, %s20982_s26  ;;  %s21370_s26 = sld [smem:[#allocation58_spill]] }
 0xa95   : > { %7831 = vrot.lane.b32.xlu1 %v7822_v32, %s20984_s2  ;;  %s12655_s2 = sshll.u32 %s15878_s11, 4  ;;  %s21374_s11 = smov 32  }
 0xa97   : > { %7853 = vrot.lane.b32.xlu0 %v7838_v47, %s20980_s10 }
 0xa99   : > { %7855 = vrot.lane.b32.xlu1 %v7848_v45, %s20980_s10  ;;  %s1377_s15 = scalar_lea.vmem %s21370_s26, %s12655_s2  ;;  %s21378_s26 = smov 64  }
 0xa9a   : > { %s21380_s2 = smov 96  }
 0xa9b   : > { %7817 = vrot.lane.b32.xlu0 %v7812_v53, %s20980_s10 }
 0xa9d   : > { %7815 = vrot.lane.b32.xlu1 %v7811_v35, %s20980_s10  ;;  %s21369_s10 = sld [smem:[#allocation45_spill]] }
 0xae9   : > { %v7790_v51 = vpop.permute.xlu0 %7789 }
 0xaea   : > { %v7861_v17 = vsel %vm21363_vm6, 0.0, %v7790_v51  ;;  %vm21381_vm6 = vmmov %vm21372_vm1 }
 0xaeb   : > { %v7792_v10 = vpop.permute.xlu1 %7791 }
 0xaec   : > { %v7862_v3 = vsel %vm21364_vm7, %v19882_v62, %v7792_v10  ;;  %v12348_v10 = vld [vmem:[%s21369_s10] ss:$0 sm:$0xff]  ;;  %vm21382_vm7 = vmmov %vm21372_vm1  ;;  %s21388_s10 = sld [smem:[#allocation33_spill]] }
 0xaed   : > { %v7794_v30 = vpop.permute.xlu0 %7793 }
 0xaee   : > { %v7863_v23 = vsel %vm21366_vm13, %v19890_v63, %v7794_v30  ;;  %vm21384_vm13 = vmmov %vm21372_vm1 }
 0xaef   : > { %v7802_v24 = vpop.permute.xlu1 %7801 }
 0xaf0   : > { %v7865_v60 = vsel %vm4513_vm8, %v7861_v17, %v7802_v24 }
 0xaf1   : > { %v7840_v9 = vpop.permute.xlu0 %7839  ;;  %v7869_v14 = vsel %vm6651_vm5, %v7865_v60, %v19836_v37 }
 0xaf3   : > { %v7828_v59 = vpop.permute.xlu1 %7827 }
 0xaf4   : > { %v7873_v5 = vsel %vm21360_vm3, %v7810_v16, %v7828_v59  ;;  %vm21376_vm3 = vmmov %vm21373_vm2 }
 0xaf5   : > { %v7804_v52 = vpop.permute.xlu0 %7803  ;;  %v7877_v27 = vsel %vm4513_vm8, %v7873_v5, %v19840_v12 }
 0xaf6   : > { %v7866_v21 = vsel %vm4513_vm8, %v7862_v3, %v7804_v52 }
 0xaf7   : > { %v7796_v7 = vpop.permute.xlu1 %7795 }
 0xaf8   : > { %v7864_v47 = vsel %vm21365_vm10, %v19893_v43, %v7796_v7  ;;  %vm21383_vm10 = vmmov %vm21372_vm1 }
 0xaf9   : > { %v7850_v0 = vpop.permute.xlu0 %7849  ;;  %v7868_v20 = vsel %vm4513_vm8, %v7864_v47, %v19860_v40 }
 0xafa   : > { %v7881_v41 = vsel %vm6651_vm5, %v7877_v27, %v7850_v0 }
 0xafb   : > { %v7842_v55 = vpop.permute.xlu1 %7841 }
 0xafd   : > { %v7814_v49 = vpop.permute.xlu0 %7813 }
 0xaff   : > { %v7806_v2 = vpop.permute.xlu1 %7805 }
 0xb00   : > { %v7867_v43 = vsel %vm4513_vm8, %v7863_v23, %v7806_v2 }
 0xb01   : > { %v7830_v6 = vpop.permute.xlu0 %7829 }
 0xb02   : > { %v7874_v13 = vsel %vm21359_vm15, %v7811_v35, %v7830_v6  ;;  %v7870_v35 = vsel %vm6651_vm5, %v7866_v21, %v7814_v49  ;;  %vm21375_vm15 = vmmov %vm21373_vm2  ;;  %v14980_v21 = vld [vmem:[%s21368_s1 + $0x50] sm:$0xff]  }
 0xb03   : > { %v7852_v39 = vpop.permute.xlu1 %7851  ;;  %v7878_v36 = vsel %vm4513_vm8, %v7874_v13, %v7840_v9  ;;  %v12344_v16 = vcombine.low %v7869_v14, %v7870_v35  ;;  %v14985_v14 = vld [vmem:[%s21368_s1 + $0x20] sm:$0xff]  }
 0xb04   : > { %v7882_v31 = vsel %vm6651_vm5, %v7878_v36, %v7852_v39 }
 0xb05   : > { %v7844_v1 = vpop.permute.xlu0 %7843  ;;  %v12345_v62 = vcombine.low %v7881_v41, %v7882_v31 }
 0xb06   : > { %v7880_v29 = vsel %vm4513_vm8, %v7876_v15, %v7844_v1  ;;  %v14976_v1 = vld [vmem:[%s21368_s1 + $0x40] sm:$0xff]  }
 0xb07   : > { %v7832_v46 = vpop.permute.xlu1 %7831  ;;  %12758 = vmatprep.subr.bf16.mxu1 %v14976_v1 }
 0xb08   : > { %v7875_v44 = vsel %vm21361_vm4, %v7812_v53, %v7832_v46  ;;  %vm21377_vm4 = vmmov %vm21373_vm2 }
 0xb09   : > { %v7854_v57 = vpop.permute.xlu0 %7853  ;;  %v7879_v28 = vsel %vm4513_vm8, %v7875_v44, %v7842_v55 }
 0xb0a   : > { %v7883_v34 = vsel %vm6651_vm5, %v7879_v28, %v7854_v57  ;;  %v14977_v28 = vld [vmem:[%s21368_s1] sm:$0xff]  }
 0xb0b   : > { %v7856_v11 = vpop.permute.xlu1 %7855  ;;  %12759 = vmatpush3.bf16.msra.mxu1 %v14977_v28 }
 0xb0c   : > { %v7884_v45 = vsel %vm6651_vm5, %v7880_v29, %v7856_v11  ;;  %v14978_v29 = vld [vmem:[%s21368_s1 + $0x48] sm:$0xff]  }
 0xb0d   : > { %v12347_v22 = vcombine.low %v7883_v34, %v7884_v45  ;;  %v7818_v18 = vpop.permute.xlu0 %7817  ;;  %12760 = vmatprep.subr.bf16.mxu1 %v14978_v29  ;;  %v14979_v45 = vld [vmem:[%s21368_s1 + $0x8] sm:$0xff]  }
 0xb0e   : > { %v7872_v56 = vsel %vm6651_vm5, %v7868_v20, %v7818_v18  ;;  %v14982_v20 = vld [vmem:[%s21368_s1 + $0x58] sm:$0xff]  }
 0xb0f   : > { %v7816_v8 = vpop.permute.xlu1 %7815  ;;  %v7910_v4 = vpack.c.bf16 %v12347_v22, %v12345_v62  ;;  %12761 = vmatpush3.bf16.msra.mxu1 %v14979_v45 }
 0xb10   : > { %v7871_v42 = vsel %vm6651_vm5, %v7867_v43, %v7816_v8  ;;  %12762 = vmatprep.subr.bf16.mxu1 %v14980_v21  ;;  %v14981_v43 = vld [vmem:[%s21368_s1 + $0x10] sm:$0xff]   ;;  %v14983_v8 = vld [vmem:[%s21368_s1 + $0x18] sm:$0xff]  }
 0xb11   : > { %v12346_v63 = vcombine.low %v7871_v42, %v7872_v56  ;;  %8098 = vmatprep.mubr.bf16.mxu0 %v7910_v4  ;;  %v14984_v4 = vld [vmem:[%s21368_s1 + $0x60] sm:$0xff]   ;;  %v14986_v56 = vld [vmem:[%s21368_s1 + $0x68] sm:$0xff]  }
 0xb13   : > { %v7909_v50 = vpack.c.bf16 %v12346_v63, %v12344_v16  ;;  %12763 = vmatpush3.bf16.msra.mxu1 %v14981_v43  ;;  %v14987_v16 = vld [vmem:[%s21368_s1 + $0x28] sm:$0xff]  }
 0xb14   : > { %12764 = vmatprep.subr.bf16.mxu1 %v14982_v20 }
 0xb15   : > { %8099 = vmatmul.mubr.bf16.vlgmr.msra.gmra.mrb[48].mxu0 %v7909_v50  ;;  %v14988_v50 = vld [vmem:[%s21368_s1 + $0x70] sm:$0xff]  }
 0xb16   : > { %13169 = vmatprep.mubr.msk.bf16.mxu0 %vm15594_vm11, %v21170_v26  ;;  %13166 = vmatpush3.bf16.msra.mxu0 %v14974_v61 }
 0xb17   : > { %13167 = vmatprep.subr.bf16.mxu0 %v21170_v26  ;;  %12765 = vmatpush3.bf16.msra.mxu1 %v14983_v8 }
 0xb18   : > { %12766 = vmatprep.subr.bf16.mxu1 %v14984_v4 }
 0xb1a   : > { %13168 = vmatpush3.bf16.msra.mxu0 %v14975_v58 }
 0xb1b   : > { %12767 = vmatpush3.bf16.msra.mxu1 %v14985_v14 }
 0xb1c   : > { %12768 = vmatprep.subr.bf16.mxu1 %v14986_v56 }
 0xb1f   : > { %12769 = vmatpush3.bf16.msra.mxu1 %v14987_v16 }
 0xb20   : > { %12770 = vmatprep.subr.bf16.mxu1 %v14988_v50 }
 0xb54   : > { %v8141_v53 = vpop.f32.mrb[52].mxu1 }
 0xb55   : > { %v13163_v25 = vpop.f32.mrb[53].mxu1 }
 0xb56   : > { %v8144_v33 = vpop.f32.mrb[54].mxu1 }
 0xb57   : > { %v13164_v32 = vpop.f32.mrb[55].mxu1 }
 0xb58   : > { %v14991_v32 = vld [vmem:[%s21368_s1 + $0x38] sm:$0xff]  }
 0xbe8   : > { %v12749_v51 = vpop.f32.mrb[48].mxu0 }
 0xbe9   : > { %v12750_v30 = vpop.f32.mrb[49].mxu0 }
 0xbea   : > { %v12751_v24 = vadd.f32 %v12750_v30, %v12749_v51  ;;  %v12752_v9 = vpop.f32.mrb[50].mxu0 }
 0xbeb   : > { %v12753_v59 = vpop.f32.mrb[51].mxu0 }
 0xbec   : > { %v8101_v52 = vadd.f32 %v12751_v24, %v12348_v10  ;;  %v12754_v7 = vadd.f32 %v12753_v59, %v12752_v9 }
 0xbee   : > { %v8142_v0 = vadd.f32 %v8141_v53, %v8101_v52  ;;  %v8104_v55 = vadd.f32 %v12754_v7, %v12348_v10  ;;  %v14989_v53 = vld [vmem:[%s21368_s1 + $0x30] sm:$0xff]  }
 0xbef   : > { %12771 = vmatpush3.bf16.msra.mxu1 %v14989_v53 }
 0xbf0   : > { %v8148_v49 = vmax.f32 %v8142_v0, 0.0  ;;  %v8145_v2 = vadd.f32 %v8144_v33, %v8104_v55  ;;  %v14990_v33 = vld [vmem:[%s21368_s1 + $0x78] sm:$0xff]   ;;  %s21390_s1 = sshll.u32 %s19259_s13, 4 }
 0xbf1   : > { %12772 = vmatprep.subr.bf16.mxu1 %v14990_v33  ;;  %v14992_v33 = vld [vmem:[%s21388_s10 + $0x80] sm:$0xff]   ;;  %s20101_s3 = scalar_lea.vmem [#allocation7], %s21390_s1  ;;  %s21397_s1 = sld [smem:[#allocation34_spill]] }
 0xbf2   : > { %8154 = vst.msk [vmem:[%s1377_s15] sm:$0xff] %vm21371_vm14, %v8148_v49  ;;  %v8149_v6 = vmax.f32 %v8145_v2, 0.0  ;;  %v8156_v39 = vrot.slane %v8148_v49, 7  ;;  %v8152_v13 = vcombine.high %v8148_v49, %v8148_v49  ;;  %vm21385_vm14 = vmmov %vm21372_vm1 }
 0xbf3   : > { %12773 = vmatpush3.bf16.msra.mxu1 %v14991_v32  ;;  %v14993_v32 = vld [vmem:[%s21388_s10 + $0x88] sm:$0xff]  }
 0xbf4   : > { %v8153_v36 = vcombine.high %v8149_v6, %v8149_v6  ;;  %8155 = vst.msk [vmem:[%s1377_s15 + $0x8] sm:$0xff] %vm21372_vm1, %v8149_v6  ;;  %v8164_v46 = vsel %vm1517_vm0, 0.0, %v8156_v39  ;;  %v8157_v5 = vrot.slane %v8152_v13, 7  ;;  %v8158_v44 = vrot.slane %v8149_v6, 7  ;;  %13173 = vmatprep.subr.bf16.mxu1 %v21170_v26  ;;  %s21389_s15 = sld [smem:[#allocation46_spill]] }
 0xbf5   : > { %v19993_v57 = vsel %vm21373_vm2, %v8164_v46, 0.0  ;;  %vm21386_vm2 = vmmov %vm21372_vm1 }
 0xbf6   : > { %v8159_v31 = vrot.slane %v8153_v36, 7  ;;  %8176 = vrot.lane.b32.xlu0 %v19993_v57, %s21374_s11  ;;  %v8165_v15 = vsel %vm1517_vm0, 0.0, %v8157_v5  ;;  %v8166_v17 = vsel %vm1517_vm0, 0.0, %v8158_v44  ;;  %v8223_v62 = vrot.slane %v19993_v57, 2 }
 0xbf7   : > { %v20001_v3 = vsel %vm21375_vm15, %v8165_v15, 0.0  ;;  %v20004_v27 = vsel %vm21376_vm3, %v8166_v17, 0.0  ;;  %v8197_v42 = vrot.slane %v19993_v57, 1  ;;  %vm21387_vm15 = vmmov %vm21372_vm1  ;;  %vm8545_vm3 = vcmask 257024  }
 0xbf8   : > { %v8167_v11 = vsel %vm1517_vm0, 0.0, %v8159_v31  ;;  %8178 = vrot.lane.b32.xlu1 %v20001_v3, %s21374_s11  ;;  %v8224_v47 = vrot.slane %v20001_v3, 2  ;;  %v8225_v41 = vrot.slane %v20004_v27, 2  ;;  %v8198_v35 = vrot.slane %v20001_v3, 1 }
 0xbf9   : > { %v20013_v34 = vsel %vm21377_vm4, %v8167_v11, 0.0  ;;  %v8199_v63 = vrot.slane %v20004_v27, 1  ;;  %vm21391_vm4 = vmmov %vm21372_vm1 }
 0xbfa   : > { %8180 = vrot.lane.b32.xlu0 %v20004_v27, %s21374_s11  ;;  %v8235_v60 = vrot.slane %v20013_v34, 2  ;;  %v8286_v22 = vcombine.low %v8224_v47, %v8225_v41  ;;  %v8209_v25 = vrot.slane %v20013_v34, 1 }
 0xbfc   : > { %8188 = vrot.lane.b32.xlu1 %v20001_v3, %s21378_s26  ;;  %v8289_v18 = vcombine.low %v8235_v60, %v21176_v48  ;;  %v8263_v31 = vsel %vm21384_vm13, %v8209_v25, %v19834_v38  ;;  %vm21395_vm13 = vmmov %vm21372_vm1 }
 0xbfe   : > { %8226 = vrot.lane.b32.xlu0 %v8223_v62, %s21378_s26  ;;  %v8298_v23 = vpack.c.bf16 %v8289_v18, %v8286_v22 }
 0xc00   : > { %13170 = vmatmul.mubr.msk.bf16.vlgmr.msra.gmra.mrb[52].mxu0 %vm21379_vm9, %v8298_v23  ;;  %8214 = vrot.lane.b32.xlu1 %v8198_v35, %s21374_s11  ;;  %vm21392_vm9 = vmmov %vm21372_vm1 }
 0xc02   : > { %8190 = vrot.lane.b32.xlu0 %v20004_v27, %s21378_s26 }
 0xc04   : > { %8182 = vrot.lane.b32.xlu1 %v20013_v34, %s21374_s11 }
 0xc06   : > { %8236 = vrot.lane.b32.xlu0 %v8223_v62, %s21380_s2 }
 0xc08   : > { %8228 = vrot.lane.b32.xlu1 %v8224_v47, %s21378_s26 }
 0xc0a   : > { %8200 = vrot.lane.b32.xlu0 %v8197_v42, %s21380_s2 }
 0xc0c   : > { %8192 = vrot.lane.b32.xlu1 %v20013_v34, %s21378_s26 }
 0xc0e   : > { %8216 = vrot.lane.b32.xlu0 %v8199_v63, %s21374_s11 }
 0xc10   : > { %8238 = vrot.lane.b32.xlu1 %v8224_v47, %s21380_s2 }
 0xc12   : > { %8230 = vrot.lane.b32.xlu0 %v8225_v41, %s21378_s26 }
 0xc14   : > { %8218 = vrot.lane.b32.xlu1 %v8209_v25, %s21374_s11 }
 0xc16   : > { %8240 = vrot.lane.b32.xlu0 %v8225_v41, %s21380_s2 }
 0xc18   : > { %8242 = vrot.lane.b32.xlu1 %v8235_v60, %s21380_s2 }
 0xc1a   : > { %8204 = vrot.lane.b32.xlu0 %v8199_v63, %s21380_s2 }
 0xc1c   : > { %8202 = vrot.lane.b32.xlu1 %v8198_v35, %s21380_s2 }
 0xc68   : > { %v8177_v61 = vpop.permute.xlu0 %8176 }
 0xc69   : > { %v8248_v15 = vsel %vm21385_vm14, 0.0, %v8177_v61  ;;  %v14994_v61 = vld [vmem:[%s21388_s10 + $0x40] sm:$0xff]   ;;  %vm21396_vm14 = vmmov %vm21372_vm1 }
 0xc6a   : > { %v8179_v58 = vpop.permute.xlu1 %8178  ;;  %12783 = vmatprep.subr.bf16.mxu0 %v14994_v61 }
 0xc6b   : > { %v8249_v17 = vsel %vm21372_vm1, %v19993_v57, %v8179_v58  ;;  %v14995_v58 = vld [vmem:[%s21388_s10] sm:$0xff]  }
 0xc6c   : > { %v8181_v51 = vpop.permute.xlu0 %8180  ;;  %12784 = vmatpush3.bf16.msra.mxu0 %v14995_v58  ;;  %v15000_v58 = vld [vmem:[%s21388_s10 + $0x58] sm:$0xff]  }
 0xc6d   : > { %v8250_v23 = vsel %vm21387_vm15, %v20001_v3, %v8181_v51 }
 0xc6e   : > { %v8189_v10 = vpop.permute.xlu1 %8188 }
 0xc6f   : > { %v8252_v21 = vsel %vm4513_vm8, %v8248_v15, %v8189_v10  ;;  %v12372_v10 = vld [vmem:[%s21389_s15] ss:$0 sm:$0xff] }
 0xc70   : > { %v8227_v30 = vpop.permute.xlu0 %8226  ;;  %v8256_v4 = vsel %vm6651_vm5, %v8252_v21, %v19836_v37 }
 0xc72   : > { %v8215_v24 = vpop.permute.xlu1 %8214 }
 0xc73   : > { %v8260_v36 = vsel %vm21382_vm7, %v8197_v42, %v8215_v24  ;;  %vm8613_vm7 = vcmask 1042432  }
 0xc74   : > { %v8191_v9 = vpop.permute.xlu0 %8190  ;;  %v8264_v29 = vsel %vm4513_vm8, %v8260_v36, %v19840_v12 }
 0xc75   : > { %v8253_v62 = vsel %vm4513_vm8, %v8249_v17, %v8191_v9 }
 0xc76   : > { %v8183_v59 = vpop.permute.xlu1 %8182 }
 0xc77   : > { %v8251_v41 = vsel %vm21386_vm2, %v20004_v27, %v8183_v59  ;;  %vm12570_vm2 = vmneg %vm4513_vm8 }
 0xc78   : > { %v8237_v52 = vpop.permute.xlu0 %8236  ;;  %v8255_v43 = vsel %vm4513_vm8, %v8251_v41, %v19860_v40  ;;  %vm20432_vm15 = vmpackc.low %vm12570_vm2, %vm12570_vm2 }
 0xc79   : > { %v8268_v34 = vsel %vm6651_vm5, %v8264_v29, %v8237_v52 }
 0xc7a   : > { %v8229_v7 = vpop.permute.xlu1 %8228 }
 0xc7c   : > { %v8201_v0 = vpop.permute.xlu0 %8200 }
 0xc7e   : > { %v8193_v55 = vpop.permute.xlu1 %8192 }
 0xc7f   : > { %v8254_v27 = vsel %vm4513_vm8, %v8250_v23, %v8193_v55 }
 0xc80   : > { %v8217_v49 = vpop.permute.xlu0 %8216 }
 0xc81   : > { %v8261_v6 = vsel %vm21381_vm6, %v8198_v35, %v8217_v49  ;;  %v8257_v35 = vsel %vm6651_vm5, %v8253_v62, %v8201_v0  ;;  %vm8574_vm6 = vcmask 254976  }
 0xc82   : > { %v8239_v2 = vpop.permute.xlu1 %8238  ;;  %v8265_v13 = vsel %vm4513_vm8, %v8261_v6, %v8227_v30  ;;  %v12368_v3 = vcombine.low %v8256_v4, %v8257_v35  ;;  %v14996_v35 = vld [vmem:[%s21388_s10 + $0x48] sm:$0xff]  }
 0xc83   : > { %v8269_v28 = vsel %vm6651_vm5, %v8265_v13, %v8239_v2  ;;  %12785 = vmatprep.subr.bf16.mxu0 %v14996_v35 }
 0xc84   : > { %v8231_v39 = vpop.permute.xlu0 %8230  ;;  %v12369_v57 = vcombine.low %v8268_v34, %v8269_v28 }
 0xc85   : > { %v8267_v11 = vsel %vm4513_vm8, %v8263_v31, %v8231_v39 }
 0xc86   : > { %v8219_v1 = vpop.permute.xlu1 %8218 }
 0xc87   : > { %v8262_v46 = vsel %vm21383_vm10, %v8199_v63, %v8219_v1  ;;  %vm21394_vm10 = vmmov %vm21372_vm1 }
 0xc88   : > { %v8241_v5 = vpop.permute.xlu0 %8240  ;;  %v8266_v44 = vsel %vm4513_vm8, %v8262_v46, %v8229_v7 }
 0xc89   : > { %v8270_v45 = vsel %vm6651_vm5, %v8266_v44, %v8241_v5 }
 0xc8a   : > { %v8243_v47 = vpop.permute.xlu1 %8242 }
 0xc8b   : > { %v8271_v60 = vsel %vm6651_vm5, %v8267_v11, %v8243_v47 }
 0xc8c   : > { %v12371_v22 = vcombine.low %v8270_v45, %v8271_v60  ;;  %v8205_v18 = vpop.permute.xlu0 %8204 }
 0xc8d   : > { %v8259_v14 = vsel %vm6651_vm5, %v8255_v43, %v8205_v18 }
 0xc8e   : > { %v8203_v20 = vpop.permute.xlu1 %8202  ;;  %v8297_v8 = vpack.c.bf16 %v12371_v22, %v12369_v57 }
 0xc8f   : > { %v8258_v56 = vsel %vm6651_vm5, %v8254_v27, %v8203_v20  ;;  %v14997_v27 = vld [vmem:[%s21388_s10 + $0x8] sm:$0xff]  }
 0xc90   : > { %v12370_v42 = vcombine.low %v8258_v56, %v8259_v14  ;;  %8485 = vmatprep.mubr.bf16.mxu1 %v8297_v8  ;;  %12786 = vmatpush3.bf16.msra.mxu0 %v14997_v27 }
 0xc92   : > { %v8296_v16 = vpack.c.bf16 %v12370_v42, %v12368_v3 }
 0xc94   : > { %8486 = vmatmul.mubr.bf16.vlgmr.msra.gmra.mrb[56].mxu1 %v8296_v16  ;;  %v14998_v16 = vld [vmem:[%s21388_s10 + $0x50] sm:$0xff]  }
 0xc95   : > { %13177 = vmatprep.mubr.msk.bf16.mxu1 %vm15594_vm11, %v21170_v26  ;;  %13174 = vmatpush3.bf16.msra.mxu1 %v14992_v33 }
 0xc96   : > { %13175 = vmatprep.subr.bf16.mxu1 %v21170_v26  ;;  %12787 = vmatprep.subr.bf16.mxu0 %v14998_v16 }
 0xc99   : > { %13176 = vmatpush3.bf16.msra.mxu1 %v14993_v32 }
 0xcd3   : > { %v8528_v63 = vpop.f32.mrb[52].mxu0 }
 0xcd4   : > { %v13171_v50 = vpop.f32.mrb[53].mxu0 }
 0xcd5   : > { %v8531_v53 = vpop.f32.mrb[54].mxu0 }
 0xcd6   : > { %v13172_v25 = vpop.f32.mrb[55].mxu0 }
 0xd67   : > { %v12774_v51 = vpop.f32.mrb[56].mxu1 }
 0xd68   : > { %v12775_v30 = vpop.f32.mrb[57].mxu1 }
 0xd69   : > { %v12776_v24 = vadd.f32 %v12775_v30, %v12774_v51  ;;  %v12777_v9 = vpop.f32.mrb[58].mxu1  ;;  %v15001_v51 = vld [vmem:[%s21388_s10 + $0x18] sm:$0xff]  }
 0xd6a   : > { %v12778_v59 = vpop.f32.mrb[59].mxu1 }
 0xd6b   : > { %v8488_v52 = vadd.f32 %v12776_v24, %v12372_v10  ;;  %v12779_v7 = vadd.f32 %v12778_v59, %v12777_v9 }
 0xd6d   : > { %v8529_v0 = vadd.f32 %v8528_v63, %v8488_v52  ;;  %v8491_v55 = vadd.f32 %v12779_v7, %v12372_v10  ;;  %v14999_v63 = vld [vmem:[%s21388_s10 + $0x10] sm:$0xff]  }
 0xd6e   : > { %12788 = vmatpush3.bf16.msra.mxu0 %v14999_v63 }
 0xd6f   : > { %v8535_v49 = vmax.f32 %v8529_v0, 0.0  ;;  %v8532_v2 = vadd.f32 %v8531_v53, %v8491_v55  ;;  %12789 = vmatprep.subr.bf16.mxu0 %v15000_v58  ;;  %v20124_v55 = vrot.slane %v21176_v48, %v18656_v19  ;;  %v15010_v58 = vld [vmem:[%s21397_s1 + $0x40] sm:$0xff]  }
 0xd70   : > { %12808 = vmatprep.subr.bf16.mxu1 %v15010_v58 }
 0xd71   : > { %8537 = vst.msk [vmem:[%s20101_s3] sm:$0xff] %vm21391_vm4, %v8535_v49  ;;  %v8541_v6 = vcombine.high %v8535_v49, %v8535_v49  ;;  %v8536_v39 = vmax.f32 %v8532_v2, 0.0  ;;  %v8546_v13 = vsel %vm8545_vm3, %v8535_v49, -inf  ;;  %vm10696_vm4 = vcmask 1041408  }
 0xd72   : > { %12790 = vmatpush3.bf16.msra.mxu0 %v15001_v51  ;;  %v15011_v51 = vld [vmem:[%s21397_s1] sm:$0xff]  }
 0xd73   : > { %v8547_v1 = vsel %vm8545_vm3, %v8541_v6, -inf  ;;  %8538 = vst.msk [vmem:[%s20101_s3 + $0x8] sm:$0xff] %vm21392_vm9, %v8536_v39  ;;  %v8542_v36 = vcombine.high %v8536_v39, %v8536_v39  ;;  %v8549_v5 = vsel %vm8545_vm3, %v8536_v39, -inf  ;;  %v15002_v6 = vld [vmem:[%s21388_s10 + $0x60] sm:$0xff]   ;;  %vm11130_vm9 = vcmask 516096  }
 0xd74   : > { %v8548_v46 = vmax.f32 %v8546_v13, %v8547_v1  ;;  %v15003_v39 = vld [vmem:[%s21388_s10 + $0x20] sm:$0xff]   ;;  %12791 = vmatprep.subr.bf16.mxu0 %v15002_v6 }
 0xd75   : > { %v8550_v44 = vsel %vm8545_vm3, %v8542_v36, -inf  ;;  %vm10684_vm3 = vcmask 517120  }
 0xd76   : > { %v8560_v28 = vrot.slane %v8548_v46, %v18656_v19  ;;  %v8551_v31 = vmax.f32 %v8549_v5, %v8550_v44  ;;  %12792 = vmatpush3.bf16.msra.mxu0 %v15003_v39  ;;  %v15004_v46 = vld [vmem:[%s21388_s10 + $0x68] sm:$0xff]   ;;  %v15006_v44 = vld [vmem:[%s21388_s10 + $0x70] sm:$0xff]  }
 0xd77   : > { %v15005_v5 = vld [vmem:[%s21388_s10 + $0x28] sm:$0xff]   ;;  %12793 = vmatprep.subr.bf16.mxu0 %v15004_v46 }
 0xd78   : > { %v8561_v15 = vcombine.high %v8560_v28, %v8560_v28  ;;  %v8575_v17 = vsel %vm8574_vm6, %v8560_v28, -inf  ;;  %v8568_v29 = vrot.slane %v8551_v31, %v18656_v19 }
 0xd79   : > { %v8576_v11 = vrot.slane %v8575_v17, 4 }
 0xd7a   : > { %v8569_v47 = vcombine.high %v8568_v29, %v8568_v29  ;;  %v8589_v41 = vsel %vm8574_vm6, %v8568_v29, -inf  ;;  %v8582_v34 = vsel %vm8574_vm6, %v8561_v15, -inf  ;;  %12794 = vmatpush3.bf16.msra.mxu0 %v15005_v5  ;;  %v15007_v15 = vld [vmem:[%s21388_s10 + $0x30] sm:$0xff]   ;;  %v15008_v29 = vld [vmem:[%s21388_s10 + $0x78] sm:$0xff]  }
 0xd7b   : > { %v8590_v45 = vrot.slane %v8589_v41, 4  ;;  %v8577_v60 = vmax.f32 %v8575_v17, %v8576_v11  ;;  %v8583_v21 = vrot.slane %v8582_v34, 4  ;;  %12795 = vmatprep.subr.bf16.mxu0 %v15006_v44  ;;  %v15009_v11 = vld [vmem:[%s21388_s10 + $0x38] sm:$0xff]  }
 0xd7c   : > { %v8596_v62 = vsel %vm8574_vm6, %v8569_v47, -inf  ;;  %v15021_v5 = vld [vmem:[%s21397_s1 + $0x18] sm:$0xff]  }
 0xd7d   : > { %v8578_v57 = vrot.slane %v8577_v60, 2  ;;  %v8584_v22 = vmax.f32 %v8582_v34, %v8583_v21  ;;  %v8591_v18 = vmax.f32 %v8589_v41, %v8590_v45  ;;  %v8597_v23 = vrot.slane %v8596_v62, 4 }
 0xd7e   : > { %12796 = vmatpush3.bf16.msra.mxu0 %v15007_v15  ;;  %v15024_v15 = vld [vmem:[%s21397_s1 + $0x90] sm:$0xff]  }
 0xd7f   : > { %v8579_v43 = vmax.f32 %v8577_v60, %v8578_v57  ;;  %v8585_v20 = vrot.slane %v8584_v22, 2  ;;  %v8592_v8 = vrot.slane %v8591_v18, 2  ;;  %v8598_v4 = vmax.f32 %v8596_v62, %v8597_v23  ;;  %12797 = vmatprep.subr.bf16.mxu0 %v15008_v29  ;;  %v15025_v29 = vld [vmem:[%s21397_s1 + $0x20] sm:$0xff]  }
 0xd81   : > { %v8580_v14 = vrot.slane %v8579_v43, 1  ;;  %v8586_v56 = vmax.f32 %v8584_v22, %v8585_v20  ;;  %v8593_v3 = vmax.f32 %v8591_v18, %v8592_v8  ;;  %v8599_v42 = vrot.slane %v8598_v4, 2 }
 0xd82   : > { %12798 = vmatpush3.bf16.msra.mxu0 %v15009_v11 }
 0xd83   : > { %v8587_v50 = vrot.slane %v8586_v56, 1  ;;  %v8594_v53 = vrot.slane %v8593_v3, 1  ;;  %v8600_v25 = vmax.f32 %v8598_v4, %v8599_v42  ;;  %v8581_v33 = vmax.f32 %v8579_v43, %v8580_v14 }
 0xd85   : > { %v8588_v32 = vmax.f32 %v8586_v56, %v8587_v50  ;;  %v8601_v61 = vrot.slane %v8600_v25, 1  ;;  %v8595_v30 = vmax.f32 %v8593_v3, %v8594_v53 }
 0xd87   : > { %v8607_v10 = vsel %vm5796_vm12, %v8588_v32, %v8581_v33  ;;  %v8602_v24 = vmax.f32 %v8600_v25, %v8601_v61 }
 0xd88   : > { %v8611_v9 = vsel %vm1517_vm0, 0.0, %v8607_v10  ;;  %v15012_v10 = vld [vmem:[%s21397_s1 + $0x48] sm:$0xff]  }
 0xd89   : > { %v8614_v59 = vsel %vm8613_vm7, %v8611_v9, 0.0  ;;  %v8608_v52 = vsel %vm5796_vm12, %v8602_v24, %v8595_v30  ;;  %vm21393_vm12 = vmmov %vm21372_vm1  ;;  %v15014_v30 = vld [vmem:[%s21397_s1 + $0xc0] sm:$0xff]   ;;  %v15018_v9 = vld [vmem:[%s21397_s1 + $0xc8] sm:$0xff]  }
 0xd8a   : > { %8618 = vrot.lane.b32.xlu1 %v8614_v59, %s21374_s11  ;;  %v8612_v7 = vsel %vm1517_vm0, 0.0, %v8608_v52  ;;  %v8637_v2 = vrot.slane %v8614_v59, 2  ;;  %v8627_v28 = vrot.slane %v8614_v59, 1  ;;  %v15016_v24 = vld [vmem:[%s21397_s1 + $0x80] sm:$0xff]   ;;  %12830 = vmatprep.subr.bf16.mxu0 %v15014_v30  ;;  %v15015_v52 = vld [vmem:[%s21397_s1 + $0x50] sm:$0xff]  }
 0xd8b   : > { %v8615_v0 = vsel %vm8613_vm7, %v8612_v7, 0.0  ;;  %v15020_v7 = vld [vmem:[%s21397_s1 + $0x88] sm:$0xff]  }
 0xd8c   : > { %8620 = vrot.lane.b32.xlu0 %v8615_v0, %s21374_s11  ;;  %v8641_v49 = vrot.slane %v8615_v0, 2  ;;  %v8631_v36 = vrot.slane %v8615_v0, 1 }
 0xd8e   : > { %v8678_v13 = vrot.slane %v8641_v49, %v18656_v19  ;;  %8638 = vrot.lane.b32.xlu1 %v8637_v2, %s21378_s26  ;;  %v8655_v27 = vsel %vm21372_vm1, %v8631_v36, %v19834_v38 }
 0xd90   : > { %v12393_v1 = vcombine.low %v8678_v13, %v20124_v55  ;;  %8624 = vrot.lane.b32.xlu0 %v8615_v0, %s21378_s26  ;;  %v15017_v0 = vld [vmem:[%s21397_s1 + $0x10] sm:$0xff]  }
 0xd92   : > { %8634 = vrot.lane.b32.xlu1 %v8631_v36, %s21374_s11  ;;  %v8711_v31 = vrot.slane %v12393_v1, %v18656_v19  ;;  %s21398_s11 = sld [smem:[#allocation47_spill]] }
 0xd94   : > { %8628 = vrot.lane.b32.xlu0 %v8627_v28, %s21380_s2  ;;  %v8718_v17 = vpack.c.bf16 %v8711_v31, %v8711_v31  ;;  %v15023_v31 = vld [vmem:[%s21397_s1 + $0x60] sm:$0xff]  }
 0xd96   : > { %13178 = vmatmul.mubr.msk.bf16.vlgmr.msra.gmra.mrb[60].mxu1 %vm21393_vm12, %v8718_v17  ;;  %8642 = vrot.lane.b32.xlu1 %v8637_v2, %s21380_s2 }
 0xd97   : > { %12809 = vmatpush3.bf16.msra.mxu1 %v15011_v51 }
 0xd98   : > { %8644 = vrot.lane.b32.xlu0 %v8641_v49, %s21380_s2  ;;  %12810 = vmatprep.subr.bf16.mxu1 %v15012_v10  ;;  %v15019_v49 = vld [vmem:[%s21397_s1 + $0x58] sm:$0xff]   ;;  %v12394_v6 = vld [vmem:[%s21398_s11] ss:$0 sm:$0xff]  ;;  %s20177_s2 = sshll.u32 %s19259_s13, 2  ;;  %s21399_s11 = sld [smem:[#allocation35_spill]] }
 0xd99   : > { %s20988_s15 = scalar_lea.vmem [#allocation9], %s20177_s2 }
 0xdfc   : > { %v8619_v47 = vpop.permute.xlu1 %8618 }
 0xdfd   : > { %v8648_v21 = vsel %vm21394_vm10, 0.0, %v8619_v47 }
 0xdfe   : > { %v8621_v41 = vpop.permute.xlu0 %8620 }
 0xdff   : > { %v8649_v18 = vsel %vm21396_vm14, %v8614_v59, %v8621_v41  ;;  %v15013_v59 = vld [vmem:[%s21397_s1 + $0x8] sm:$0xff]  }
 0xe00   : > { %v8639_v34 = vpop.permute.xlu1 %8638  ;;  %v8651_v4 = vsel %vm4513_vm8, %v8649_v18, %v19860_v40  ;;  %12811 = vmatpush3.bf16.msra.mxu1 %v15013_v59 }
 0xe01   : > { %v8657_v8 = vsel %vm4513_vm8, %v8655_v27, %v8639_v34  ;;  %12812 = vmatprep.subr.bf16.mxu1 %v15015_v52  ;;  %v15030_v27 = vld [vmem:[%s21397_s1 + $0xe0] sm:$0xff]  }
 0xe02   : > { %v8625_v45 = vpop.permute.xlu0 %8624 }
 0xe03   : > { %v8650_v57 = vsel %vm4513_vm8, %v8648_v21, %v8625_v45 }
 0xe04   : > { %v8635_v60 = vpop.permute.xlu1 %8634  ;;  %v8652_v43 = vsel %vm6651_vm5, %v8650_v57, %v19836_v37  ;;  %12813 = vmatpush3.bf16.msra.mxu1 %v15017_v0  ;;  %v15027_v57 = vld [vmem:[%s21397_s1 + $0x68] sm:$0xff]  }
 0xe05   : > { %v8654_v62 = vsel %vm21395_vm13, %v8627_v28, %v8635_v60  ;;  %12814 = vmatprep.subr.bf16.mxu1 %v15019_v49  ;;  %v15022_v28 = vld [vmem:[%s21397_s1 + $0xd0] sm:$0xff]  }
 0xe06   : > { %v8629_v22 = vpop.permute.xlu0 %8628  ;;  %v8656_v35 = vsel %vm4513_vm8, %v8654_v62, %v19840_v12  ;;  %v15026_v62 = vld [vmem:[%s21397_s1 + $0xd8] sm:$0xff]  }
 0xe07   : > { %v8653_v3 = vsel %vm6651_vm5, %v8651_v4, %v8629_v22  ;;  %v15028_v22 = vld [vmem:[%s21397_s1 + $0x98] sm:$0xff]  }
 0xe08   : > { %v8643_v23 = vpop.permute.xlu1 %8642  ;;  %12815 = vmatpush3.bf16.msra.mxu1 %v15021_v5 }
 0xe09   : > { %v8658_v20 = vsel %vm6651_vm5, %v8656_v35, %v8643_v23  ;;  %12816 = vmatprep.subr.bf16.mxu1 %v15023_v31  ;;  %v15029_v23 = vld [vmem:[%s21397_s1 + $0x28] sm:$0xff]  }
 0xe0a   : > { %v8664_v14 = vcombine.low %v8652_v43, %v8658_v20  ;;  %v8645_v56 = vpop.permute.xlu0 %8644  ;;  %v15031_v43 = vld [vmem:[%s21397_s1 + $0x70] sm:$0xff]  }
 0xe0b   : > { %v8659_v12 = vsel %vm6651_vm5, %v8657_v8, %v8645_v56  ;;  %vm8963_vm5 = vcmask 519168   ;;  %v15032_v8 = vld [vmem:[%s21397_s1 + $0xa0] sm:$0xff]   ;;  %v15034_v56 = vld [vmem:[%s21397_s1 + $0xe8] sm:$0xff]  }
 0xe0c   : > { %v8680_v42 = vcombine.low %v8653_v3, %v8659_v12  ;;  %v8671_v38 = vrot.slane %v8664_v14, %v18656_v19  ;;  %12817 = vmatpush3.bf16.msra.mxu1 %v15025_v29  ;;  %v15033_v14 = vld [vmem:[%s21397_s1 + $0x30] sm:$0xff]   ;;  %v15035_v3 = vld [vmem:[%s21397_s1 + $0x78] sm:$0xff]   ;;  %v15036_v12 = vld [vmem:[%s21397_s1 + $0xa8] sm:$0xff]  }
 0xe0d   : > { %12818 = vmatprep.subr.bf16.mxu1 %v15027_v57  ;;  %v15045_v57 = vld [vmem:[%s21397_s1 + $0x118] sm:$0xff]  }
 0xe0e   : > { %v8687_v37 = vrot.slane %v8680_v42, %v18656_v19 }
 0xe10   : > { %v12392_v16 = vcombine.low %v8671_v38, %v8687_v37  ;;  %12819 = vmatpush3.bf16.msra.mxu1 %v15029_v23  ;;  %v15037_v38 = vld [vmem:[%s21397_s1 + $0x38] sm:$0xff]   ;;  %v15038_v37 = vld [vmem:[%s21397_s1 + $0xf0] sm:$0xff]   ;;  %v15046_v23 = vld [vmem:[%s21399_s11 + $0x40] sm:$0xff]  }
 0xe11   : > { %12820 = vmatprep.subr.bf16.mxu1 %v15031_v43  ;;  %v15050_v43 = vld [vmem:[%s21399_s11 + $0xc0] sm:$0xff]  }
 0xe12   : > { %v8704_v63 = vrot.slane %v12392_v16, %v18656_v19  ;;  %v15039_v16 = vld [vmem:[%s21397_s1 + $0xb0] sm:$0xff]  }
 0xe14   : > { %v8712_v40 = vcombine.high %v8704_v63, %v8704_v63  ;;  %v8716_v53 = vpack.c.bf16 %v8704_v63, %v8704_v63  ;;  %12821 = vmatpush3.bf16.msra.mxu1 %v15033_v14  ;;  %v15051_v14 = vld [vmem:[%s21399_s11 + $0x50] sm:$0xff]  }
 0xe15   : > { %12822 = vmatprep.subr.bf16.mxu1 %v15035_v3  ;;  %v15053_v3 = vld [vmem:[%s21399_s11 + $0x10] sm:$0xff]  }
 0xe16   : > { %v8717_v50 = vpack.c.bf16 %v8712_v40, %v8712_v40  ;;  %v15041_v40 = vld [vmem:[%s21397_s1 + $0xf8] sm:$0xff]  }
 0xe18   : > { %8905 = vmatprep.mubr.bf16.mxu0 %v8717_v50  ;;  %12823 = vmatpush3.bf16.msra.mxu1 %v15037_v38  ;;  %v15042_v50 = vld [vmem:[%s21397_s1 + $0xb8] sm:$0xff]  }
 0xe19   : > { %8906 = vmatmul.mubr.bf16.vlgmr.msra.gmra.mrb[56].mxu0 %v8716_v53  ;;  %13181 = vmatprep.subr.bf16.mxu1 %v21170_v26 }
 0xe1a   : > { %12831 = vmatpush3.bf16.msra.mxu0 %v15016_v24 }
 0xe1b   : > { %12832 = vmatprep.subr.bf16.mxu0 %v15018_v9 }
 0xe1e   : > { %12833 = vmatpush3.bf16.msra.mxu0 %v15020_v7 }
 0xe1f   : > { %12834 = vmatprep.subr.bf16.mxu0 %v15022_v28 }
 0xe22   : > { %12835 = vmatpush3.bf16.msra.mxu0 %v15024_v15 }
 0xe23   : > { %12836 = vmatprep.subr.bf16.mxu0 %v15026_v62 }
 0xe26   : > { %12837 = vmatpush3.bf16.msra.mxu0 %v15028_v22 }
 0xe27   : > { %12838 = vmatprep.subr.bf16.mxu0 %v15030_v27  ;;  %v15048_v27 = vld [vmem:[%s21399_s11 + $0x48] sm:$0xff]  }
 0xe2a   : > { %12839 = vmatpush3.bf16.msra.mxu0 %v15032_v8  ;;  %v15054_v8 = vld [vmem:[%s21399_s11 + $0xc8] sm:$0xff]  }
 0xe2b   : > { %12840 = vmatprep.subr.bf16.mxu0 %v15034_v56  ;;  %v15056_v56 = vld [vmem:[%s21399_s11 + $0x88] sm:$0xff]  }
 0xe2e   : > { %12841 = vmatpush3.bf16.msra.mxu0 %v15036_v12  ;;  %v15055_v12 = vld [vmem:[%s21399_s11 + $0x58] sm:$0xff]  }
 0xe2f   : > { %12842 = vmatprep.subr.bf16.mxu0 %v15038_v37 }
 0xe32   : > { %12843 = vmatpush3.bf16.msra.mxu0 %v15039_v16 }
 0xe33   : > { %12844 = vmatprep.subr.bf16.mxu0 %v15041_v40 }
 0xe36   : > { %12845 = vmatpush3.bf16.msra.mxu0 %v15042_v50 }
 0xe37   : > { %12879 = vmatprep.subr.bf16.mxu0 %v15050_v43  ;;  %v15077_v43 = vld [vmem:[%s21399_s11 + $0xf8] sm:$0xff]  }
 0xe69   : > { %v8947_v25 = vpop.f32.mrb[60].mxu1 }
 0xe6a   : > { %v13179_v33 = vpop.f32.mrb[61].mxu1 }
 0xe6b   : > { %v8950_v32 = vpop.f32.mrb[62].mxu1 }
 0xe6c   : > { %v13180_v61 = vpop.f32.mrb[63].mxu1 }
 0xeec   : > { %v12799_v2 = vpop.f32.mrb[56].mxu0 }
 0xeed   : > { %v12800_v39 = vpop.f32.mrb[57].mxu0 }
 0xeee   : > { %v12801_v13 = vadd.f32 %v12800_v39, %v12799_v2  ;;  %v12802_v1 = vpop.f32.mrb[58].mxu0 }
 0xeef   : > { %v12803_v36 = vpop.f32.mrb[59].mxu0 }
 0xef0   : > { %v8908_v46 = vadd.f32 %v12801_v13, %v12394_v6 }
 0xef2   : > { %v8948_v44 = vadd.f32 %v8947_v25, %v8908_v46 }
 0xef4   : > { %v8953_v17 = vmax.f32 %v8948_v44, 0.0 }
 0xef6   : > { %v8961_v11 = vrot.slane %v8953_v17, %v18656_v19  ;;  %8964 = vst.msk [vmem:[%s20988_s15] sm:$0xf] %vm8963_vm5, %v8953_v17  ;;  %v15040_v17 = vld [vmem:[%s21397_s1 + $0x100] sm:$0xff]   ;;  %s21400_s15 = sld [smem:[#allocation48_spill]] }
 0xef8   : > { %v8971_v47 = vrot.slane %v8961_v11, %v18656_v19  ;;  %v8962_v41 = vcombine.high %v8961_v11, %v8961_v11 }
 0xefa   : > { %v8979_v34 = vrot.slane %v8971_v47, 7  ;;  %v8978_v45 = vrot.slane %v8962_v41, %v18656_v19  ;;  %v15043_v47 = vld [vmem:[%s21397_s1 + $0x108] sm:$0xff]  }
 0xefc   : > { %v8983_v60 = vsel %vm1517_vm0, 0.0, %v8979_v34  ;;  %v8980_v21 = vrot.slane %v8978_v45, 7  ;;  %v12416_v40 = vld [vmem:[%s21400_s15] ss:$0 sm:$0xff]  ;;  %s20989_s15 = scalar_lea.vmem [#allocation10], %s20177_s2 }
 0xefd   : > { %v20196_v18 = vsel %vm8613_vm7, %v8983_v60, 0.0 }
 0xefe   : > { %8989 = vrot.lane.b32.xlu1 %v20196_v18, %s21378_s26  ;;  %v8984_v35 = vsel %vm1517_vm0, 0.0, %v8980_v21  ;;  %v8995_v4 = vrot.slane %v20196_v18, 1  ;;  %v15044_v21 = vld [vmem:[%s21397_s1 + $0x110] sm:$0xff]  }
 0xeff   : > { %v20205_v20 = vsel %vm8613_vm7, %v8984_v35, 0.0  ;;  %v15047_v35 = vld [vmem:[%s21399_s11] sm:$0xff]  }
 0xf00   : > { %8991 = vrot.lane.b32.xlu0 %v20205_v20, %s21378_s26  ;;  %v9002_v42 = vrot.slane %v20205_v20, 1  ;;  %v9011_v63 = vrot.slane %v20205_v20, 2 }
 0xf02   : > { %8996 = vrot.lane.b32.xlu1 %v21175_v54, %s21378_s26  ;;  %v9008_v54 = vrot.slane %v20196_v18, 2  ;;  %v9057_v34 = vrot.slane %v9011_v63, %v18656_v19 }
 0xf04   : > { %8998 = vrot.lane.b32.xlu0 %v8995_v4, %s21378_s26  ;;  %v9093_v62 = vcombine.low %v9057_v34, %v20124_v55 }
 0xf06   : > { %9005 = vrot.lane.b32.xlu1 %v9002_v42, %s21378_s26  ;;  %v9100_v22 = vrot.slane %v9093_v62, %v18656_v19  ;;  %v15071_v62 = vld [vmem:[%s21399_s11 + $0x78] sm:$0xff]  }
 0xf08   : > { %9012 = vrot.lane.b32.xlu0 %v9008_v54, %s21378_s26 }
 0xf0a   : > { %9014 = vrot.lane.b32.xlu1 %v9011_v63, %s21378_s26 }
 0xf70   : > { %v8990_v53 = vpop.permute.xlu1 %8989 }
 0xf71   : > { %v9018_v32 = vsel %vm4513_vm8, 0.0, %v8990_v53 }
 0xf72   : > { %v8992_v25 = vpop.permute.xlu0 %8991 }
 0xf73   : > { %v9019_v10 = vsel %vm4513_vm8, %v20196_v18, %v8992_v25  ;;  %v9110_v18 = vpack.c.bf16 %v9100_v22, %v9100_v22  ;;  %v15073_v22 = vld [vmem:[%s21399_s11 + $0x38] sm:$0xff]  }
 0xf74   : > { %v20230_v33 = vpop.permute.xlu1 %8996 }
 0xf75   : > { %v9020_v61 = vsel %vm4513_vm8, %v20205_v20, %v20230_v33  ;;  %v9023_v13 = vsel %vm4513_vm8, %v9002_v42, %v20230_v33  ;;  %v15052_v20 = vld [vmem:[%s21399_s11 + $0x80] sm:$0xff]   ;;  %v15057_v42 = vld [vmem:[%s21399_s11 + $0x18] sm:$0xff]  }
 0xf76   : > { %v8999_v58 = vpop.permute.xlu0 %8998  ;;  %v9034_v51 = vcombine.low %v9018_v32, %v9020_v61 }
 0xf77   : > { %v9021_v30 = vsel %vm4513_vm8, 0.0, %v8999_v58 }
 0xf78   : > { %v9058_v24 = vcombine.low %v9019_v10, %v9021_v30  ;;  %v9006_v9 = vpop.permute.xlu1 %9005  ;;  %v9042_v59 = vrot.slane %v9034_v51, %v18656_v19 }
 0xf79   : > { %v9022_v0 = vsel %vm4513_vm8, %v8995_v4, %v9006_v9  ;;  %v15049_v4 = vld [vmem:[%s21399_s11 + $0x8] sm:$0xff]  }
 0xf7a   : > { %v9066_v52 = vrot.slane %v9058_v24, %v18656_v19  ;;  %v9013_v7 = vpop.permute.xlu0 %9012 }
 0xf7b   : > { %v9024_v49 = vsel %vm4513_vm8, %v21176_v48, %v9013_v7  ;;  %v15058_v7 = vld [vmem:[%s21399_s11 + $0xd0] sm:$0xff]  }
 0xf7c   : > { %v12414_v2 = vcombine.low %v9042_v59, %v9066_v52  ;;  %v9035_v6 = vcombine.low %v9022_v0, %v9024_v49  ;;  %v9015_v39 = vpop.permute.xlu1 %9014  ;;  %v15059_v0 = vld [vmem:[%s21399_s11 + $0x60] sm:$0xff]   ;;  %v15060_v49 = vld [vmem:[%s21399_s11 + $0x90] sm:$0xff]  }
 0xf7d   : > { %v9025_v1 = vsel %vm4513_vm8, %v9008_v54, %v9015_v39 }
 0xf7e   : > { %v9059_v36 = vcombine.low %v9023_v13, %v9025_v1  ;;  %v9083_v46 = vrot.slane %v12414_v2, %v18656_v19  ;;  %v9049_v5 = vrot.slane %v9035_v6, %v18656_v19  ;;  %v15061_v2 = vld [vmem:[%s21399_s11 + $0x20] sm:$0xff]   ;;  %v15062_v1 = vld [vmem:[%s21399_s11 + $0xd8] sm:$0xff]  }
 0xf80   : > { %v9073_v44 = vrot.slane %v9059_v36, %v18656_v19  ;;  %v9091_v28 = vcombine.high %v9083_v46, %v9083_v46  ;;  %v9106_v29 = vpack.c.bf16 %v9083_v46, %v9083_v46 }
 0xf82   : > { %v12415_v31 = vcombine.low %v9049_v5, %v9073_v44  ;;  %v9107_v15 = vpack.c.bf16 %v9091_v28, %v9091_v28  ;;  %v15063_v5 = vld [vmem:[%s21399_s11 + $0x68] sm:$0xff]   ;;  %v15064_v44 = vld [vmem:[%s21399_s11 + $0x98] sm:$0xff]  }
 0xf83   : > { %v15065_v28 = vld [vmem:[%s21399_s11 + $0x28] sm:$0xff]  }
 0xf84   : > { %9441 = vmatprep.mubr.bf16.mxu1 %v9107_v15  ;;  %v9090_v11 = vrot.slane %v12415_v31, %v18656_v19 }
 0xf85   : > { %9442 = vmatmul.mubr.bf16.vlgmr.msra.gmra.mrb[64].mxu1 %v9106_v29  ;;  %v15067_v29 = vld [vmem:[%s21399_s11 + $0x70] sm:$0xff]  }
 0xf86   : > { %13182 = vmatpush3.bf16.msra.mxu1 %v15040_v17  ;;  %v9092_v41 = vcombine.high %v9090_v11, %v9090_v11  ;;  %13189 = vmatprep.mubr.msk.bf16.mxu1 %vm15594_vm11, %v21170_v26  ;;  %v9108_v60 = vpack.c.bf16 %v9090_v11, %v9090_v11  ;;  %v15066_v17 = vld [vmem:[%s21399_s11 + $0xe0] sm:$0xff]  }
 0xf87   : > { %13183 = vmatprep.subr.bf16.mxu1 %v21170_v26  ;;  %v15068_v11 = vld [vmem:[%s21399_s11 + $0xa0] sm:$0xff]  }
 0xf88   : > { %v9109_v45 = vpack.c.bf16 %v9092_v41, %v9092_v41 }
 0xf8a   : > { %13184 = vmatpush3.bf16.msra.mxu1 %v15043_v47  ;;  %9481 = vmatprep.mubr.bf16.mxu0 %v9109_v45  ;;  %v15069_v45 = vld [vmem:[%s21399_s11 + $0x30] sm:$0xff]  }
 0xf8b   : > { %9482 = vmatmul.mubr.bf16.vlgmr.msra.gmra.mrb[60].mxu0 %v9108_v60  ;;  %13185 = vmatprep.subr.bf16.mxu1 %v21170_v26 }
 0xf8c   : > { %12880 = vmatpush3.bf16.msra.mxu0 %v15052_v20 }
 0xf8d   : > { %12881 = vmatprep.subr.bf16.mxu0 %v15054_v8  ;;  %v15078_v8 = vld [vmem:[%s21399_s11 + $0xb8] sm:$0xff]  }
 0xf8e   : > { %13186 = vmatpush3.bf16.msra.mxu1 %v15044_v21  ;;  %v15070_v21 = vld [vmem:[%s21399_s11 + $0xe8] sm:$0xff]  }
 0xf8f   : > { %13187 = vmatprep.subr.bf16.mxu1 %v21170_v26 }
 0xf90   : > { %12882 = vmatpush3.bf16.msra.mxu0 %v15056_v56 }
 0xf91   : > { %12883 = vmatprep.subr.bf16.mxu0 %v15058_v7 }
 0xf92   : > { %13188 = vmatpush3.bf16.msra.mxu1 %v15045_v57  ;;  %v15072_v57 = vld [vmem:[%s21399_s11 + $0xa8] sm:$0xff]  }
 0xf93   : > { %12857 = vmatprep.subr.bf16.mxu1 %v15046_v23 }
 0xf94   : > { %12884 = vmatpush3.bf16.msra.mxu0 %v15060_v49  ;;  %v15076_v49 = vld [vmem:[%s21399_s11 + $0x100] sm:$0xff]  }
 0xf95   : > { %13190 = vmatmul.mubr.msk.bf16.vlgmr.msra.gmra.mrb[68].mxu1 %vm4513_vm8, %v9110_v18  ;;  %12885 = vmatprep.subr.bf16.mxu0 %v15062_v1  ;;  %v15074_v18 = vld [vmem:[%s21399_s11 + $0xf0] sm:$0xff]  }
 0xf96   : > { %12858 = vmatpush3.bf16.msra.mxu1 %v15047_v35 }
 0xf97   : > { %12859 = vmatprep.subr.bf16.mxu1 %v15048_v27  ;;  %v15075_v27 = vld [vmem:[%s21399_s11 + $0xb0] sm:$0xff]  }
 0xf98   : > { %12886 = vmatpush3.bf16.msra.mxu0 %v15064_v44 }
 0xf99   : > { %12887 = vmatprep.subr.bf16.mxu0 %v15066_v17 }
 0xf9a   : > { %12860 = vmatpush3.bf16.msra.mxu1 %v15049_v4 }
 0xf9b   : > { %12861 = vmatprep.subr.bf16.mxu1 %v15051_v14 }
 0xf9c   : > { %12888 = vmatpush3.bf16.msra.mxu0 %v15068_v11 }
 0xf9d   : > { %12889 = vmatprep.subr.bf16.mxu0 %v15070_v21 }
 0xf9e   : > { %12862 = vmatpush3.bf16.msra.mxu1 %v15053_v3 }
 0xf9f   : > { %12863 = vmatprep.subr.bf16.mxu1 %v15055_v12 }
 0xfa0   : > { %12890 = vmatpush3.bf16.msra.mxu0 %v15072_v57 }
 0xfa1   : > { %12891 = vmatprep.subr.bf16.mxu0 %v15074_v18 }
 0xfa2   : > { %12864 = vmatpush3.bf16.msra.mxu1 %v15057_v42 }
 0xfa3   : > { %12865 = vmatprep.subr.bf16.mxu1 %v15059_v0 }
 0xfa4   : > { %12892 = vmatpush3.bf16.msra.mxu0 %v15075_v27 }
 0xfa5   : > { %12893 = vmatprep.subr.bf16.mxu0 %v15077_v43 }
 0xfa6   : > { %12866 = vmatpush3.bf16.msra.mxu1 %v15061_v2 }
 0xfa7   : > { %12867 = vmatprep.subr.bf16.mxu1 %v15063_v5  ;;  %v15080_v5 = vld [vmem:[%s21399_s11 + $0x110] sm:$0xff]  }
 0xfa8   : > { %12894 = vmatpush3.bf16.msra.mxu0 %v15078_v8 }
 0xfaa   : > { %12868 = vmatpush3.bf16.msra.mxu1 %v15065_v28  ;;  %v15081_v28 = vld [vmem:[%s21399_s11 + $0x118] sm:$0xff]  }
 0xfab   : > { %12869 = vmatprep.subr.bf16.mxu1 %v15067_v29 }
 0xfae   : > { %12870 = vmatpush3.bf16.msra.mxu1 %v15069_v45 }
 0xfaf   : > { %12871 = vmatprep.subr.bf16.mxu1 %v15071_v62 }
 0xfb2   : > { %12872 = vmatpush3.bf16.msra.mxu1 %v15073_v22 }
 0xfb3   : > { %13193 = vmatprep.subr.bf16.mxu1 %v21170_v26 }
0x1058   : > { %v12824_v38 = vpop.f32.mrb[64].mxu1 }
0x1059   : > { %v12825_v37 = vpop.f32.mrb[65].mxu1 }
0x105a   : > { %v12826_v54 = vadd.f32 %v12825_v37, %v12824_v38  ;;  %v12827_v16 = vpop.f32.mrb[66].mxu1 }
0x105b   : > { %v12828_v63 = vpop.f32.mrb[67].mxu1 }
0x105c   : > { %v9444_v25 = vadd.f32 %v12826_v54, %v12416_v40 }
0x105e   : > { %v12846_v50 = vpop.f32.mrb[60].mxu0 }
0x105f   : > { %v12847_v53 = vpop.f32.mrb[61].mxu0 }
0x1060   : > { %v12848_v32 = vadd.f32 %v12847_v53, %v12846_v50  ;;  %v12849_v61 = vpop.f32.mrb[62].mxu0 }
0x1061   : > { %v12850_v58 = vpop.f32.mrb[63].mxu0 }
0x1062   : > { %v9484_v51 = vadd.f32 %v12848_v32, %v9444_v25 }
0x1068   : > { %v9523_v10 = vpop.f32.mrb[68].mxu1 }
0x1069   : > { %v9524_v30 = vadd.f32 %v9523_v10, %v9484_v51  ;;  %v13191_v24 = vpop.f32.mrb[69].mxu1 }
0x106a   : > { %v9526_v9 = vpop.f32.mrb[70].mxu1 }
0x106b   : > { %v9529_v59 = vmax.f32 %v9524_v30, 0.0  ;;  %v13192_v52 = vpop.f32.mrb[71].mxu1 }
0x106d   : > { %v9537_v6 = vrot.slane %v9529_v59, %v18656_v19  ;;  %9539 = vst.msk [vmem:[%s20989_s15] sm:$0xf] %vm8963_vm5, %v9529_v59  ;;  %s21401_s15 = sld [smem:[#allocation36_spill]] }
0x106f   : > { %v9538_v39 = vcombine.high %v9537_v6, %v9537_v6  ;;  %v9546_v13 = vrot.slane %v9537_v6, %v18656_v19 }
0x1071   : > { %v9554_v36 = vrot.slane %v9546_v13, 7  ;;  %v9553_v46 = vrot.slane %v9538_v39, %v18656_v19  ;;  %v15079_v39 = vld [vmem:[%s21399_s11 + $0x108] sm:$0xff]   ;;  %s11658_s11 = sshll.u32 %s19572_s18, 4  ;;  %s20589_s11 = int_to_ptr.vmem [resolvable:$true] %s11658_s11 }
0x1072   : > { %s15194_s12 = scalar_lea.vmem %s20589_s11, 1024 }
0x1073   : > { %v9558_v31 = vsel %vm1517_vm0, 0.0, %v9554_v36  ;;  %v9555_v15 = vrot.slane %v9553_v46, 7  ;;  %s21402_s1 = smov %s21401_s15  ;;  %v15082_v17 = vld [vmem:[%s21401_s15 + $0x40] sm:$0xff]   ;;  %s21406_s15 = sld [smem:[#allocation37_spill]] }
0x1074   : > { %v9560_v47 = vsel %vm8613_vm7, %v9558_v31, 0.0  ;;  %v15083_v29 = vld [vmem:[%s21402_s1] sm:$0xff]   ;;  %v15084_v11 = vld [vmem:[%s21402_s1 + $0x48] sm:$0xff]   ;;  %12906 = vmatprep.subr.bf16.mxu0 %v15082_v17  ;;  %v15089_v62 = vld [vmem:[%s21402_s1 + $0x10] sm:$0xff]   ;;  %p15195_p11 = scmp.ne.s32.totalorder %s20589_s11, %s15194_s12 }
0x1075   : > { %9564 = vrot.lane.b32.xlu0 %v9560_v47, %s21378_s26  ;;  %v9559_v41 = vsel %vm1517_vm0, 0.0, %v9555_v15  ;;  %v9570_v60 = vrot.slane %v9560_v47, 1  ;;  %v9580_v35 = vrot.slane %v9560_v47, 2  ;;  %v15085_v45 = vld [vmem:[%s21402_s1 + $0x8] sm:$0xff]   ;;  %v15091_v57 = vld [vmem:[%s21402_s1 + $0x58] sm:$0xff]  }
0x1076   : > { %v20300_v34 = vsel %vm8613_vm7, %v9559_v41, 0.0  ;;  %v15088_v41 = vld [vmem:[%s21402_s1 + $0x80] sm:$0xff]   ;;  %v15092_v21 = vld [vmem:[%s21402_s1 + $0x88] sm:$0xff]   ;;  %v15093_v22 = vld [vmem:[%s21402_s1 + $0x18] sm:$0xff]   ;;  %p15196_p12 = pnand %p15195_p11, %p15866_p5 }
0x1077   : > { %9566 = vrot.lane.b32.xlu1 %v20300_v34, %s21378_s26  ;;  %v9574_v23 = vrot.slane %v20300_v34, 1  ;;  %v9582_v20 = vrot.slane %v20300_v34, 2  ;;  %v9591_v3 = vsel %vm4513_vm8, %v20300_v34, %v20230_v33  ;;  %v15090_v34 = vld [vmem:[%s21402_s1 + $0xc8] sm:$0xff]  }
0x1078   : > { %p15197_p13 = pneg %p15196_p12 }
0x1079   : > { %9571 = vrot.lane.b32.xlu0 %v9570_v60, %s21378_s26  ;;  %v9594_v51 = vsel %vm4513_vm8, %v9574_v23, %v20230_v33  ;;  %v9628_v1 = vrot.slane %v9582_v20, %v18656_v19 }
0x107b   : > { %9577 = vrot.lane.b32.xlu1 %v9574_v23, %s21378_s26  ;;  %v9664_v44 = vcombine.low %v9628_v1, %v20124_v55  ;;  %v15105_v1 = vld [vmem:[%s21402_s1 + $0x30] sm:$0xff]  }
0x107d   : > { %9583 = vrot.lane.b32.xlu0 %v9580_v35, %s21378_s26  ;;  %v9671_v31 = vrot.slane %v9664_v44, %v18656_v19  ;;  %v15107_v44 = vld [vmem:[%s21402_s1 + $0x78] sm:$0xff]  }
0x107f   : > { %9585 = vrot.lane.b32.xlu1 %v9582_v20, %s21378_s26  ;;  %v9681_v15 = vpack.c.bf16 %v9671_v31, %v9671_v31  ;;  %v12456_v20 = vld [vmem:[%s21403_s4] ss:$0 sm:$0xff]  ;;  %s20992_s4 = scalar_lea.vmem [#allocation12], %s20177_s2  ;;  %v15109_v31 = vld [vmem:[%s21402_s1 + $0x38] sm:$0xff]  }
0x10e7   : > { %v9565_v4 = vpop.permute.xlu0 %9564 }
0x10e8   : > { %v9589_v14 = vsel %vm4513_vm8, 0.0, %v9565_v4 }
0x10e9   : > { %v9567_v56 = vpop.permute.xlu1 %9566  ;;  %v9605_v12 = vcombine.low %v9589_v14, %v9591_v3 }
0x10ea   : > { %v9590_v38 = vsel %vm4513_vm8, %v9560_v47, %v9567_v56  ;;  %v15086_v47 = vld [vmem:[%s21402_s1 + $0xc0] sm:$0xff]  }
0x10eb   : > { %v9572_v42 = vpop.permute.xlu0 %9571  ;;  %v9613_v63 = vrot.slane %v9605_v12, %v18656_v19 }
0x10ec   : > { %v9592_v37 = vsel %vm4513_vm8, 0.0, %v9572_v42 }
0x10ed   : > { %v9629_v54 = vcombine.low %v9590_v38, %v9592_v37  ;;  %v9578_v16 = vpop.permute.xlu1 %9577 }
0x10ee   : > { %v9593_v53 = vsel %vm4513_vm8, %v9570_v60, %v9578_v16  ;;  %v15087_v60 = vld [vmem:[%s21402_s1 + $0x50] sm:$0xff]  }
0x10ef   : > { %v9637_v40 = vrot.slane %v9629_v54, %v18656_v19  ;;  %v9584_v50 = vpop.permute.xlu0 %9583 }
0x10f0   : > { %v9595_v25 = vsel %vm4513_vm8, %v21176_v48, %v9584_v50  ;;  %v15094_v50 = vld [vmem:[%s21402_s1 + $0xd0] sm:$0xff]  }
0x10f1   : > { %v12454_v32 = vcombine.low %v9613_v63, %v9637_v40  ;;  %v9606_v61 = vcombine.low %v9593_v53, %v9595_v25  ;;  %v9586_v58 = vpop.permute.xlu1 %9585  ;;  %v15095_v53 = vld [vmem:[%s21402_s1 + $0x60] sm:$0xff]   ;;  %v15096_v25 = vld [vmem:[%s21402_s1 + $0x90] sm:$0xff]  }
0x10f2   : > { %v9596_v10 = vsel %vm4513_vm8, %v9580_v35, %v9586_v58 }
0x10f3   : > { %v9630_v30 = vcombine.low %v9594_v51, %v9596_v10  ;;  %v9654_v24 = vrot.slane %v12454_v32, %v18656_v19  ;;  %v9620_v9 = vrot.slane %v9606_v61, %v18656_v19  ;;  %v15097_v32 = vld [vmem:[%s21402_s1 + $0x20] sm:$0xff]   ;;  %v15098_v10 = vld [vmem:[%s21402_s1 + $0xd8] sm:$0xff]  }
0x10f5   : > { %v9644_v59 = vrot.slane %v9630_v30, %v18656_v19  ;;  %v9662_v52 = vcombine.high %v9654_v24, %v9654_v24  ;;  %v9677_v2 = vpack.c.bf16 %v9654_v24, %v9654_v24  ;;  %v15099_v30 = vld [vmem:[%s21402_s1 + $0x68] sm:$0xff]   ;;  %v15100_v24 = vld [vmem:[%s21402_s1 + $0x98] sm:$0xff]  }
0x10f7   : > { %v12455_v7 = vcombine.low %v9620_v9, %v9644_v59  ;;  %v9678_v0 = vpack.c.bf16 %v9662_v52, %v9662_v52  ;;  %v15101_v52 = vld [vmem:[%s21402_s1 + $0x28] sm:$0xff]  }
0x10f9   : > { %10012 = vmatprep.mubr.bf16.mxu1 %v9678_v0  ;;  %v9661_v6 = vrot.slane %v12455_v7, %v18656_v19 }
0x10fa   : > { %10013 = vmatmul.mubr.bf16.vlgmr.msra.gmra.mrb[72].mxu1 %v9677_v2  ;;  %v15103_v2 = vld [vmem:[%s21402_s1 + $0x70] sm:$0xff]  }
0x10fb   : > { %13194 = vmatpush3.bf16.msra.mxu1 %v15076_v49  ;;  %v9663_v13 = vcombine.high %v9661_v6, %v9661_v6  ;;  %13201 = vmatprep.mubr.msk.bf16.mxu1 %vm15594_vm11, %v21170_v26  ;;  %v9679_v46 = vpack.c.bf16 %v9661_v6, %v9661_v6  ;;  %v15102_v49 = vld [vmem:[%s21402_s1 + $0xe0] sm:$0xff]  }
0x10fc   : > { %13195 = vmatprep.subr.bf16.mxu1 %v21170_v26  ;;  %v15104_v6 = vld [vmem:[%s21402_s1 + $0xa0] sm:$0xff]  }
0x10fd   : > { %v9680_v36 = vpack.c.bf16 %v9663_v13, %v9663_v13 }
0x10ff   : > { %13196 = vmatpush3.bf16.msra.mxu1 %v15079_v39  ;;  %10052 = vmatprep.mubr.bf16.mxu0 %v9680_v36 }
0x1100   : > { %10053 = vmatmul.mubr.bf16.vlgmr.msra.gmra.mrb[64].mxu0 %v9679_v46  ;;  %13197 = vmatprep.subr.bf16.mxu1 %v21170_v26 }
0x1101   : > { %12907 = vmatpush3.bf16.msra.mxu0 %v15083_v29  ;;  %v15111_v29 = vld [vmem:[%s21402_s1 + $0xb0] sm:$0xff]  }
0x1102   : > { %12908 = vmatprep.subr.bf16.mxu0 %v15084_v11 }
0x1103   : > { %13198 = vmatpush3.bf16.msra.mxu1 %v15080_v5  ;;  %v15106_v5 = vld [vmem:[%s21402_s1 + $0xe8] sm:$0xff]  }
0x1104   : > { %13199 = vmatprep.subr.bf16.mxu1 %v21170_v26 }
0x1105   : > { %12909 = vmatpush3.bf16.msra.mxu0 %v15085_v45 }
0x1106   : > { %12910 = vmatprep.subr.bf16.mxu0 %v15087_v60 }
0x1107   : > { %13200 = vmatpush3.bf16.msra.mxu1 %v15081_v28  ;;  %v15108_v28 = vld [vmem:[%s21402_s1 + $0xa8] sm:$0xff]  }
0x1108   : > { %12928 = vmatprep.subr.bf16.mxu1 %v15086_v47  ;;  %v15113_v47 = vld [vmem:[%s21402_s1 + $0xf8] sm:$0xff]  }
0x1109   : > { %12911 = vmatpush3.bf16.msra.mxu0 %v15089_v62 }
0x110a   : > { %13202 = vmatmul.mubr.msk.bf16.vlgmr.msra.gmra.mrb[76].mxu1 %vm4513_vm8, %v9681_v15  ;;  %12912 = vmatprep.subr.bf16.mxu0 %v15091_v57  ;;  %v15110_v15 = vld [vmem:[%s21402_s1 + $0xf0] sm:$0xff]  }
0x110b   : > { %12929 = vmatpush3.bf16.msra.mxu1 %v15088_v41 }
0x110c   : > { %12930 = vmatprep.subr.bf16.mxu1 %v15090_v34  ;;  %v15114_v34 = vld [vmem:[%s21402_s1 + $0xb8] sm:$0xff]  }
0x110d   : > { %12913 = vmatpush3.bf16.msra.mxu0 %v15093_v22 }
0x110e   : > { %12914 = vmatprep.subr.bf16.mxu0 %v15095_v53 }
0x110f   : > { %12931 = vmatpush3.bf16.msra.mxu1 %v15092_v21 }
0x1110   : > { %12932 = vmatprep.subr.bf16.mxu1 %v15094_v50 }
0x1111   : > { %12915 = vmatpush3.bf16.msra.mxu0 %v15097_v32 }
0x1112   : > { %12916 = vmatprep.subr.bf16.mxu0 %v15099_v30 }
0x1113   : > { %12933 = vmatpush3.bf16.msra.mxu1 %v15096_v25  ;;  %v15112_v25 = vld [vmem:[%s21402_s1 + $0x100] sm:$0xff]  }
0x1114   : > { %12934 = vmatprep.subr.bf16.mxu1 %v15098_v10 }
0x1115   : > { %12917 = vmatpush3.bf16.msra.mxu0 %v15101_v52  ;;  %v15116_v52 = vld [vmem:[%s21402_s1 + $0x110] sm:$0xff]  }
0x1116   : > { %12918 = vmatprep.subr.bf16.mxu0 %v15103_v2 }
0x1117   : > { %12935 = vmatpush3.bf16.msra.mxu1 %v15100_v24 }
0x1118   : > { %12936 = vmatprep.subr.bf16.mxu1 %v15102_v49 }
0x1119   : > { %12919 = vmatpush3.bf16.msra.mxu0 %v15105_v1 }
0x111a   : > { %12920 = vmatprep.subr.bf16.mxu0 %v15107_v44 }
0x111b   : > { %12937 = vmatpush3.bf16.msra.mxu1 %v15104_v6 }
0x111c   : > { %12938 = vmatprep.subr.bf16.mxu1 %v15106_v5 }
0x111d   : > { %12921 = vmatpush3.bf16.msra.mxu0 %v15109_v31 }
0x111e   : > { %13205 = vmatprep.subr.bf16.mxu0 %v21170_v26 }
0x111f   : > { %12939 = vmatpush3.bf16.msra.mxu1 %v15108_v28 }
0x1120   : > { %12940 = vmatprep.subr.bf16.mxu1 %v15110_v15 }
0x1123   : > { %12941 = vmatpush3.bf16.msra.mxu1 %v15111_v29 }
0x1124   : > { %12942 = vmatprep.subr.bf16.mxu1 %v15113_v47 }
0x1127   : > { %12943 = vmatpush3.bf16.msra.mxu1 %v15114_v34 }
0x11cd   : > { %v12873_v18 = vpop.f32.mrb[72].mxu1 }
0x11ce   : > { %v12874_v23 = vpop.f32.mrb[73].mxu1 }
0x11cf   : > { %v12875_v35 = vadd.f32 %v12874_v23, %v12873_v18  ;;  %v12876_v27 = vpop.f32.mrb[74].mxu1 }
0x11d0   : > { %v12877_v43 = vpop.f32.mrb[75].mxu1 }
0x11d1   : > { %v10015_v14 = vadd.f32 %v12875_v35, %v12456_v20 }
0x11d3   : > { %v12895_v8 = vpop.f32.mrb[64].mxu0 }
0x11d4   : > { %v12896_v4 = vpop.f32.mrb[65].mxu0 }
0x11d5   : > { %v12897_v56 = vadd.f32 %v12896_v4, %v12895_v8  ;;  %v12898_v3 = vpop.f32.mrb[66].mxu0 }
0x11d6   : > { %v12899_v12 = vpop.f32.mrb[67].mxu0 }
0x11d7   : > { %v10055_v42 = vadd.f32 %v12897_v56, %v10015_v14 }
0x11dd   : > { %v10094_v38 = vpop.f32.mrb[76].mxu1 }
0x11de   : > { %v10095_v37 = vadd.f32 %v10094_v38, %v10055_v42  ;;  %v13203_v54 = vpop.f32.mrb[77].mxu1 }
0x11df   : > { %v10097_v16 = vpop.f32.mrb[78].mxu1 }
0x11e0   : > { %v10100_v63 = vmax.f32 %v10095_v37, 0.0  ;;  %v13204_v40 = vpop.f32.mrb[79].mxu1 }
0x11e2   : > { %v10108_v61 = vrot.slane %v10100_v63, %v18656_v19  ;;  %10110 = vst.msk [vmem:[%s20992_s4] sm:$0xf] %vm8963_vm5, %v10100_v63  ;;  %s21407_s4 = smov %s21406_s15 }
0x11e3   : > { %v15119_v6 = vld [vmem:[%s21407_s4] sm:$0xff]   ;;  %v15124_v5 = vld [vmem:[%s21407_s4 + $0x50] sm:$0xff]   ;;  %v15127_v44 = vld [vmem:[%s21407_s4 + $0x88] sm:$0xff]  }
0x11e4   : > { %v10109_v58 = vcombine.high %v10108_v61, %v10108_v61  ;;  %v10117_v51 = vrot.slane %v10108_v61, %v18656_v19  ;;  %v15123_v1 = vld [vmem:[%s21407_s4 + $0x80] sm:$0xff]   ;;  %v15130_v28 = vld [vmem:[%s21407_s4 + $0xd0] sm:$0xff]   ;;  %v15128_v15 = vld [vmem:[%s21407_s4 + $0x58] sm:$0xff]  }
0x11e5   : > { %v15125_v31 = vld [vmem:[%s21407_s4 + $0x10] sm:$0xff]   ;;  %v15134_v29 = vld [vmem:[%s21407_s4 + $0xd8] sm:$0xff]   ;;  %v15132_v47 = vld [vmem:[%s21407_s4 + $0x60] sm:$0xff]  }
0x11e6   : > { %v10125_v9 = vrot.slane %v10117_v51, 7  ;;  %v10124_v59 = vrot.slane %v10109_v58, %v18656_v19  ;;  %v15115_v58 = vld [vmem:[%s21402_s1 + $0x108] sm:$0xff]   ;;  %v15138_v34 = vld [vmem:[%s21407_s4 + $0xe0] sm:$0xff]  }
0x11e8   : > { %v10129_v7 = vsel %vm1517_vm0, 0.0, %v10125_v9  ;;  %v10126_v0 = vrot.slane %v10124_v59, 7  ;;  %v20438_v59 = vpack.c.bf16 %v20230_v33, %v20230_v33 }
0x11e9   : > { %v10131_v39 = vsel %vm8613_vm7, %v10129_v7, 0.0 }
0x11ea   : > { %10135 = vrot.lane.b32.xlu0 %v10131_v39, %s21378_s26  ;;  %v10130_v13 = vsel %vm1517_vm0, 0.0, %v10126_v0  ;;  %v10141_v46 = vrot.slane %v10131_v39, 1  ;;  %v10151_v11 = vrot.slane %v10131_v39, 2  ;;  %v15117_v0 = vld [vmem:[%s21402_s1 + $0x118] sm:$0xff]   ;;  %s20994_s1 = scalar_lea.vmem [#allocation13], %s20177_s2 }
0x11eb   : > { %v20388_v36 = vsel %vm8613_vm7, %v10130_v13, 0.0  ;;  %v15122_v13 = vld [vmem:[%s21407_s4 + $0xc0] sm:$0xff]  }
0x11ec   : > { %10137 = vrot.lane.b32.xlu1 %v20388_v36, %s21378_s26  ;;  %v10145_v17 = vrot.slane %v20388_v36, 1  ;;  %v10153_v41 = vrot.slane %v20388_v36, 2  ;;  %v10162_v62 = vsel %vm4513_vm8, %v20388_v36, %v20230_v33  ;;  %v15126_v36 = vld [vmem:[%s21407_s4 + $0xc8] sm:$0xff]  }
0x11ee   : > { %10142 = vrot.lane.b32.xlu0 %v10141_v46, %s21378_s26  ;;  %v10165_v42 = vsel %vm4513_vm8, %v10145_v17, %v20230_v33  ;;  %v10199_v10 = vrot.slane %v10153_v41, %v18656_v19 }
0x11f0   : > { %10148 = vrot.lane.b32.xlu1 %v10145_v17, %s21378_s26  ;;  %v10235_v7 = vcombine.low %v10199_v10, %v20124_v55  ;;  %v15118_v55 = vld [vmem:[%s21406_s15 + $0x40] sm:$0xff]   ;;  %v15131_v17 = vld [vmem:[%s21407_s4 + $0x90] sm:$0xff]   ;;  %s21408_s15 = sld [smem:[#allocation50_spill]] }
0x11f1   : > { %12955 = vmatprep.subr.bf16.mxu1 %v15118_v55  ;;  %v15148_v55 = vld [vmem:[%s21407_s4 + $0xf8] sm:$0xff]  }
0x11f2   : > { %10154 = vrot.lane.b32.xlu0 %v10151_v11, %s21378_s26  ;;  %v10242_v49 = vrot.slane %v10235_v7, %v18656_v19 }
0x11f4   : > { %10156 = vrot.lane.b32.xlu1 %v10153_v41, %s21378_s26  ;;  %v10252_v2 = vpack.c.bf16 %v10242_v49, %v10242_v49  ;;  %v15135_v41 = vld [vmem:[%s21407_s4 + $0x98] sm:$0xff]  }
0x125c   : > { %v10136_v45 = vpop.permute.xlu0 %10135 }
0x125d   : > { %v10160_v60 = vsel %vm4513_vm8, 0.0, %v10136_v45  ;;  %v15133_v45 = vld [vmem:[%s21407_s4 + $0x20] sm:$0xff]  }
0x125e   : > { %v10138_v21 = vpop.permute.xlu1 %10137  ;;  %v10176_v57 = vcombine.low %v10160_v60, %v10162_v62  ;;  %v15136_v60 = vld [vmem:[%s21407_s4 + $0x68] sm:$0xff]  }
0x125f   : > { %v10161_v18 = vsel %vm4513_vm8, %v10131_v39, %v10138_v21  ;;  %v15120_v39 = vld [vmem:[%s21407_s4 + $0x48] sm:$0xff]   ;;  %v15139_v21 = vld [vmem:[%s21407_s4 + $0xa0] sm:$0xff]  }
0x1260   : > { %v10143_v22 = vpop.permute.xlu0 %10142  ;;  %v10184_v43 = vrot.slane %v10176_v57, %v18656_v19  ;;  %v15142_v62 = vld [vmem:[%s21407_s4 + $0xe8] sm:$0xff]  }
0x1261   : > { %v10163_v23 = vsel %vm4513_vm8, 0.0, %v10143_v22  ;;  %v15137_v57 = vld [vmem:[%s21407_s4 + $0x28] sm:$0xff]   ;;  %v15140_v22 = vld [vmem:[%s21407_s4 + $0x70] sm:$0xff]  }
0x1262   : > { %v10200_v35 = vcombine.low %v10161_v18, %v10163_v23  ;;  %v10149_v27 = vpop.permute.xlu1 %10148  ;;  %v15143_v18 = vld [vmem:[%s21407_s4 + $0xa8] sm:$0xff]   ;;  %v15146_v23 = vld [vmem:[%s21407_s4 + $0xf0] sm:$0xff]  }
0x1263   : > { %v10164_v4 = vsel %vm4513_vm8, %v10141_v46, %v10149_v27  ;;  %v15121_v46 = vld [vmem:[%s21407_s4 + $0x8] sm:$0xff]   ;;  %v15144_v27 = vld [vmem:[%s21407_s4 + $0x78] sm:$0xff]  }
0x1264   : > { %v10208_v20 = vrot.slane %v10200_v35, %v18656_v19  ;;  %v10155_v8 = vpop.permute.xlu0 %10154  ;;  %v15141_v35 = vld [vmem:[%s21407_s4 + $0x30] sm:$0xff]  }
0x1265   : > { %v10166_v14 = vsel %vm4513_vm8, %v21176_v48, %v10155_v8 }
0x1266   : > { %v12494_v56 = vcombine.low %v10184_v43, %v10208_v20  ;;  %v10177_v3 = vcombine.low %v10164_v4, %v10166_v14  ;;  %v10157_v12 = vpop.permute.xlu1 %10156  ;;  %v15147_v43 = vld [vmem:[%s21407_s4 + $0xb0] sm:$0xff]   ;;  %v15145_v20 = vld [vmem:[%s21407_s4 + $0x38] sm:$0xff]  }
0x1267   : > { %v10167_v38 = vsel %vm4513_vm8, %v10151_v11, %v10157_v12  ;;  %v15129_v11 = vld [vmem:[%s21407_s4 + $0x18] sm:$0xff]   ;;  %v12496_v12 = vld [vmem:[%s21408_s15] ss:$0 sm:$0xff]  ;;  %s21409_s15 = sld [smem:[#allocation38_spill]] }
0x1268   : > { %v10201_v37 = vcombine.low %v10165_v42, %v10167_v38  ;;  %v10225_v54 = vrot.slane %v12494_v56, %v18656_v19  ;;  %v10191_v16 = vrot.slane %v10177_v3, %v18656_v19 }
0x126a   : > { %v10215_v63 = vrot.slane %v10201_v37, %v18656_v19  ;;  %v10233_v40 = vcombine.high %v10225_v54, %v10225_v54  ;;  %v10248_v32 = vpack.c.bf16 %v10225_v54, %v10225_v54 }
0x126c   : > { %v12495_v50 = vcombine.low %v10191_v16, %v10215_v63  ;;  %v10249_v53 = vpack.c.bf16 %v10233_v40, %v10233_v40 }
0x126e   : > { %10583 = vmatprep.mubr.bf16.mxu0 %v10249_v53  ;;  %v10232_v61 = vrot.slane %v12495_v50, %v18656_v19 }
0x126f   : > { %10584 = vmatmul.mubr.bf16.vlgmr.msra.gmra.mrb[68].mxu0 %v10248_v32 }
0x1270   : > { %13206 = vmatpush3.bf16.msra.mxu0 %v15112_v25  ;;  %v10234_v51 = vcombine.high %v10232_v61, %v10232_v61  ;;  %13213 = vmatprep.mubr.msk.bf16.mxu0 %vm15594_vm11, %v21170_v26  ;;  %v10250_v24 = vpack.c.bf16 %v10232_v61, %v10232_v61 }
0x1271   : > { %13207 = vmatprep.subr.bf16.mxu0 %v21170_v26 }
0x1272   : > { %v10251_v30 = vpack.c.bf16 %v10234_v51, %v10234_v51 }
0x1274   : > { %13208 = vmatpush3.bf16.msra.mxu0 %v15115_v58  ;;  %10623 = vmatprep.mubr.bf16.mxu1 %v10251_v30 }
0x1275   : > { %10624 = vmatmul.mubr.bf16.vlgmr.msra.gmra.mrb[80].mxu1 %v10250_v24  ;;  %13209 = vmatprep.subr.bf16.mxu0 %v21170_v26 }
0x1276   : > { %12574 = vmatprep.mubr.msk.bf16.mxu1 %vm20432_vm15, %v20438_v59  ;;  %12956 = vmatpush3.bf16.msra.mxu1 %v15119_v6  ;;  %v15150_v6 = vld [vmem:[%s21407_s4 + $0xb8] sm:$0xff]  }
0x1277   : > { %12957 = vmatprep.subr.bf16.mxu1 %v15120_v39 }
0x1278   : > { %13210 = vmatpush3.bf16.msra.mxu0 %v15116_v52 }
0x1279   : > { %13211 = vmatprep.subr.bf16.mxu0 %v21170_v26 }
0x127a   : > { %12958 = vmatpush3.bf16.msra.mxu1 %v15121_v46 }
0x127b   : > { %12959 = vmatprep.subr.bf16.mxu1 %v15124_v5 }
0x127c   : > { %13212 = vmatpush3.bf16.msra.mxu0 %v15117_v0 }
0x127d   : > { %12977 = vmatprep.subr.bf16.mxu0 %v15122_v13 }
0x127e   : > { %12960 = vmatpush3.bf16.msra.mxu1 %v15125_v31 }
0x127f   : > { %13214 = vmatmul.mubr.msk.bf16.vlgmr.msra.gmra.mrb[72].mxu0 %vm4513_vm8, %v10252_v2  ;;  %12961 = vmatprep.subr.bf16.mxu1 %v15128_v15 }
0x1280   : > { %12978 = vmatpush3.bf16.msra.mxu0 %v15123_v1 }
0x1281   : > { %12979 = vmatprep.subr.bf16.mxu0 %v15126_v36 }
0x1282   : > { %12962 = vmatpush3.bf16.msra.mxu1 %v15129_v11 }
0x1283   : > { %12963 = vmatprep.subr.bf16.mxu1 %v15132_v47  ;;  %v15151_v47 = vld [vmem:[%s21407_s4 + $0x108] sm:$0xff]  }
0x1284   : > { %12980 = vmatpush3.bf16.msra.mxu0 %v15127_v44 }
0x1285   : > { %12981 = vmatprep.subr.bf16.mxu0 %v15130_v28  ;;  %v15149_v28 = vld [vmem:[%s21407_s4 + $0x100] sm:$0xff]  }
0x1286   : > { %12964 = vmatpush3.bf16.msra.mxu1 %v15133_v45  ;;  %v15153_v45 = vld [vmem:[%s21407_s4 + $0x118] sm:$0xff]  }
0x1287   : > { %12965 = vmatprep.subr.bf16.mxu1 %v15136_v60  ;;  %v20513_v60 = vpack.c.bf16 %v21176_v48, %v21176_v48 }
0x1288   : > { %12982 = vmatpush3.bf16.msra.mxu0 %v15131_v17 }
0x1289   : > { %12983 = vmatprep.subr.bf16.mxu0 %v15134_v29 }
0x128a   : > { %12966 = vmatpush3.bf16.msra.mxu1 %v15137_v57 }
0x128b   : > { %12967 = vmatprep.subr.bf16.mxu1 %v15140_v22 }
0x128c   : > { %12984 = vmatpush3.bf16.msra.mxu0 %v15135_v41 }
0x128d   : > { %12985 = vmatprep.subr.bf16.mxu0 %v15138_v34  ;;  %v15152_v34 = vld [vmem:[%s21407_s4 + $0x110] sm:$0xff]   ;;  %s20580_s4 = sand.u32 1, %s15847_s22  }
0x128e   : > { %12968 = vmatpush3.bf16.msra.mxu1 %v15141_v35 }
0x128f   : > { %12969 = vmatprep.subr.bf16.mxu1 %v15144_v27 }
0x1290   : > { %12986 = vmatpush3.bf16.msra.mxu0 %v15139_v21 }
0x1291   : > { %12987 = vmatprep.subr.bf16.mxu0 %v15142_v62 }
0x1292   : > { %12970 = vmatpush3.bf16.msra.mxu1 %v15145_v20 }
0x1293   : > { %13217 = vmatprep.subr.bf16.mxu1 %v21170_v26 }
0x1294   : > { %12988 = vmatpush3.bf16.msra.mxu0 %v15143_v18 }
0x1295   : > { %12989 = vmatprep.subr.bf16.mxu0 %v15146_v23 }
0x1298   : > { %12990 = vmatpush3.bf16.msra.mxu0 %v15147_v43 }
0x1299   : > { %12991 = vmatprep.subr.bf16.mxu0 %v15148_v55 }
0x129c   : > { %12992 = vmatpush3.bf16.msra.mxu0 %v15150_v6 }
0x1342   : > { %v12922_v8 = vpop.f32.mrb[68].mxu0 }
0x1343   : > { %v12923_v4 = vpop.f32.mrb[69].mxu0 }
0x1344   : > { %v12924_v14 = vadd.f32 %v12923_v4, %v12922_v8  ;;  %v12925_v56 = vpop.f32.mrb[70].mxu0 }
0x1345   : > { %v12926_v3 = vpop.f32.mrb[71].mxu0 }
0x1346   : > { %v10586_v37 = vadd.f32 %v12924_v14, %v12496_v12 }
0x1348   : > { %v12944_v42 = vpop.f32.mrb[80].mxu1 }
0x1349   : > { %v12945_v38 = vpop.f32.mrb[81].mxu1 }
0x134a   : > { %v12946_v54 = vadd.f32 %v12945_v38, %v12944_v42  ;;  %v12947_v16 = vpop.f32.mrb[82].mxu1 }
0x134b   : > { %v12948_v63 = vpop.f32.mrb[83].mxu1 }
0x134c   : > { %v10626_v40 = vadd.f32 %v12946_v54, %v10586_v37 }
0x1352   : > { %v10665_v50 = vpop.f32.mrb[72].mxu0 }
0x1353   : > { %v10666_v53 = vadd.f32 %v10665_v50, %v10626_v40  ;;  %v13215_v25 = vpop.f32.mrb[73].mxu0 }
0x1354   : > { %v10668_v32 = vpop.f32.mrb[74].mxu0 }
0x1355   : > { %v10671_v61 = vmax.f32 %v10666_v53, 0.0  ;;  %v13216_v58 = vpop.f32.mrb[75].mxu0 }
0x1357   : > { %v10680_v51 = vrot.slane %v10671_v61, %v18656_v19  ;;  %10672 = vst.msk [vmem:[%s20994_s1] sm:$0xf] %vm8963_vm5, %v10671_v61  ;;  %s21410_s1 = smov %s21409_s15 }
0x1358   : > { %v15155_v21 = vld [vmem:[%s21410_s1] sm:$0xff]   ;;  %v15156_v62 = vld [vmem:[%s21410_s1 + $0x48] sm:$0xff]   ;;  %v15160_v35 = vld [vmem:[%s21410_s1 + $0x50] sm:$0xff]  }
0x1359   : > { %v10681_v10 = vcombine.high %v10680_v51, %v10680_v51  ;;  %v10685_v30 = vsel %vm10684_vm3, %v10680_v51, -inf  ;;  %v15158_v57 = vld [vmem:[%s21410_s1 + $0xc0] sm:$0xff]   ;;  %v15162_v18 = vld [vmem:[%s21410_s1 + $0xc8] sm:$0xff]   ;;  %v15166_v43 = vld [vmem:[%s21410_s1 + $0xd0] sm:$0xff]  }
0x135a   : > { %v15159_v22 = vld [vmem:[%s21410_s1 + $0x80] sm:$0xff]   ;;  %v15157_v23 = vld [vmem:[%s21410_s1 + $0x8] sm:$0xff]   ;;  %v15161_v20 = vld [vmem:[%s21410_s1 + $0x10] sm:$0xff]  }
0x135b   : > { %v10686_v24 = vsel %vm10684_vm3, %v10681_v10, -inf  ;;  %v15163_v27 = vld [vmem:[%s21410_s1 + $0x88] sm:$0xff]   ;;  %v15164_v8 = vld [vmem:[%s21410_s1 + $0x58] sm:$0xff]   ;;  %v15167_v4 = vld [vmem:[%s21410_s1 + $0x90] sm:$0xff]  }
0x135c   : > { %v10687_v52 = vmax.f32 %v10685_v30, %v10686_v24  ;;  %v15170_v14 = vld [vmem:[%s21410_s1 + $0xd8] sm:$0xff]   ;;  %v15168_v3 = vld [vmem:[%s21410_s1 + $0x60] sm:$0xff]   ;;  %v15172_v37 = vld [vmem:[%s21410_s1 + $0x68] sm:$0xff]  }
0x135d   : > { %v15165_v56 = vld [vmem:[%s21410_s1 + $0x18] sm:$0xff]   ;;  %v15174_v42 = vld [vmem:[%s21410_s1 + $0xe0] sm:$0xff]   ;;  %v15178_v16 = vld [vmem:[%s21410_s1 + $0xe8] sm:$0xff]  }
0x135e   : > { %v10688_v7 = vsel %vm10684_vm3, %v10687_v52, -inf  ;;  %v15171_v12 = vld [vmem:[%s21410_s1 + $0x98] sm:$0xff]   ;;  %v15169_v38 = vld [vmem:[%s21410_s1 + $0x20] sm:$0xff]   ;;  %v15173_v63 = vld [vmem:[%s21410_s1 + $0x28] sm:$0xff]  }
0x135f   : > { %v10689_v0 = vrot.slane %v10688_v7, 4  ;;  %v15175_v54 = vld [vmem:[%s21410_s1 + $0xa0] sm:$0xff]   ;;  %v15176_v40 = vld [vmem:[%s21410_s1 + $0x70] sm:$0xff]   ;;  %v15179_v50 = vld [vmem:[%s21410_s1 + $0xa8] sm:$0xff]  }
0x1360   : > { %v15182_v53 = vld [vmem:[%s21410_s1 + $0xf0] sm:$0xff]   ;;  %v15180_v32 = vld [vmem:[%s21410_s1 + $0x78] sm:$0xff]  }
0x1361   : > { %v10690_v49 = vmax.f32 %v10688_v7, %v10689_v0  ;;  %v15177_v25 = vld [vmem:[%s21410_s1 + $0x30] sm:$0xff]   ;;  %v15181_v58 = vld [vmem:[%s21410_s1 + $0x38] sm:$0xff]  }
0x1362   : > { %v15183_v61 = vld [vmem:[%s21410_s1 + $0xb0] sm:$0xff]   ;;  %v15189_v9 = vld [vmem:[%s21410_s1 + $0x118] sm:$0xff]  }
0x1363   : > { %v10691_v2 = vrot.slane %v10690_v49, 2 }
0x1365   : > { %v10692_v39 = vmax.f32 %v10690_v49, %v10691_v2 }
0x1367   : > { %v10693_v19 = vrot.slane %v10692_v39, 1 }
0x1369   : > { %v10694_v13 = vmax.f32 %v10692_v39, %v10693_v19 }
0x136b   : > { %v10695_v1 = vsel %vm1517_vm0, 0.0, %v10694_v13  ;;  %v15184_v13 = vld [vmem:[%s21410_s1 + $0xf8] sm:$0xff]  }
0x136c   : > { %v10697_v36 = vsel %vm10696_vm4, %v10695_v1, 0.0  ;;  %v15186_v1 = vld [vmem:[%s21410_s1 + $0xb8] sm:$0xff]  }
0x136d   : > { %10699 = vrot.lane.b32.xlu0 %v10697_v36, %s21378_s26  ;;  %v10704_v46 = vrot.slane %v10697_v36, 2  ;;  %v10702_v5 = vrot.slane %v10697_v36, 1 }
0x136f   : > { %10705 = vrot.lane.b32.xlu1 %v10704_v46, %s21378_s26  ;;  %v10710_v17 = vsel %vm4513_vm8, %v10702_v5, %v20230_v33 }
0x1370   : > { %v10714_v41 = vpack.c.bf16 %v10710_v17, %v10710_v17 }
0x13df   : > { %v10700_v44 = vpop.permute.xlu0 %10699 }
0x13e0   : > { %v12578_v31 = vpack.c.bf16 %v10700_v44, %v10700_v44 }
0x13e1   : > { %v10706_v15 = vpop.permute.xlu1 %10705 }
0x13e2   : > { %v10711_v29 = vsel %vm4513_vm8, %v21176_v48, %v10706_v15  ;;  %12579 = vmatmul.mubr.msk.bf16.vlgmr.msra.gmra.mrb[84].mxu1 %vm20432_vm15, %v12578_v31 }
0x13e3   : > { %v10715_v11 = vpack.c.bf16 %v10711_v29, %v10711_v29  ;;  %13218 = vmatpush3.bf16.msra.mxu1 %v15149_v28  ;;  %13225 = vmatprep.mubr.msk.bf16.mxu1 %vm15594_vm11, %v21170_v26 }
0x13e4   : > { %13219 = vmatprep.subr.bf16.mxu1 %v21170_v26 }
0x13e5   : > { %11081 = vmatprep.mubr.bf16.mxu0 %v10715_v11 }
0x13e6   : > { %11082 = vmatmul.mubr.bf16.vlgmr.msra.gmra.mrb[76].mxu0 %v10714_v41 }
0x13e7   : > { %13220 = vmatpush3.bf16.msra.mxu1 %v15151_v47  ;;  %12621 = vmatprep.mubr.msk.bf16.mxu0 %vm20432_vm15, %v20438_v59  ;;  %v15154_v59 = vld [vmem:[%s21409_s15 + $0x40] sm:$0xff]   ;;  %s21411_s15 = sld [smem:[#allocation51_spill]] }
0x13e8   : > { %13221 = vmatprep.subr.bf16.mxu1 %v21170_v26  ;;  %13004 = vmatprep.subr.bf16.mxu0 %v15154_v59 }
0x13e9   : > { %13005 = vmatpush3.bf16.msra.mxu0 %v15155_v21 }
0x13ea   : > { %13006 = vmatprep.subr.bf16.mxu0 %v15156_v62 }
0x13eb   : > { %13222 = vmatpush3.bf16.msra.mxu1 %v15152_v34  ;;  %v15185_v34 = vld [vmem:[%s21410_s1 + $0x100] sm:$0xff]  }
0x13ec   : > { %13223 = vmatprep.subr.bf16.mxu1 %v21170_v26 }
0x13ed   : > { %13007 = vmatpush3.bf16.msra.mxu0 %v15157_v23  ;;  %v10789_v52 = vld [vmem:[%s21411_s15] sm:$0x1]  ;;  %s20995_s15 = scalar_lea.vmem [#allocation15], %s19259_s13 }
0x13ee   : > { %13008 = vmatprep.subr.bf16.mxu0 %v15160_v35 }
0x13ef   : > { %13224 = vmatpush3.bf16.msra.mxu1 %v15153_v45 }
0x13f0   : > { %13026 = vmatprep.subr.bf16.mxu1 %v15158_v57 }
0x13f1   : > { %13009 = vmatpush3.bf16.msra.mxu0 %v15161_v20 }
0x13f2   : > { %13226 = vmatmul.mubr.msk.bf16.vlgmr.msra.gmra.mrb[88].mxu1 %vm4513_vm8, %v20513_v60  ;;  %13010 = vmatprep.subr.bf16.mxu0 %v15164_v8 }
0x13f3   : > { %13027 = vmatpush3.bf16.msra.mxu1 %v15159_v22  ;;  %v15187_v22 = vld [vmem:[%s21410_s1 + $0x108] sm:$0xff]  }
0x13f4   : > { %13028 = vmatprep.subr.bf16.mxu1 %v15162_v18 }
0x13f5   : > { %13011 = vmatpush3.bf16.msra.mxu0 %v15165_v56 }
0x13f6   : > { %13012 = vmatprep.subr.bf16.mxu0 %v15168_v3 }
0x13f7   : > { %13029 = vmatpush3.bf16.msra.mxu1 %v15163_v27 }
0x13f8   : > { %13030 = vmatprep.subr.bf16.mxu1 %v15166_v43 }
0x13f9   : > { %13013 = vmatpush3.bf16.msra.mxu0 %v15169_v38 }
0x13fa   : > { %13014 = vmatprep.subr.bf16.mxu0 %v15172_v37 }
0x13fb   : > { %13031 = vmatpush3.bf16.msra.mxu1 %v15167_v4 }
0x13fc   : > { %13032 = vmatprep.subr.bf16.mxu1 %v15170_v14 }
0x13fd   : > { %13015 = vmatpush3.bf16.msra.mxu0 %v15173_v63 }
0x13fe   : > { %13016 = vmatprep.subr.bf16.mxu0 %v15176_v40 }
0x13ff   : > { %13033 = vmatpush3.bf16.msra.mxu1 %v15171_v12 }
0x1400   : > { %13034 = vmatprep.subr.bf16.mxu1 %v15174_v42 }
0x1401   : > { %13017 = vmatpush3.bf16.msra.mxu0 %v15177_v25 }
0x1402   : > { %13018 = vmatprep.subr.bf16.mxu0 %v15180_v32 }
0x1403   : > { %13035 = vmatpush3.bf16.msra.mxu1 %v15175_v54 }
0x1404   : > { %13036 = vmatprep.subr.bf16.mxu1 %v15178_v16 }
0x1405   : > { %13019 = vmatpush3.bf16.msra.mxu0 %v15181_v58 }
0x1406   : > { %13229 = vmatprep.subr.bf16.mxu0 %v21170_v26 }
0x1407   : > { %13037 = vmatpush3.bf16.msra.mxu1 %v15179_v50 }
0x1408   : > { %13038 = vmatprep.subr.bf16.mxu1 %v15182_v53 }
0x140b   : > { %13039 = vmatpush3.bf16.msra.mxu1 %v15183_v61 }
0x140c   : > { %13040 = vmatprep.subr.bf16.mxu1 %v15184_v13 }
0x140f   : > { %13041 = vmatpush3.bf16.msra.mxu1 %v15186_v1 }
0x14b5   : > { %v12971_v51 = vpop.f32.mrb[84].mxu1 }
0x14b6   : > { %v12972_v10 = vpop.f32.mrb[85].mxu1 }
0x14b7   : > { %v12973_v30 = vadd.f32 %v12972_v10, %v12971_v51  ;;  %v12974_v24 = vpop.f32.mrb[86].mxu1 }
0x14b8   : > { %v12975_v7 = vpop.f32.mrb[87].mxu1 }
0x14b9   : > { %v12993_v0 = vpop.f32.mrb[76].mxu0  ;;  %v11044_v2 = vadd.f32 %v12973_v30, %v10789_v52 }
0x14ba   : > { %v12994_v49 = vpop.f32.mrb[77].mxu0 }
0x14bb   : > { %v12995_v55 = vadd.f32 %v12994_v49, %v12993_v0  ;;  %v12996_v6 = vpop.f32.mrb[78].mxu0 }
0x14bc   : > { %v12997_v39 = vpop.f32.mrb[79].mxu0 }
0x14bd   : > { %v11084_v19 = vadd.f32 %v12995_v55, %v11044_v2 }
0x14c5   : > { %v11123_v36 = vpop.f32.mrb[88].mxu1 }
0x14c6   : > { %v11124_v46 = vadd.f32 %v11123_v36, %v11084_v19  ;;  %v13227_v5 = vpop.f32.mrb[89].mxu1 }
0x14c7   : > { %v11126_v44 = vpop.f32.mrb[90].mxu1 }
0x14c8   : > { %v11129_v28 = vmax.f32 %v11124_v46, 0.0  ;;  %v13228_v31 = vpop.f32.mrb[91].mxu1 }
0x14ca   : > { %11131 = vst.msk [vmem:[%s20995_s15] sm:$0x1] %vm11130_vm9, %v11129_v28  ;;  %v11133_v15 = vrot.slane %v11129_v28, 7  ;;  %s11674_s15 = sshll.u32 %s19758_s5, 4  ;;  %s15595_s5 = smov [#allocation4]   ;;  %s20577_s15 = int_to_ptr.vmem [resolvable:$true] %s11674_s15 }
0x14cb   : > { %s15198_s17 = sshll.u32 %s15595_s5, 4  ;;  %s15199_s17 = int_to_ptr.vmem [resolvable:$false] %s15198_s17 }
0x14cc   : > { %v11135_v17 = vsel %vm1517_vm0, 0.0, %v11133_v15  ;;  %s15200_s19 = scalar_lea.vmem %s15199_s17, 2048  ;;  %p15201_p0 = scmp.lt.s32.totalorder %s20589_s11, %s15199_s17 }
0x14cd   : > { %v11136_v29 = vsel %vm10696_vm4, %v11135_v17, 0.0  ;;  %p15202_p1 = scmp.lt.s32.totalorder %s15200_s19, %s15194_s12 }
0x14ce   : > { %11138 = vrot.lane.b32.xlu0 %v11136_v29, %s21378_s26  ;;  %v11143_v11 = vrot.slane %v11136_v29, 2  ;;  %v11141_v47 = vrot.slane %v11136_v29, 1 }
0x14cf   : > { %p15203_p2 = por %p15202_p1, %p15201_p0 }
0x14d0   : > { %11144 = vrot.lane.b32.xlu1 %v11143_v11, %s21378_s26  ;;  %v11148_v21 = vsel %vm4513_vm8, %v11141_v47, %v20230_v33  ;;  %s21412_s26 = sld [smem:[#allocation56_spill]] }
0x14d1   : > { %v11151_v33 = vpack.c.bf16 %v11148_v21, %v11148_v21  ;;  %p15204_p3 = pnand %p15203_p2, %p15197_p13 }
0x14d6   : > { %s20586_s10 = scalar_lea.hbm %s21412_s26, %s21002_s9 }
0x1540   : > { %v11139_v41 = vpop.permute.xlu0 %11138 }
0x1541   : > { %v12625_v45 = vpack.c.bf16 %v11139_v41, %v11139_v41 }
0x1542   : > { %v11145_v59 = vpop.permute.xlu1 %11144 }
0x1543   : > { %v11149_v62 = vsel %vm4513_vm8, %v21176_v48, %v11145_v59  ;;  %12626 = vmatmul.mubr.msk.bf16.vlgmr.msra.gmra.mrb[80].mxu0 %vm20432_vm15, %v12625_v45  ;;  %v15188_v48 = vld [vmem:[%s21410_s1 + $0x110] sm:$0xff]   ;;  %s21007_s1 = scalar_lea.sflag [#allocation5], %s20580_s4 }
0x1544   : > { %v11152_v57 = vpack.c.bf16 %v11149_v62, %v11149_v62  ;;  %13230 = vmatpush3.bf16.msra.mxu0 %v15185_v34  ;;  %13237 = vmatprep.mubr.msk.bf16.mxu0 %vm15594_vm11, %v21170_v26 }
0x1545   : > { %13231 = vmatprep.subr.bf16.mxu0 %v21170_v26 }
0x1546   : > { %11514 = vmatprep.mubr.bf16.mxu1 %v11152_v57 }
0x1547   : > { %11515 = vmatmul.mubr.bf16.vlgmr.msra.gmra.mrb[92].mxu1 %v11151_v33 }
0x1548   : > { %13232 = vmatpush3.bf16.msra.mxu0 %v15187_v22 }
0x1549   : > { %13233 = vmatprep.subr.bf16.mxu0 %v21170_v26 }
0x154c   : > { %13234 = vmatpush3.bf16.msra.mxu0 %v15188_v48 }
0x154d   : > { %13235 = vmatprep.subr.bf16.mxu0 %v21170_v26 }
0x1550   : > { %13236 = vmatpush3.bf16.msra.mxu0 %v15189_v9 }
0x1553   : > { %13238 = vmatmul.mubr.msk.bf16.vlgmr.msra.gmra.mrb[84].mxu0 %vm4513_vm8, %v20513_v60 }
0x1554   : > { %15207 = shalt.err (!%p15204_p3)
}
0x1555   : > { %s15208_s18 = scalar_lea.hbm %s20586_s10, 1024  ;;  %s15212_s5 = scalar_lea.hbm %s21412_s26, 2048 }
0x1556   : > { %p15209_p4 = scmp.ne.s32.totalorder %s20586_s10, %s15208_s18  ;;  %p15213_p9 = scmp.lt.u32.totalorder %s20586_s10, %s21412_s26 }
0x1557   : > { %p15214_p10 = scmp.lt.u32.totalorder %s15212_s5, %s15208_s18  ;;  %p15216_p12 = scmp.lt.u32.totalorder %s15208_s18, %s20586_s10 }
0x1558   : > { %p15210_p7 = pnand %p15209_p4, %p15866_p5 }
0x1559   : > { %p15215_p11 = por %p15214_p10, %p15213_p9 }
0x155a   : > { %p15211_p8 = pneg %p15210_p7 }
0x155b   : > { %p15217_p0 = por %p15216_p12, %p15215_p11 }
0x155d   : > { %p15218_p13 = pnand %p15217_p0, %p15211_p8 }
0x155f   : > { %15221 = shalt.err (!%p15218_p13)
}
0x1560   : > { %s21011_s17 = smov 128   ;;  %s21413_s19 = smov 8  }
0x1561   : > { %s21414_s12 = sld [smem:[#allocation57_spill]]  ;;  %s21415_s9 = sld [smem:[#allocation59_spill]] }
0x1562   : > { %13244 = dma.vmem_to_hbm [thread:$0]  (%p15866_p5), %s20589_s11, 1024, %s20586_s10, %s21007_s1, %s21011_s17, %s21011_s17, %s21413_s19  }
0x1563   : > { %s12658_s18 = sshll.u32 %s15847_s22, 8  ;;  %s11693_s5 = sshll.u32 %s20101_s3, 4  ;;  %s20622_s5 = int_to_ptr.vmem [resolvable:$true] %s11693_s5 }
0x1564   : > { %s21010_s24 = scalar_lea.sflag [#allocation8], %s20580_s4  ;;  %s15222_s25 = scalar_lea.vmem %s20622_s5, 256 }
0x1565   : > { %p15223_p1 = scmp.ne.s32.totalorder %s20622_s5, %s15222_s25  ;;  %s15597_s26 = smov [#allocation7]  }
0x1566   : > { %s15226_s27 = sshll.u32 %s15597_s26, 4  ;;  %s15227_s27 = int_to_ptr.vmem [resolvable:$false] %s15226_s27 }
0x1567   : > { %s20617_s20 = scalar_lea.hbm %s21414_s12, %s12658_s18  ;;  %s20620_s21 = scalar_lea.hbm %s21415_s9, %s12658_s18 }
0x1568   : > { %p15224_p2 = pnand %p15223_p1, %p15866_p5  ;;  %s15228_s10 = scalar_lea.vmem %s15227_s27, 512 }
0x1569   : > { %p15229_p4 = scmp.lt.s32.totalorder %s20622_s5, %s15227_s27  ;;  %p15230_p7 = scmp.lt.s32.totalorder %s15228_s10, %s15222_s25 }
0x156a   : > { %p15225_p3 = pneg %p15224_p2 }
0x156b   : > { %p15231_p8 = por %p15230_p7, %p15229_p4 }
0x156d   : > { %p15232_p9 = pnand %p15231_p8, %p15225_p3 }
0x156f   : > { %15235 = shalt.err (!%p15232_p9)
}
0x1570   : > { %s15236_s3 = scalar_lea.hbm %s20620_s21, 256  ;;  %s15240_s11 = scalar_lea.hbm %s21415_s9, 512 }
0x1571   : > { %p15237_p10 = scmp.ne.s32.totalorder %s20620_s21, %s15236_s3  ;;  %p15241_p0 = scmp.lt.u32.totalorder %s20620_s21, %s21415_s9 }
0x1572   : > { %p15242_p13 = scmp.lt.u32.totalorder %s15240_s11, %s15236_s3  ;;  %p15244_p2 = scmp.lt.u32.totalorder %s15236_s3, %s20620_s21 }
0x1573   : > { %p15238_p11 = pnand %p15237_p10, %p15866_p5 }
0x1574   : > { %p15243_p1 = por %p15242_p13, %p15241_p0 }
0x1575   : > { %p15239_p12 = pneg %p15238_p11 }
0x1576   : > { %p15245_p4 = por %p15244_p2, %p15243_p1 }
0x1578   : > { %p15246_p3 = pnand %p15245_p4, %p15239_p12 }
0x157a   : > { %15249 = shalt.err (!%p15246_p3)
}
0x157b   : > { %s21416_s25 = sld [smem:[#allocation61_spill]]  ;;  %s20648_s27 = sshll.u32 %s15847_s22, 6 }
0x157c   : > { %13246 = dma.vmem_to_hbm [thread:$0]  (%p15866_p5), %s20622_s5, 256, %s20620_s21, %s21010_s24, %s21011_s17, %s21011_s17, %s21413_s19  }
0x157d   : > { %s21417_s26 = scalar_lea.vmem [#allocation10], %s20177_s2  ;;  %s21013_s3 = scalar_lea.sflag [#allocation11], %s20580_s4 }
0x157e   : > { %s11722_s18 = sshll.u32 %s21417_s26, 4  ;;  %s15598_s1 = smov [#allocation10]   ;;  %s11723_s18 = int_to_ptr.vmem [resolvable:$true] %s11722_s18 }
0x157f   : > { %s15250_s11 = scalar_lea.vmem %s11723_s18, 64  ;;  %s15254_s9 = sshll.u32 %s15598_s1, 4  ;;  %s15255_s9 = int_to_ptr.vmem [resolvable:$false] %s15254_s9 }
0x1580   : > { %p15251_p7 = scmp.ne.s32.totalorder %s11723_s18, %s15250_s11  ;;  %s15256_s28 = scalar_lea.vmem %s15255_s9, 128 }
0x1581   : > { %s20654_s10 = scalar_lea.hbm %s21416_s25, %s20648_s27  ;;  %p15257_p10 = scmp.lt.s32.totalorder %s11723_s18, %s15255_s9 }
0x1582   : > { %p15252_p8 = pnand %p15251_p7, %p15866_p5  ;;  %p15258_p11 = scmp.lt.s32.totalorder %s15256_s28, %s15250_s11 }
0x1584   : > { %p15253_p9 = pneg %p15252_p8  ;;  %p15259_p12 = por %p15258_p11, %p15257_p10 }
0x1586   : > { %p15260_p0 = pnand %p15259_p12, %p15253_p9 }
0x1588   : > { %15263 = shalt.err (!%p15260_p0)
}
0x1589   : > { %s15264_s21 = scalar_lea.hbm %s20654_s10, 64  ;;  %s15268_s1 = scalar_lea.hbm %s21416_s25, 128 }
0x158a   : > { %p15265_p13 = scmp.ne.s32.totalorder %s20654_s10, %s15264_s21  ;;  %p15269_p4 = scmp.lt.u32.totalorder %s20654_s10, %s21416_s25 }
0x158b   : > { %p15270_p3 = scmp.lt.u32.totalorder %s15268_s1, %s15264_s21  ;;  %p15272_p8 = scmp.lt.u32.totalorder %s15264_s21, %s20654_s10 }
0x158c   : > { %p15266_p1 = pnand %p15265_p13, %p15866_p5 }
0x158d   : > { %p15271_p7 = por %p15270_p3, %p15269_p4 }
0x158e   : > { %p15267_p2 = pneg %p15266_p1 }
0x158f   : > { %p15273_p10 = por %p15272_p8, %p15271_p7 }
0x1591   : > { %p15274_p9 = pnand %p15273_p10, %p15267_p2 }
0x1593   : > { %15277 = shalt.err (!%p15274_p9)
}
0x1594   : > { %s21418_s9 = sld [smem:[#allocation55_spill]]  ;;  %s20674_s28 = scalar_lea.hbm %s21055_s14, %s20648_s27 }
0x1595   : > { %13248 = dma.vmem_to_hbm [thread:$0]  (%p15866_p5), %s11723_s18, 64, %s20654_s10, %s21013_s3  }
0x1596   : > { %s21419_s5 = scalar_lea.vmem [#allocation13], %s20177_s2  ;;  %s21420_s11 = sshll.u32 %s15847_s22, 10 }
0x1597   : > { %s11748_s26 = sshll.u32 %s21419_s5, 4  ;;  %s11615_s1 = scalar_lea.sflag [#allocation14], %s20580_s4  ;;  %s20678_s26 = int_to_ptr.vmem [resolvable:$true] %s11748_s26 }
0x1598   : > { %s15278_s24 = scalar_lea.vmem %s20678_s26, 64  ;;  %s15599_s17 = smov [#allocation13]  }
0x1599   : > { %p15279_p11 = scmp.ne.s32.totalorder %s20678_s26, %s15278_s24  ;;  %s15282_s18 = sshll.u32 %s15599_s17, 4  ;;  %s15283_s18 = int_to_ptr.vmem [resolvable:$false] %s15282_s18 }
0x159a   : > { %s20683_s21 = scalar_lea.hbm %s21418_s9, %s21420_s11  ;;  %s15284_s10 = scalar_lea.vmem %s15283_s18, 128 }
0x159b   : > { %p15280_p12 = pnand %p15279_p11, %p15866_p5  ;;  %p15285_p13 = scmp.lt.s32.totalorder %s20678_s26, %s15283_s18 }
0x159c   : > { %p15286_p1 = scmp.lt.s32.totalorder %s15284_s10, %s15278_s24 }
0x159d   : > { %p15281_p0 = pneg %p15280_p12 }
0x159e   : > { %p15287_p2 = por %p15286_p1, %p15285_p13 }
0x15a0   : > { %p15288_p4 = pnand %p15287_p2, %p15281_p0 }
0x15a2   : > { %15291 = shalt.err (!%p15288_p4)
}
0x15a3   : > { %s15292_s5 = scalar_lea.hbm %s20674_s28, 64  ;;  %s15296_s17 = scalar_lea.hbm %s21055_s14, 128 }
0x15a4   : > { %p15293_p3 = scmp.ne.s32.totalorder %s20674_s28, %s15292_s5  ;;  %p15297_p10 = scmp.lt.u32.totalorder %s20674_s28, %s21055_s14 }
0x15a5   : > { %p15298_p9 = scmp.lt.u32.totalorder %s15296_s17, %s15292_s5  ;;  %p15300_p12 = scmp.lt.u32.totalorder %s15292_s5, %s20674_s28 }
0x15a6   : > { %p15294_p7 = pnand %p15293_p3, %p15866_p5 }
0x15a7   : > { %p15299_p11 = por %p15298_p9, %p15297_p10 }
0x15a8   : > { %p15295_p8 = pneg %p15294_p7 }
0x15a9   : > { %p15301_p13 = por %p15300_p12, %p15299_p11 }
0x15ab   : > { %p15302_p0 = pnand %p15301_p13, %p15295_p8 }
0x15ad   : > { %15305 = shalt.err (!%p15302_p0)
}
0x15ae   : > { %s21421_s24 = sld [smem:[#allocation60_spill]]  ;;  %s11642_s11 = sshll.u32 %s19273_s23, 4  ;;  %s20710_s11 = int_to_ptr.vmem [resolvable:$true] %s11642_s11 }
0x15af   : > { %13250 = dma.vmem_to_hbm [thread:$0]  (%p15866_p5), %s20678_s26, 64, %s20674_s28, %s11615_s1  }
0x15b0   : > { %s21422_s10 = scalar_lea.vmem [#allocation9], %s20177_s2  ;;  %s11575_s17 = scalar_lea.sflag [#allocation3], %s19259_s13 }
0x15b1   : > { %s20714_s5 = sshll.u32 %s21422_s10, 4  ;;  %s15306_s3 = scalar_lea.vmem %s20710_s11, 1024  ;;  %s11710_s5 = int_to_ptr.vmem [resolvable:$true] %s20714_s5 }
0x15b2   : > { %p15307_p1 = scmp.ne.s32.totalorder %s20710_s11, %s15306_s3  ;;  %s15600_s14 = smov [#allocation2]  }
0x15b3   : > { %s15310_s25 = sshll.u32 %s15600_s14, 4  ;;  %s15311_s25 = int_to_ptr.vmem [resolvable:$false] %s15310_s25 }
0x15b4   : > { %s20708_s18 = scalar_lea.hbm %s21421_s24, %s20648_s27  ;;  %p15308_p2 = pnand %p15307_p1, %p15866_p5 }
0x15b5   : > { %s15312_s23 = scalar_lea.vmem %s15311_s25, 2048  ;;  %p15313_p3 = scmp.lt.s32.totalorder %s20710_s11, %s15311_s25 }
0x15b6   : > { %p15309_p4 = pneg %p15308_p2  ;;  %p15314_p7 = scmp.lt.s32.totalorder %s15312_s23, %s15306_s3 }
0x15b8   : > { %p15315_p8 = por %p15314_p7, %p15313_p3 }
0x15ba   : > { %p15316_p10 = pnand %p15315_p8, %p15309_p4 }
0x15bc   : > { %15319 = shalt.err (!%p15316_p10)
}
0x15bd   : > { %s15320_s28 = scalar_lea.hbm %s20683_s21, 1024  ;;  %s15324_s14 = scalar_lea.hbm %s21418_s9, 2048 }
0x15be   : > { %p15321_p9 = scmp.ne.s32.totalorder %s20683_s21, %s15320_s28  ;;  %p15325_p13 = scmp.lt.u32.totalorder %s20683_s21, %s21418_s9 }
0x15bf   : > { %p15326_p0 = scmp.lt.u32.totalorder %s15324_s14, %s15320_s28  ;;  %p15328_p2 = scmp.lt.u32.totalorder %s15320_s28, %s20683_s21 }
0x15c0   : > { %p15322_p11 = pnand %p15321_p9, %p15866_p5 }
0x15c1   : > { %p15327_p1 = por %p15326_p0, %p15325_p13 }
0x15c2   : > { %p15323_p12 = pneg %p15322_p11 }
0x15c3   : > { %p15329_p3 = por %p15328_p2, %p15327_p1 }
0x15c5   : > { %p15330_p4 = pnand %p15329_p3, %p15323_p12 }
0x15c7   : > { %15333 = shalt.err (!%p15330_p4)
}
0x15c8   : > { %s21423_s25 = smov 128   ;;  %s15334_s3 = scalar_lea.vmem %s20577_s15, 256 }
0x15c9   : > { %13243 = dma.vmem_to_hbm [thread:$0]  (%p15866_p5), %s20710_s11, 1024, %s20683_s21, %s11575_s17, %s21423_s25, %s21423_s25, %s21413_s19  }
0x15ca   : > { %p15335_p7 = scmp.ne.s32.totalorder %s20577_s15, %s15334_s3  ;;  %s15601_s26 = smov [#allocation6]  }
0x15cb   : > { %s15338_s10 = sshll.u32 %s15601_s26, 4  ;;  %s15339_s10 = int_to_ptr.vmem [resolvable:$false] %s15338_s10 }
0x15cc   : > { %p15336_p8 = pnand %p15335_p7, %p15866_p5  ;;  %s15340_s23 = scalar_lea.vmem %s15339_s10, 512 }
0x15cd   : > { %p15341_p9 = scmp.lt.s32.totalorder %s20577_s15, %s15339_s10  ;;  %p15342_p11 = scmp.lt.s32.totalorder %s15340_s23, %s15334_s3 }
0x15ce   : > { %p15337_p10 = pneg %p15336_p8 }
0x15cf   : > { %p15343_p12 = por %p15342_p11, %p15341_p9 }
0x15d1   : > { %p15344_p13 = pnand %p15343_p12, %p15337_p10 }
0x15d3   : > { %15347 = shalt.err (!%p15344_p13)
}
0x15d4   : > { %s15348_s21 = scalar_lea.hbm %s20617_s20, 256  ;;  %s15352_s11 = scalar_lea.hbm %s21414_s12, 512 }
0x15d5   : > { %p15349_p0 = scmp.ne.s32.totalorder %s20617_s20, %s15348_s21  ;;  %p15353_p3 = scmp.lt.u32.totalorder %s20617_s20, %s21414_s12 }
0x15d6   : > { %p15354_p4 = scmp.lt.u32.totalorder %s15352_s11, %s15348_s21  ;;  %p15356_p8 = scmp.lt.u32.totalorder %s15348_s21, %s20617_s20 }
0x15d7   : > { %p15350_p1 = pnand %p15349_p0, %p15866_p5 }
0x15d8   : > { %p15355_p7 = por %p15354_p4, %p15353_p3 }
0x15d9   : > { %p15351_p2 = pneg %p15350_p1 }
0x15da   : > { %p15357_p9 = por %p15356_p8, %p15355_p7 }
0x15dc   : > { %p15358_p10 = pnand %p15357_p9, %p15351_p2 }
0x15de   : > { %15361 = shalt.err (!%p15358_p10)
}
0x15df   : > { %s21424_s17 = scalar_lea.sflag [#allocation5], %s20580_s4  ;;  %s20764_s28 = scalar_lea.hbm %s15809_s6, %s20648_s27 }
0x15e0   : > { %13245 = dma.vmem_to_hbm [thread:$0]  (%p15866_p5), %s20577_s15, 256, %s20617_s20, %s21424_s17, %s21423_s25, %s21423_s25, %s21413_s19  }
0x15e1   : > { %s15362_s14 = scalar_lea.vmem %s11710_s5, 64  ;;  %s15602_s3 = smov [#allocation9]  }
0x15e2   : > { %p15363_p11 = scmp.ne.s32.totalorder %s11710_s5, %s15362_s14  ;;  %s15366_s26 = sshll.u32 %s15602_s3, 4  ;;  %s15367_s26 = int_to_ptr.vmem [resolvable:$false] %s15366_s26 }
0x15e3   : > { %s15368_s10 = scalar_lea.vmem %s15367_s26, 128  ;;  %p15369_p0 = scmp.lt.s32.totalorder %s11710_s5, %s15367_s26 }
0x15e4   : > { %p15364_p12 = pnand %p15363_p11, %p15866_p5  ;;  %p15370_p1 = scmp.lt.s32.totalorder %s15368_s10, %s15362_s14 }
0x15e6   : > { %p15365_p13 = pneg %p15364_p12  ;;  %p15371_p2 = por %p15370_p1, %p15369_p0 }
0x15e8   : > { %p15372_p3 = pnand %p15371_p2, %p15365_p13 }
0x15ea   : > { %15375 = shalt.err (!%p15372_p3)
}
0x15eb   : > { %s15376_s20 = scalar_lea.hbm %s20708_s18, 64  ;;  %s15380_s15 = scalar_lea.hbm %s21421_s24, 128 }
0x15ec   : > { %p15377_p4 = scmp.ne.s32.totalorder %s20708_s18, %s15376_s20  ;;  %p15381_p9 = scmp.lt.u32.totalorder %s20708_s18, %s21421_s24 }
0x15ed   : > { %p15382_p10 = scmp.lt.u32.totalorder %s15380_s15, %s15376_s20  ;;  %p15384_p12 = scmp.lt.u32.totalorder %s15376_s20, %s20708_s18 }
0x15ee   : > { %p15378_p7 = pnand %p15377_p4, %p15866_p5 }
0x15ef   : > { %p15383_p11 = por %p15382_p10, %p15381_p9 }
0x15f0   : > { %p15379_p8 = pneg %p15378_p7 }
0x15f1   : > { %p15385_p0 = por %p15384_p12, %p15383_p11 }
0x15f3   : > { %p15386_p13 = pnand %p15385_p0, %p15379_p8 }
0x15f5   : > { %15389 = shalt.err (!%p15386_p13)
}
0x15f6   : > { %s21425_s19 = scalar_lea.sflag [#allocation8], %s20580_s4  ;;  %s21426_s27 = scalar_lea.vmem [#allocation12], %s20177_s2 }
0x15f7   : > { %13247 = dma.vmem_to_hbm [thread:$0]  (%p15866_p5), %s11710_s5, 64, %s20708_s18, %s21425_s19  }
0x15f8   : > { %s11735_s25 = sshll.u32 %s21426_s27, 4  ;;  %s12648_s23 = sshll.u32 %s15847_s22, 4  ;;  %s11736_s25 = int_to_ptr.vmem [resolvable:$true] %s11735_s25 }
0x15f9   : > { %s20787_s21 = scalar_lea.hbm %s15819_s30, %s12648_s23  ;;  %s15390_s11 = scalar_lea.vmem %s11736_s25, 64 }
0x15fa   : > { %p15391_p1 = scmp.ne.s32.totalorder %s11736_s25, %s15390_s11  ;;  %s15603_s17 = smov [#allocation12]  }
0x15fb   : > { %s15394_s14 = sshll.u32 %s15603_s17, 4  ;;  %s15395_s14 = int_to_ptr.vmem [resolvable:$false] %s15394_s14 }
0x15fc   : > { %p15392_p2 = pnand %p15391_p1, %p15866_p5  ;;  %s15396_s3 = scalar_lea.vmem %s15395_s14, 128 }
0x15fd   : > { %p15397_p4 = scmp.lt.s32.totalorder %s11736_s25, %s15395_s14  ;;  %p15398_p7 = scmp.lt.s32.totalorder %s15396_s3, %s15390_s11 }
0x15fe   : > { %p15393_p3 = pneg %p15392_p2 }
0x15ff   : > { %p15399_p8 = por %p15398_p7, %p15397_p4 }
0x1601   : > { %p15400_p9 = pnand %p15399_p8, %p15393_p3 }
0x1603   : > { %15403 = shalt.err (!%p15400_p9)
}
0x1604   : > { %s15404_s2 = scalar_lea.hbm %s20764_s28, 64  ;;  %s15408_s18 = scalar_lea.hbm %s15809_s6, 128 }
0x1605   : > { %p15405_p10 = scmp.ne.s32.totalorder %s20764_s28, %s15404_s2  ;;  %p15409_p0 = scmp.lt.u32.totalorder %s20764_s28, %s15809_s6 }
0x1606   : > { %p15410_p13 = scmp.lt.u32.totalorder %s15408_s18, %s15404_s2  ;;  %p15412_p2 = scmp.lt.u32.totalorder %s15404_s2, %s20764_s28 }
0x1607   : > { %p15406_p11 = pnand %p15405_p10, %p15866_p5 }
0x1608   : > { %p15411_p1 = por %p15410_p13, %p15409_p0 }
0x1609   : > { %p15407_p12 = pneg %p15406_p11 }
0x160a   : > { %p15413_p4 = por %p15412_p2, %p15411_p1 }
0x160c   : > { %p15414_p3 = pnand %p15413_p4, %p15407_p12 }
0x160e   : > { %15417 = shalt.err (!%p15414_p3)
}
0x160f   : > { %s21427_s5 = scalar_lea.sflag [#allocation11], %s20580_s4  ;;  %s21428_s26 = scalar_lea.vmem [#allocation15], %s19259_s13 }
0x1610   : > { %13249 = dma.vmem_to_hbm [thread:$0]  (%p15866_p5), %s11736_s25, 64, %s20764_s28, %s21427_s5  }
0x1611   : > { %s11761_s10 = sshll.u32 %s21428_s26, 4  ;;  %s15604_s15 = smov [#allocation15]   ;;  %s11762_s10 = int_to_ptr.vmem [resolvable:$true] %s11761_s10 }
0x1612   : > { %s15418_s20 = scalar_lea.vmem %s11762_s10, 16  ;;  %s15422_s19 = sshll.u32 %s15604_s15, 4  ;;  %s15423_s19 = int_to_ptr.vmem [resolvable:$false] %s15422_s19 }
0x1613   : > { %p15419_p7 = scmp.ne.s32.totalorder %s11762_s10, %s15418_s20  ;;  %s15424_s27 = scalar_lea.vmem %s15423_s19, 32 }
0x1614   : > { %p15425_p10 = scmp.lt.s32.totalorder %s11762_s10, %s15423_s19  ;;  %p15426_p11 = scmp.lt.s32.totalorder %s15424_s27, %s15418_s20 }
0x1615   : > { %p15420_p8 = pnand %p15419_p7, %p15866_p5 }
0x1616   : > { %p15427_p12 = por %p15426_p11, %p15425_p10 }
0x1617   : > { %p15421_p9 = pneg %p15420_p8 }
0x1619   : > { %p15428_p0 = pnand %p15427_p12, %p15421_p9 }
0x161b   : > { %15431 = shalt.err (!%p15428_p0)
}
0x161c   : > { %s15432_s28 = scalar_lea.hbm %s20787_s21, 16  ;;  %s15436_s25 = scalar_lea.hbm %s15819_s30, 32 }
0x161d   : > { %p15433_p13 = scmp.ne.s32.totalorder %s20787_s21, %s15432_s28  ;;  %p15437_p4 = scmp.lt.u32.totalorder %s20787_s21, %s15819_s30 }
0x161e   : > { %p15438_p3 = scmp.lt.u32.totalorder %s15436_s25, %s15432_s28  ;;  %p15440_p8 = scmp.lt.u32.totalorder %s15432_s28, %s20787_s21 }
0x161f   : > { %p15434_p1 = pnand %p15433_p13, %p15866_p5 }
0x1620   : > { %p15439_p7 = por %p15438_p3, %p15437_p4 }
0x1621   : > { %p15435_p2 = pneg %p15434_p1 }
0x1622   : > { %p15441_p10 = por %p15440_p8, %p15439_p7 }
0x1624   : > { %p15442_p9 = pnand %p15441_p10, %p15435_p2 }
0x1626   : > { %15445 = shalt.err (!%p15442_p9)
}
0x1627   : > { %s21429_s11 = sld [smem:[#allocation52_spill]]  ;;  %v13020_v26 = vpop.f32.mrb[80].mxu0  ;;  %v13042_v43 = vpop.f32.mrb[92].mxu1  ;;  %s1357_s4 = scalar_lea.vmem [#allocation16], %s19259_s13 }
0x1628   : > { %13251 = dma.vmem_to_hbm [thread:$0]  (%p15866_p5), %s11762_s10, 16, %s20787_s21, %s11615_s1   ;;  %v13021_v60 = vpop.f32.mrb[81].mxu0  ;;  %v13043_v20 = vpop.f32.mrb[93].mxu1 }
0x1629   : > { %v13022_v18 = vadd.f32 %v13021_v60, %v13020_v26  ;;  %v13023_v23 = vpop.f32.mrb[82].mxu0  ;;  %v13044_v4 = vadd.f32 %v13043_v20, %v13042_v43  ;;  %v13045_v14 = vpop.f32.mrb[94].mxu1  ;;  %s11774_s1 = sshll.u32 %s1357_s4, 4  ;;  %s20826_s21 = scalar_lea.hbm %s15824_s8, %s12648_s23  ;;  %s20828_s1 = int_to_ptr.vmem [resolvable:$true] %s11774_s1 }
0x162a   : > { %v13024_v27 = vpop.f32.mrb[83].mxu0  ;;  %v13046_v56 = vpop.f32.mrb[95].mxu1  ;;  %s11624_s17 = scalar_lea.sflag [#allocation17], %s19259_s13  ;;  %s15446_s14 = scalar_lea.vmem %s20828_s1, 16 }
0x162b   : > { %v11556_v12 = vpop.f32.mrb[84].mxu0  ;;  %p15447_p11 = scmp.ne.s32.totalorder %s20828_s1, %s15446_s14  ;;  %s15605_s3 = smov [#allocation16]  }
0x162c   : > { %v13239_v38 = vpop.f32.mrb[85].mxu0  ;;  %s15450_s2 = sshll.u32 %s15605_s3, 4  ;;  %s15451_s2 = int_to_ptr.vmem [resolvable:$false] %s15450_s2 }
0x162d   : > { %v11225_v35 = vld [vmem:[%s21429_s11] sm:$0x1]  ;;  %v11559_v37 = vpop.f32.mrb[86].mxu0  ;;  %p15448_p12 = pnand %p15447_p11, %p15866_p5  ;;  %s15452_s18 = scalar_lea.vmem %s15451_s2, 32 }
0x162e   : > { %v11477_v8 = vadd.f32 %v13022_v18, %v11225_v35  ;;  %v13240_v16 = vpop.f32.mrb[87].mxu0  ;;  %p15453_p13 = scmp.lt.s32.totalorder %s20828_s1, %s15451_s2  ;;  %p15454_p1 = scmp.lt.s32.totalorder %s15452_s18, %s15446_s14 }
0x162f   : > { %p15449_p0 = pneg %p15448_p12 }
0x1630   : > { %v11517_v3 = vadd.f32 %v13044_v4, %v11477_v8  ;;  %p15455_p2 = por %p15454_p1, %p15453_p13 }
0x1632   : > { %v11557_v42 = vadd.f32 %v11556_v12, %v11517_v3  ;;  %p15456_p4 = pnand %p15455_p2, %p15449_p0 }
0x1634   : > { %v11562_v54 = vmax.f32 %v11557_v42, 0.0 }
0x1636   : > { %11563 = vst.msk [vmem:[%s1357_s4] sm:$0x1] %vm11130_vm9, %v11562_v54 }
0x1637   : > { %15459 = shalt.err (!%p15456_p4)
}
0x1638   : > { %s15460_s22 = scalar_lea.hbm %s20826_s21, 16  ;;  %s15464_s13 = scalar_lea.hbm %s15824_s8, 32 }
0x1639   : > { %p15461_p3 = scmp.ne.s32.totalorder %s20826_s21, %s15460_s22  ;;  %p15465_p10 = scmp.lt.u32.totalorder %s20826_s21, %s15824_s8 }
0x163a   : > { %p15466_p9 = scmp.lt.u32.totalorder %s15464_s13, %s15460_s22  ;;  %p15468_p12 = scmp.lt.u32.totalorder %s15460_s22, %s20826_s21 }
0x163b   : > { %p15462_p7 = pnand %p15461_p3, %p15866_p5 }
0x163c   : > { %p15467_p11 = por %p15466_p9, %p15465_p10 }
0x163d   : > { %p15463_p8 = pneg %p15462_p7 }
0x163e   : > { %p15469_p13 = por %p15468_p12, %p15467_p11 }
0x1640   : > { %p15470_p0 = pnand %p15469_p13, %p15463_p8 }
0x1642   : > { %15473 = shalt.err (!%p15470_p0)
}
0x1643   : > { %13252 = dma.vmem_to_hbm [thread:$0]  (%p15866_p5), %s20828_s1, 16, %s20826_s21, %s11624_s17  }
0x1644 PF: > { %s21430_s23 = sld [smem:[#allocation63_spill]]  ;;  %p13294_p1 = scmp.ge.s32.totalorder %s15528_s0, 2 }
0x1646   : > { %p20853_p2 = pnand %p13294_p1, %p15870_p6 }
0x164a   : > { %s11802_s26 = sand.u32 1, %s21430_s23  }
0x164b   : > { %s11803_s20 = scalar_lea.sflag [#allocation3], %s11802_s26 }
0x164c   : > { %15491 = dma.done.wait (!%p20853_p2), %s11803_s20, 1024  }
0x164d   : > { %15493 = vsyncadd (!%p20853_p2), %s11803_s20, 4294966272  ;;  %s21433_s7 = sadd.s32 4294967294, %s15528_s0  }
0x164e   : > { %s11811_s15 = sand.u32 1, %s21433_s7  }
0x164f   : > { %s11812_s19 = scalar_lea.sflag [#allocation5], %s11811_s15 }
0x1650   : > { %15495 = dma.done.wait (!%p20853_p2), %s11812_s19, 1280  }
0x1651   : > { %15497 = vsyncadd (!%p20853_p2), %s11812_s19, 4294966016  ;;  %s11838_s27 = scalar_lea.sflag [#allocation8], %s11811_s15 }
0x1652   : > { %15499 = dma.done.wait (!%p20853_p2), %s11838_s27, 320  }
0x1653   : > { %15501 = vsyncadd (!%p20853_p2), %s11838_s27, 4294966976  ;;  %s11856_s28 = scalar_lea.sflag [#allocation11], %s11811_s15 }
0x1654   : > { %15503 = dma.done.wait (!%p20853_p2), %s11856_s28, 128  }
0x1655   : > { %15505 = vsyncadd (!%p20853_p2), %s11856_s28, 4294967168  ;;  %s11874_s0 = scalar_lea.sflag [#allocation14], %s11811_s15 }
0x1656   : > { %15507 = dma.done.wait (!%p20853_p2), %s11874_s0, 80  }
0x1657   : > { %15509 = vsyncadd (!%p20853_p2), %s11874_s0, 4294967216  ;;  %s11891_s25 = scalar_lea.sflag [#allocation17], %s11802_s26 }
0x1658   : > { %15511 = dma.done.wait (!%p20853_p2), %s11891_s25, 16  }
0x1659   : > { %15513 = vsyncadd (!%p20853_p2), %s11891_s25, 4294967280  ;;  %s21434_s0 = sld [smem:[#allocation65_spill]]  ;;  %s21435_s11 = sld [smem:[#allocation64_spill]] }
0x165a   : > { %s21436_s18 = sld [smem:[#allocation66_spill]]  ;;  %s21437_s15 = smov %s15520_s16 }
0x165f   : > { %p111_p5 = scmp.ge.s32.totalorder %s21434_s0, 4   ;;  %s21438_s16 = smov %s21435_s11 }
0x1661   :  { %113 = sbr.rel (!%p111_p5) target bundleno = 101 (0x65), region = 398 }
0x1668   :  { %11895 = vsyncpa [#allocation3], 1 }
0x1669   :  { %11897 = vsyncpa [#allocation3 + $0x1], 1 }
0x166a   :  { %11898 = vsyncpa [#allocation5], 1 }
0x166b   :  { %11900 = vsyncpa [#allocation5 + $0x1], 1 }
0x166c   :  { %11901 = vsyncpa [#allocation8], 1 }
0x166d   :  { %11903 = vsyncpa [#allocation8 + $0x1], 1 }
0x166e   :  { %11904 = vsyncpa [#allocation11], 1 }
0x166f   :  { %11906 = vsyncpa [#allocation11 + $0x1], 1 }
0x1670   :  { %11907 = vsyncpa [#allocation14], 1 }
0x1671   :  { %11909 = vsyncpa [#allocation14 + $0x1], 1 }
0x1672   :  { %11910 = vsyncpa [#allocation17], 1 }
0x1673   :  { %11912 = vsyncpa [#allocation17 + $0x1], 1 }

</bundles_post_ra>
